<compile_context>
chip_gen: v7x
topology: tpu7x:2x2x1
jax: 0.10.0
libtpu: 0.0.40
codegen_flags: <defaults>
</compile_context>

<pallas_src>
import numpy as np
import jax
import jax.numpy as jnp
from jax import lax
from jax.experimental import pallas as pl
from jax.experimental.pallas import tpu as pltpu

EPS = 1e-5                       # nn.BatchNorm2d default eps
VMEM_LIMIT = 32 * 1024 * 1024    # fits v5e/v6e/v7x scoped-VMEM budgets


# ---------------- static per-layer geometry ----------------

def _layer_cfg(h, cin, cout):
    p = h + 2                     # padded spatial size (SAME, 3x3)
    ho = h // 2                   # floor-mode 2x2 pool output size
    pq = p * p
    rv = pq - 2 * p - 2           # rows of shifted-slab conv output (= (h-1)*p + h)
    return dict(H=h, W=h, P=p, Q=p, PQ=pq, Cin=cin, Cout=cout,
                Rv=rv, Lh=rv - p - 1, Ho=ho, Wo=ho, Np=ho * ho,
                PQo=(ho + 2) * (ho + 2))


def _pick_bb(batch):
    """Images per grid step: amortize ~0.35us/step overhead, keep >=2 steps (v7x)."""
    if batch < 4:
        return 1
    cap = min(batch // 2, 8)
    for d in range(cap, 0, -1):
        if batch % d == 0:
            return d
    return 1


# ---------------- pass 1: conv + BN partial stats ----------------

def _make_conv_stats_kernel(cfg, bb, prebuilt_patches):
    Q, Rv = cfg["Q"], cfg["Rv"]
    offs = [dy * Q + dx for dy in range(3) for dx in range(3)]

    def kernel(x_ref, w_ref, valid_ref, y_ref, sum_ref, ssq_ref):
        w = w_ref[...]
        vmask = valid_ref[...]                       # (Rv, 1) f32, zeros junk rows
        s_acc = None
        q_acc = None
        for b in range(bb):                          # static unroll over the batch block
            if prebuilt_patches:
                patches = x_ref[b]                   # (Rv, 9*Cin) built in the wrapper
            else:
                # im2col from 9 shifted slices of the resident padded slab.
                patches = jnp.concatenate(
                    [x_ref[b, pl.ds(o, Rv), :] for o in offs], axis=1)
            y = jnp.dot(patches, w, preferred_element_type=jnp.float32)  # (Rv, Cout) f32
            ym = y * vmask
            y_ref[b] = ym.astype(y_ref.dtype)        # conv output: computed once, reused
            s = jnp.sum(ym, axis=0, keepdims=True)
            q = jnp.sum(ym * y, axis=0, keepdims=True)
            s_acc = s if s_acc is None else s_acc + s
            q_acc = q if q_acc is None else q_acc + q
        sum_ref[0] = s_acc
        ssq_ref[0] = q_acc

    return kernel


# ---------------- pass 2: folded BN affine -> ReLU -> 2x2 max pool ----------------

def _make_bn_pool_kernel(cfg, bb, mode):
    # mode: "slab" (emit next layer's padded slab), "head" (fused classifier),
    #       "feat" (final features, no classifier).
    Q, Rv, Lh = cfg["Q"], cfg["Rv"], cfg["Lh"]

    def kernel(y_ref, scale_ref, shift_ref, *rest):
        if mode == "head":
            wc_ref, bc_ref, out_ref = rest
            sel = None
        else:
            sel_ref, out_ref = rest
            sel = sel_ref[...]                       # hoisted out of the bb loop
        scale = scale_ref[...]
        shift = shift_ref[...]
        for b in range(bb):
            z = jnp.maximum(y_ref[b].astype(jnp.float32) * scale + shift, 0.0)
            v = jnp.maximum(z[:Rv - Q, :], z[Q:, :])        # vertical pair-max
            hp = jnp.maximum(v[:Lh, :], v[1:, :])           # horizontal pair-max (Lh, Cout)
            if mode == "head":
                pooled = hp[0:1, :]                         # Ho == Wo == 1 -> row 0
                out_ref[b] = jnp.dot(pooled, wc_ref[...],
                                     preferred_element_type=jnp.float32) + bc_ref[...]
            else:
                # One-hot selection matmul: picks each pooled pixel's row and (for
                # "slab") places it at the interior of the next layer's padded slab.
                pooled = jnp.dot(sel, hp.astype(sel.dtype),
                                 preferred_element_type=jnp.float32)
                out_ref[b] = pooled.astype(out_ref.dtype)

    return kernel


# ---------------- one conv block ----------------

def _conv_block(x_slab, w2d, gamma, beta, cfg, act_dtype, *, last, head, prebuilt):
    B = x_slab.shape[0]
    bb = _pick_bb(B)
    nblk = B // bb
    Q, W, H = cfg["Q"], cfg["W"], cfg["H"]
    Rv, Lh, Cout = cfg["Rv"], cfg["Lh"], cfg["Cout"]
    Ho, Wo, Np, PQo = cfg["Ho"], cfg["Wo"], cfg["Np"], cfg["PQo"]

    cparams = pltpu.CompilerParams(dimension_semantics=("parallel",),
                                   vmem_limit_bytes=VMEM_LIMIT)
    x_spec = pl.BlockSpec((bb,) + tuple(x_slab.shape[1:]), lambda i: (i, 0, 0))
    w_spec = pl.BlockSpec(w2d.shape, lambda i: (0, 0))
    cvec_spec = pl.BlockSpec((1, Cout), lambda i: (0, 0))
    stat_spec = pl.BlockSpec((1, 1, Cout), lambda i: (i, 0, 0))
    y_spec = pl.BlockSpec((bb, Rv, Cout), lambda i: (i, 0, 0))

    # ---- pass 1: conv (one MXU matmul per image) + masked y + partial stats ----
    rr = np.arange(Rv)
    valid = jnp.asarray(((rr % Q < W) & (rr // Q < H))
                        .astype(np.float32).reshape(Rv, 1))
    y, psum, pssq = pl.pallas_call(
        _make_conv_stats_kernel(cfg, bb, prebuilt),
        grid=(nblk,),
        in_specs=[x_spec, w_spec, pl.BlockSpec((Rv, 1), lambda i: (0, 0))],
        out_specs=(y_spec, stat_spec, stat_spec),
        out_shape=(jax.ShapeDtypeStruct((B, Rv, Cout), act_dtype),
                   jax.ShapeDtypeStruct((nblk, 1, Cout), jnp.float32),
                   jax.ShapeDtypeStruct((nblk, 1, Cout), jnp.float32)),
        compiler_params=cparams,
    )(x_slab, w2d, valid)

    # glue: fold training-mode BatchNorm into a per-channel affine.  The conv bias is
    # dropped: the batch-mean subtraction cancels it exactly (and var is bias-invariant).
    n = B * H * W
    mean = jnp.sum(psum[:, 0, :], axis=0) / n
    var = jnp.sum(pssq[:, 0, :], axis=0) / n - mean * mean     # biased batch variance
    var = jnp.maximum(var, 0.0)                                # cancellation guard
    inv = 1.0 / jnp.sqrt(var + EPS)
    scale = (gamma * inv).reshape(1, Cout).astype(jnp.float32)
    shift = (beta - mean * gamma * inv).reshape(1, Cout).astype(jnp.float32)

    # ---- pass 2: BN affine -> ReLU -> pool (+ padded-slab store / fused head) ----
    if last and head is not None:
        assert Ho == 1 and Wo == 1, "fused classifier assumes a 1x1 final feature map"
        wc_t, bc = head
        nc = wc_t.shape[1]
        return pl.pallas_call(
            _make_bn_pool_kernel(cfg, bb, "head"),
            grid=(nblk,),
            in_specs=[y_spec, cvec_spec, cvec_spec,
                      pl.BlockSpec(wc_t.shape, lambda i: (0, 0)),
                      pl.BlockSpec((1, nc), lambda i: (0, 0))],
            out_specs=pl.BlockSpec((bb, 1, nc), lambda i: (i, 0, 0)),
            out_shape=jax.ShapeDtypeStruct((B, 1, nc), jnp.float32),
            compiler_params=cparams,
        )(y, scale, shift, wc_t, bc)

    if last:
        # Final features without a classifier (Np == 1 for 28x28 inputs).
        sel_np = np.zeros((Np, Lh), np.float32)
        for io in range(Ho):
            for jo in range(Wo):
                sel_np[io * Wo + jo, 2 * io * Q + 2 * jo] = 1.0
        sel = jnp.asarray(sel_np, act_dtype)
        return pl.pallas_call(
            _make_bn_pool_kernel(cfg, bb, "feat"),
            grid=(nblk,),
            in_specs=[y_spec, cvec_spec, cvec_spec,
                      pl.BlockSpec((Np, Lh), lambda i: (0, 0))],
            out_specs=pl.BlockSpec((bb, Np, Cout), lambda i: (i, 0, 0)),
            out_shape=jax.ShapeDtypeStruct((B, Np, Cout), act_dtype),
            compiler_params=cparams,
        )(y, scale, shift, sel)

    # Intermediate layer: the selector also embeds the zero border, so the output is
    # already the NEXT layer's zero-padded slab (no jnp.pad between layers).
    Qo = Wo + 2
    sel_np = np.zeros((PQo, Lh), np.float32)
    for io in range(Ho):
        for jo in range(Wo):
            sel_np[(io + 1) * Qo + (jo + 1), 2 * io * Q + 2 * jo] = 1.0
    sel = jnp.asarray(sel_np, act_dtype)
    return pl.pallas_call(
        _make_bn_pool_kernel(cfg, bb, "slab"),
        grid=(nblk,),
        in_specs=[y_spec, cvec_spec, cvec_spec,
                  pl.BlockSpec((PQo, Lh), lambda i: (0, 0))],
        out_specs=pl.BlockSpec((bb, PQo, Cout), lambda i: (i, 0, 0)),
        out_shape=jax.ShapeDtypeStruct((B, PQo, Cout), act_dtype),
        compiler_params=cparams,
    )(y, scale, shift, sel)


# ---------------- full forward ----------------

def omniglot_cnn_forward(x_nchw, params, *, act_dtype=jnp.bfloat16):
    """OmniglotCNN.forward: 4 x (conv3x3/64 + BN + ReLU + maxpool2) (+ Linear head)."""
    x = jnp.transpose(x_nchw, (0, 2, 3, 1)).astype(jnp.float32)   # NCHW -> NHWC
    B, h = x.shape[0], x.shape[1]
    cin0 = x.shape[3]

    head = None
    if params.get("classifier") is not None:
        wc, bc = params["classifier"]
        head = (wc.T.astype(jnp.float32), bc.reshape(1, -1).astype(jnp.float32))

    n_layers = len(params["convs"])

    # Layer-1 prep (the only inter-layer XLA glue left): pad + flatten, plus the tiny
    # Cin=1 im2col (Rv x 9 per image) so layer 1 also runs as a single MXU matmul.
    cfg0 = _layer_cfg(h, cin0, params["convs"][0][0].shape[3])
    xp = jnp.pad(x, ((0, 0), (1, 1), (1, 1), (0, 0))).reshape(B, cfg0["PQ"], cin0)
    offs0 = [dy * cfg0["Q"] + dx for dy in range(3) for dx in range(3)]
    slab = jnp.concatenate([xp[:, o:o + cfg0["Rv"], :] for o in offs0],
                           axis=2).astype(act_dtype)              # (B, Rv, 9*cin0)

    for li, (w, b, gamma, beta) in enumerate(params["convs"]):
        cin, cout = w.shape[2], w.shape[3]
        cfg = _layer_cfg(h, cin, cout)
        last = li == n_layers - 1
        w2d = w.reshape(9 * cin, cout).astype(act_dtype)
        out = _conv_block(slab, w2d, gamma, beta, cfg, act_dtype,
                          last=last, head=head if last else None, prebuilt=(li == 0))
        if last:
            # (B, nc) logits, or flattened features (Np == 1 for 28x28 inputs, so the
            # HW-vs-C flatten order is irrelevant here).
            return out.reshape(B, -1).astype(jnp.float32)
        slab = out                       # next layer's zero-padded slab, act dtype
        h = cfg["Ho"]


# ---------------- deterministic parameter init ----------------

def init_params(key, n_classes=5, hidden=64, in_channels=1):
    params = {"convs": []}
    cin = in_channels
    for _ in range(4):
        key, k1, k2 = jax.random.split(key, 3)
        fan_in = 9 * cin
        w = jax.random.normal(k1, (3, 3, cin, hidden), jnp.float32) / np.sqrt(fan_in)
        b = jax.random.normal(k2, (hidden,), jnp.float32) * 0.01
        gamma = jnp.ones((hidden,), jnp.float32)   # BN weight init
        beta = jnp.zeros((hidden,), jnp.float32)   # BN bias init
        params["convs"].append((w, b, gamma, beta))
        cin = hidden
    if n_classes:
        key, kc = jax.random.split(key)
        # init_weights(): classifier.weight ~ N(0,1), classifier.bias = 0
        params["classifier"] = (
            jax.random.normal(kc, (n_classes, hidden), jnp.float32),
            jnp.zeros((n_classes,), jnp.float32),
        )
    return params


# ---------------- pure-JAX f32 reference ----------------

def ref_forward(x_nchw, params):
    x = jnp.transpose(x_nchw, (0, 2, 3, 1)).astype(jnp.float32)
    for (w, b, gamma, beta) in params["convs"]:
        y = lax.conv_general_dilated(
            x, w, window_strides=(1, 1), padding="SAME",
            dimension_numbers=("NHWC", "HWIO", "NHWC"),
            precision=lax.Precision.HIGHEST) + b
        mean = y.mean(axis=(0, 1, 2))
        var = ((y - mean) ** 2).mean(axis=(0, 1, 2))
        y = (y - mean) / jnp.sqrt(var + EPS) * gamma + beta
        y = jnp.maximum(y, 0.0)
        x = lax.reduce_window(y, -jnp.inf, lax.max,
                              (1, 2, 2, 1), (1, 2, 2, 1), "VALID")
    feat = x.reshape(x.shape[0], -1)
    cls = params.get("classifier")
    if cls is None:
        return feat
    wc, bc = cls
    return jnp.dot(feat, wc.T, precision=lax.Precision.HIGHEST) + bc


if __name__ == "__main__":
    key = jax.random.PRNGKey(0)
    kx, kp = jax.random.split(key)
    n_classes = 5
    # Module docstring: inputs are (batch, 1, 28, 28) NCHW.
    x = jax.random.normal(kx, (2, 1, 28, 28), jnp.float32)
    params = init_params(kp, n_classes=n_classes)

    ref = np.asarray(ref_forward(x, params))

    # Deployment path: bf16 MXU operands and bf16 inter-stage activations.
    fwd_bf16 = jax.jit(lambda xx, pp: omniglot_cnn_forward(xx, pp, act_dtype=jnp.bfloat16))
    out = jax.block_until_ready(fwd_bf16(x, params))
    assert out.shape == (2, n_classes)
    np.testing.assert_allclose(np.asarray(out), ref, rtol=6e-2, atol=3e-1)

    # All-f32 kernel mode: tighter check that catches structural bugs the loose bf16
    # tolerance could hide (margin left only for MXU f32-pass / reduction-order noise).
    fwd_f32 = jax.jit(lambda xx, pp: omniglot_cnn_forward(xx, pp, act_dtype=jnp.float32))
    out32 = jax.block_until_ready(fwd_f32(x, params))
    np.testing.assert_allclose(np.asarray(out32), ref, rtol=2e-2, atol=5e-2)

    print("KERNEL_OK")
</pallas_src>

<mosaic_0001>
module attributes {stable_mosaic.version = 11 : i64} {
  func.func @kernel(%arg0: i32, %arg1: memref<1x838x9xbf16, #tpu.memory_space<vmem>>, %arg2: memref<9x64xbf16, #tpu.memory_space<vmem>>, %arg3: memref<838x1xf32, #tpu.memory_space<vmem>>, %arg4: memref<1x838x64xbf16, #tpu.memory_space<vmem>>, %arg5: memref<1x1x64xf32, #tpu.memory_space<vmem>>, %arg6: memref<1x1x64xf32, #tpu.memory_space<vmem>>) attributes {dimension_semantics = [#tpu.dimension_semantics<parallel>], iteration_bounds = array<i64: 2>, scalar_prefetch = 0 : i64, scratch_operands = 0 : i64, tpu.core_type = #tpu.core_type<tc>, window_params = [{transform_indices = @transform_0, window_bounds = array<i64: 1, 838, 9>}, {pipeline_mode = #tpu.pipeline_mode<synchronous>, transform_indices = @transform_1, window_bounds = array<i64: 9, 64>}, {pipeline_mode = #tpu.pipeline_mode<synchronous>, transform_indices = @transform_2, window_bounds = array<i64: 838, 1>}, {transform_indices = @transform_3, window_bounds = array<i64: 1, 838, 64>}, {transform_indices = @transform_4, window_bounds = array<i64: 1, 1, 64>}, {transform_indices = @transform_5, window_bounds = array<i64: 1, 1, 64>}]} {
    %c0 = arith.constant 0 : index
    %c0_0 = arith.constant 0 : index
    %0 = vector.load %arg2[%c0, %c0_0] : memref<9x64xbf16, #tpu.memory_space<vmem>>, vector<9x64xbf16>
    %c0_1 = arith.constant 0 : index
    %c0_2 = arith.constant 0 : index
    %1 = vector.load %arg3[%c0_1, %c0_2] : memref<838x1xf32, #tpu.memory_space<vmem>>, vector<838x1xf32>
    %c0_3 = arith.constant 0 : index
    %c0_4 = arith.constant 0 : index
    %c0_5 = arith.constant 0 : index
    %2 = vector.load %arg1[%c0_3, %c0_4, %c0_5] : memref<1x838x9xbf16, #tpu.memory_space<vmem>>, vector<1x838x9xbf16>
    %3 = vector.shape_cast %2 : vector<1x838x9xbf16> to vector<838x9xbf16>
    %cst = arith.constant dense<0.000000e+00> : vector<838x64xf32>
    %4 = tpu.matmul %3, %0, %cst {dimension_numbers = #tpu.dot_dimension_numbers<[1], [0], [0], [1], [0, 0, 1, 1], [], []>} : vector<838x9xbf16>, vector<9x64xbf16>, vector<838x64xf32> -> vector<838x64xf32>
    %5 = vector.broadcast %1 : vector<838x1xf32> to vector<838x64xf32>
    %6 = arith.mulf %4, %5 : vector<838x64xf32>
    %7 = arith.truncf %6 : vector<838x64xf32> to vector<838x64xbf16>
    %c0_6 = arith.constant 0 : index
    %c0_7 = arith.constant 0 : index
    %c0_8 = arith.constant 0 : index
    %8 = vector.load %arg4[%c0_6, %c0_7, %c0_8] : memref<1x838x64xbf16, #tpu.memory_space<vmem>>, vector<1x838x64xbf16>
    %9 = vector.shape_cast %8 : vector<1x838x64xbf16> to vector<838x64xbf16>
    %10 = vector.shape_cast %7 : vector<838x64xbf16> to vector<1x838x64xbf16>
    tpu.vector_store %arg4[%c0_6, %c0_7, %c0_8], %10 {strides = array<i32>} : memref<1x838x64xbf16, #tpu.memory_space<vmem>>, vector<1x838x64xbf16>,
    %cst_9 = arith.constant dense<0.000000e+00> : vector<64xf32>
    %11 = vector.multi_reduction <add>, %6, %cst_9 [0] : vector<838x64xf32> to vector<64xf32>
    %12 = vector.shape_cast %11 : vector<64xf32> to vector<1x64xf32>
    %13 = arith.mulf %6, %4 : vector<838x64xf32>
    %cst_10 = arith.constant dense<0.000000e+00> : vector<64xf32>
    %14 = vector.multi_reduction <add>, %13, %cst_10 [0] : vector<838x64xf32> to vector<64xf32>
    %15 = vector.shape_cast %14 : vector<64xf32> to vector<1x64xf32>
    %c0_11 = arith.constant 0 : index
    %c0_12 = arith.constant 0 : index
    %c0_13 = arith.constant 0 : index
    %16 = vector.load %arg5[%c0_11, %c0_12, %c0_13] : memref<1x1x64xf32, #tpu.memory_space<vmem>>, vector<1x1x64xf32>
    %17 = vector.shape_cast %16 : vector<1x1x64xf32> to vector<1x64xf32>
    %18 = vector.shape_cast %12 : vector<1x64xf32> to vector<1x1x64xf32>
    tpu.vector_store %arg5[%c0_11, %c0_12, %c0_13], %18 {strides = array<i32>} : memref<1x1x64xf32, #tpu.memory_space<vmem>>, vector<1x1x64xf32>,
    %c0_14 = arith.constant 0 : index
    %c0_15 = arith.constant 0 : index
    %c0_16 = arith.constant 0 : index
    %19 = vector.load %arg6[%c0_14, %c0_15, %c0_16] : memref<1x1x64xf32, #tpu.memory_space<vmem>>, vector<1x1x64xf32>
    %20 = vector.shape_cast %19 : vector<1x1x64xf32> to vector<1x64xf32>
    %21 = vector.shape_cast %15 : vector<1x64xf32> to vector<1x1x64xf32>
    tpu.vector_store %arg6[%c0_14, %c0_15, %c0_16], %21 {strides = array<i32>} : memref<1x1x64xf32, #tpu.memory_space<vmem>>, vector<1x1x64xf32>,
    return
  }
  func.func @transform_0(%arg0: i32) -> (i32, i32, i32) {
    %c0_i32 = arith.constant 0 : i32
    %c0_i32_0 = arith.constant 0 : i32
    %c0_i32_1 = arith.constant 0 : i32
    return %arg0, %c0_i32, %c0_i32_0 : i32, i32, i32
  }
  func.func @transform_1(%arg0: i32) -> (i32, i32) {
    %c0_i32 = arith.constant 0 : i32
    %c0_i32_0 = arith.constant 0 : i32
    %c0_i32_1 = arith.constant 0 : i32
    return %c0_i32, %c0_i32_0 : i32, i32
  }
  func.func @transform_2(%arg0: i32) -> (i32, i32) {
    %c0_i32 = arith.constant 0 : i32
    %c0_i32_0 = arith.constant 0 : i32
    %c0_i32_1 = arith.constant 0 : i32
    return %c0_i32, %c0_i32_0 : i32, i32
  }
  func.func @transform_3(%arg0: i32) -> (i32, i32, i32) {
    %c0_i32 = arith.constant 0 : i32
    %c0_i32_0 = arith.constant 0 : i32
    %c0_i32_1 = arith.constant 0 : i32
    return %arg0, %c0_i32, %c0_i32_0 : i32, i32, i32
  }
  func.func @transform_4(%arg0: i32) -> (i32, i32, i32) {
    %c0_i32 = arith.constant 0 : i32
    %c0_i32_0 = arith.constant 0 : i32
    %c0_i32_1 = arith.constant 0 : i32
    return %arg0, %c0_i32, %c0_i32_0 : i32, i32, i32
  }
  func.func @transform_5(%arg0: i32) -> (i32, i32, i32) {
    %c0_i32 = arith.constant 0 : i32
    %c0_i32_0 = arith.constant 0 : i32
    %c0_i32_1 = arith.constant 0 : i32
    return %arg0, %c0_i32, %c0_i32_0 : i32, i32, i32
  }
}

module attributes {stable_mosaic.version = 11 : i64} {
  func.func @kernel(%arg0: i32, %arg1: memref<1x838x64xbf16, #tpu.memory_space<vmem>>, %arg2: memref<1x64xf32, #tpu.memory_space<vmem>>, %arg3: memref<1x64xf32, #tpu.memory_space<vmem>>, %arg4: memref<256x807xbf16, #tpu.memory_space<vmem>>, %arg5: memref<1x256x64xbf16, #tpu.memory_space<vmem>>) attributes {dimension_semantics = [#tpu.dimension_semantics<parallel>], iteration_bounds = array<i64: 2>, scalar_prefetch = 0 : i64, scratch_operands = 0 : i64, tpu.core_type = #tpu.core_type<tc>, window_params = [{transform_indices = @transform_0, window_bounds = array<i64: 1, 838, 64>}, {pipeline_mode = #tpu.pipeline_mode<synchronous>, transform_indices = @transform_1, window_bounds = array<i64: 1, 64>}, {pipeline_mode = #tpu.pipeline_mode<synchronous>, transform_indices = @transform_2, window_bounds = array<i64: 1, 64>}, {pipeline_mode = #tpu.pipeline_mode<synchronous>, transform_indices = @transform_3, window_bounds = array<i64: 256, 807>}, {transform_indices = @transform_4, window_bounds = array<i64: 1, 256, 64>}]} {
    %c0 = arith.constant 0 : index
    %c0_0 = arith.constant 0 : index
    %0 = vector.load %arg4[%c0, %c0_0] : memref<256x807xbf16, #tpu.memory_space<vmem>>, vector<256x807xbf16>
    %c0_1 = arith.constant 0 : index
    %c0_2 = arith.constant 0 : index
    %1 = vector.load %arg2[%c0_1, %c0_2] : memref<1x64xf32, #tpu.memory_space<vmem>>, vector<1x64xf32>
    %c0_3 = arith.constant 0 : index
    %c0_4 = arith.constant 0 : index
    %2 = vector.load %arg3[%c0_3, %c0_4] : memref<1x64xf32, #tpu.memory_space<vmem>>, vector<1x64xf32>
    %c0_5 = arith.constant 0 : index
    %c0_6 = arith.constant 0 : index
    %c0_7 = arith.constant 0 : index
    %3 = vector.load %arg1[%c0_5, %c0_6, %c0_7] : memref<1x838x64xbf16, #tpu.memory_space<vmem>>, vector<1x838x64xbf16>
    %4 = vector.shape_cast %3 : vector<1x838x64xbf16> to vector<838x64xbf16>
    %5 = arith.extf %4 : vector<838x64xbf16> to vector<838x64xf32>
    %6 = vector.broadcast %1 : vector<1x64xf32> to vector<838x64xf32>
    %7 = arith.mulf %5, %6 : vector<838x64xf32>
    %8 = vector.broadcast %2 : vector<1x64xf32> to vector<838x64xf32>
    %9 = arith.addf %7, %8 : vector<838x64xf32>
    %cst = arith.constant 0.000000e+00 : f32
    %10 = vector.broadcast %cst : f32 to vector<838x64xf32>
    %11 = arith.maximumf %9, %10 : vector<838x64xf32>
    %12 = vector.extract_strided_slice %11 {offsets = [0, 0], sizes = [808, 64], strides = [1, 1]} : vector<838x64xf32> to vector<808x64xf32>
    %13 = vector.extract_strided_slice %11 {offsets = [30, 0], sizes = [808, 64], strides = [1, 1]} : vector<838x64xf32> to vector<808x64xf32>
    %14 = arith.maximumf %12, %13 : vector<808x64xf32>
    %15 = vector.extract_strided_slice %14 {offsets = [0, 0], sizes = [807, 64], strides = [1, 1]} : vector<808x64xf32> to vector<807x64xf32>
    %16 = vector.extract_strided_slice %14 {offsets = [1, 0], sizes = [807, 64], strides = [1, 1]} : vector<808x64xf32> to vector<807x64xf32>
    %17 = arith.maximumf %15, %16 : vector<807x64xf32>
    %18 = arith.truncf %17 : vector<807x64xf32> to vector<807x64xbf16>
    %cst_8 = arith.constant dense<0.000000e+00> : vector<256x64xf32>
    %19 = tpu.matmul %0, %18, %cst_8 {dimension_numbers = #tpu.dot_dimension_numbers<[1], [0], [0], [1], [0, 0, 1, 1], [], []>} : vector<256x807xbf16>, vector<807x64xbf16>, vector<256x64xf32> -> vector<256x64xf32>
    %20 = arith.truncf %19 : vector<256x64xf32> to vector<256x64xbf16>
    %c0_9 = arith.constant 0 : index
    %c0_10 = arith.constant 0 : index
    %c0_11 = arith.constant 0 : index
    %21 = vector.load %arg5[%c0_9, %c0_10, %c0_11] : memref<1x256x64xbf16, #tpu.memory_space<vmem>>, vector<1x256x64xbf16>
    %22 = vector.shape_cast %21 : vector<1x256x64xbf16> to vector<256x64xbf16>
    %23 = vector.shape_cast %20 : vector<256x64xbf16> to vector<1x256x64xbf16>
    tpu.vector_store %arg5[%c0_9, %c0_10, %c0_11], %23 {strides = array<i32>} : memref<1x256x64xbf16, #tpu.memory_space<vmem>>, vector<1x256x64xbf16>,
    return
  }
  func.func @transform_0(%arg0: i32) -> (i32, i32, i32) {
    %c0_i32 = arith.constant 0 : i32
    %c0_i32_0 = arith.constant 0 : i32
    %c0_i32_1 = arith.constant 0 : i32
    return %arg0, %c0_i32, %c0_i32_0 : i32, i32, i32
  }
  func.func @transform_1(%arg0: i32) -> (i32, i32) {
    %c0_i32 = arith.constant 0 : i32
    %c0_i32_0 = arith.constant 0 : i32
    %c0_i32_1 = arith.constant 0 : i32
    return %c0_i32, %c0_i32_0 : i32, i32
  }
  func.func @transform_2(%arg0: i32) -> (i32, i32) {
    %c0_i32 = arith.constant 0 : i32
    %c0_i32_0 = arith.constant 0 : i32
    %c0_i32_1 = arith.constant 0 : i32
    return %c0_i32, %c0_i32_0 : i32, i32
  }
  func.func @transform_3(%arg0: i32) -> (i32, i32) {
    %c0_i32 = arith.constant 0 : i32
    %c0_i32_0 = arith.constant 0 : i32
    %c0_i32_1 = arith.constant 0 : i32
    return %c0_i32, %c0_i32_0 : i32, i32
  }
  func.func @transform_4(%arg0: i32) -> (i32, i32, i32) {
    %c0_i32 = arith.constant 0 : i32
    %c0_i32_0 = arith.constant 0 : i32
    %c0_i32_1 = arith.constant 0 : i32
    return %arg0, %c0_i32, %c0_i32_0 : i32, i32, i32
  }
}

module attributes {stable_mosaic.version = 11 : i64} {
  func.func @kernel(%arg0: i32, %arg1: memref<1x256x64xbf16, #tpu.memory_space<vmem>>, %arg2: memref<576x64xbf16, #tpu.memory_space<vmem>>, %arg3: memref<222x1xf32, #tpu.memory_space<vmem>>, %arg4: memref<1x222x64xbf16, #tpu.memory_space<vmem>>, %arg5: memref<1x1x64xf32, #tpu.memory_space<vmem>>, %arg6: memref<1x1x64xf32, #tpu.memory_space<vmem>>) attributes {dimension_semantics = [#tpu.dimension_semantics<parallel>], iteration_bounds = array<i64: 2>, scalar_prefetch = 0 : i64, scratch_operands = 0 : i64, tpu.core_type = #tpu.core_type<tc>, window_params = [{transform_indices = @transform_0, window_bounds = array<i64: 1, 256, 64>}, {pipeline_mode = #tpu.pipeline_mode<synchronous>, transform_indices = @transform_1, window_bounds = array<i64: 576, 64>}, {pipeline_mode = #tpu.pipeline_mode<synchronous>, transform_indices = @transform_2, window_bounds = array<i64: 222, 1>}, {transform_indices = @transform_3, window_bounds = array<i64: 1, 222, 64>}, {transform_indices = @transform_4, window_bounds = array<i64: 1, 1, 64>}, {transform_indices = @transform_5, window_bounds = array<i64: 1, 1, 64>}]} {
    %c0 = arith.constant 0 : index
    %c0_0 = arith.constant 0 : index
    %0 = vector.load %arg2[%c0, %c0_0] : memref<576x64xbf16, #tpu.memory_space<vmem>>, vector<576x64xbf16>
    %c0_1 = arith.constant 0 : index
    %c0_2 = arith.constant 0 : index
    %1 = vector.load %arg3[%c0_1, %c0_2] : memref<222x1xf32, #tpu.memory_space<vmem>>, vector<222x1xf32>
    %c0_3 = arith.constant 0 : index
    %c0_4 = arith.constant 0 : index
    %c0_5 = arith.constant 0 : index
    %2 = vector.load %arg1[%c0_3, %c0_4, %c0_5] : memref<1x256x64xbf16, #tpu.memory_space<vmem>>, vector<1x222x64xbf16>
    %3 = vector.shape_cast %2 : vector<1x222x64xbf16> to vector<222x64xbf16>
    %c0_6 = arith.constant 0 : index
    %c1 = arith.constant 1 : index
    %c0_7 = arith.constant 0 : index
    %4 = vector.load %arg1[%c0_6, %c1, %c0_7] : memref<1x256x64xbf16, #tpu.memory_space<vmem>>, vector<1x222x64xbf16>
    %5 = vector.shape_cast %4 : vector<1x222x64xbf16> to vector<222x64xbf16>
    %c0_8 = arith.constant 0 : index
    %c2 = arith.constant 2 : index
    %c0_9 = arith.constant 0 : index
    %6 = vector.load %arg1[%c0_8, %c2, %c0_9] : memref<1x256x64xbf16, #tpu.memory_space<vmem>>, vector<1x222x64xbf16>
    %7 = vector.shape_cast %6 : vector<1x222x64xbf16> to vector<222x64xbf16>
    %c0_10 = arith.constant 0 : index
    %c16 = arith.constant 16 : index
    %c0_11 = arith.constant 0 : index
    %8 = vector.load %arg1[%c0_10, %c16, %c0_11] : memref<1x256x64xbf16, #tpu.memory_space<vmem>>, vector<1x222x64xbf16>
    %9 = vector.shape_cast %8 : vector<1x222x64xbf16> to vector<222x64xbf16>
    %c0_12 = arith.constant 0 : index
    %c17 = arith.constant 17 : index
    %c0_13 = arith.constant 0 : index
    %10 = vector.load %arg1[%c0_12, %c17, %c0_13] : memref<1x256x64xbf16, #tpu.memory_space<vmem>>, vector<1x222x64xbf16>
    %11 = vector.shape_cast %10 : vector<1x222x64xbf16> to vector<222x64xbf16>
    %c0_14 = arith.constant 0 : index
    %c18 = arith.constant 18 : index
    %c0_15 = arith.constant 0 : index
    %12 = vector.load %arg1[%c0_14, %c18, %c0_15] : memref<1x256x64xbf16, #tpu.memory_space<vmem>>, vector<1x222x64xbf16>
    %13 = vector.shape_cast %12 : vector<1x222x64xbf16> to vector<222x64xbf16>
    %c0_16 = arith.constant 0 : index
    %c32 = arith.constant 32 : index
    %c0_17 = arith.constant 0 : index
    %14 = vector.load %arg1[%c0_16, %c32, %c0_17] : memref<1x256x64xbf16, #tpu.memory_space<vmem>>, vector<1x222x64xbf16>
    %15 = vector.shape_cast %14 : vector<1x222x64xbf16> to vector<222x64xbf16>
    %c0_18 = arith.constant 0 : index
    %c33 = arith.constant 33 : index
    %c0_19 = arith.constant 0 : index
    %16 = vector.load %arg1[%c0_18, %c33, %c0_19] : memref<1x256x64xbf16, #tpu.memory_space<vmem>>, vector<1x222x64xbf16>
    %17 = vector.shape_cast %16 : vector<1x222x64xbf16> to vector<222x64xbf16>
    %c0_20 = arith.constant 0 : index
    %c34 = arith.constant 34 : index
    %c0_21 = arith.constant 0 : index
    %18 = vector.load %arg1[%c0_20, %c34, %c0_21] : memref<1x256x64xbf16, #tpu.memory_space<vmem>>, vector<1x222x64xbf16>
    %19 = vector.shape_cast %18 : vector<1x222x64xbf16> to vector<222x64xbf16>
    %20 = tpu.concatenate %3, %5, %7, %9, %11, %13, %15, %17, %19 in 1 : vector<222x64xbf16>, vector<222x64xbf16>, vector<222x64xbf16>, vector<222x64xbf16>, vector<222x64xbf16>, vector<222x64xbf16>, vector<222x64xbf16>, vector<222x64xbf16>, vector<222x64xbf16> -> vector<222x576xbf16>
    %cst = arith.constant dense<0.000000e+00> : vector<222x64xf32>
    %21 = tpu.matmul %20, %0, %cst {dimension_numbers = #tpu.dot_dimension_numbers<[1], [0], [0], [1], [0, 0, 1, 1], [], []>} : vector<222x576xbf16>, vector<576x64xbf16>, vector<222x64xf32> -> vector<222x64xf32>
    %22 = vector.broadcast %1 : vector<222x1xf32> to vector<222x64xf32>
    %23 = arith.mulf %21, %22 : vector<222x64xf32>
    %24 = arith.truncf %23 : vector<222x64xf32> to vector<222x64xbf16>
    %c0_22 = arith.constant 0 : index
    %c0_23 = arith.constant 0 : index
    %c0_24 = arith.constant 0 : index
    %25 = vector.load %arg4[%c0_22, %c0_23, %c0_24] : memref<1x222x64xbf16, #tpu.memory_space<vmem>>, vector<1x222x64xbf16>
    %26 = vector.shape_cast %25 : vector<1x222x64xbf16> to vector<222x64xbf16>
    %27 = vector.shape_cast %24 : vector<222x64xbf16> to vector<1x222x64xbf16>
    tpu.vector_store %arg4[%c0_22, %c0_23, %c0_24], %27 {strides = array<i32>} : memref<1x222x64xbf16, #tpu.memory_space<vmem>>, vector<1x222x64xbf16>,
    %cst_25 = arith.constant dense<0.000000e+00> : vector<64xf32>
    %28 = vector.multi_reduction <add>, %23, %cst_25 [0] : vector<222x64xf32> to vector<64xf32>
    %29 = vector.shape_cast %28 : vector<64xf32> to vector<1x64xf32>
    %30 = arith.mulf %23, %21 : vector<222x64xf32>
    %cst_26 = arith.constant dense<0.000000e+00> : vector<64xf32>
    %31 = vector.multi_reduction <add>, %30, %cst_26 [0] : vector<222x64xf32> to vector<64xf32>
    %32 = vector.shape_cast %31 : vector<64xf32> to vector<1x64xf32>
    %c0_27 = arith.constant 0 : index
    %c0_28 = arith.constant 0 : index
    %c0_29 = arith.constant 0 : index
    %33 = vector.load %arg5[%c0_27, %c0_28, %c0_29] : memref<1x1x64xf32, #tpu.memory_space<vmem>>, vector<1x1x64xf32>
    %34 = vector.shape_cast %33 : vector<1x1x64xf32> to vector<1x64xf32>
    %35 = vector.shape_cast %29 : vector<1x64xf32> to vector<1x1x64xf32>
    tpu.vector_store %arg5[%c0_27, %c0_28, %c0_29], %35 {strides = array<i32>} : memref<1x1x64xf32, #tpu.memory_space<vmem>>, vector<1x1x64xf32>,
    %c0_30 = arith.constant 0 : index
    %c0_31 = arith.constant 0 : index
    %c0_32 = arith.constant 0 : index
    %36 = vector.load %arg6[%c0_30, %c0_31, %c0_32] : memref<1x1x64xf32, #tpu.memory_space<vmem>>, vector<1x1x64xf32>
    %37 = vector.shape_cast %36 : vector<1x1x64xf32> to vector<1x64xf32>
    %38 = vector.shape_cast %32 : vector<1x64xf32> to vector<1x1x64xf32>
    tpu.vector_store %arg6[%c0_30, %c0_31, %c0_32], %38 {strides = array<i32>} : memref<1x1x64xf32, #tpu.memory_space<vmem>>, vector<1x1x64xf32>,
    return
  }
  func.func @transform_0(%arg0: i32) -> (i32, i32, i32) {
    %c0_i32 = arith.constant 0 : i32
    %c0_i32_0 = arith.constant 0 : i32
    %c0_i32_1 = arith.constant 0 : i32
    return %arg0, %c0_i32, %c0_i32_0 : i32, i32, i32
  }
  func.func @transform_1(%arg0: i32) -> (i32, i32) {
    %c0_i32 = arith.constant 0 : i32
    %c0_i32_0 = arith.constant 0 : i32
    %c0_i32_1 = arith.constant 0 : i32
    return %c0_i32, %c0_i32_0 : i32, i32
  }
  func.func @transform_2(%arg0: i32) -> (i32, i32) {
    %c0_i32 = arith.constant 0 : i32
    %c0_i32_0 = arith.constant 0 : i32
    %c0_i32_1 = arith.constant 0 : i32
    return %c0_i32, %c0_i32_0 : i32, i32
  }
  func.func @transform_3(%arg0: i32) -> (i32, i32, i32) {
    %c0_i32 = arith.constant 0 : i32
    %c0_i32_0 = arith.constant 0 : i32
    %c0_i32_1 = arith.constant 0 : i32
    return %arg0, %c0_i32, %c0_i32_0 : i32, i32, i32
  }
  func.func @transform_4(%arg0: i32) -> (i32, i32, i32) {
    %c0_i32 = arith.constant 0 : i32
    %c0_i32_0 = arith.constant 0 : i32
    %c0_i32_1 = arith.constant 0 : i32
    return %arg0, %c0_i32, %c0_i32_0 : i32, i32, i32
  }
  func.func @transform_5(%arg0: i32) -> (i32, i32, i32) {
    %c0_i32 = arith.constant 0 : i32
    %c0_i32_0 = arith.constant 0 : i32
    %c0_i32_1 = arith.constant 0 : i32
    return %arg0, %c0_i32, %c0_i32_0 : i32, i32, i32
  }
}

module attributes {stable_mosaic.version = 11 : i64} {
  func.func @kernel(%arg0: i32, %arg1: memref<1x222x64xbf16, #tpu.memory_space<vmem>>, %arg2: memref<1x64xf32, #tpu.memory_space<vmem>>, %arg3: memref<1x64xf32, #tpu.memory_space<vmem>>, %arg4: memref<81x205xbf16, #tpu.memory_space<vmem>>, %arg5: memref<1x81x64xbf16, #tpu.memory_space<vmem>>) attributes {dimension_semantics = [#tpu.dimension_semantics<parallel>], iteration_bounds = array<i64: 2>, scalar_prefetch = 0 : i64, scratch_operands = 0 : i64, tpu.core_type = #tpu.core_type<tc>, window_params = [{transform_indices = @transform_0, window_bounds = array<i64: 1, 222, 64>}, {pipeline_mode = #tpu.pipeline_mode<synchronous>, transform_indices = @transform_1, window_bounds = array<i64: 1, 64>}, {pipeline_mode = #tpu.pipeline_mode<synchronous>, transform_indices = @transform_2, window_bounds = array<i64: 1, 64>}, {pipeline_mode = #tpu.pipeline_mode<synchronous>, transform_indices = @transform_3, window_bounds = array<i64: 81, 205>}, {transform_indices = @transform_4, window_bounds = array<i64: 1, 81, 64>}]} {
    %c0 = arith.constant 0 : index
    %c0_0 = arith.constant 0 : index
    %0 = vector.load %arg4[%c0, %c0_0] : memref<81x205xbf16, #tpu.memory_space<vmem>>, vector<81x205xbf16>
    %c0_1 = arith.constant 0 : index
    %c0_2 = arith.constant 0 : index
    %1 = vector.load %arg2[%c0_1, %c0_2] : memref<1x64xf32, #tpu.memory_space<vmem>>, vector<1x64xf32>
    %c0_3 = arith.constant 0 : index
    %c0_4 = arith.constant 0 : index
    %2 = vector.load %arg3[%c0_3, %c0_4] : memref<1x64xf32, #tpu.memory_space<vmem>>, vector<1x64xf32>
    %c0_5 = arith.constant 0 : index
    %c0_6 = arith.constant 0 : index
    %c0_7 = arith.constant 0 : index
    %3 = vector.load %arg1[%c0_5, %c0_6, %c0_7] : memref<1x222x64xbf16, #tpu.memory_space<vmem>>, vector<1x222x64xbf16>
    %4 = vector.shape_cast %3 : vector<1x222x64xbf16> to vector<222x64xbf16>
    %5 = arith.extf %4 : vector<222x64xbf16> to vector<222x64xf32>
    %6 = vector.broadcast %1 : vector<1x64xf32> to vector<222x64xf32>
    %7 = arith.mulf %5, %6 : vector<222x64xf32>
    %8 = vector.broadcast %2 : vector<1x64xf32> to vector<222x64xf32>
    %9 = arith.addf %7, %8 : vector<222x64xf32>
    %cst = arith.constant 0.000000e+00 : f32
    %10 = vector.broadcast %cst : f32 to vector<222x64xf32>
    %11 = arith.maximumf %9, %10 : vector<222x64xf32>
    %12 = vector.extract_strided_slice %11 {offsets = [0, 0], sizes = [206, 64], strides = [1, 1]} : vector<222x64xf32> to vector<206x64xf32>
    %13 = vector.extract_strided_slice %11 {offsets = [16, 0], sizes = [206, 64], strides = [1, 1]} : vector<222x64xf32> to vector<206x64xf32>
    %14 = arith.maximumf %12, %13 : vector<206x64xf32>
    %15 = vector.extract_strided_slice %14 {offsets = [0, 0], sizes = [205, 64], strides = [1, 1]} : vector<206x64xf32> to vector<205x64xf32>
    %16 = vector.extract_strided_slice %14 {offsets = [1, 0], sizes = [205, 64], strides = [1, 1]} : vector<206x64xf32> to vector<205x64xf32>
    %17 = arith.maximumf %15, %16 : vector<205x64xf32>
    %18 = arith.truncf %17 : vector<205x64xf32> to vector<205x64xbf16>
    %cst_8 = arith.constant dense<0.000000e+00> : vector<81x64xf32>
    %19 = tpu.matmul %0, %18, %cst_8 {dimension_numbers = #tpu.dot_dimension_numbers<[1], [0], [0], [1], [0, 0, 1, 1], [], []>} : vector<81x205xbf16>, vector<205x64xbf16>, vector<81x64xf32> -> vector<81x64xf32>
    %20 = arith.truncf %19 : vector<81x64xf32> to vector<81x64xbf16>
    %c0_9 = arith.constant 0 : index
    %c0_10 = arith.constant 0 : index
    %c0_11 = arith.constant 0 : index
    %21 = vector.load %arg5[%c0_9, %c0_10, %c0_11] : memref<1x81x64xbf16, #tpu.memory_space<vmem>>, vector<1x81x64xbf16>
    %22 = vector.shape_cast %21 : vector<1x81x64xbf16> to vector<81x64xbf16>
    %23 = vector.shape_cast %20 : vector<81x64xbf16> to vector<1x81x64xbf16>
    tpu.vector_store %arg5[%c0_9, %c0_10, %c0_11], %23 {strides = array<i32>} : memref<1x81x64xbf16, #tpu.memory_space<vmem>>, vector<1x81x64xbf16>,
    return
  }
  func.func @transform_0(%arg0: i32) -> (i32, i32, i32) {
    %c0_i32 = arith.constant 0 : i32
    %c0_i32_0 = arith.constant 0 : i32
    %c0_i32_1 = arith.constant 0 : i32
    return %arg0, %c0_i32, %c0_i32_0 : i32, i32, i32
  }
  func.func @transform_1(%arg0: i32) -> (i32, i32) {
    %c0_i32 = arith.constant 0 : i32
    %c0_i32_0 = arith.constant 0 : i32
    %c0_i32_1 = arith.constant 0 : i32
    return %c0_i32, %c0_i32_0 : i32, i32
  }
  func.func @transform_2(%arg0: i32) -> (i32, i32) {
    %c0_i32 = arith.constant 0 : i32
    %c0_i32_0 = arith.constant 0 : i32
    %c0_i32_1 = arith.constant 0 : i32
    return %c0_i32, %c0_i32_0 : i32, i32
  }
  func.func @transform_3(%arg0: i32) -> (i32, i32) {
    %c0_i32 = arith.constant 0 : i32
    %c0_i32_0 = arith.constant 0 : i32
    %c0_i32_1 = arith.constant 0 : i32
    return %c0_i32, %c0_i32_0 : i32, i32
  }
  func.func @transform_4(%arg0: i32) -> (i32, i32, i32) {
    %c0_i32 = arith.constant 0 : i32
    %c0_i32_0 = arith.constant 0 : i32
    %c0_i32_1 = arith.constant 0 : i32
    return %arg0, %c0_i32, %c0_i32_0 : i32, i32, i32
  }
}

module attributes {stable_mosaic.version = 11 : i64} {
  func.func @kernel(%arg0: i32, %arg1: memref<1x81x64xbf16, #tpu.memory_space<vmem>>, %arg2: memref<576x64xbf16, #tpu.memory_space<vmem>>, %arg3: memref<61x1xf32, #tpu.memory_space<vmem>>, %arg4: memref<1x61x64xbf16, #tpu.memory_space<vmem>>, %arg5: memref<1x1x64xf32, #tpu.memory_space<vmem>>, %arg6: memref<1x1x64xf32, #tpu.memory_space<vmem>>) attributes {dimension_semantics = [#tpu.dimension_semantics<parallel>], iteration_bounds = array<i64: 2>, scalar_prefetch = 0 : i64, scratch_operands = 0 : i64, tpu.core_type = #tpu.core_type<tc>, window_params = [{transform_indices = @transform_0, window_bounds = array<i64: 1, 81, 64>}, {pipeline_mode = #tpu.pipeline_mode<synchronous>, transform_indices = @transform_1, window_bounds = array<i64: 576, 64>}, {pipeline_mode = #tpu.pipeline_mode<synchronous>, transform_indices = @transform_2, window_bounds = array<i64: 61, 1>}, {transform_indices = @transform_3, window_bounds = array<i64: 1, 61, 64>}, {transform_indices = @transform_4, window_bounds = array<i64: 1, 1, 64>}, {transform_indices = @transform_5, window_bounds = array<i64: 1, 1, 64>}]} {
    %c0 = arith.constant 0 : index
    %c0_0 = arith.constant 0 : index
    %0 = vector.load %arg2[%c0, %c0_0] : memref<576x64xbf16, #tpu.memory_space<vmem>>, vector<576x64xbf16>
    %c0_1 = arith.constant 0 : index
    %c0_2 = arith.constant 0 : index
    %1 = vector.load %arg3[%c0_1, %c0_2] : memref<61x1xf32, #tpu.memory_space<vmem>>, vector<61x1xf32>
    %c0_3 = arith.constant 0 : index
    %c0_4 = arith.constant 0 : index
    %c0_5 = arith.constant 0 : index
    %2 = vector.load %arg1[%c0_3, %c0_4, %c0_5] : memref<1x81x64xbf16, #tpu.memory_space<vmem>>, vector<1x61x64xbf16>
    %3 = vector.shape_cast %2 : vector<1x61x64xbf16> to vector<61x64xbf16>
    %c0_6 = arith.constant 0 : index
    %c1 = arith.constant 1 : index
    %c0_7 = arith.constant 0 : index
    %4 = vector.load %arg1[%c0_6, %c1, %c0_7] : memref<1x81x64xbf16, #tpu.memory_space<vmem>>, vector<1x61x64xbf16>
    %5 = vector.shape_cast %4 : vector<1x61x64xbf16> to vector<61x64xbf16>
    %c0_8 = arith.constant 0 : index
    %c2 = arith.constant 2 : index
    %c0_9 = arith.constant 0 : index
    %6 = vector.load %arg1[%c0_8, %c2, %c0_9] : memref<1x81x64xbf16, #tpu.memory_space<vmem>>, vector<1x61x64xbf16>
    %7 = vector.shape_cast %6 : vector<1x61x64xbf16> to vector<61x64xbf16>
    %c0_10 = arith.constant 0 : index
    %c9 = arith.constant 9 : index
    %c0_11 = arith.constant 0 : index
    %8 = vector.load %arg1[%c0_10, %c9, %c0_11] : memref<1x81x64xbf16, #tpu.memory_space<vmem>>, vector<1x61x64xbf16>
    %9 = vector.shape_cast %8 : vector<1x61x64xbf16> to vector<61x64xbf16>
    %c0_12 = arith.constant 0 : index
    %c10 = arith.constant 10 : index
    %c0_13 = arith.constant 0 : index
    %10 = vector.load %arg1[%c0_12, %c10, %c0_13] : memref<1x81x64xbf16, #tpu.memory_space<vmem>>, vector<1x61x64xbf16>
    %11 = vector.shape_cast %10 : vector<1x61x64xbf16> to vector<61x64xbf16>
    %c0_14 = arith.constant 0 : index
    %c11 = arith.constant 11 : index
    %c0_15 = arith.constant 0 : index
    %12 = vector.load %arg1[%c0_14, %c11, %c0_15] : memref<1x81x64xbf16, #tpu.memory_space<vmem>>, vector<1x61x64xbf16>
    %13 = vector.shape_cast %12 : vector<1x61x64xbf16> to vector<61x64xbf16>
    %c0_16 = arith.constant 0 : index
    %c18 = arith.constant 18 : index
    %c0_17 = arith.constant 0 : index
    %14 = vector.load %arg1[%c0_16, %c18, %c0_17] : memref<1x81x64xbf16, #tpu.memory_space<vmem>>, vector<1x61x64xbf16>
    %15 = vector.shape_cast %14 : vector<1x61x64xbf16> to vector<61x64xbf16>
    %c0_18 = arith.constant 0 : index
    %c19 = arith.constant 19 : index
    %c0_19 = arith.constant 0 : index
    %16 = vector.load %arg1[%c0_18, %c19, %c0_19] : memref<1x81x64xbf16, #tpu.memory_space<vmem>>, vector<1x61x64xbf16>
    %17 = vector.shape_cast %16 : vector<1x61x64xbf16> to vector<61x64xbf16>
    %c0_20 = arith.constant 0 : index
    %c20 = arith.constant 20 : index
    %c0_21 = arith.constant 0 : index
    %18 = vector.load %arg1[%c0_20, %c20, %c0_21] : memref<1x81x64xbf16, #tpu.memory_space<vmem>>, vector<1x61x64xbf16>
    %19 = vector.shape_cast %18 : vector<1x61x64xbf16> to vector<61x64xbf16>
    %20 = tpu.concatenate %3, %5, %7, %9, %11, %13, %15, %17, %19 in 1 : vector<61x64xbf16>, vector<61x64xbf16>, vector<61x64xbf16>, vector<61x64xbf16>, vector<61x64xbf16>, vector<61x64xbf16>, vector<61x64xbf16>, vector<61x64xbf16>, vector<61x64xbf16> -> vector<61x576xbf16>
    %cst = arith.constant dense<0.000000e+00> : vector<61x64xf32>
    %21 = tpu.matmul %20, %0, %cst {dimension_numbers = #tpu.dot_dimension_numbers<[1], [0], [0], [1], [0, 0, 1, 1], [], []>} : vector<61x576xbf16>, vector<576x64xbf16>, vector<61x64xf32> -> vector<61x64xf32>
    %22 = vector.broadcast %1 : vector<61x1xf32> to vector<61x64xf32>
    %23 = arith.mulf %21, %22 : vector<61x64xf32>
    %24 = arith.truncf %23 : vector<61x64xf32> to vector<61x64xbf16>
    %c0_22 = arith.constant 0 : index
    %c0_23 = arith.constant 0 : index
    %c0_24 = arith.constant 0 : index
    %25 = vector.load %arg4[%c0_22, %c0_23, %c0_24] : memref<1x61x64xbf16, #tpu.memory_space<vmem>>, vector<1x61x64xbf16>
    %26 = vector.shape_cast %25 : vector<1x61x64xbf16> to vector<61x64xbf16>
    %27 = vector.shape_cast %24 : vector<61x64xbf16> to vector<1x61x64xbf16>
    tpu.vector_store %arg4[%c0_22, %c0_23, %c0_24], %27 {strides = array<i32>} : memref<1x61x64xbf16, #tpu.memory_space<vmem>>, vector<1x61x64xbf16>,
    %cst_25 = arith.constant dense<0.000000e+00> : vector<64xf32>
    %28 = vector.multi_reduction <add>, %23, %cst_25 [0] : vector<61x64xf32> to vector<64xf32>
    %29 = vector.shape_cast %28 : vector<64xf32> to vector<1x64xf32>
    %30 = arith.mulf %23, %21 : vector<61x64xf32>
    %cst_26 = arith.constant dense<0.000000e+00> : vector<64xf32>
    %31 = vector.multi_reduction <add>, %30, %cst_26 [0] : vector<61x64xf32> to vector<64xf32>
    %32 = vector.shape_cast %31 : vector<64xf32> to vector<1x64xf32>
    %c0_27 = arith.constant 0 : index
    %c0_28 = arith.constant 0 : index
    %c0_29 = arith.constant 0 : index
    %33 = vector.load %arg5[%c0_27, %c0_28, %c0_29] : memref<1x1x64xf32, #tpu.memory_space<vmem>>, vector<1x1x64xf32>
    %34 = vector.shape_cast %33 : vector<1x1x64xf32> to vector<1x64xf32>
    %35 = vector.shape_cast %29 : vector<1x64xf32> to vector<1x1x64xf32>
    tpu.vector_store %arg5[%c0_27, %c0_28, %c0_29], %35 {strides = array<i32>} : memref<1x1x64xf32, #tpu.memory_space<vmem>>, vector<1x1x64xf32>,
    %c0_30 = arith.constant 0 : index
    %c0_31 = arith.constant 0 : index
    %c0_32 = arith.constant 0 : index
    %36 = vector.load %arg6[%c0_30, %c0_31, %c0_32] : memref<1x1x64xf32, #tpu.memory_space<vmem>>, vector<1x1x64xf32>
    %37 = vector.shape_cast %36 : vector<1x1x64xf32> to vector<1x64xf32>
    %38 = vector.shape_cast %32 : vector<1x64xf32> to vector<1x1x64xf32>
    tpu.vector_store %arg6[%c0_30, %c0_31, %c0_32], %38 {strides = array<i32>} : memref<1x1x64xf32, #tpu.memory_space<vmem>>, vector<1x1x64xf32>,
    return
  }
  func.func @transform_0(%arg0: i32) -> (i32, i32, i32) {
    %c0_i32 = arith.constant 0 : i32
    %c0_i32_0 = arith.constant 0 : i32
    %c0_i32_1 = arith.constant 0 : i32
    return %arg0, %c0_i32, %c0_i32_0 : i32, i32, i32
  }
  func.func @transform_1(%arg0: i32) -> (i32, i32) {
    %c0_i32 = arith.constant 0 : i32
    %c0_i32_0 = arith.constant 0 : i32
    %c0_i32_1 = arith.constant 0 : i32
    return %c0_i32, %c0_i32_0 : i32, i32
  }
  func.func @transform_2(%arg0: i32) -> (i32, i32) {
    %c0_i32 = arith.constant 0 : i32
    %c0_i32_0 = arith.constant 0 : i32
    %c0_i32_1 = arith.constant 0 : i32
    return %c0_i32, %c0_i32_0 : i32, i32
  }
  func.func @transform_3(%arg0: i32) -> (i32, i32, i32) {
    %c0_i32 = arith.constant 0 : i32
    %c0_i32_0 = arith.constant 0 : i32
    %c0_i32_1 = arith.constant 0 : i32
    return %arg0, %c0_i32, %c0_i32_0 : i32, i32, i32
  }
  func.func @transform_4(%arg0: i32) -> (i32, i32, i32) {
    %c0_i32 = arith.constant 0 : i32
    %c0_i32_0 = arith.constant 0 : i32
    %c0_i32_1 = arith.constant 0 : i32
    return %arg0, %c0_i32, %c0_i32_0 : i32, i32, i32
  }
  func.func @transform_5(%arg0: i32) -> (i32, i32, i32) {
    %c0_i32 = arith.constant 0 : i32
    %c0_i32_0 = arith.constant 0 : i32
    %c0_i32_1 = arith.constant 0 : i32
    return %arg0, %c0_i32, %c0_i32_0 : i32, i32, i32
  }
}

module attributes {stable_mosaic.version = 11 : i64} {
  func.func @kernel(%arg0: i32, %arg1: memref<1x61x64xbf16, #tpu.memory_space<vmem>>, %arg2: memref<1x64xf32, #tpu.memory_space<vmem>>, %arg3: memref<1x64xf32, #tpu.memory_space<vmem>>, %arg4: memref<25x51xbf16, #tpu.memory_space<vmem>>, %arg5: memref<1x25x64xbf16, #tpu.memory_space<vmem>>) attributes {dimension_semantics = [#tpu.dimension_semantics<parallel>], iteration_bounds = array<i64: 2>, scalar_prefetch = 0 : i64, scratch_operands = 0 : i64, tpu.core_type = #tpu.core_type<tc>, window_params = [{transform_indices = @transform_0, window_bounds = array<i64: 1, 61, 64>}, {pipeline_mode = #tpu.pipeline_mode<synchronous>, transform_indices = @transform_1, window_bounds = array<i64: 1, 64>}, {pipeline_mode = #tpu.pipeline_mode<synchronous>, transform_indices = @transform_2, window_bounds = array<i64: 1, 64>}, {pipeline_mode = #tpu.pipeline_mode<synchronous>, transform_indices = @transform_3, window_bounds = array<i64: 25, 51>}, {transform_indices = @transform_4, window_bounds = array<i64: 1, 25, 64>}]} {
    %c0 = arith.constant 0 : index
    %c0_0 = arith.constant 0 : index
    %0 = vector.load %arg4[%c0, %c0_0] : memref<25x51xbf16, #tpu.memory_space<vmem>>, vector<25x51xbf16>
    %c0_1 = arith.constant 0 : index
    %c0_2 = arith.constant 0 : index
    %1 = vector.load %arg2[%c0_1, %c0_2] : memref<1x64xf32, #tpu.memory_space<vmem>>, vector<1x64xf32>
    %c0_3 = arith.constant 0 : index
    %c0_4 = arith.constant 0 : index
    %2 = vector.load %arg3[%c0_3, %c0_4] : memref<1x64xf32, #tpu.memory_space<vmem>>, vector<1x64xf32>
    %c0_5 = arith.constant 0 : index
    %c0_6 = arith.constant 0 : index
    %c0_7 = arith.constant 0 : index
    %3 = vector.load %arg1[%c0_5, %c0_6, %c0_7] : memref<1x61x64xbf16, #tpu.memory_space<vmem>>, vector<1x61x64xbf16>
    %4 = vector.shape_cast %3 : vector<1x61x64xbf16> to vector<61x64xbf16>
    %5 = arith.extf %4 : vector<61x64xbf16> to vector<61x64xf32>
    %6 = vector.broadcast %1 : vector<1x64xf32> to vector<61x64xf32>
    %7 = arith.mulf %5, %6 : vector<61x64xf32>
    %8 = vector.broadcast %2 : vector<1x64xf32> to vector<61x64xf32>
    %9 = arith.addf %7, %8 : vector<61x64xf32>
    %cst = arith.constant 0.000000e+00 : f32
    %10 = vector.broadcast %cst : f32 to vector<61x64xf32>
    %11 = arith.maximumf %9, %10 : vector<61x64xf32>
    %12 = vector.extract_strided_slice %11 {offsets = [0, 0], sizes = [52, 64], strides = [1, 1]} : vector<61x64xf32> to vector<52x64xf32>
    %13 = vector.extract_strided_slice %11 {offsets = [9, 0], sizes = [52, 64], strides = [1, 1]} : vector<61x64xf32> to vector<52x64xf32>
    %14 = arith.maximumf %12, %13 : vector<52x64xf32>
    %15 = vector.extract_strided_slice %14 {offsets = [0, 0], sizes = [51, 64], strides = [1, 1]} : vector<52x64xf32> to vector<51x64xf32>
    %16 = vector.extract_strided_slice %14 {offsets = [1, 0], sizes = [51, 64], strides = [1, 1]} : vector<52x64xf32> to vector<51x64xf32>
    %17 = arith.maximumf %15, %16 : vector<51x64xf32>
    %18 = arith.truncf %17 : vector<51x64xf32> to vector<51x64xbf16>
    %cst_8 = arith.constant dense<0.000000e+00> : vector<25x64xf32>
    %19 = tpu.matmul %0, %18, %cst_8 {dimension_numbers = #tpu.dot_dimension_numbers<[1], [0], [0], [1], [0, 0, 1, 1], [], []>} : vector<25x51xbf16>, vector<51x64xbf16>, vector<25x64xf32> -> vector<25x64xf32>
    %20 = arith.truncf %19 : vector<25x64xf32> to vector<25x64xbf16>
    %c0_9 = arith.constant 0 : index
    %c0_10 = arith.constant 0 : index
    %c0_11 = arith.constant 0 : index
    %21 = vector.load %arg5[%c0_9, %c0_10, %c0_11] : memref<1x25x64xbf16, #tpu.memory_space<vmem>>, vector<1x25x64xbf16>
    %22 = vector.shape_cast %21 : vector<1x25x64xbf16> to vector<25x64xbf16>
    %23 = vector.shape_cast %20 : vector<25x64xbf16> to vector<1x25x64xbf16>
    tpu.vector_store %arg5[%c0_9, %c0_10, %c0_11], %23 {strides = array<i32>} : memref<1x25x64xbf16, #tpu.memory_space<vmem>>, vector<1x25x64xbf16>,
    return
  }
  func.func @transform_0(%arg0: i32) -> (i32, i32, i32) {
    %c0_i32 = arith.constant 0 : i32
    %c0_i32_0 = arith.constant 0 : i32
    %c0_i32_1 = arith.constant 0 : i32
    return %arg0, %c0_i32, %c0_i32_0 : i32, i32, i32
  }
  func.func @transform_1(%arg0: i32) -> (i32, i32) {
    %c0_i32 = arith.constant 0 : i32
    %c0_i32_0 = arith.constant 0 : i32
    %c0_i32_1 = arith.constant 0 : i32
    return %c0_i32, %c0_i32_0 : i32, i32
  }
  func.func @transform_2(%arg0: i32) -> (i32, i32) {
    %c0_i32 = arith.constant 0 : i32
    %c0_i32_0 = arith.constant 0 : i32
    %c0_i32_1 = arith.constant 0 : i32
    return %c0_i32, %c0_i32_0 : i32, i32
  }
  func.func @transform_3(%arg0: i32) -> (i32, i32) {
    %c0_i32 = arith.constant 0 : i32
    %c0_i32_0 = arith.constant 0 : i32
    %c0_i32_1 = arith.constant 0 : i32
    return %c0_i32, %c0_i32_0 : i32, i32
  }
  func.func @transform_4(%arg0: i32) -> (i32, i32, i32) {
    %c0_i32 = arith.constant 0 : i32
    %c0_i32_0 = arith.constant 0 : i32
    %c0_i32_1 = arith.constant 0 : i32
    return %arg0, %c0_i32, %c0_i32_0 : i32, i32, i32
  }
}

module attributes {stable_mosaic.version = 11 : i64} {
  func.func @kernel(%arg0: i32, %arg1: memref<1x25x64xbf16, #tpu.memory_space<vmem>>, %arg2: memref<576x64xbf16, #tpu.memory_space<vmem>>, %arg3: memref<13x1xf32, #tpu.memory_space<vmem>>, %arg4: memref<1x13x64xbf16, #tpu.memory_space<vmem>>, %arg5: memref<1x1x64xf32, #tpu.memory_space<vmem>>, %arg6: memref<1x1x64xf32, #tpu.memory_space<vmem>>) attributes {dimension_semantics = [#tpu.dimension_semantics<parallel>], iteration_bounds = array<i64: 2>, scalar_prefetch = 0 : i64, scratch_operands = 0 : i64, tpu.core_type = #tpu.core_type<tc>, window_params = [{transform_indices = @transform_0, window_bounds = array<i64: 1, 25, 64>}, {pipeline_mode = #tpu.pipeline_mode<synchronous>, transform_indices = @transform_1, window_bounds = array<i64: 576, 64>}, {pipeline_mode = #tpu.pipeline_mode<synchronous>, transform_indices = @transform_2, window_bounds = array<i64: 13, 1>}, {transform_indices = @transform_3, window_bounds = array<i64: 1, 13, 64>}, {transform_indices = @transform_4, window_bounds = array<i64: 1, 1, 64>}, {transform_indices = @transform_5, window_bounds = array<i64: 1, 1, 64>}]} {
    %c0 = arith.constant 0 : index
    %c0_0 = arith.constant 0 : index
    %0 = vector.load %arg2[%c0, %c0_0] : memref<576x64xbf16, #tpu.memory_space<vmem>>, vector<576x64xbf16>
    %c0_1 = arith.constant 0 : index
    %c0_2 = arith.constant 0 : index
    %1 = vector.load %arg3[%c0_1, %c0_2] : memref<13x1xf32, #tpu.memory_space<vmem>>, vector<13x1xf32>
    %c0_3 = arith.constant 0 : index
    %c0_4 = arith.constant 0 : index
    %c0_5 = arith.constant 0 : index
    %2 = vector.load %arg1[%c0_3, %c0_4, %c0_5] : memref<1x25x64xbf16, #tpu.memory_space<vmem>>, vector<1x13x64xbf16>
    %3 = vector.shape_cast %2 : vector<1x13x64xbf16> to vector<13x64xbf16>
    %c0_6 = arith.constant 0 : index
    %c1 = arith.constant 1 : index
    %c0_7 = arith.constant 0 : index
    %4 = vector.load %arg1[%c0_6, %c1, %c0_7] : memref<1x25x64xbf16, #tpu.memory_space<vmem>>, vector<1x13x64xbf16>
    %5 = vector.shape_cast %4 : vector<1x13x64xbf16> to vector<13x64xbf16>
    %c0_8 = arith.constant 0 : index
    %c2 = arith.constant 2 : index
    %c0_9 = arith.constant 0 : index
    %6 = vector.load %arg1[%c0_8, %c2, %c0_9] : memref<1x25x64xbf16, #tpu.memory_space<vmem>>, vector<1x13x64xbf16>
    %7 = vector.shape_cast %6 : vector<1x13x64xbf16> to vector<13x64xbf16>
    %c0_10 = arith.constant 0 : index
    %c5 = arith.constant 5 : index
    %c0_11 = arith.constant 0 : index
    %8 = vector.load %arg1[%c0_10, %c5, %c0_11] : memref<1x25x64xbf16, #tpu.memory_space<vmem>>, vector<1x13x64xbf16>
    %9 = vector.shape_cast %8 : vector<1x13x64xbf16> to vector<13x64xbf16>
    %c0_12 = arith.constant 0 : index
    %c6 = arith.constant 6 : index
    %c0_13 = arith.constant 0 : index
    %10 = vector.load %arg1[%c0_12, %c6, %c0_13] : memref<1x25x64xbf16, #tpu.memory_space<vmem>>, vector<1x13x64xbf16>
    %11 = vector.shape_cast %10 : vector<1x13x64xbf16> to vector<13x64xbf16>
    %c0_14 = arith.constant 0 : index
    %c7 = arith.constant 7 : index
    %c0_15 = arith.constant 0 : index
    %12 = vector.load %arg1[%c0_14, %c7, %c0_15] : memref<1x25x64xbf16, #tpu.memory_space<vmem>>, vector<1x13x64xbf16>
    %13 = vector.shape_cast %12 : vector<1x13x64xbf16> to vector<13x64xbf16>
    %c0_16 = arith.constant 0 : index
    %c10 = arith.constant 10 : index
    %c0_17 = arith.constant 0 : index
    %14 = vector.load %arg1[%c0_16, %c10, %c0_17] : memref<1x25x64xbf16, #tpu.memory_space<vmem>>, vector<1x13x64xbf16>
    %15 = vector.shape_cast %14 : vector<1x13x64xbf16> to vector<13x64xbf16>
    %c0_18 = arith.constant 0 : index
    %c11 = arith.constant 11 : index
    %c0_19 = arith.constant 0 : index
    %16 = vector.load %arg1[%c0_18, %c11, %c0_19] : memref<1x25x64xbf16, #tpu.memory_space<vmem>>, vector<1x13x64xbf16>
    %17 = vector.shape_cast %16 : vector<1x13x64xbf16> to vector<13x64xbf16>
    %c0_20 = arith.constant 0 : index
    %c12 = arith.constant 12 : index
    %c0_21 = arith.constant 0 : index
    %18 = vector.load %arg1[%c0_20, %c12, %c0_21] : memref<1x25x64xbf16, #tpu.memory_space<vmem>>, vector<1x13x64xbf16>
    %19 = vector.shape_cast %18 : vector<1x13x64xbf16> to vector<13x64xbf16>
    %20 = tpu.concatenate %3, %5, %7, %9, %11, %13, %15, %17, %19 in 1 : vector<13x64xbf16>, vector<13x64xbf16>, vector<13x64xbf16>, vector<13x64xbf16>, vector<13x64xbf16>, vector<13x64xbf16>, vector<13x64xbf16>, vector<13x64xbf16>, vector<13x64xbf16> -> vector<13x576xbf16>
    %cst = arith.constant dense<0.000000e+00> : vector<13x64xf32>
    %21 = tpu.matmul %20, %0, %cst {dimension_numbers = #tpu.dot_dimension_numbers<[1], [0], [0], [1], [0, 0, 1, 1], [], []>} : vector<13x576xbf16>, vector<576x64xbf16>, vector<13x64xf32> -> vector<13x64xf32>
    %22 = vector.broadcast %1 : vector<13x1xf32> to vector<13x64xf32>
    %23 = arith.mulf %21, %22 : vector<13x64xf32>
    %24 = arith.truncf %23 : vector<13x64xf32> to vector<13x64xbf16>
    %c0_22 = arith.constant 0 : index
    %c0_23 = arith.constant 0 : index
    %c0_24 = arith.constant 0 : index
    %25 = vector.load %arg4[%c0_22, %c0_23, %c0_24] : memref<1x13x64xbf16, #tpu.memory_space<vmem>>, vector<1x13x64xbf16>
    %26 = vector.shape_cast %25 : vector<1x13x64xbf16> to vector<13x64xbf16>
    %27 = vector.shape_cast %24 : vector<13x64xbf16> to vector<1x13x64xbf16>
    tpu.vector_store %arg4[%c0_22, %c0_23, %c0_24], %27 {strides = array<i32>} : memref<1x13x64xbf16, #tpu.memory_space<vmem>>, vector<1x13x64xbf16>,
    %cst_25 = arith.constant dense<0.000000e+00> : vector<64xf32>
    %28 = vector.multi_reduction <add>, %23, %cst_25 [0] : vector<13x64xf32> to vector<64xf32>
    %29 = vector.shape_cast %28 : vector<64xf32> to vector<1x64xf32>
    %30 = arith.mulf %23, %21 : vector<13x64xf32>
    %cst_26 = arith.constant dense<0.000000e+00> : vector<64xf32>
    %31 = vector.multi_reduction <add>, %30, %cst_26 [0] : vector<13x64xf32> to vector<64xf32>
    %32 = vector.shape_cast %31 : vector<64xf32> to vector<1x64xf32>
    %c0_27 = arith.constant 0 : index
    %c0_28 = arith.constant 0 : index
    %c0_29 = arith.constant 0 : index
    %33 = vector.load %arg5[%c0_27, %c0_28, %c0_29] : memref<1x1x64xf32, #tpu.memory_space<vmem>>, vector<1x1x64xf32>
    %34 = vector.shape_cast %33 : vector<1x1x64xf32> to vector<1x64xf32>
    %35 = vector.shape_cast %29 : vector<1x64xf32> to vector<1x1x64xf32>
    tpu.vector_store %arg5[%c0_27, %c0_28, %c0_29], %35 {strides = array<i32>} : memref<1x1x64xf32, #tpu.memory_space<vmem>>, vector<1x1x64xf32>,
    %c0_30 = arith.constant 0 : index
    %c0_31 = arith.constant 0 : index
    %c0_32 = arith.constant 0 : index
    %36 = vector.load %arg6[%c0_30, %c0_31, %c0_32] : memref<1x1x64xf32, #tpu.memory_space<vmem>>, vector<1x1x64xf32>
    %37 = vector.shape_cast %36 : vector<1x1x64xf32> to vector<1x64xf32>
    %38 = vector.shape_cast %32 : vector<1x64xf32> to vector<1x1x64xf32>
    tpu.vector_store %arg6[%c0_30, %c0_31, %c0_32], %38 {strides = array<i32>} : memref<1x1x64xf32, #tpu.memory_space<vmem>>, vector<1x1x64xf32>,
    return
  }
  func.func @transform_0(%arg0: i32) -> (i32, i32, i32) {
    %c0_i32 = arith.constant 0 : i32
    %c0_i32_0 = arith.constant 0 : i32
    %c0_i32_1 = arith.constant 0 : i32
    return %arg0, %c0_i32, %c0_i32_0 : i32, i32, i32
  }
  func.func @transform_1(%arg0: i32) -> (i32, i32) {
    %c0_i32 = arith.constant 0 : i32
    %c0_i32_0 = arith.constant 0 : i32
    %c0_i32_1 = arith.constant 0 : i32
    return %c0_i32, %c0_i32_0 : i32, i32
  }
  func.func @transform_2(%arg0: i32) -> (i32, i32) {
    %c0_i32 = arith.constant 0 : i32
    %c0_i32_0 = arith.constant 0 : i32
    %c0_i32_1 = arith.constant 0 : i32
    return %c0_i32, %c0_i32_0 : i32, i32
  }
  func.func @transform_3(%arg0: i32) -> (i32, i32, i32) {
    %c0_i32 = arith.constant 0 : i32
    %c0_i32_0 = arith.constant 0 : i32
    %c0_i32_1 = arith.constant 0 : i32
    return %arg0, %c0_i32, %c0_i32_0 : i32, i32, i32
  }
  func.func @transform_4(%arg0: i32) -> (i32, i32, i32) {
    %c0_i32 = arith.constant 0 : i32
    %c0_i32_0 = arith.constant 0 : i32
    %c0_i32_1 = arith.constant 0 : i32
    return %arg0, %c0_i32, %c0_i32_0 : i32, i32, i32
  }
  func.func @transform_5(%arg0: i32) -> (i32, i32, i32) {
    %c0_i32 = arith.constant 0 : i32
    %c0_i32_0 = arith.constant 0 : i32
    %c0_i32_1 = arith.constant 0 : i32
    return %arg0, %c0_i32, %c0_i32_0 : i32, i32, i32
  }
}

module attributes {stable_mosaic.version = 11 : i64} {
  func.func @kernel(%arg0: i32, %arg1: memref<1x13x64xbf16, #tpu.memory_space<vmem>>, %arg2: memref<1x64xf32, #tpu.memory_space<vmem>>, %arg3: memref<1x64xf32, #tpu.memory_space<vmem>>, %arg4: memref<64x5xf32, #tpu.memory_space<vmem>>, %arg5: memref<1x5xf32, #tpu.memory_space<vmem>>, %arg6: memref<1x1x5xf32, #tpu.memory_space<vmem>>) attributes {dimension_semantics = [#tpu.dimension_semantics<parallel>], iteration_bounds = array<i64: 2>, scalar_prefetch = 0 : i64, scratch_operands = 0 : i64, tpu.core_type = #tpu.core_type<tc>, window_params = [{transform_indices = @transform_0, window_bounds = array<i64: 1, 13, 64>}, {pipeline_mode = #tpu.pipeline_mode<synchronous>, transform_indices = @transform_1, window_bounds = array<i64: 1, 64>}, {pipeline_mode = #tpu.pipeline_mode<synchronous>, transform_indices = @transform_2, window_bounds = array<i64: 1, 64>}, {pipeline_mode = #tpu.pipeline_mode<synchronous>, transform_indices = @transform_3, window_bounds = array<i64: 64, 5>}, {pipeline_mode = #tpu.pipeline_mode<synchronous>, transform_indices = @transform_4, window_bounds = array<i64: 1, 5>}, {transform_indices = @transform_5, window_bounds = array<i64: 1, 1, 5>}]} {
    %c0 = arith.constant 0 : index
    %c0_0 = arith.constant 0 : index
    %0 = vector.load %arg2[%c0, %c0_0] : memref<1x64xf32, #tpu.memory_space<vmem>>, vector<1x64xf32>
    %c0_1 = arith.constant 0 : index
    %c0_2 = arith.constant 0 : index
    %1 = vector.load %arg3[%c0_1, %c0_2] : memref<1x64xf32, #tpu.memory_space<vmem>>, vector<1x64xf32>
    %c0_3 = arith.constant 0 : index
    %c0_4 = arith.constant 0 : index
    %c0_5 = arith.constant 0 : index
    %2 = vector.load %arg1[%c0_3, %c0_4, %c0_5] : memref<1x13x64xbf16, #tpu.memory_space<vmem>>, vector<1x13x64xbf16>
    %3 = vector.shape_cast %2 : vector<1x13x64xbf16> to vector<13x64xbf16>
    %4 = arith.extf %3 : vector<13x64xbf16> to vector<13x64xf32>
    %5 = vector.broadcast %0 : vector<1x64xf32> to vector<13x64xf32>
    %6 = arith.mulf %4, %5 : vector<13x64xf32>
    %7 = vector.broadcast %1 : vector<1x64xf32> to vector<13x64xf32>
    %8 = arith.addf %6, %7 : vector<13x64xf32>
    %cst = arith.constant 0.000000e+00 : f32
    %9 = vector.broadcast %cst : f32 to vector<13x64xf32>
    %10 = arith.maximumf %8, %9 : vector<13x64xf32>
    %11 = vector.extract_strided_slice %10 {offsets = [0, 0], sizes = [8, 64], strides = [1, 1]} : vector<13x64xf32> to vector<8x64xf32>
    %12 = vector.extract_strided_slice %10 {offsets = [5, 0], sizes = [8, 64], strides = [1, 1]} : vector<13x64xf32> to vector<8x64xf32>
    %13 = arith.maximumf %11, %12 : vector<8x64xf32>
    %14 = vector.extract_strided_slice %13 {offsets = [0, 0], sizes = [7, 64], strides = [1, 1]} : vector<8x64xf32> to vector<7x64xf32>
    %15 = vector.extract_strided_slice %13 {offsets = [1, 0], sizes = [7, 64], strides = [1, 1]} : vector<8x64xf32> to vector<7x64xf32>
    %16 = arith.maximumf %14, %15 : vector<7x64xf32>
    %17 = vector.extract_strided_slice %16 {offsets = [0, 0], sizes = [1, 64], strides = [1, 1]} : vector<7x64xf32> to vector<1x64xf32>
    %c0_6 = arith.constant 0 : index
    %c0_7 = arith.constant 0 : index
    %18 = vector.load %arg4[%c0_6, %c0_7] : memref<64x5xf32, #tpu.memory_space<vmem>>, vector<64x5xf32>
    %cst_8 = arith.constant dense<0.000000e+00> : vector<1x5xf32>
    %19 = tpu.matmul %17, %18, %cst_8 {dimension_numbers = #tpu.dot_dimension_numbers<[1], [0], [0], [1], [0, 0, 1, 1], [], []>} : vector<1x64xf32>, vector<64x5xf32>, vector<1x5xf32> -> vector<1x5xf32>
    %c0_9 = arith.constant 0 : index
    %c0_10 = arith.constant 0 : index
    %20 = vector.load %arg5[%c0_9, %c0_10] : memref<1x5xf32, #tpu.memory_space<vmem>>, vector<1x5xf32>
    %21 = arith.addf %19, %20 : vector<1x5xf32>
    %c0_11 = arith.constant 0 : index
    %c0_12 = arith.constant 0 : index
    %c0_13 = arith.constant 0 : index
    %22 = vector.load %arg6[%c0_11, %c0_12, %c0_13] : memref<1x1x5xf32, #tpu.memory_space<vmem>>, vector<1x1x5xf32>
    %23 = vector.shape_cast %22 : vector<1x1x5xf32> to vector<1x5xf32>
    %24 = vector.shape_cast %21 : vector<1x5xf32> to vector<1x1x5xf32>
    tpu.vector_store %arg6[%c0_11, %c0_12, %c0_13], %24 {strides = array<i32>} : memref<1x1x5xf32, #tpu.memory_space<vmem>>, vector<1x1x5xf32>,
    return
  }
  func.func @transform_0(%arg0: i32) -> (i32, i32, i32) {
    %c0_i32 = arith.constant 0 : i32
    %c0_i32_0 = arith.constant 0 : i32
    %c0_i32_1 = arith.constant 0 : i32
    return %arg0, %c0_i32, %c0_i32_0 : i32, i32, i32
  }
  func.func @transform_1(%arg0: i32) -> (i32, i32) {
    %c0_i32 = arith.constant 0 : i32
    %c0_i32_0 = arith.constant 0 : i32
    %c0_i32_1 = arith.constant 0 : i32
    return %c0_i32, %c0_i32_0 : i32, i32
  }
  func.func @transform_2(%arg0: i32) -> (i32, i32) {
    %c0_i32 = arith.constant 0 : i32
    %c0_i32_0 = arith.constant 0 : i32
    %c0_i32_1 = arith.constant 0 : i32
    return %c0_i32, %c0_i32_0 : i32, i32
  }
  func.func @transform_3(%arg0: i32) -> (i32, i32) {
    %c0_i32 = arith.constant 0 : i32
    %c0_i32_0 = arith.constant 0 : i32
    %c0_i32_1 = arith.constant 0 : i32
    return %c0_i32, %c0_i32_0 : i32, i32
  }
  func.func @transform_4(%arg0: i32) -> (i32, i32) {
    %c0_i32 = arith.constant 0 : i32
    %c0_i32_0 = arith.constant 0 : i32
    %c0_i32_1 = arith.constant 0 : i32
    return %c0_i32, %c0_i32_0 : i32, i32
  }
  func.func @transform_5(%arg0: i32) -> (i32, i32, i32) {
    %c0_i32 = arith.constant 0 : i32
    %c0_i32_0 = arith.constant 0 : i32
    %c0_i32_1 = arith.constant 0 : i32
    return %arg0, %c0_i32, %c0_i32_0 : i32, i32, i32
  }
}

</mosaic_0001>

<bundles_post_ra>
// kernel: _lambda_.11
= control target key start
LH: loop header
LB: loop body
LE: loop exit
PB: predicated region body
PF: predicated region fallthrough
CT: control target
= control target key end

     0   :  { %s1011_s15 = smov 0   ;;  %s1234_s0 = inlined_call_operand.vmem [shape: bf16[2,222,64], index: 0, kind: input, shape index: {}]   ;;  %s1235_s1 = inlined_call_operand.vmem [shape: f32[1,64], index: 1, kind: input, shape index: {}]   ;;  %s1236_s2 = inlined_call_operand.vmem [shape: f32[1,64], index: 2, kind: input, shape index: {}]   ;;  %s1237_s3 = inlined_call_operand.vmem [shape: bf16[81,205], index: 3, kind: input, shape index: {}]   ;;  %s1238_s4 = inlined_call_operand.vmem [shape: bf16[2,81,64], index: 4, kind: output, shape index: {}]  }
   0x1 LB: > { %s806_s16 = sadd.s32 4294967295, %s982_s15   ;;  %p810_p0 = scmp.ge.s32.totalorder %s982_s15, 1  ;;  %s982_s15 = sphi %s1011_s15, %s14_s15  }
   0x2   : > { %p162_p1 = scmp.lt.s32.totalorder %s982_s15, 3 }
   0x4   : > { %p163_p2 = pnand %p810_p0, %p162_p1 }
   0x5   : > { %p188_p3 = scmp.lt.s32.totalorder (!%p163_p2), %s806_s16, 1  ;;  %v984_v0 = vmov (!%p163_p2), 0   ;;  %vm584_vm0 = vcmask (!%p163_p2), 629760   ;;  %v961_v1 = vld [vmem:[%s1237_s3 + $0x4] ss:$8 sps:$4 sm:$0xff] (!%p163_p2)   ;;  %vm416_vm1 = vcmask (!%p163_p2), 1046528  }
   0x6   : > { %166 = sbr.rel (%p163_p2) target bundleno = 321 (0x141), region = 36  ;;  %609 = vmatprep.subr.bf16.mxu0 (!%p163_p2), %v984_v0  ;;  %921 = vmatprep.subr.bf16.mxu1 (!%p163_p2), %v984_v0  ;;  %v964_v2 = vld [vmem:[%s1237_s3 + $0x34] ss:$8 sps:$4 sm:$0xff] (!%p163_p2)   ;;  %v1039_v3 = vld [vmem:[%s1235_s1] ss:$0 sm:$0xff] (!%p163_p2)  ;;  %vm603_vm2 = vcmask (!%p163_p2), 1045504  }
   0x7   : > { %827 = vmatprep.mubr.msk.bf16.mxu0 (!%p163_p2), %vm584_vm0, %v961_v1  ;;  %830 = vmatprep.mubr.msk.bf16.mxu1 (!%p163_p2), %vm584_vm0, %v964_v2  ;;  %v1050_v13 = vld [vmem:[%s1236_s2] ss:$0 sm:$0xff] (!%p163_p2)  ;;  %vm734_vm3 = vcmask (!%p163_p2), 519168   ;;  %vm745_vm4 = vcmask (!%p163_p2), 516096   ;;  %vm746_vm5 = vsmask.f32 (!%p163_p2), 256 }
   0x8   : > { %vm747_vm6 = vmand (!%p163_p2), %vm745_vm4, %vm746_vm5 }
   0xd   : > { %s1240_s16 = smov (!%p188_p3, %s806_s16), 1 }
   0xe   : > { %s947_s19 = smul.u32 112, %s1240_s16 }
   0xf   : > { %s948_s23 = smul.u32 44, %s1240_s16 }
  0x10   : > { %s1034_s24 = scalar_lea.vmem %s1234_s0, %s947_s19 }
  0x11   : > { %v858_v4 = vld [vmem:[%s1034_s24] sm:$0xff]   ;;  %v909_v5 = vld [vmem:[%s1034_s24 + $0x8] sm:$0xff]   ;;  %v910_v6 = vld [vmem:[%s1034_s24 + $0x10] sm:$0xff]   ;;  %s1207_s26 = scalar_lea.vmem %s1238_s4, %s948_s23 }
  0x12   : > { %v859_v7 = vunpack.c.l.bf16 %v858_v4  ;;  %v860_v8 = vunpack.c.h.bf16 %v858_v4  ;;  %v863_v9 = vunpack.c.l.bf16 %v909_v5  ;;  %v864_v10 = vunpack.c.h.bf16 %v909_v5  ;;  %v911_v11 = vld [vmem:[%s1034_s24 + $0x18] sm:$0xff]   ;;  %v912_v12 = vld [vmem:[%s1034_s24 + $0x20] sm:$0xff]   ;;  %v913_v42 = vld [vmem:[%s1034_s24 + $0x28] sm:$0xff]  }
  0x13   : > { %v867_v14 = vunpack.c.l.bf16 %v910_v6  ;;  %v868_v15 = vunpack.c.h.bf16 %v910_v6  ;;  %v871_v16 = vunpack.c.l.bf16 %v911_v11  ;;  %v872_v17 = vunpack.c.h.bf16 %v911_v11  ;;  %v914_v5 = vld [vmem:[%s1034_s24 + $0x30] sm:$0xff]  }
  0x14   : > { %v274_v18 = vmul.f32 %v859_v7, %v1039_v3  ;;  %v275_v19 = vmul.f32 %v860_v8, %v1039_v3  ;;  %v276_v20 = vmul.f32 %v863_v9, %v1039_v3  ;;  %v277_v21 = vmul.f32 %v864_v10, %v1039_v3 }
  0x15   : > { %v278_v22 = vmul.f32 %v867_v14, %v1039_v3  ;;  %v279_v23 = vmul.f32 %v868_v15, %v1039_v3  ;;  %v280_v24 = vmul.f32 %v871_v16, %v1039_v3  ;;  %v875_v25 = vunpack.c.l.bf16 %v912_v12 }
  0x16   : > { %v308_v26 = vadd.f32 %v1050_v13, %v274_v18  ;;  %v309_v27 = vadd.f32 %v1050_v13, %v275_v19  ;;  %v310_v28 = vadd.f32 %v1050_v13, %v276_v20  ;;  %v311_v29 = vadd.f32 %v1050_v13, %v277_v21  ;;  %v915_v19 = vld [vmem:[%s1034_s24 + $0x38] sm:$0xff]  }
  0x17   : > { %v312_v30 = vadd.f32 %v1050_v13, %v278_v22  ;;  %v313_v31 = vadd.f32 %v1050_v13, %v279_v23  ;;  %v314_v32 = vadd.f32 %v1050_v13, %v280_v24  ;;  %v281_v33 = vmul.f32 %v872_v17, %v1039_v3 }
  0x18   : > { %v336_v34 = vmax.f32 %v308_v26, 0.0  ;;  %v337_v35 = vmax.f32 %v309_v27, 0.0  ;;  %v338_v36 = vmax.f32 %v310_v28, 0.0  ;;  %v339_v37 = vmax.f32 %v311_v29, 0.0 }
  0x19   : > { %v340_v38 = vmax.f32 %v312_v30, 0.0  ;;  %v341_v39 = vmax.f32 %v313_v31, 0.0  ;;  %v342_v40 = vmax.f32 %v314_v32, 0.0  ;;  %v282_v41 = vmul.f32 %v875_v25, %v1039_v3  ;;  %v916_v32 = vld [vmem:[%s1034_s24 + $0x40] sm:$0xff]  }
  0x1a   : > { %v364_v43 = vmax.f32 %v336_v34, %v338_v36  ;;  %v365_v44 = vmax.f32 %v337_v35, %v339_v37  ;;  %v315_v45 = vadd.f32 %v1050_v13, %v281_v33  ;;  %v876_v46 = vunpack.c.h.bf16 %v912_v12 }
  0x1b   : > { %v366_v47 = vmax.f32 %v338_v36, %v340_v38  ;;  %v367_v48 = vmax.f32 %v339_v37, %v341_v39  ;;  %v368_v49 = vmax.f32 %v340_v38, %v342_v40  ;;  %v316_v50 = vadd.f32 %v1050_v13, %v282_v41 }
  0x1c   : > { %v417_v51 = vrot.slane %v364_v43, 1  ;;  %v418_v52 = vrot.slane %v365_v44, 1  ;;  %v343_v53 = vmax.f32 %v315_v45, 0.0  ;;  %v879_v54 = vunpack.c.l.bf16 %v913_v42 }
  0x1d   : > { %v420_v55 = vrot.slane %v366_v47, 1  ;;  %v422_v56 = vrot.slane %v367_v48, 1  ;;  %v424_v57 = vrot.slane %v368_v49, 1  ;;  %v344_v58 = vmax.f32 %v316_v50, 0.0 }
  0x1e   : > { %v419_v59 = vsel %vm416_vm1, %v417_v51, %v418_v52  ;;  %v369_v60 = vmax.f32 %v341_v39, %v343_v53  ;;  %v283_v61 = vmul.f32 %v876_v46, %v1039_v3  ;;  %v284_v62 = vmul.f32 %v879_v54, %v1039_v3 }
  0x1f   : > { %v421_v63 = vsel %vm416_vm1, %v418_v52, %v420_v55  ;;  %v494_v1 = vmax.f32 %v364_v43, %v419_v59  ;;  %v423_v2 = vsel %vm416_vm1, %v420_v55, %v422_v56  ;;  %v425_v4 = vsel %vm416_vm1, %v422_v56, %v424_v57 }
  0x20   : > { %v495_v6 = vmax.f32 %v365_v44, %v421_v63  ;;  %v496_v7 = vmax.f32 %v366_v47, %v423_v2  ;;  %v497_v8 = vmax.f32 %v367_v48, %v425_v4  ;;  %v370_v9 = vmax.f32 %v342_v40, %v344_v58 }
  0x21   : > { %v426_v10 = vrot.slane %v369_v60, 1  ;;  %v317_v11 = vadd.f32 %v1050_v13, %v283_v61  ;;  %v318_v12 = vadd.f32 %v1050_v13, %v284_v62  ;;  %v880_v14 = vunpack.c.h.bf16 %v913_v42 }
  0x22   : > { %v520_v15 = vpack.c.bf16 %v495_v6, %v494_v1  ;;  %v521_v16 = vpack.c.bf16 %v497_v8, %v496_v7  ;;  %v428_v17 = vrot.slane %v370_v9, 1  ;;  %v883_v18 = vunpack.c.l.bf16 %v914_v5  ;;  %v918_v8 = vld [vmem:[%s1034_s24 + $0x50] sm:$0xff]  }
  0x23   : > { %v427_v20 = vsel %vm416_vm1, %v424_v57, %v426_v10  ;;  %v345_v21 = vmax.f32 %v317_v11, 0.0  ;;  %v346_v22 = vmax.f32 %v318_v12, 0.0  ;;  %v285_v23 = vmul.f32 %v880_v14, %v1039_v3 }
  0x24   : > { %610 = vmatpush1.bf16.msra.mxu0 %v520_v15  ;;  %934 = vmatpush1.bf16.msra.mxu1 %v520_v15  ;;  %v429_v24 = vsel %vm416_vm1, %v426_v10, %v428_v17  ;;  %v498_v25 = vmax.f32 %v368_v49, %v427_v20  ;;  %v286_v26 = vmul.f32 %v883_v18, %v1039_v3  ;;  %v884_v27 = vunpack.c.h.bf16 %v914_v5  ;;  %v917_v49 = vld [vmem:[%s1034_s24 + $0x48] sm:$0xff]  }
  0x25   : > { %611 = vmatprep.subr.bf16.mxu0 %v984_v0  ;;  %922 = vmatprep.subr.bf16.mxu1 %v984_v0  ;;  %v499_v28 = vmax.f32 %v369_v60, %v429_v24  ;;  %v371_v29 = vmax.f32 %v343_v53, %v345_v21  ;;  %v372_v30 = vmax.f32 %v344_v58, %v346_v22  ;;  %v887_v31 = vunpack.c.l.bf16 %v915_v19 }
  0x26   : > { %v319_v33 = vadd.f32 %v1050_v13, %v285_v23  ;;  %v320_v34 = vadd.f32 %v1050_v13, %v286_v26  ;;  %v287_v35 = vmul.f32 %v884_v27, %v1039_v3  ;;  %v888_v36 = vunpack.c.h.bf16 %v915_v19 }
  0x27   : > { %v522_v37 = vpack.c.bf16 %v499_v28, %v498_v25  ;;  %v430_v38 = vrot.slane %v371_v29, 1  ;;  %v432_v39 = vrot.slane %v372_v30, 1  ;;  %v288_v40 = vmul.f32 %v887_v31, %v1039_v3 }
  0x28   : > { %612 = vmatpush1.bf16.msra.mxu0 %v521_v16  ;;  %935 = vmatpush1.bf16.msra.mxu1 %v521_v16  ;;  %v347_v41 = vmax.f32 %v319_v33, 0.0  ;;  %v348_v42 = vmax.f32 %v320_v34, 0.0  ;;  %v321_v43 = vadd.f32 %v1050_v13, %v287_v35  ;;  %v891_v44 = vunpack.c.l.bf16 %v916_v32 }
  0x29   : > { %613 = vmatprep.subr.bf16.mxu0 %v984_v0  ;;  %923 = vmatprep.subr.bf16.mxu1 %v984_v0  ;;  %v431_v45 = vsel %vm416_vm1, %v428_v17, %v430_v38  ;;  %v433_v46 = vsel %vm416_vm1, %v430_v38, %v432_v39  ;;  %v322_v47 = vadd.f32 %v1050_v13, %v288_v40  ;;  %v892_v48 = vunpack.c.h.bf16 %v916_v32 }
  0x2a   : > { %v500_v50 = vmax.f32 %v370_v9, %v431_v45  ;;  %v501_v51 = vmax.f32 %v371_v29, %v433_v46  ;;  %v373_v52 = vmax.f32 %v345_v21, %v347_v41  ;;  %v374_v53 = vmax.f32 %v346_v22, %v348_v42 }
  0x2b   : > { %v349_v54 = vmax.f32 %v321_v43, 0.0  ;;  %v350_v55 = vmax.f32 %v322_v47, 0.0  ;;  %v289_v56 = vmul.f32 %v888_v36, %v1039_v3  ;;  %v290_v57 = vmul.f32 %v891_v44, %v1039_v3 }
  0x2c   : > { %614 = vmatpush1.bf16.msra.mxu0 %v522_v37  ;;  %936 = vmatpush1.bf16.msra.mxu1 %v522_v37  ;;  %v523_v58 = vpack.c.bf16 %v501_v51, %v500_v50  ;;  %v434_v59 = vrot.slane %v373_v52, 1  ;;  %v436_v60 = vrot.slane %v374_v53, 1  ;;  %v895_v61 = vunpack.c.l.bf16 %v917_v49  ;;  %v920_v51 = vld [vmem:[%s1034_s24 + $0x60] sm:$0xff]  }
  0x2d   : > { %615 = vmatprep.subr.bf16.mxu0 %v984_v0  ;;  %924 = vmatprep.subr.bf16.mxu1 %v984_v0  ;;  %v375_v62 = vmax.f32 %v347_v41, %v349_v54  ;;  %v1103_v63 = vmax.f32 %v348_v42, %v350_v55  ;;  %v323_v1 = vadd.f32 %v1050_v13, %v289_v56  ;;  %v896_v2 = vunpack.c.h.bf16 %v917_v49 }
  0x2e   : > { %v435_v4 = vsel %vm416_vm1, %v432_v39, %v434_v59  ;;  %v437_v5 = vsel %vm416_vm1, %v434_v59, %v436_v60  ;;  %v324_v6 = vadd.f32 %v1050_v13, %v290_v57  ;;  %v291_v7 = vmul.f32 %v892_v48, %v1039_v3 }
  0x2f   : > { %v502_v9 = vmax.f32 %v372_v30, %v435_v4  ;;  %v503_v10 = vmax.f32 %v373_v52, %v437_v5  ;;  %v438_v11 = vrot.slane %v375_v62, 1  ;;  %v440_v12 = vrot.slane %v1103_v63, 1  ;;  %v919_v30 = vld [vmem:[%s1034_s24 + $0x58] sm:$0xff]  }
  0x30   : > { %616 = vmatpush1.bf16.msra.mxu0 %v523_v58  ;;  %937 = vmatpush1.bf16.msra.mxu1 %v523_v58  ;;  %v351_v14 = vmax.f32 %v323_v1, 0.0  ;;  %v352_v15 = vmax.f32 %v324_v6, 0.0  ;;  %v292_v16 = vmul.f32 %v895_v61, %v1039_v3  ;;  %v325_v17 = vadd.f32 %v1050_v13, %v291_v7 }
  0x31   : > { %617 = vmatprep.subr.bf16.mxu0 %v984_v0  ;;  %925 = vmatprep.subr.bf16.mxu1 %v984_v0  ;;  %v524_v18 = vpack.c.bf16 %v503_v10, %v502_v9  ;;  %v439_v19 = vsel %vm416_vm1, %v436_v60, %v438_v11  ;;  %v441_v20 = vsel %vm416_vm1, %v438_v11, %v440_v12  ;;  %v899_v21 = vunpack.c.l.bf16 %v918_v8  ;;  %v238_v10 = vld [vmem:[%s1034_s24 + $0x68] sm:$0xf] }
  0x32   : > { %v504_v22 = vmax.f32 %v374_v53, %v439_v19  ;;  %v505_v23 = vmax.f32 %v375_v62, %v441_v20  ;;  %v377_v24 = vmax.f32 %v349_v54, %v351_v14  ;;  %v378_v25 = vmax.f32 %v350_v55, %v352_v15 }
  0x33   : > { %v326_v26 = vadd.f32 %v1050_v13, %v292_v16  ;;  %v353_v27 = vmax.f32 %v325_v17, 0.0  ;;  %v293_v28 = vmul.f32 %v896_v2, %v1039_v3  ;;  %v294_v29 = vmul.f32 %v899_v21, %v1039_v3  ;;  %v239_v16 = vld [vmem:[%s1034_s24 + $0x6c] sm:$0x7] }
  0x34   : > { %618 = vmatpush1.bf16.msra.mxu0 %v524_v18  ;;  %938 = vmatpush1.bf16.msra.mxu1 %v524_v18  ;;  %v525_v31 = vpack.c.bf16 %v505_v23, %v504_v22  ;;  %v442_v32 = vrot.slane %v377_v24, 1  ;;  %v444_v33 = vrot.slane %v378_v25, 1  ;;  %v900_v34 = vunpack.c.h.bf16 %v918_v8 }
  0x35   : > { %619 = vmatprep.subr.bf16.mxu0 %v984_v0  ;;  %926 = vmatprep.subr.bf16.mxu1 %v984_v0  ;;  %v354_v35 = vmax.f32 %v326_v26, 0.0  ;;  %v379_v36 = vmax.f32 %v351_v14, %v353_v27  ;;  %v327_v37 = vadd.f32 %v1050_v13, %v293_v28  ;;  %v328_v38 = vadd.f32 %v1050_v13, %v294_v29 }
  0x36   : > { %v443_v39 = vsel %vm416_vm1, %v440_v12, %v442_v32  ;;  %v445_v40 = vsel %vm416_vm1, %v442_v32, %v444_v33  ;;  %v903_v41 = vunpack.c.l.bf16 %v919_v30  ;;  %v295_v42 = vmul.f32 %v900_v34, %v1039_v3 }
  0x37   : > { %v506_v43 = vmax.f32 %v1103_v63, %v443_v39  ;;  %v507_v44 = vmax.f32 %v377_v24, %v445_v40  ;;  %v380_v45 = vmax.f32 %v352_v15, %v354_v35  ;;  %v446_v46 = vrot.slane %v379_v36, 1 }
  0x38   : > { %620 = vmatpush1.bf16.msra.mxu0 %v525_v31  ;;  %939 = vmatpush1.bf16.msra.mxu1 %v525_v31  ;;  %v355_v47 = vmax.f32 %v327_v37, 0.0  ;;  %v356_v48 = vmax.f32 %v328_v38, 0.0  ;;  %v296_v49 = vmul.f32 %v903_v41, %v1039_v3  ;;  %v329_v50 = vadd.f32 %v1050_v13, %v295_v42 }
  0x39   : > { %621 = vmatprep.subr.bf16.mxu0 %v984_v0  ;;  %927 = vmatprep.subr.bf16.mxu1 %v984_v0  ;;  %v526_v52 = vpack.c.bf16 %v507_v44, %v506_v43  ;;  %v447_v53 = vsel %vm416_vm1, %v444_v33, %v446_v46  ;;  %v448_v54 = vrot.slane %v380_v45, 1  ;;  %v904_v55 = vunpack.c.h.bf16 %v919_v30 }
  0x3a   : > { %v508_v56 = vmax.f32 %v378_v25, %v447_v53  ;;  %v381_v57 = vmax.f32 %v353_v27, %v355_v47  ;;  %v382_v58 = vmax.f32 %v354_v35, %v356_v48  ;;  %v330_v59 = vadd.f32 %v1050_v13, %v296_v49 }
  0x3b   : > { %v449_v60 = vsel %vm416_vm1, %v446_v46, %v448_v54  ;;  %v357_v61 = vmax.f32 %v329_v50, 0.0  ;;  %v907_v62 = vunpack.c.l.bf16 %v920_v51  ;;  %v297_v63 = vmul.f32 %v904_v55, %v1039_v3 }
  0x3c   : > { %622 = vmatpush1.bf16.msra.mxu0 %v526_v52  ;;  %940 = vmatpush1.bf16.msra.mxu1 %v526_v52  ;;  %v509_v1 = vmax.f32 %v379_v36, %v449_v60  ;;  %v450_v2 = vrot.slane %v381_v57, 1  ;;  %v452_v4 = vrot.slane %v382_v58, 1  ;;  %v358_v5 = vmax.f32 %v330_v59, 0.0 }
  0x3d   : > { %623 = vmatprep.subr.bf16.mxu0 %v984_v0  ;;  %928 = vmatprep.subr.bf16.mxu1 %v984_v0  ;;  %v383_v6 = vmax.f32 %v355_v47, %v357_v61  ;;  %v298_v7 = vmul.f32 %v907_v62, %v1039_v3  ;;  %v331_v8 = vadd.f32 %v1050_v13, %v297_v63  ;;  %v908_v9 = vunpack.c.h.bf16 %v920_v51 }
  0x3e   : > { %v527_v11 = vpack.c.bf16 %v509_v1, %v508_v56  ;;  %v451_v12 = vsel %vm416_vm1, %v448_v54, %v450_v2  ;;  %v453_v14 = vsel %vm416_vm1, %v450_v2, %v452_v4  ;;  %v384_v15 = vmax.f32 %v356_v48, %v358_v5 }
  0x3f   : > { %v510_v17 = vmax.f32 %v380_v45, %v451_v12  ;;  %v511_v18 = vmax.f32 %v381_v57, %v453_v14  ;;  %v454_v19 = vrot.slane %v383_v6, 1  ;;  %v332_v20 = vadd.f32 %v1050_v13, %v298_v7  ;;  %v965_v7 = vld [vmem:[%s1237_s3 + $0x14] ss:$8 sps:$4 sm:$0xff]   ;;  %v974_v14 = vld [vmem:[%s1237_s3 + $0x20] ss:$8 sps:$4 sm:$0xff]  }
  0x40   : > { %624 = vmatpush1.bf16.msra.mxu0 %v527_v11  ;;  %941 = vmatpush1.bf16.msra.mxu1 %v527_v11  ;;  %v456_v21 = vrot.slane %v384_v15, 1  ;;  %v359_v22 = vmax.f32 %v331_v8, 0.0  ;;  %v266_v23 = vunpack.c.l.bf16 %v238_v10  ;;  %v299_v24 = vmul.f32 %v908_v9, %v1039_v3  ;;  %v967_v8 = vld [vmem:[%s1237_s3 + $0x44] ss:$8 sps:$4 sm:$0xff]   ;;  %v969_v9 = vld [vmem:[%s1237_s3 + $0x10] ss:$8 sps:$4 sm:$0xff]  }
  0x41   : > { %625 = vmatprep.subr.bf16.mxu0 %v984_v0  ;;  %929 = vmatprep.subr.bf16.mxu1 %v984_v0  ;;  %v528_v25 = vpack.c.bf16 %v511_v18, %v510_v17  ;;  %v455_v26 = vsel %vm416_vm1, %v452_v4, %v454_v19  ;;  %v360_v27 = vmax.f32 %v332_v20, 0.0  ;;  %v267_v28 = vunpack.c.l.bf16 %v239_v16  ;;  %v970_v10 = vld [vmem:[%s1237_s3 + $0x40] ss:$8 sps:$4 sm:$0xff]   ;;  %v971_v11 = vld [vmem:[%s1237_s3 + $0x24] ss:$8 sps:$4 sm:$0xff]  }
  0x42   : > { %v457_v29 = vsel %vm416_vm1, %v454_v19, %v456_v21  ;;  %v512_v30 = vmax.f32 %v382_v58, %v455_v26  ;;  %v385_v31 = vmax.f32 %v357_v61, %v359_v22  ;;  %v300_v32 = vmul.f32 %v1039_v3, %v266_v23 }
  0x43   : > { %v513_v33 = vmax.f32 %v383_v6, %v457_v29  ;;  %v386_v34 = vmax.f32 %v358_v5, %v360_v27  ;;  %v333_v35 = vadd.f32 %v1050_v13, %v299_v24  ;;  %v301_v36 = vmul.f32 %v1039_v3, %v267_v28  ;;  %v959_v5 = vld [vmem:[%s1237_s3] ss:$8 sps:$4 sm:$0xff]   ;;  %v962_v6 = vld [vmem:[%s1237_s3 + $0x30] ss:$8 sps:$4 sm:$0xff]  }
  0x44   : > { %626 = vmatpush1.bf16.msra.mxu0 %v528_v25  ;;  %942 = vmatpush1.bf16.msra.mxu1 %v528_v25  ;;  %v458_v37 = vrot.slane %v385_v31, 1  ;;  %v334_v38 = vadd.f32 %v1050_v13, %v300_v32  ;;  %v985_v57 = vmov 65535  }
  0x45   : > { %627 = vmatprep.subr.bf16.mxu0 %v984_v0  ;;  %930 = vmatprep.subr.bf16.mxu1 %v984_v0  ;;  %v529_v39 = vpack.c.bf16 %v513_v33, %v512_v30  ;;  %v460_v40 = vrot.slane %v386_v34, 1  ;;  %v361_v41 = vmax.f32 %v333_v35, 0.0  ;;  %v335_v42 = vadd.f32 %v1050_v13, %v301_v36 }
  0x46   : > { %v459_v43 = vsel %vm416_vm1, %v456_v21, %v458_v37  ;;  %v362_v44 = vmax.f32 %v334_v38, 0.0  ;;  %v604_v58 = vsel %vm603_vm2, 4294967295, %v985_v57 }
  0x47   : > { %v461_v45 = vsel %vm416_vm1, %v458_v37, %v460_v40  ;;  %v514_v3 = vmax.f32 %v384_v15, %v459_v43  ;;  %v387_v46 = vmax.f32 %v359_v22, %v361_v41  ;;  %v363_v47 = vmax.f32 %v335_v42, 0.0  ;;  %v748_v42 = vld [vmem:[%s1207_s26 + $0x28] sm:$0x1] }
  0x48   : > { %628 = vmatpush1.bf16.msra.mxu0 %v529_v39  ;;  %943 = vmatpush1.bf16.msra.mxu1 %v529_v39  ;;  %v515_v48 = vmax.f32 %v385_v31, %v461_v45  ;;  %v388_v49 = vmax.f32 %v360_v27, %v362_v44  ;;  %v605_v1 = vsel %vm416_vm1, %v604_v58, 0 }
  0x49   : > { %629 = vmatprep.subr.bf16.mxu0 %v984_v0  ;;  %931 = vmatprep.subr.bf16.mxu1 %v984_v0  ;;  %v462_v50 = vrot.slane %v387_v46, 1  ;;  %v389_v51 = vmax.f32 %v361_v41, %v363_v47 }
  0x4a   : > { %v530_v13 = vpack.c.bf16 %v515_v48, %v514_v3  ;;  %v464_v52 = vrot.slane %v388_v49, 1 }
  0x4b   : > { %v463_v53 = vsel %vm416_vm1, %v460_v40, %v462_v50  ;;  %v466_v54 = vrot.slane %v389_v51, 1 }
  0x4c   : > { %630 = vmatpush1.bf16.msra.mxu0 %v530_v13  ;;  %944 = vmatpush1.bf16.msra.mxu1 %v530_v13  ;;  %v465_v55 = vsel %vm416_vm1, %v462_v50, %v464_v52  ;;  %v516_v56 = vmax.f32 %v386_v34, %v463_v53 }
  0x4d   : > { %631 = vmatprep.subr.bf16.mxu0 %v984_v0  ;;  %932 = vmatprep.subr.bf16.mxu1 %v984_v0  ;;  %v517_v59 = vmax.f32 %v387_v46, %v465_v55  ;;  %v467_v60 = vsel %vm416_vm1, %v464_v52, %v466_v54  ;;  %v519_v61 = vmax.f32 %v389_v51, %v466_v54 }
  0x4e   : > { %v518_v62 = vmax.f32 %v388_v49, %v467_v60 }
  0x4f   : > { %v531_v63 = vpack.c.bf16 %v517_v59, %v516_v56 }
  0x50   : > { %v532_v2 = vpack.c.bf16 %v519_v61, %v518_v62 }
  0x51   : > { %632 = vmatpush1.bf16.msra.mxu0 %v531_v63  ;;  %945 = vmatpush1.bf16.msra.mxu1 %v531_v63 }
  0x52   : > { %633 = vmatprep.subr.bf16.mxu0 %v984_v0  ;;  %933 = vmatprep.subr.bf16.mxu1 %v984_v0  ;;  %v607_v4 = vand.u32 %v605_v1, %v532_v2  ;;  %v209_v0 = vld [vmem:[%s1237_s3 + $0x50] sm:$0x11] }
  0x53   : > { %v826_v12 = vcombine.high %v209_v0, %v209_v0  ;;  %v825_v15 = vcombine.low %v209_v0, %v209_v0 }
  0x55   : > { %634 = vmatpush1.bf16.msra.mxu0 %v607_v4  ;;  %946 = vmatpush1.bf16.msra.mxu1 %v607_v4 }
  0x58   : > { %642 = vmatmul.mubr.bf16.vlgmr.msra.gmra.mrb[0].mxu0 %v959_v5  ;;  %666 = vmatmul.mubr.bf16.vlgmr.msra.gmra.mrb[0].mxu1 %v962_v6 }
  0x59   : > { %828 = vmatprep.mubr.msk.bf16.mxu0 %vm584_vm0, %v965_v7  ;;  %831 = vmatprep.mubr.msk.bf16.mxu1 %vm584_vm0, %v967_v8 }
  0x60   : > { %650 = vmatmul.mubr.bf16.gmra.mrb[4].mxu0 %v969_v9  ;;  %674 = vmatmul.mubr.bf16.gmra.mrb[4].mxu1 %v970_v10 }
  0x61   : > { %829 = vmatprep.mubr.msk.bf16.mxu0 %vm584_vm0, %v971_v11  ;;  %832 = vmatprep.mubr.msk.bf16.mxu1 %vm584_vm0, %v826_v12 }
  0x68   : > { %658 = vmatmul.mubr.bf16.gmra.mrb[8].mxu0 %v974_v14  ;;  %682 = vmatmul.mubr.bf16.gmra.mrb[8].mxu1 %v825_v15 }
 0x12b   : > { %v643_v16 = vpop.f32.mrb[0].mxu0  ;;  %v667_v17 = vpop.f32.mrb[0].mxu1 }
 0x12c   : > { %v846_v18 = vpack.c.bf16 %v643_v16, %v643_v16  ;;  %v852_v19 = vpack.c.bf16 %v667_v17, %v667_v17  ;;  %v645_v20 = vpop.f32.mrb[1].mxu0  ;;  %v669_v21 = vpop.f32.mrb[1].mxu1 }
 0x12d   : > { %v646_v22 = vpop.f32.mrb[2].mxu0  ;;  %v670_v23 = vpop.f32.mrb[2].mxu1 }
 0x12e   : > { %735 = vst.msk [vmem:[%s1207_s26] sm:$0xf] %vm734_vm3, %v846_v18  ;;  %741 = vst.msk [vmem:[%s1207_s26 + $0x18] sm:$0xf] %vm734_vm3, %v852_v19  ;;  %v847_v24 = vpack.c.bf16 %v646_v22, %v646_v22  ;;  %v853_v25 = vpack.c.bf16 %v670_v23, %v670_v23  ;;  %v648_v26 = vpop.f32.mrb[3].mxu0  ;;  %v672_v27 = vpop.f32.mrb[3].mxu1 }
 0x130   : > { %736 = vst.msk [vmem:[%s1207_s26 + $0x4] sm:$0xf] %vm734_vm3, %v847_v24  ;;  %742 = vst.msk [vmem:[%s1207_s26 + $0x1c] sm:$0xf] %vm734_vm3, %v853_v25 }
 0x133   : > { %v651_v28 = vpop.f32.mrb[4].mxu0  ;;  %v675_v29 = vpop.f32.mrb[4].mxu1 }
 0x134   : > { %v848_v30 = vpack.c.bf16 %v651_v28, %v651_v28  ;;  %v854_v31 = vpack.c.bf16 %v675_v29, %v675_v29  ;;  %v653_v32 = vpop.f32.mrb[5].mxu0  ;;  %v677_v33 = vpop.f32.mrb[5].mxu1 }
 0x135   : > { %v654_v34 = vpop.f32.mrb[6].mxu0  ;;  %v678_v35 = vpop.f32.mrb[6].mxu1 }
 0x136   : > { %737 = vst.msk [vmem:[%s1207_s26 + $0x8] sm:$0xf] %vm734_vm3, %v848_v30  ;;  %743 = vst.msk [vmem:[%s1207_s26 + $0x20] sm:$0xf] %vm734_vm3, %v854_v31  ;;  %v849_v36 = vpack.c.bf16 %v654_v34, %v654_v34  ;;  %v855_v37 = vpack.c.bf16 %v678_v35, %v678_v35  ;;  %v656_v38 = vpop.f32.mrb[7].mxu0  ;;  %v680_v39 = vpop.f32.mrb[7].mxu1 }
 0x138   : > { %738 = vst.msk [vmem:[%s1207_s26 + $0xc] sm:$0xf] %vm734_vm3, %v849_v36  ;;  %744 = vst.msk [vmem:[%s1207_s26 + $0x24] sm:$0xf] %vm734_vm3, %v855_v37 }
 0x13b   : > { %v659_v40 = vpop.f32.mrb[8].mxu0  ;;  %v683_v41 = vpop.f32.mrb[8].mxu1 }
 0x13c   : > { %v850_v43 = vpack.c.bf16 %v659_v40, %v659_v40  ;;  %v856_v44 = vpack.c.bf16 %v683_v41, %v683_v41  ;;  %v661_v45 = vpop.f32.mrb[9].mxu0  ;;  %v685_v3 = vpop.f32.mrb[9].mxu1 }
 0x13d   : > { %v662_v46 = vpop.f32.mrb[10].mxu0  ;;  %v686_v47 = vpop.f32.mrb[10].mxu1 }
 0x13e   : > { %739 = vst.msk [vmem:[%s1207_s26 + $0x10] sm:$0xf] %vm734_vm3, %v850_v43  ;;  %v749_v48 = vsel %vm747_vm6, %v856_v44, %v748_v42  ;;  %v851_v49 = vpack.c.bf16 %v662_v46, %v662_v46  ;;  %v664_v50 = vpop.f32.mrb[11].mxu0  ;;  %v687_v51 = vpop.f32.mrb[11].mxu1 }
 0x13f   : > { %750 = vst [vmem:[%s1207_s26 + $0x28] sm:$0x1] %v749_v48 }
 0x140   : > { %740 = vst.msk [vmem:[%s1207_s26 + $0x14] sm:$0xf] %vm734_vm3, %v851_v49 }
 0x141 PF: > { %s14_s15 = sadd.s32 1, %s982_s15  }
 0x142   : > { %p11_p4 = scmp.ge.s32.totalorder %s14_s15, 4  }
 0x144   :  { %13 = sbr.rel (!%p11_p4) target bundleno = 1 (0x1), region = 66 }

// kernel: _lambda_.8
= control target key start
LH: loop header
LB: loop body
LE: loop exit
PB: predicated region body
PF: predicated region fallthrough
CT: control target
= control target key end

     0   :  { %s3856_s18 = smov 0   ;;  %s5466_s0 = inlined_call_operand.vmem [shape: bf16[2,838,9], index: 0, kind: input, shape index: {}]   ;;  %s5467_s1 = inlined_call_operand.vmem [shape: bf16[9,64], index: 1, kind: input, shape index: {}]   ;;  %s5468_s2 = inlined_call_operand.vmem [shape: f32[838,1], index: 2, kind: input, shape index: {}]   ;;  %s5469_s3 = inlined_call_operand.vmem [shape: bf16[2,838,64], index: 3, kind: output, shape index: {0}]   ;;  %s5470_s4 = inlined_call_operand.vmem [shape: f32[2,1,64], index: 4, kind: output, shape index: {1}]   ;;  %s5471_s5 = inlined_call_operand.vmem [shape: f32[2,1,64], index: 5, kind: output, shape index: {2}]  }
   0x1 LB: > { %s3149_s19 = sadd.s32 4294967295, %s3820_s18   ;;  %p3153_p0 = scmp.ge.s32.totalorder %s3820_s18, 1  ;;  %s3820_s18 = sphi %s3856_s18, %s16_s18  }
   0x2   : > { %p192_p1 = scmp.lt.s32.totalorder %s3820_s18, 3 }
   0x4   : > { %p193_p2 = pnand %p3153_p0, %p192_p1 }
   0x6   : > { %196 = sbr.rel (%p193_p2) target bundleno = 568 (0x238), region = 32 }
   0xd   : > { %v247_v0 = vld [vmem:[%s5468_s2 + $0x10] sm:$0xff]  ;;  %v245_v1 = vld [vmem:[%s5468_s2] sm:$0xff]  ;;  %vm883_vm0 = vcmask 1043456   ;;  %v3822_v2 = vmov 0   ;;  %vm884_vm1 = vcmask 1044480   ;;  %v3823_v4 = vmov 0.0  }
   0xe   : > { %3759 = vset.pattern.permute.xlu1 %v3822_v2  ;;  %3758 = vset.pattern.permute.xlu0 %v3822_v2  ;;  %v3760_v3 = vld [vmem:[%s5467_s1] sm:$0x1f]   ;;  %v248_v5 = vld [vmem:[%s5468_s2 + $0x18] sm:$0xff]  ;;  %v246_v6 = vld [vmem:[%s5468_s2 + $0x8] sm:$0xff]  ;;  %v3824_v7 = vmov 65535   ;;  %p226_p3 = scmp.lt.s32.totalorder %s3149_s19, 1 }
   0xf   : > { %1358 = vperm.xlu1 %3759, %v247_v0   ;;  %1348 = vperm.xlu0 %3758, %v245_v1   ;;  %v885_v8 = vsel %vm883_vm0, 4294967295, %v3824_v7  ;;  %vm3825_vm2 = vmmov 0   ;;  %v250_v11 = vld [vmem:[%s5468_s2 + $0x28] sm:$0xff]  ;;  %v249_v12 = vld [vmem:[%s5468_s2 + $0x20] sm:$0xff]  ;;  %vm723_vm3 = vcmask 72704   ;;  %v252_v13 = vld [vmem:[%s5468_s2 + $0x38] sm:$0xff] }
  0x10   : > { %3529 = vmatprep.subr.bf16.mxu0 %v3823_v4  ;;  %3743 = vmatprep.subr.bf16.mxu1 %v3823_v4  ;;  %v886_v9 = vsel %vm884_vm1, %v885_v8, 0  ;;  %s5635_s19 = smov (!%p226_p3, %s3149_s19), 1  ;;  %v251_v14 = vld [vmem:[%s5468_s2 + $0x30] sm:$0xff]  ;;  %v254_v17 = vld [vmem:[%s5468_s2 + $0x48] sm:$0xff]  ;;  %v253_v18 = vld [vmem:[%s5468_s2 + $0x40] sm:$0xff]  ;;  %vm2397_vm4 = vcmask 519168  }
  0x11   : > { %3531 = vmatprep.mubr.msk.bf16.mxu0 %vm3825_vm2, %v3823_v4  ;;  %3639 = vmatprep.mubr.msk.bf16.mxu1 %vm3825_vm2, %v3823_v4  ;;  %v888_v10 = vand.u32 %v3760_v3, %v886_v9  ;;  %s3745_s9 = smul.u32 420, %s5635_s19  ;;  %v256_v21 = vld [vmem:[%s5468_s2 + $0x58] sm:$0xff]  ;;  %v255_v22 = vld [vmem:[%s5468_s2 + $0x50] sm:$0xff]  ;;  %v258_v23 = vld [vmem:[%s5468_s2 + $0x68] sm:$0xff]  ;;  %vm2504_vm5 = vcmask 523264   ;;  %vm2502_vm6 = vcmask 518144   ;;  %s238_s27 = scalar_lea.vmem %s5470_s4, %s5635_s19 }
  0x12   : > { %v257_v24 = vld [vmem:[%s5468_s2 + $0x60] sm:$0xff]  ;;  %v260_v27 = vld [vmem:[%s5468_s2 + $0x78] sm:$0xff]  ;;  %v259_v28 = vld [vmem:[%s5468_s2 + $0x70] sm:$0xff]  ;;  %vm2712_vm7 = vcmask 521216   ;;  %vm3041_vm8 = vcmask 516096   ;;  %s241_s30 = scalar_lea.vmem %s5471_s5, %s5635_s19 }
  0x13   : > { %1363 = vperm.xlu1 %3759, %v248_v5   ;;  %1353 = vperm.xlu0 %3758, %v246_v6   ;;  %s3899_s12 = scalar_lea.vmem %s5466_s0, %s3745_s9  ;;  %v262_v29 = vld [vmem:[%s5468_s2 + $0x88] sm:$0xff]  ;;  %v261_v30 = vld [vmem:[%s5468_s2 + $0x80] sm:$0xff]  ;;  %v264_v33 = vld [vmem:[%s5468_s2 + $0x98] sm:$0xff] }
  0x14   : > { %3530 = vmatpush3.bf16.msra.mxu0 %v888_v10  ;;  %3744 = vmatpush3.bf16.msra.mxu1 %v888_v10  ;;  %v3761_v15 = vld [vmem:[%s3899_s12] sm:$0xff]   ;;  %v3762_v16 = vld [vmem:[%s3899_s12 + $0xd8] sm:$0xff]   ;;  %v3763_v19 = vld [vmem:[%s3899_s12 + $0x8] sm:$0xff]  }
  0x15   : > { %v3764_v20 = vld [vmem:[%s3899_s12 + $0xe0] sm:$0xff]   ;;  %v3765_v25 = vld [vmem:[%s3899_s12 + $0x10] sm:$0xff]   ;;  %v3766_v26 = vld [vmem:[%s3899_s12 + $0xe8] sm:$0xff]  }
  0x16   : > { %v3767_v31 = vld [vmem:[%s3899_s12 + $0x18] sm:$0xff]   ;;  %v3768_v32 = vld [vmem:[%s3899_s12 + $0xf0] sm:$0xff]   ;;  %v266_v35 = vld [vmem:[%s5468_s2 + $0xa8] sm:$0xff] }
  0x17   : > { %1373 = vperm.xlu1 %3759, %v250_v11   ;;  %1368 = vperm.xlu0 %3758, %v249_v12   ;;  %v263_v34 = vld [vmem:[%s5468_s2 + $0x90] sm:$0xff]  ;;  %v265_v36 = vld [vmem:[%s5468_s2 + $0xa0] sm:$0xff]  ;;  %v3770_v38 = vld [vmem:[%s3899_s12 + $0xf8] sm:$0xff]  }
  0x18   : > { %3532 = vmatmul.mubr.msk.bf16.vlgmr.msra.gmra.mrb[0].mxu0 %vm723_vm3, %v3761_v15  ;;  %3640 = vmatmul.mubr.msk.bf16.vlgmr.msra.gmra.mrb[0].mxu1 %vm723_vm3, %v3762_v16  ;;  %v3769_v37 = vld [vmem:[%s3899_s12 + $0x20] sm:$0xff]   ;;  %v268_v39 = vld [vmem:[%s5468_s2 + $0xb8] sm:$0xff]  ;;  %v267_v40 = vld [vmem:[%s5468_s2 + $0xb0] sm:$0xff] }
  0x19   : > { %3535 = vmatprep.mubr.msk.bf16.mxu0 %vm3825_vm2, %v3823_v4  ;;  %3643 = vmatprep.mubr.msk.bf16.mxu1 %vm3825_vm2, %v3823_v4  ;;  %v270_v41 = vld [vmem:[%s5468_s2 + $0xc8] sm:$0xff]  ;;  %v269_v42 = vld [vmem:[%s5468_s2 + $0xc0] sm:$0xff]  ;;  %v272_v45 = vld [vmem:[%s5468_s2 + $0xd8] sm:$0xff] }
  0x1a   : > { %v3771_v43 = vld [vmem:[%s3899_s12 + $0x28] sm:$0xff]   ;;  %v3772_v44 = vld [vmem:[%s3899_s12 + $0x100] sm:$0xff]   ;;  %v271_v46 = vld [vmem:[%s5468_s2 + $0xd0] sm:$0xff] }
  0x1b   : > { %1383 = vperm.xlu1 %3759, %v252_v13   ;;  %1378 = vperm.xlu0 %3758, %v251_v14   ;;  %v274_v47 = vld [vmem:[%s5468_s2 + $0xe8] sm:$0xff]  ;;  %v273_v48 = vld [vmem:[%s5468_s2 + $0xe0] sm:$0xff]  ;;  %v3773_v49 = vld [vmem:[%s3899_s12 + $0x30] sm:$0xff]  }
  0x1c   : > { %v3774_v50 = vld [vmem:[%s3899_s12 + $0x108] sm:$0xff]   ;;  %v276_v51 = vld [vmem:[%s5468_s2 + $0xf8] sm:$0xff]  ;;  %v275_v52 = vld [vmem:[%s5468_s2 + $0xf0] sm:$0xff] }
  0x1d   : > { %v278_v53 = vld [vmem:[%s5468_s2 + $0x108] sm:$0xff]  ;;  %v277_v54 = vld [vmem:[%s5468_s2 + $0x100] sm:$0xff]  ;;  %v3775_v55 = vld [vmem:[%s3899_s12 + $0x38] sm:$0xff]  }
  0x1e   : > { %v3776_v56 = vld [vmem:[%s3899_s12 + $0x110] sm:$0xff]   ;;  %v280_v57 = vld [vmem:[%s5468_s2 + $0x118] sm:$0xff]  ;;  %v282_v59 = vld [vmem:[%s5468_s2 + $0x128] sm:$0xff] }
  0x1f   : > { %1393 = vperm.xlu1 %3759, %v254_v17   ;;  %1388 = vperm.xlu0 %3758, %v253_v18   ;;  %v279_v58 = vld [vmem:[%s5468_s2 + $0x110] sm:$0xff]  ;;  %v281_v60 = vld [vmem:[%s5468_s2 + $0x120] sm:$0xff]  ;;  %v3778_v62 = vld [vmem:[%s3899_s12 + $0x118] sm:$0xff]  }
  0x20   : > { %3536 = vmatmul.mubr.msk.bf16.gmra.mrb[4].mxu0 %vm723_vm3, %v3763_v19  ;;  %3644 = vmatmul.mubr.msk.bf16.gmra.mrb[4].mxu1 %vm723_vm3, %v3764_v20  ;;  %v3777_v61 = vld [vmem:[%s3899_s12 + $0x40] sm:$0xff]   ;;  %v284_v63 = vld [vmem:[%s5468_s2 + $0x138] sm:$0xff]  ;;  %v283_v0 = vld [vmem:[%s5468_s2 + $0x130] sm:$0xff] }
  0x21   : > { %3539 = vmatprep.mubr.msk.bf16.mxu0 %vm3825_vm2, %v3823_v4  ;;  %3647 = vmatprep.mubr.msk.bf16.mxu1 %vm3825_vm2, %v3823_v4  ;;  %v286_v1 = vld [vmem:[%s5468_s2 + $0x148] sm:$0xff]  ;;  %v285_v2 = vld [vmem:[%s5468_s2 + $0x140] sm:$0xff]  ;;  %v288_v6 = vld [vmem:[%s5468_s2 + $0x158] sm:$0xff] }
  0x22   : > { %v3779_v3 = vld [vmem:[%s3899_s12 + $0x48] sm:$0xff]   ;;  %v3780_v5 = vld [vmem:[%s3899_s12 + $0x120] sm:$0xff]   ;;  %v287_v7 = vld [vmem:[%s5468_s2 + $0x150] sm:$0xff] }
  0x23   : > { %1403 = vperm.xlu1 %3759, %v256_v21   ;;  %1398 = vperm.xlu0 %3758, %v255_v22   ;;  %v290_v8 = vld [vmem:[%s5468_s2 + $0x168] sm:$0xff]  ;;  %v289_v9 = vld [vmem:[%s5468_s2 + $0x160] sm:$0xff]  ;;  %v3781_v10 = vld [vmem:[%s3899_s12 + $0x50] sm:$0xff]  }
  0x24   : > { %v3782_v11 = vld [vmem:[%s3899_s12 + $0x128] sm:$0xff]   ;;  %v292_v12 = vld [vmem:[%s5468_s2 + $0x178] sm:$0xff]  ;;  %v291_v13 = vld [vmem:[%s5468_s2 + $0x170] sm:$0xff] }
  0x25   : > { %v294_v14 = vld [vmem:[%s5468_s2 + $0x188] sm:$0xff]  ;;  %v293_v15 = vld [vmem:[%s5468_s2 + $0x180] sm:$0xff]  ;;  %v3783_v16 = vld [vmem:[%s3899_s12 + $0x58] sm:$0xff]  }
  0x26   : > { %v3784_v17 = vld [vmem:[%s3899_s12 + $0x130] sm:$0xff]   ;;  %v296_v18 = vld [vmem:[%s5468_s2 + $0x198] sm:$0xff]  ;;  %v298_v20 = vld [vmem:[%s5468_s2 + $0x1a8] sm:$0xff] }
  0x27   : > { %1413 = vperm.xlu1 %3759, %v258_v23   ;;  %1408 = vperm.xlu0 %3758, %v257_v24   ;;  %v295_v19 = vld [vmem:[%s5468_s2 + $0x190] sm:$0xff]  ;;  %v297_v21 = vld [vmem:[%s5468_s2 + $0x1a0] sm:$0xff]  ;;  %v3786_v23 = vld [vmem:[%s3899_s12 + $0x138] sm:$0xff]  }
  0x28   : > { %3540 = vmatmul.mubr.msk.bf16.gmra.mrb[8].mxu0 %vm723_vm3, %v3765_v25  ;;  %3648 = vmatmul.mubr.msk.bf16.gmra.mrb[8].mxu1 %vm723_vm3, %v3766_v26  ;;  %v3785_v22 = vld [vmem:[%s3899_s12 + $0x60] sm:$0xff]   ;;  %v300_v24 = vld [vmem:[%s5468_s2 + $0x1b8] sm:$0xff]  ;;  %v299_v25 = vld [vmem:[%s5468_s2 + $0x1b0] sm:$0xff] }
  0x29   : > { %3543 = vmatprep.mubr.msk.bf16.mxu0 %vm3825_vm2, %v3823_v4  ;;  %3651 = vmatprep.mubr.msk.bf16.mxu1 %vm3825_vm2, %v3823_v4  ;;  %v302_v26 = vld [vmem:[%s5468_s2 + $0x1c8] sm:$0xff] }
  0x2b   : > { %1423 = vperm.xlu1 %3759, %v260_v27   ;;  %1418 = vperm.xlu0 %3758, %v259_v28   ;;  %v301_v27 = vld [vmem:[%s5468_s2 + $0x1c0] sm:$0xff]  ;;  %v3787_v28 = vld [vmem:[%s3899_s12 + $0x68] sm:$0xff]  }
  0x2f   : > { %1433 = vperm.xlu1 %3759, %v262_v29   ;;  %1428 = vperm.xlu0 %3758, %v261_v30   ;;  %v3788_v29 = vld [vmem:[%s3899_s12 + $0x140] sm:$0xff]   ;;  %v304_v30 = vld [vmem:[%s5468_s2 + $0x1d8] sm:$0xff] }
  0x30   : > { %3544 = vmatmul.mubr.msk.bf16.gmra.mrb[12].mxu0 %vm723_vm3, %v3767_v31  ;;  %3652 = vmatmul.mubr.msk.bf16.gmra.mrb[12].mxu1 %vm723_vm3, %v3768_v32  ;;  %v303_v31 = vld [vmem:[%s5468_s2 + $0x1d0] sm:$0xff]  ;;  %v306_v32 = vld [vmem:[%s5468_s2 + $0x1e8] sm:$0xff] }
  0x31   : > { %3547 = vmatprep.mubr.msk.bf16.mxu0 %vm3825_vm2, %v3823_v4  ;;  %3655 = vmatprep.mubr.msk.bf16.mxu1 %vm3825_vm2, %v3823_v4 }
  0x33   : > { %1443 = vperm.xlu1 %3759, %v264_v33   ;;  %1438 = vperm.xlu0 %3758, %v263_v34   ;;  %v305_v33 = vld [vmem:[%s5468_s2 + $0x1e0] sm:$0xff]  ;;  %v3789_v34 = vld [vmem:[%s3899_s12 + $0x70] sm:$0xff]  }
  0x37   : > { %1453 = vperm.xlu1 %3759, %v266_v35   ;;  %1448 = vperm.xlu0 %3758, %v265_v36   ;;  %v3790_v35 = vld [vmem:[%s3899_s12 + $0x148] sm:$0xff]   ;;  %v308_v36 = vld [vmem:[%s5468_s2 + $0x1f8] sm:$0xff] }
  0x38   : > { %3548 = vmatmul.mubr.msk.bf16.gmra.mrb[16].mxu0 %vm723_vm3, %v3769_v37  ;;  %3656 = vmatmul.mubr.msk.bf16.gmra.mrb[16].mxu1 %vm723_vm3, %v3770_v38  ;;  %v307_v37 = vld [vmem:[%s5468_s2 + $0x1f0] sm:$0xff]  ;;  %v310_v38 = vld [vmem:[%s5468_s2 + $0x208] sm:$0xff] }
  0x39   : > { %3551 = vmatprep.mubr.msk.bf16.mxu0 %vm3825_vm2, %v3823_v4  ;;  %3659 = vmatprep.mubr.msk.bf16.mxu1 %vm3825_vm2, %v3823_v4 }
  0x3b   : > { %1463 = vperm.xlu1 %3759, %v268_v39   ;;  %1458 = vperm.xlu0 %3758, %v267_v40   ;;  %v309_v39 = vld [vmem:[%s5468_s2 + $0x200] sm:$0xff]  ;;  %v3791_v40 = vld [vmem:[%s3899_s12 + $0x78] sm:$0xff]  }
  0x3f   : > { %1473 = vperm.xlu1 %3759, %v270_v41   ;;  %1468 = vperm.xlu0 %3758, %v269_v42  }
  0x40   : > { %3552 = vmatmul.mubr.msk.bf16.gmra.mrb[20].mxu0 %vm723_vm3, %v3771_v43  ;;  %3660 = vmatmul.mubr.msk.bf16.gmra.mrb[20].mxu1 %vm723_vm3, %v3772_v44  ;;  %v3792_v43 = vld [vmem:[%s3899_s12 + $0x150] sm:$0xff]   ;;  %v312_v44 = vld [vmem:[%s5468_s2 + $0x218] sm:$0xff] }
  0x41   : > { %3555 = vmatprep.mubr.msk.bf16.mxu0 %vm3825_vm2, %v3823_v4  ;;  %3663 = vmatprep.mubr.msk.bf16.mxu1 %vm3825_vm2, %v3823_v4 }
  0x43   : > { %1483 = vperm.xlu1 %3759, %v272_v45   ;;  %1478 = vperm.xlu0 %3758, %v271_v46   ;;  %v311_v45 = vld [vmem:[%s5468_s2 + $0x210] sm:$0xff] }
  0x47   : > { %1493 = vperm.xlu1 %3759, %v274_v47   ;;  %1488 = vperm.xlu0 %3758, %v273_v48   ;;  %v314_v48 = vld [vmem:[%s5468_s2 + $0x228] sm:$0xff] }
  0x48   : > { %3556 = vmatmul.mubr.msk.bf16.gmra.mrb[24].mxu0 %vm723_vm3, %v3773_v49  ;;  %3664 = vmatmul.mubr.msk.bf16.gmra.mrb[24].mxu1 %vm723_vm3, %v3774_v50  ;;  %v313_v49 = vld [vmem:[%s5468_s2 + $0x220] sm:$0xff] }
  0x49   : > { %3559 = vmatprep.mubr.msk.bf16.mxu0 %vm3825_vm2, %v3823_v4  ;;  %3667 = vmatprep.mubr.msk.bf16.mxu1 %vm3825_vm2, %v3823_v4  ;;  %v3793_v50 = vld [vmem:[%s3899_s12 + $0x80] sm:$0xff]  }
  0x4b   : > { %1503 = vperm.xlu1 %3759, %v276_v51   ;;  %1498 = vperm.xlu0 %3758, %v275_v52  }
  0x4f   : > { %1513 = vperm.xlu1 %3759, %v278_v53   ;;  %1508 = vperm.xlu0 %3758, %v277_v54   ;;  %v3794_v53 = vld [vmem:[%s3899_s12 + $0x158] sm:$0xff]  }
  0x50   : > { %3560 = vmatmul.mubr.msk.bf16.gmra.mrb[28].mxu0 %vm723_vm3, %v3775_v55  ;;  %3668 = vmatmul.mubr.msk.bf16.gmra.mrb[28].mxu1 %vm723_vm3, %v3776_v56  ;;  %v316_v54 = vld [vmem:[%s5468_s2 + $0x238] sm:$0xff]  ;;  %v315_v55 = vld [vmem:[%s5468_s2 + $0x230] sm:$0xff] }
  0x51   : > { %3563 = vmatprep.mubr.msk.bf16.mxu0 %vm3825_vm2, %v3823_v4  ;;  %3671 = vmatprep.mubr.msk.bf16.mxu1 %vm3825_vm2, %v3823_v4 }
  0x53   : > { %1523 = vperm.xlu1 %3759, %v280_v57   ;;  %1518 = vperm.xlu0 %3758, %v279_v58   ;;  %v318_v58 = vld [vmem:[%s5468_s2 + $0x248] sm:$0xff] }
  0x57   : > { %1533 = vperm.xlu1 %3759, %v282_v59   ;;  %1528 = vperm.xlu0 %3758, %v281_v60   ;;  %v317_v59 = vld [vmem:[%s5468_s2 + $0x240] sm:$0xff]  ;;  %v3795_v60 = vld [vmem:[%s3899_s12 + $0x88] sm:$0xff]  }
  0x58   : > { %3564 = vmatmul.mubr.msk.bf16.gmra.mrb[32].mxu0 %vm723_vm3, %v3777_v61  ;;  %3672 = vmatmul.mubr.msk.bf16.gmra.mrb[32].mxu1 %vm723_vm3, %v3778_v62 }
  0x59   : > { %3567 = vmatprep.mubr.msk.bf16.mxu0 %vm3825_vm2, %v3823_v4  ;;  %3675 = vmatprep.mubr.msk.bf16.mxu1 %vm3825_vm2, %v3823_v4 }
  0x5b   : > { %1543 = vperm.xlu1 %3759, %v284_v63   ;;  %1538 = vperm.xlu0 %3758, %v283_v0   ;;  %v3796_v63 = vld [vmem:[%s3899_s12 + $0x160] sm:$0xff]   ;;  %v320_v0 = vld [vmem:[%s5468_s2 + $0x258] sm:$0xff] }
  0x5f   : > { %1553 = vperm.xlu1 %3759, %v286_v1   ;;  %1548 = vperm.xlu0 %3758, %v285_v2   ;;  %v319_v1 = vld [vmem:[%s5468_s2 + $0x250] sm:$0xff] }
  0x60   : > { %3568 = vmatmul.mubr.msk.bf16.gmra.mrb[36].mxu0 %vm723_vm3, %v3779_v3  ;;  %3676 = vmatmul.mubr.msk.bf16.gmra.mrb[36].mxu1 %vm723_vm3, %v3780_v5  ;;  %v322_v5 = vld [vmem:[%s5468_s2 + $0x268] sm:$0xff] }
  0x61   : > { %3571 = vmatprep.mubr.msk.bf16.mxu0 %vm3825_vm2, %v3823_v4  ;;  %3679 = vmatprep.mubr.msk.bf16.mxu1 %vm3825_vm2, %v3823_v4 }
  0x63   : > { %1563 = vperm.xlu1 %3759, %v288_v6   ;;  %1558 = vperm.xlu0 %3758, %v287_v7   ;;  %v321_v6 = vld [vmem:[%s5468_s2 + $0x260] sm:$0xff]  ;;  %v3797_v7 = vld [vmem:[%s3899_s12 + $0x90] sm:$0xff]  }
  0x67   : > { %1573 = vperm.xlu1 %3759, %v290_v8   ;;  %1568 = vperm.xlu0 %3758, %v289_v9  }
  0x68   : > { %3572 = vmatmul.mubr.msk.bf16.gmra.mrb[40].mxu0 %vm723_vm3, %v3781_v10  ;;  %3680 = vmatmul.mubr.msk.bf16.gmra.mrb[40].mxu1 %vm723_vm3, %v3782_v11  ;;  %v3798_v10 = vld [vmem:[%s3899_s12 + $0x168] sm:$0xff]   ;;  %v324_v11 = vld [vmem:[%s5468_s2 + $0x278] sm:$0xff] }
  0x69   : > { %3575 = vmatprep.mubr.msk.bf16.mxu0 %vm3825_vm2, %v3823_v4  ;;  %3683 = vmatprep.mubr.msk.bf16.mxu1 %vm3825_vm2, %v3823_v4 }
  0x6b   : > { %1583 = vperm.xlu1 %3759, %v292_v12   ;;  %1578 = vperm.xlu0 %3758, %v291_v13   ;;  %v323_v12 = vld [vmem:[%s5468_s2 + $0x270] sm:$0xff] }
  0x6f   : > { %1593 = vperm.xlu1 %3759, %v294_v14   ;;  %1588 = vperm.xlu0 %3758, %v293_v15   ;;  %v326_v15 = vld [vmem:[%s5468_s2 + $0x288] sm:$0xff] }
  0x70   : > { %3576 = vmatmul.mubr.msk.bf16.gmra.mrb[44].mxu0 %vm723_vm3, %v3783_v16  ;;  %3684 = vmatmul.mubr.msk.bf16.gmra.mrb[44].mxu1 %vm723_vm3, %v3784_v17  ;;  %v325_v16 = vld [vmem:[%s5468_s2 + $0x280] sm:$0xff]  ;;  %v3799_v17 = vld [vmem:[%s3899_s12 + $0x98] sm:$0xff]  }
  0x71   : > { %3579 = vmatprep.mubr.msk.bf16.mxu0 %vm3825_vm2, %v3823_v4  ;;  %3687 = vmatprep.mubr.msk.bf16.mxu1 %vm3825_vm2, %v3823_v4 }
  0x73   : > { %1603 = vperm.xlu1 %3759, %v296_v18   ;;  %1598 = vperm.xlu0 %3758, %v295_v19  }
  0x77   : > { %1613 = vperm.xlu1 %3759, %v298_v20   ;;  %1608 = vperm.xlu0 %3758, %v297_v21   ;;  %v3800_v20 = vld [vmem:[%s3899_s12 + $0x170] sm:$0xff]   ;;  %v328_v21 = vld [vmem:[%s5468_s2 + $0x298] sm:$0xff] }
  0x78   : > { %3580 = vmatmul.mubr.msk.bf16.gmra.mrb[48].mxu0 %vm723_vm3, %v3785_v22  ;;  %3688 = vmatmul.mubr.msk.bf16.gmra.mrb[48].mxu1 %vm723_vm3, %v3786_v23  ;;  %v327_v22 = vld [vmem:[%s5468_s2 + $0x290] sm:$0xff] }
  0x79   : > { %3583 = vmatprep.mubr.msk.bf16.mxu0 %vm3825_vm2, %v3823_v4  ;;  %3691 = vmatprep.mubr.msk.bf16.mxu1 %vm3825_vm2, %v3823_v4 }
  0x7b   : > { %1623 = vperm.xlu1 %3759, %v300_v24   ;;  %1618 = vperm.xlu0 %3758, %v299_v25   ;;  %v330_v25 = vld [vmem:[%s5468_s2 + $0x2a8] sm:$0xff] }
  0x7f   : > { %1633 = vperm.xlu1 %3759, %v302_v26   ;;  %1628 = vperm.xlu0 %3758, %v301_v27   ;;  %v329_v26 = vld [vmem:[%s5468_s2 + $0x2a0] sm:$0xff] }
  0x80   : > { %3584 = vmatmul.mubr.msk.bf16.gmra.mrb[52].mxu0 %vm723_vm3, %v3787_v28  ;;  %3692 = vmatmul.mubr.msk.bf16.gmra.mrb[52].mxu1 %vm723_vm3, %v3788_v29  ;;  %v3801_v27 = vld [vmem:[%s3899_s12 + $0xa0] sm:$0xff]  }
  0x81   : > { %3587 = vmatprep.mubr.msk.bf16.mxu0 %vm3825_vm2, %v3823_v4  ;;  %3695 = vmatprep.mubr.msk.bf16.mxu1 %vm3825_vm2, %v3823_v4 }
  0x83   : > { %1643 = vperm.xlu1 %3759, %v304_v30   ;;  %1638 = vperm.xlu0 %3758, %v303_v31   ;;  %v3802_v30 = vld [vmem:[%s3899_s12 + $0x178] sm:$0xff]  }
  0x84   : > { %v332_v31 = vld [vmem:[%s5468_s2 + $0x2b8] sm:$0xff] }
  0x87   : > { %1653 = vperm.xlu1 %3759, %v306_v32   ;;  %1648 = vperm.xlu0 %3758, %v305_v33   ;;  %v331_v32 = vld [vmem:[%s5468_s2 + $0x2b0] sm:$0xff] }
  0x88   : > { %3588 = vmatmul.mubr.msk.bf16.gmra.mrb[56].mxu0 %vm723_vm3, %v3789_v34  ;;  %3696 = vmatmul.mubr.msk.bf16.gmra.mrb[56].mxu1 %vm723_vm3, %v3790_v35  ;;  %v334_v35 = vld [vmem:[%s5468_s2 + $0x2c8] sm:$0xff] }
  0x89   : > { %3591 = vmatprep.mubr.msk.bf16.mxu0 %vm3825_vm2, %v3823_v4  ;;  %3699 = vmatprep.mubr.msk.bf16.mxu1 %vm3825_vm2, %v3823_v4 }
  0x8b   : > { %1663 = vperm.xlu1 %3759, %v308_v36   ;;  %1658 = vperm.xlu0 %3758, %v307_v37   ;;  %v333_v36 = vld [vmem:[%s5468_s2 + $0x2c0] sm:$0xff]  ;;  %v3803_v37 = vld [vmem:[%s3899_s12 + $0xa8] sm:$0xff]  }
  0x8e   : > { %v4202_v41 = vpop.permute.xlu1 %1358  ;;  %v4204_v42 = vpop.permute.xlu0 %1348 }
  0x8f   : > { %1673 = vperm.xlu1 %3759, %v310_v38   ;;  %1668 = vperm.xlu0 %3758, %v309_v39  }
  0x90   : > { %3592 = vmatmul.mubr.msk.bf16.gmra.mrb[60].mxu0 %vm723_vm3, %v3791_v40  ;;  %3700 = vmatmul.mubr.msk.bf16.gmra.mrb[60].mxu1 %vm723_vm3, %v3792_v43  ;;  %v3804_v40 = vld [vmem:[%s3899_s12 + $0x180] sm:$0xff]   ;;  %v336_v43 = vld [vmem:[%s5468_s2 + $0x2d8] sm:$0xff] }
  0x91   : > { %3595 = vmatprep.mubr.msk.bf16.mxu0 %vm3825_vm2, %v3823_v4  ;;  %3703 = vmatprep.mubr.msk.bf16.mxu1 %vm3825_vm2, %v3823_v4 }
  0x92   : > { %v4215_v46 = vpop.permute.xlu1 %1363  ;;  %v4217_v47 = vpop.permute.xlu0 %1353 }
  0x93   : > { %1683 = vperm.xlu1 %3759, %v312_v44   ;;  %1678 = vperm.xlu0 %3758, %v311_v45   ;;  %v335_v44 = vld [vmem:[%s5468_s2 + $0x2d0] sm:$0xff] }
  0x96   : > { %v4230_v51 = vpop.permute.xlu1 %1373  ;;  %v4232_v52 = vpop.permute.xlu0 %1368 }
  0x97   : > { %1693 = vperm.xlu1 %3759, %v314_v48   ;;  %1688 = vperm.xlu0 %3758, %v313_v49   ;;  %v338_v49 = vld [vmem:[%s5468_s2 + $0x2e8] sm:$0xff] }
  0x98   : > { %3596 = vmatmul.mubr.msk.bf16.gmra.mrb[64].mxu0 %vm723_vm3, %v3793_v50  ;;  %3704 = vmatmul.mubr.msk.bf16.gmra.mrb[64].mxu1 %vm723_vm3, %v3794_v53  ;;  %v337_v50 = vld [vmem:[%s5468_s2 + $0x2e0] sm:$0xff]  ;;  %v3805_v53 = vld [vmem:[%s3899_s12 + $0xb0] sm:$0xff]  }
  0x99   : > { %3599 = vmatprep.mubr.msk.bf16.mxu0 %vm3825_vm2, %v3823_v4  ;;  %3707 = vmatprep.mubr.msk.bf16.mxu1 %vm3825_vm2, %v3823_v4 }
  0x9a   : > { %v4243_v56 = vpop.permute.xlu1 %1383  ;;  %v4245_v57 = vpop.permute.xlu0 %1378 }
  0x9b   : > { %1703 = vperm.xlu1 %3759, %v316_v54   ;;  %1698 = vperm.xlu0 %3758, %v315_v55  }
  0x9e   : > { %v4258_v61 = vpop.permute.xlu1 %1393  ;;  %v4260_v62 = vpop.permute.xlu0 %1388 }
  0x9f   : > { %1713 = vperm.xlu1 %3759, %v318_v58   ;;  %1708 = vperm.xlu0 %3758, %v317_v59   ;;  %v3806_v58 = vld [vmem:[%s3899_s12 + $0x188] sm:$0xff]   ;;  %v340_v59 = vld [vmem:[%s5468_s2 + $0x2f8] sm:$0xff] }
  0xa0   : > { %3600 = vmatmul.mubr.msk.bf16.gmra.mrb[68].mxu0 %vm723_vm3, %v3795_v60  ;;  %3708 = vmatmul.mubr.msk.bf16.gmra.mrb[68].mxu1 %vm723_vm3, %v3796_v63  ;;  %v339_v60 = vld [vmem:[%s5468_s2 + $0x2f0] sm:$0xff] }
  0xa1   : > { %3603 = vmatprep.mubr.msk.bf16.mxu0 %vm3825_vm2, %v3823_v4  ;;  %3711 = vmatprep.mubr.msk.bf16.mxu1 %vm3825_vm2, %v3823_v4 }
  0xa2   : > { %v4271_v2 = vpop.permute.xlu1 %1403  ;;  %v4273_v3 = vpop.permute.xlu0 %1398 }
  0xa3   : > { %1723 = vperm.xlu1 %3759, %v320_v0   ;;  %1718 = vperm.xlu0 %3758, %v319_v1   ;;  %v342_v1 = vld [vmem:[%s5468_s2 + $0x308] sm:$0xff] }
  0xa6   : > { %v4286_v8 = vpop.permute.xlu1 %1413  ;;  %v4288_v9 = vpop.permute.xlu0 %1408 }
  0xa7   : > { %1733 = vperm.xlu1 %3759, %v322_v5   ;;  %1728 = vperm.xlu0 %3758, %v321_v6   ;;  %v341_v5 = vld [vmem:[%s5468_s2 + $0x300] sm:$0xff]  ;;  %v3807_v6 = vld [vmem:[%s3899_s12 + $0xb8] sm:$0xff]  }
  0xa8   : > { %3604 = vmatmul.mubr.msk.bf16.gmra.mrb[72].mxu0 %vm723_vm3, %v3797_v7  ;;  %3712 = vmatmul.mubr.msk.bf16.gmra.mrb[72].mxu1 %vm723_vm3, %v3798_v10 }
  0xa9   : > { %3607 = vmatprep.mubr.msk.bf16.mxu0 %vm3825_vm2, %v3823_v4  ;;  %3715 = vmatprep.mubr.msk.bf16.mxu1 %vm3825_vm2, %v3823_v4 }
  0xaa   : > { %v4299_v13 = vpop.permute.xlu1 %1423  ;;  %v4301_v14 = vpop.permute.xlu0 %1418 }
  0xab   : > { %1743 = vperm.xlu1 %3759, %v324_v11   ;;  %1738 = vperm.xlu0 %3758, %v323_v12   ;;  %v3808_v11 = vld [vmem:[%s3899_s12 + $0x190] sm:$0xff]   ;;  %v344_v12 = vld [vmem:[%s5468_s2 + $0x318] sm:$0xff] }
  0xae   : > { %v4314_v18 = vpop.permute.xlu1 %1433  ;;  %v4316_v19 = vpop.permute.xlu0 %1428 }
  0xaf   : > { %1753 = vperm.xlu1 %3759, %v326_v15   ;;  %1748 = vperm.xlu0 %3758, %v325_v16   ;;  %v343_v15 = vld [vmem:[%s5468_s2 + $0x310] sm:$0xff] }
  0xb0   : > { %3608 = vmatmul.mubr.msk.bf16.gmra.mrb[76].mxu0 %vm723_vm3, %v3799_v17  ;;  %3716 = vmatmul.mubr.msk.bf16.gmra.mrb[76].mxu1 %vm723_vm3, %v3800_v20  ;;  %v346_v20 = vld [vmem:[%s5468_s2 + $0x328] sm:$0xff] }
  0xb1   : > { %3611 = vmatprep.mubr.msk.bf16.mxu0 %vm3825_vm2, %v3823_v4  ;;  %3719 = vmatprep.mubr.msk.bf16.mxu1 %vm3825_vm2, %v3823_v4 }
  0xb2   : > { %v4327_v23 = vpop.permute.xlu1 %1443  ;;  %v4329_v24 = vpop.permute.xlu0 %1438 }
  0xb3   : > { %1763 = vperm.xlu1 %3759, %v328_v21   ;;  %1758 = vperm.xlu0 %3758, %v327_v22   ;;  %v345_v21 = vld [vmem:[%s5468_s2 + $0x320] sm:$0xff] }
  0xb4   : > { %v3809_v22 = vld [vmem:[%s3899_s12 + $0xc0] sm:$0xff]  }
  0xb6   : > { %v4342_v28 = vpop.permute.xlu1 %1453  ;;  %v4344_v29 = vpop.permute.xlu0 %1448 }
  0xb7   : > { %1773 = vperm.xlu1 %3759, %v330_v25   ;;  %1768 = vperm.xlu0 %3758, %v329_v26  }
  0xb8   : > { %3612 = vmatmul.mubr.msk.bf16.gmra.mrb[80].mxu0 %vm723_vm3, %v3801_v27  ;;  %3720 = vmatmul.mubr.msk.bf16.gmra.mrb[80].mxu1 %vm723_vm3, %v3802_v30  ;;  %v3810_v27 = vld [vmem:[%s3899_s12 + $0x198] sm:$0xff]  }
  0xb9   : > { %3615 = vmatprep.mubr.msk.bf16.mxu0 %vm3825_vm2, %v3823_v4  ;;  %3723 = vmatprep.mubr.msk.bf16.mxu1 %vm3825_vm2, %v3823_v4  ;;  %v348_v30 = vld [vmem:[%s5468_s2 + $0x338] sm:$0xff] }
  0xba   : > { %v4355_v33 = vpop.permute.xlu1 %1463  ;;  %v4357_v34 = vpop.permute.xlu0 %1458 }
  0xbb   : > { %1783 = vperm.xlu1 %3759, %v332_v31   ;;  %1778 = vperm.xlu0 %3758, %v331_v32   ;;  %v347_v31 = vld [vmem:[%s5468_s2 + $0x330] sm:$0xff] }
  0xbe   : > { %v4370_v38 = vpop.permute.xlu1 %1473  ;;  %v4372_v39 = vpop.permute.xlu0 %1468 }
  0xbf   : > { %1793 = vperm.xlu1 %3759, %v334_v35   ;;  %1788 = vperm.xlu0 %3758, %v333_v36   ;;  %v349_v36 = vld [vmem:[%s5468_s2 + $0x340] sm:$0x3f] }
  0xc0   : > { %3616 = vmatmul.mubr.msk.bf16.gmra.mrb[84].mxu0 %vm723_vm3, %v3803_v37  ;;  %3724 = vmatmul.mubr.msk.bf16.gmra.mrb[84].mxu1 %vm723_vm3, %v3804_v40  ;;  %v3811_v37 = vld [vmem:[%s3899_s12 + $0xc8] sm:$0xff]  }
  0xc1   : > { %3619 = vmatprep.mubr.msk.bf16.mxu0 %vm3825_vm2, %v3823_v4  ;;  %3727 = vmatprep.mubr.msk.bf16.mxu1 %vm3825_vm2, %v3823_v4 }
  0xc2   : > { %v4383_v45 = vpop.permute.xlu1 %1483  ;;  %v4385_v48 = vpop.permute.xlu0 %1478 }
  0xc3   : > { %1803 = vperm.xlu1 %3759, %v336_v43   ;;  %1798 = vperm.xlu0 %3758, %v335_v44   ;;  %v3812_v44 = vld [vmem:[%s3899_s12 + $0x1a0] ss:$0 sps:$4 sm:$0x77]  }
  0xc6   : > { %v4398_v54 = vpop.permute.xlu1 %1493  ;;  %v4400_v55 = vpop.permute.xlu0 %1488 }
  0xc7   : > { %1813 = vperm.xlu1 %3759, %v338_v49   ;;  %1808 = vperm.xlu0 %3758, %v337_v50  }
  0xc8   : > { %3620 = vmatmul.mubr.msk.bf16.gmra.mrb[88].mxu0 %vm723_vm3, %v3805_v53  ;;  %3728 = vmatmul.mubr.msk.bf16.gmra.mrb[88].mxu1 %vm723_vm3, %v3806_v58  ;;  %v3813_v53 = vld [vmem:[%s3899_s12 + $0xd0] sm:$0xff]   ;;  %s4510_s12 = scalar_lea.vmem %s5469_s3, %s3745_s9 }
  0xc9   : > { %3623 = vmatprep.mubr.msk.bf16.mxu0 %vm3825_vm2, %v3823_v4  ;;  %3731 = vmatprep.mubr.msk.bf16.mxu1 %vm3825_vm2, %v3823_v4 }
  0xca   : > { %v4411_v63 = vpop.permute.xlu1 %1503  ;;  %v4413_v0 = vpop.permute.xlu0 %1498 }
  0xcb   : > { %1823 = vperm.xlu1 %3759, %v340_v59   ;;  %1818 = vperm.xlu0 %3758, %v339_v60  }
  0xce   : > { %v4426_v7 = vpop.permute.xlu1 %1513  ;;  %v4428_v10 = vpop.permute.xlu0 %1508 }
  0xcf   : > { %1833 = vperm.xlu1 %3759, %v342_v1   ;;  %1828 = vperm.xlu0 %3758, %v341_v5  }
  0xd0   : > { %3624 = vmatmul.mubr.msk.bf16.gmra.mrb[92].mxu0 %vm723_vm3, %v3807_v6  ;;  %3732 = vmatmul.mubr.msk.bf16.gmra.mrb[92].mxu1 %vm723_vm3, %v3808_v11 }
  0xd1   : > { %3627 = vmatprep.mubr.msk.bf16.mxu0 %vm3825_vm2, %v3823_v4  ;;  %3735 = vmatprep.mubr.msk.bf16.mxu1 %vm3825_vm2, %v3823_v4 }
  0xd2   : > { %v4439_v16 = vpop.permute.xlu1 %1523  ;;  %v4441_v17 = vpop.permute.xlu0 %1518 }
  0xd3   : > { %1843 = vperm.xlu1 %3759, %v344_v12   ;;  %1838 = vperm.xlu0 %3758, %v343_v15  }
  0xd6   : > { %v4454_v25 = vpop.permute.xlu1 %1533  ;;  %v4456_v26 = vpop.permute.xlu0 %1528 }
  0xd7   : > { %1853 = vperm.xlu1 %3759, %v346_v20   ;;  %1848 = vperm.xlu0 %3758, %v345_v21  }
  0xd8   : > { %3628 = vmatmul.mubr.msk.bf16.gmra.mrb[96].mxu0 %vm723_vm3, %v3809_v22  ;;  %3736 = vmatmul.mubr.msk.bf16.gmra.mrb[96].mxu1 %vm723_vm3, %v3810_v27 }
  0xd9   : > { %3631 = vmatprep.mubr.msk.bf16.mxu0 %vm3825_vm2, %v3823_v4  ;;  %3739 = vmatprep.mubr.msk.bf16.mxu1 %vm3825_vm2, %v3823_v4 }
  0xda   : > { %v4467_v32 = vpop.permute.xlu1 %1543  ;;  %v4469_v35 = vpop.permute.xlu0 %1538 }
  0xdb   : > { %1863 = vperm.xlu1 %3759, %v348_v30   ;;  %1858 = vperm.xlu0 %3758, %v347_v31  }
  0xde   : > { %v4479_v40 = vpop.permute.xlu1 %1553  ;;  %v4481_v43 = vpop.permute.xlu0 %1548 }
  0xdf   : > { %1868 = vperm.xlu0 %3758, %v349_v36  }
  0xe0   : > { %3632 = vmatmul.mubr.msk.bf16.gmra.mrb[100].mxu0 %vm723_vm3, %v3811_v37  ;;  %3740 = vmatmul.mubr.msk.bf16.gmra.mrb[100].mxu1 %vm723_vm3, %v3812_v44 }
  0xe1   : > { %3635 = vmatprep.mubr.msk.bf16.mxu0 %vm3825_vm2, %v3823_v4 }
  0xe2   : > { %v4486_v49 = vpop.permute.xlu1 %1563  ;;  %v4488_v50 = vpop.permute.xlu0 %1558 }
  0xe6   : > { %v4493_v58 = vpop.permute.xlu1 %1573  ;;  %v4495_v59 = vpop.permute.xlu0 %1568 }
  0xe7   : > { %5498 = vst [vmem:[#allocation2_spill] sm:$0xff] %v4493_v58  ;;  %5499 = vst [vmem:[#allocation3_spill] sm:$0xff] %v4495_v59 }
  0xe8   : > { %3636 = vmatmul.mubr.msk.bf16.gmra.mrb[104].mxu0 %vm723_vm3, %v3813_v53 }
  0xea   : > { %v4498_v60 = vpop.permute.xlu1 %1583  ;;  %v4500_v1 = vpop.permute.xlu0 %1578 }
  0xeb   : > { %5500 = vst [vmem:[#allocation4_spill] sm:$0xff] %v4498_v60  ;;  %5501 = vst [vmem:[#allocation5_spill] sm:$0xff] %v4500_v1  ;;  %v924_v5 = vpop.f32.mrb[0].mxu0  ;;  %v4503_v12 = vpop.f32.mrb[0].mxu1 }
  0xec   : > { %v1871_v6 = vmul.f32 %v4204_v42, %v924_v5  ;;  %v3533_v11 = vpop.f32.mrb[1].mxu0  ;;  %v3641_v30 = vpop.f32.mrb[1].mxu1 }
  0xed   : > { %v927_v4 = vpop.f32.mrb[2].mxu0  ;;  %v1143_v53 = vpop.f32.mrb[2].mxu1 }
  0xee   : > { %v4512_v15 = vpop.permute.xlu1 %1593  ;;  %v3370_v20 = vpack.c.bf16 %v1871_v6, %v1871_v6  ;;  %v2721_v21 = vmul.f32 %v1871_v6, %v924_v5  ;;  %v1872_v42 = vmul.f32 %v4217_v47, %v927_v4  ;;  %v3534_v22 = vpop.f32.mrb[3].mxu0  ;;  %v2505_v31 = vsel %vm2504_vm5, %v1871_v6, 0.0 }
  0xef   : > { %5502 = vst [vmem:[#allocation6_spill] sm:$0xff] %v4512_v15  ;;  %v4515_v27 = vpop.permute.xlu0 %1588  ;;  %v3642_v60 = vpop.f32.mrb[3].mxu1 }
  0xf0   : > { %5503 = vst [vmem:[#allocation7_spill] sm:$0xff] %v4515_v27  ;;  %2398 = vst.msk [vmem:[%s4510_s12] sm:$0xf] %vm2397_vm4, %v3370_v20  ;;  %v3371_v36 = vpack.c.bf16 %v1872_v42, %v1872_v42  ;;  %v2506_v37 = vsel %vm2504_vm5, %v1872_v42, 0.0  ;;  %v2722_v44 = vmul.f32 %v1872_v42, %v927_v4  ;;  %v2826_v5 = vsel %vm2504_vm5, %v2721_v21, 0.0 }
  0xf1   : > { %v2507_v11 = vadd.f32 %v2506_v37, %v2505_v31 }
  0xf2   : > { %v4521_v15 = vpop.permute.xlu1 %1603  ;;  %2399 = vst.msk [vmem:[%s4510_s12 + $0x4] sm:$0xf] %vm2397_vm4, %v3371_v36  ;;  %v2827_v47 = vsel %vm2504_vm5, %v2722_v44, 0.0 }
  0xf3   : > { %5504 = vst [vmem:[#allocation8_spill] sm:$0xff] %v4521_v15  ;;  %v4527_v22 = vpop.permute.xlu0 %1598  ;;  %v2828_v20 = vadd.f32 %v2827_v47, %v2826_v5  ;;  %v932_v6 = vpop.f32.mrb[4].mxu0 }
  0xf4   : > { %5505 = vst [vmem:[#allocation9_spill] sm:$0xff] %v4527_v22  ;;  %v1873_v30 = vmul.f32 %v4202_v41, %v932_v6  ;;  %v3537_v27 = vpop.f32.mrb[5].mxu0  ;;  %v1148_v4 = vpop.f32.mrb[4].mxu1 }
  0xf5   : > { %v935_v42 = vpop.f32.mrb[6].mxu0  ;;  %v3645_v5 = vpop.f32.mrb[5].mxu1 }
  0xf6   : > { %v4530_v31 = vpop.permute.xlu1 %1613  ;;  %v3372_v37 = vpack.c.bf16 %v1873_v30, %v1873_v30  ;;  %v2508_v60 = vsel %vm2504_vm5, %v1873_v30, 0.0  ;;  %v2723_v21 = vmul.f32 %v1873_v30, %v932_v6  ;;  %v1874_v36 = vmul.f32 %v4215_v46, %v935_v42  ;;  %v3538_v44 = vpop.f32.mrb[7].mxu0 }
  0xf7   : > { %5506 = vst [vmem:[#allocation10_spill] sm:$0xff] %v4530_v31  ;;  %v4534_v15 = vpop.permute.xlu0 %1608  ;;  %v2509_v22 = vadd.f32 %v2508_v60, %v2507_v11  ;;  %v1151_v1 = vpop.f32.mrb[6].mxu1 }
  0xf8   : > { %2400 = vst.msk [vmem:[%s4510_s12 + $0x8] sm:$0xf] %vm2397_vm4, %v3372_v37  ;;  %v2829_v41 = vsel %vm2504_vm5, %v2723_v21, 0.0  ;;  %v3373_v27 = vpack.c.bf16 %v1874_v36, %v1874_v36  ;;  %v2510_v47 = vsel %vm2504_vm5, %v1874_v36, 0.0  ;;  %v2724_v31 = vmul.f32 %v1874_v36, %v935_v42  ;;  %v3646_v30 = vpop.f32.mrb[7].mxu1 }
  0xf9   : > { %v2830_v58 = vadd.f32 %v2829_v41, %v2828_v20  ;;  %v2511_v59 = vadd.f32 %v2510_v47, %v2509_v22 }
  0xfa   : > { %v1624_v6 = vpop.permute.xlu1 %1623  ;;  %2401 = vst.msk [vmem:[%s4510_s12 + $0xc] sm:$0xf] %vm2397_vm4, %v3373_v27  ;;  %v2831_v46 = vsel %vm2504_vm5, %v2724_v31, 0.0 }
  0xfb   : > { %v1619_v44 = vpop.permute.xlu0 %1618  ;;  %v4543_v11 = vmul.f32 %v1624_v6, %v1143_v53  ;;  %v2832_v60 = vadd.f32 %v2831_v46, %v2830_v58  ;;  %v940_v37 = vpop.f32.mrb[8].mxu0 }
  0xfc   : > { %v4546_v21 = vmul.f32 %v1619_v44, %v4503_v12  ;;  %v1875_v42 = vmul.f32 %v4232_v52, %v940_v37  ;;  %v3541_v36 = vpop.f32.mrb[9].mxu0  ;;  %v1156_v31 = vpop.f32.mrb[8].mxu1 }
  0xfd   : > { %5507 = vst [vmem:[#allocation11_spill] sm:$0xff] %v4543_v11  ;;  %v3425_v22 = vpack.c.bf16 %v4543_v11, %v4543_v11  ;;  %v4552_v20 = vmul.f32 %v4543_v11, %v1143_v53  ;;  %v943_v5 = vpop.f32.mrb[10].mxu0 }
  0xfe   : > { %v1634_v41 = vpop.permute.xlu1 %1633  ;;  %v3424_v58 = vpack.c.bf16 %v4546_v21, %v4546_v21  ;;  %v4558_v27 = vmul.f32 %v4546_v21, %v4503_v12  ;;  %v3374_v52 = vpack.c.bf16 %v1875_v42, %v1875_v42  ;;  %v2512_v47 = vsel %vm2504_vm5, %v1875_v42, 0.0  ;;  %v3542_v46 = vpop.f32.mrb[11].mxu0 }
  0xff   : > { %5508 = vst [vmem:[#allocation12_spill] sm:$0xff] %v4552_v20  ;;  %v2725_v6 = vmul.f32 %v1875_v42, %v940_v37  ;;  %v1876_v30 = vmul.f32 %v4230_v51, %v943_v5  ;;  %v1629_v53 = vpop.permute.xlu0 %1628  ;;  %2453 = vst.msk [vmem:[%s4510_s12 + $0xdc] sm:$0xf] %vm2397_vm4, %v3425_v22  ;;  %v2513_v44 = vadd.f32 %v2512_v47, %v2511_v59  ;;  %v3649_v20 = vpop.f32.mrb[9].mxu1 }
 0x100   : > { %5509 = vst [vmem:[#allocation13_spill] sm:$0xff] %v4558_v27  ;;  %2452 = vst.msk [vmem:[%s4510_s12 + $0xd8] sm:$0xf] %vm2397_vm4, %v3424_v58  ;;  %v4566_v36 = vmul.f32 %v1629_v53, %v1148_v4  ;;  %v1159_v42 = vpop.f32.mrb[10].mxu1 }
 0x101   : > { %2402 = vst.msk [vmem:[%s4510_s12 + $0x10] sm:$0xf] %vm2397_vm4, %v3374_v52  ;;  %v2833_v12 = vsel %vm2504_vm5, %v2725_v6, 0.0  ;;  %v3375_v11 = vpack.c.bf16 %v1876_v30, %v1876_v30  ;;  %v2514_v37 = vsel %vm2504_vm5, %v1876_v30, 0.0  ;;  %v2726_v51 = vmul.f32 %v1876_v30, %v943_v5  ;;  %v3650_v22 = vpop.f32.mrb[11].mxu1 }
 0x102   : > { %v2834_v46 = vadd.f32 %v2833_v12, %v2832_v60  ;;  %v2515_v27 = vadd.f32 %v2514_v37, %v2513_v44  ;;  %v3426_v59 = vpack.c.bf16 %v4566_v36, %v4566_v36  ;;  %v1644_v58 = vpop.permute.xlu1 %1643  ;;  %v4578_v47 = vmul.f32 %v4566_v36, %v1148_v4 }
 0x103   : > { %2403 = vst.msk [vmem:[%s4510_s12 + $0x14] sm:$0xf] %vm2397_vm4, %v3375_v11  ;;  %v2835_v20 = vsel %vm2504_vm5, %v2726_v51, 0.0  ;;  %v1639_v52 = vpop.permute.xlu0 %1638  ;;  %v4580_v6 = vmul.f32 %v1634_v41, %v1151_v1  ;;  %v948_v5 = vpop.f32.mrb[12].mxu0  ;;  %v4586_v30 = vmul.f32 %v1644_v58, %v1159_v42 }
 0x104   : > { %v2836_v53 = vadd.f32 %v2835_v20, %v2834_v46  ;;  %2454 = vst.msk [vmem:[%s4510_s12 + $0xe0] sm:$0xf] %vm2397_vm4, %v3426_v59  ;;  %v4584_v60 = vmul.f32 %v1639_v52, %v1156_v31  ;;  %v1877_v11 = vmul.f32 %v4245_v57, %v948_v5  ;;  %v3545_v44 = vpop.f32.mrb[13].mxu0  ;;  %v1164_v4 = vpop.f32.mrb[12].mxu1 }
 0x105   : > { %v3427_v12 = vpack.c.bf16 %v4580_v6, %v4580_v6  ;;  %v951_v41 = vpop.f32.mrb[14].mxu0  ;;  %v4592_v37 = vmul.f32 %v4580_v6, %v1151_v1  ;;  %v3429_v1 = vpack.c.bf16 %v4586_v30, %v4586_v30 }
 0x106   : > { %5510 = vst [vmem:[#allocation14_spill] sm:$0xff] %v4584_v60  ;;  %v3428_v51 = vpack.c.bf16 %v4584_v60, %v4584_v60  ;;  %v4597_v46 = vmul.f32 %v4584_v60, %v1156_v31  ;;  %v3376_v59 = vpack.c.bf16 %v1877_v11, %v1877_v11  ;;  %v2516_v57 = vsel %vm2504_vm5, %v1877_v11, 0.0  ;;  %v3546_v58 = vpop.f32.mrb[15].mxu0  ;;  %v3653_v31 = vpop.f32.mrb[13].mxu1 }
 0x107   : > { %5511 = vst [vmem:[#allocation15_spill] sm:$0xff] %v4592_v37  ;;  %v2727_v22 = vmul.f32 %v1877_v11, %v948_v5  ;;  %v1878_v20 = vmul.f32 %v4243_v56, %v951_v41  ;;  %v1649_v52 = vpop.permute.xlu0 %1648  ;;  %2455 = vst.msk [vmem:[%s4510_s12 + $0xe4] sm:$0xf] %vm2397_vm4, %v3427_v12  ;;  %v2517_v44 = vadd.f32 %v2516_v57, %v2515_v27  ;;  %v1167_v58 = vpop.f32.mrb[14].mxu1 }
 0x108   : > { %5512 = vst [vmem:[#allocation16_spill] sm:$0xff] %v4597_v46  ;;  %2456 = vst.msk [vmem:[%s4510_s12 + $0xe8] sm:$0xf] %vm2397_vm4, %v3428_v51  ;;  %v1654_v12 = vpop.permute.xlu1 %1653  ;;  %v4614_v27 = vmul.f32 %v4586_v30, %v1159_v42  ;;  %v3654_v51 = vpop.f32.mrb[15].mxu1  ;;  %v4619_v57 = vmul.f32 %v1649_v52, %v1164_v4 }
 0x109   : > { %2404 = vst.msk [vmem:[%s4510_s12 + $0x18] sm:$0xf] %vm2397_vm4, %v3376_v59  ;;  %v2837_v46 = vsel %vm2504_vm5, %v2727_v22, 0.0  ;;  %v3377_v5 = vpack.c.bf16 %v1878_v20, %v1878_v20  ;;  %v2518_v56 = vsel %vm2504_vm5, %v1878_v20, 0.0  ;;  %v2728_v11 = vmul.f32 %v1878_v20, %v951_v41  ;;  %2457 = vst.msk [vmem:[%s4510_s12 + $0xec] sm:$0xf] %vm2397_vm4, %v3429_v1 }
 0x10a   : > { %v2838_v60 = vadd.f32 %v2837_v46, %v2836_v53  ;;  %v2519_v37 = vadd.f32 %v2518_v56, %v2517_v44  ;;  %v4621_v22 = vmul.f32 %v1654_v12, %v1167_v58  ;;  %v3430_v42 = vpack.c.bf16 %v4619_v57, %v4619_v57 }
 0x10b   : > { %2405 = vst.msk [vmem:[%s4510_s12 + $0x1c] sm:$0xf] %vm2397_vm4, %v3377_v5  ;;  %v2839_v59 = vsel %vm2504_vm5, %v2728_v11, 0.0  ;;  %v1659_v41 = vpop.permute.xlu0 %1658  ;;  %v956_v53 = vpop.f32.mrb[16].mxu0  ;;  %v4627_v44 = vmul.f32 %v4619_v57, %v1164_v4 }
 0x10c   : > { %5513 = vst [vmem:[#allocation17_spill] sm:$0xff] %v4621_v22  ;;  %v2840_v31 = vadd.f32 %v2839_v59, %v2838_v60  ;;  %v1879_v46 = vmul.f32 %v4260_v62, %v956_v53  ;;  %v3549_v20 = vpop.f32.mrb[17].mxu0  ;;  %v1172_v1 = vpop.f32.mrb[16].mxu1  ;;  %v3431_v5 = vpack.c.bf16 %v4621_v22, %v4621_v22  ;;  %v4632_v60 = vmul.f32 %v4621_v22, %v1167_v58 }
 0x10d   : > { %v959_v52 = vpop.f32.mrb[18].mxu0  ;;  %v4634_v56 = vmul.f32 %v1659_v41, %v1172_v1  ;;  %2458 = vst.msk [vmem:[%s4510_s12 + $0xf0] sm:$0xf] %vm2397_vm4, %v3430_v42  ;;  %v3657_v20 = vpop.f32.mrb[17].mxu1 }
 0x10e   : > { %5514 = vst [vmem:[#allocation18_spill] sm:$0xff] %v4632_v60  ;;  %v3378_v62 = vpack.c.bf16 %v1879_v46, %v1879_v46  ;;  %v2520_v11 = vsel %vm2504_vm5, %v1879_v46, 0.0  ;;  %v2729_v12 = vmul.f32 %v1879_v46, %v956_v53  ;;  %v1880_v51 = vmul.f32 %v4258_v61, %v959_v52  ;;  %v3550_v4 = vpop.f32.mrb[19].mxu0  ;;  %2459 = vst.msk [vmem:[%s4510_s12 + $0xf4] sm:$0xf] %vm2397_vm4, %v3431_v5  ;;  %v1175_v46 = vpop.f32.mrb[18].mxu1 }
 0x10f   : > { %v2521_v59 = vadd.f32 %v2520_v11, %v2519_v37  ;;  %v3432_v58 = vpack.c.bf16 %v4634_v56, %v4634_v56  ;;  %v1664_v4 = vpop.permute.xlu1 %1663  ;;  %v4651_v37 = vmul.f32 %v4634_v56, %v1172_v1  ;;  %v3658_v5 = vpop.f32.mrb[19].mxu1 }
 0x110   : > { %2406 = vst.msk [vmem:[%s4510_s12 + $0x20] sm:$0xf] %vm2397_vm4, %v3378_v62  ;;  %v2841_v41 = vsel %vm2504_vm5, %v2729_v12, 0.0  ;;  %v3379_v60 = vpack.c.bf16 %v1880_v51, %v1880_v51  ;;  %v2522_v53 = vsel %vm2504_vm5, %v1880_v51, 0.0  ;;  %v2730_v61 = vmul.f32 %v1880_v51, %v959_v52  ;;  %v1669_v20 = vpop.permute.xlu0 %1668 }
 0x111   : > { %v2842_v22 = vadd.f32 %v2841_v41, %v2840_v31  ;;  %v2523_v42 = vadd.f32 %v2522_v53, %v2521_v59  ;;  %2460 = vst.msk [vmem:[%s4510_s12 + $0xf8] sm:$0xf] %vm2397_vm4, %v3432_v58  ;;  %5515 = vst [vmem:[#allocation19_spill] sm:$0xff] %v4651_v37  ;;  %v4656_v11 = vmul.f32 %v1664_v4, %v1175_v46 }
 0x112   : > { %2407 = vst.msk [vmem:[%s4510_s12 + $0x24] sm:$0xf] %vm2397_vm4, %v3379_v60  ;;  %v2843_v62 = vsel %vm2504_vm5, %v2730_v61, 0.0 }
 0x113   : > { %5516 = vst [vmem:[#allocation20_spill] sm:$0xff] %v4656_v11  ;;  %v2844_v12 = vadd.f32 %v2843_v62, %v2842_v22  ;;  %v964_v52 = vpop.f32.mrb[20].mxu0  ;;  %v3433_v59 = vpack.c.bf16 %v4656_v11, %v4656_v11  ;;  %v4662_v1 = vmul.f32 %v4656_v11, %v1175_v46  ;;  %v1180_v58 = vpop.f32.mrb[20].mxu1 }
 0x114   : > { %v1881_v51 = vmul.f32 %v4273_v3, %v964_v52  ;;  %v3553_v31 = vpop.f32.mrb[21].mxu0  ;;  %v4664_v41 = vmul.f32 %v1669_v20, %v1180_v58  ;;  %v3661_v62 = vpop.f32.mrb[21].mxu1 }
 0x115   : > { %5517 = vst [vmem:[#allocation21_spill] sm:$0xff] %v4662_v1  ;;  %v967_v60 = vpop.f32.mrb[22].mxu0  ;;  %2461 = vst.msk [vmem:[%s4510_s12 + $0xfc] sm:$0xf] %vm2397_vm4, %v3433_v59  ;;  %v1674_v31 = vpop.permute.xlu1 %1673 }
 0x116   : > { %v3380_v53 = vpack.c.bf16 %v1881_v51, %v1881_v51  ;;  %v2524_v61 = vsel %vm2504_vm5, %v1881_v51, 0.0  ;;  %v2731_v22 = vmul.f32 %v1881_v51, %v964_v52  ;;  %v1882_v4 = vmul.f32 %v4271_v2, %v967_v60  ;;  %v3554_v3 = vpop.f32.mrb[23].mxu0  ;;  %v1183_v11 = vpop.f32.mrb[22].mxu1 }
 0x117   : > { %v2525_v5 = vadd.f32 %v2524_v61, %v2523_v42  ;;  %v3434_v46 = vpack.c.bf16 %v4664_v41, %v4664_v41  ;;  %v4679_v42 = vmul.f32 %v4664_v41, %v1180_v58  ;;  %v4681_v59 = vmul.f32 %v1674_v31, %v1183_v11  ;;  %v3662_v61 = vpop.f32.mrb[23].mxu1 }
 0x118   : > { %2408 = vst.msk [vmem:[%s4510_s12 + $0x28] sm:$0xf] %vm2397_vm4, %v3380_v53  ;;  %v2845_v20 = vsel %vm2504_vm5, %v2731_v22, 0.0  ;;  %v3381_v1 = vpack.c.bf16 %v1882_v4, %v1882_v4  ;;  %v2526_v52 = vsel %vm2504_vm5, %v1882_v4, 0.0  ;;  %v2732_v51 = vmul.f32 %v1882_v4, %v967_v60  ;;  %v1679_v22 = vpop.permute.xlu0 %1678 }
 0x119   : > { %v2846_v2 = vadd.f32 %v2845_v20, %v2844_v12  ;;  %v2527_v3 = vadd.f32 %v2526_v52, %v2525_v5  ;;  %2462 = vst.msk [vmem:[%s4510_s12 + $0x100] sm:$0xf] %vm2397_vm4, %v3434_v46  ;;  %5518 = vst [vmem:[#allocation22_spill] sm:$0xff] %v4681_v59  ;;  %v3435_v12 = vpack.c.bf16 %v4681_v59, %v4681_v59 }
 0x11a   : > { %2409 = vst.msk [vmem:[%s4510_s12 + $0x2c] sm:$0xf] %vm2397_vm4, %v3381_v1  ;;  %v2847_v53 = vsel %vm2504_vm5, %v2732_v51, 0.0  ;;  %v4690_v58 = vmul.f32 %v4681_v59, %v1183_v11 }
 0x11b   : > { %v2848_v62 = vadd.f32 %v2847_v53, %v2846_v2  ;;  %v972_v37 = vpop.f32.mrb[24].mxu0  ;;  %v1188_v5 = vpop.f32.mrb[24].mxu1  ;;  %2463 = vst.msk [vmem:[%s4510_s12 + $0x104] sm:$0xf] %vm2397_vm4, %v3435_v12 }
 0x11c   : > { %v1883_v60 = vmul.f32 %v4288_v9, %v972_v37  ;;  %v3557_v4 = vpop.f32.mrb[25].mxu0  ;;  %5519 = vst [vmem:[#allocation23_spill] sm:$0xff] %v4690_v58  ;;  %v4694_v1 = vmul.f32 %v1679_v22, %v1188_v5  ;;  %v3665_v61 = vpop.f32.mrb[25].mxu1 }
 0x11d   : > { %v975_v46 = vpop.f32.mrb[26].mxu0  ;;  %v1684_v53 = vpop.permute.xlu1 %1683 }
 0x11e   : > { %v3382_v31 = vpack.c.bf16 %v1883_v60, %v1883_v60  ;;  %v2528_v20 = vsel %vm2504_vm5, %v1883_v60, 0.0  ;;  %v2733_v52 = vmul.f32 %v1883_v60, %v972_v37  ;;  %v1884_v51 = vmul.f32 %v4286_v8, %v975_v46  ;;  %v3558_v2 = vpop.f32.mrb[27].mxu0  ;;  %v1191_v59 = vpop.f32.mrb[26].mxu1 }
 0x11f   : > { %v2529_v9 = vadd.f32 %v2528_v20, %v2527_v3  ;;  %v3436_v11 = vpack.c.bf16 %v4694_v1, %v4694_v1  ;;  %v4707_v8 = vmul.f32 %v4694_v1, %v1188_v5  ;;  %v4709_v3 = vmul.f32 %v1684_v53, %v1191_v59  ;;  %v3666_v20 = vpop.f32.mrb[27].mxu1 }
 0x120   : > { %2410 = vst.msk [vmem:[%s4510_s12 + $0x30] sm:$0xf] %vm2397_vm4, %v3382_v31  ;;  %v2849_v22 = vsel %vm2504_vm5, %v2733_v52, 0.0  ;;  %v3383_v12 = vpack.c.bf16 %v1884_v51, %v1884_v51  ;;  %v2530_v4 = vsel %vm2504_vm5, %v1884_v51, 0.0  ;;  %v2734_v58 = vmul.f32 %v1884_v51, %v975_v46  ;;  %v1689_v52 = vpop.permute.xlu0 %1688 }
 0x121   : > { %v2850_v37 = vadd.f32 %v2849_v22, %v2848_v62  ;;  %v2531_v60 = vadd.f32 %v2530_v4, %v2529_v9  ;;  %2464 = vst.msk [vmem:[%s4510_s12 + $0x108] sm:$0xf] %vm2397_vm4, %v3436_v11  ;;  %5520 = vst [vmem:[#allocation24_spill] sm:$0xff] %v4709_v3  ;;  %v3437_v62 = vpack.c.bf16 %v4709_v3, %v4709_v3 }
 0x122   : > { %2411 = vst.msk [vmem:[%s4510_s12 + $0x34] sm:$0xf] %vm2397_vm4, %v3383_v12  ;;  %v2851_v31 = vsel %vm2504_vm5, %v2734_v58, 0.0  ;;  %v4718_v5 = vmul.f32 %v4709_v3, %v1191_v59 }
 0x123   : > { %v2852_v2 = vadd.f32 %v2851_v31, %v2850_v37  ;;  %v980_v61 = vpop.f32.mrb[28].mxu0  ;;  %v1196_v9 = vpop.f32.mrb[28].mxu1  ;;  %2465 = vst.msk [vmem:[%s4510_s12 + $0x10c] sm:$0xf] %vm2397_vm4, %v3437_v62 }
 0x124   : > { %v1885_v46 = vmul.f32 %v4301_v14, %v980_v61  ;;  %v3561_v51 = vpop.f32.mrb[29].mxu0  ;;  %5521 = vst [vmem:[#allocation25_spill] sm:$0xff] %v4718_v5  ;;  %v4722_v53 = vmul.f32 %v1689_v52, %v1196_v9  ;;  %v3669_v20 = vpop.f32.mrb[29].mxu1 }
 0x125   : > { %v983_v11 = vpop.f32.mrb[30].mxu0  ;;  %v1694_v31 = vpop.permute.xlu1 %1693 }
 0x126   : > { %v3384_v58 = vpack.c.bf16 %v1885_v46, %v1885_v46  ;;  %v2532_v22 = vsel %vm2504_vm5, %v1885_v46, 0.0  ;;  %v2735_v12 = vmul.f32 %v1885_v46, %v980_v61  ;;  %v1886_v4 = vmul.f32 %v4299_v13, %v983_v11  ;;  %v3562_v37 = vpop.f32.mrb[31].mxu0  ;;  %v1199_v3 = vpop.f32.mrb[30].mxu1 }
 0x127   : > { %v2533_v14 = vadd.f32 %v2532_v22, %v2531_v60  ;;  %v3438_v59 = vpack.c.bf16 %v4722_v53, %v4722_v53  ;;  %v4735_v13 = vmul.f32 %v4722_v53, %v1196_v9  ;;  %v4737_v60 = vmul.f32 %v1694_v31, %v1199_v3  ;;  %v3670_v22 = vpop.f32.mrb[31].mxu1 }
 0x128   : > { %2412 = vst.msk [vmem:[%s4510_s12 + $0x38] sm:$0xf] %vm2397_vm4, %v3384_v58  ;;  %v2853_v52 = vsel %vm2504_vm5, %v2735_v12, 0.0  ;;  %v3385_v62 = vpack.c.bf16 %v1886_v4, %v1886_v4  ;;  %v2534_v51 = vsel %vm2504_vm5, %v1886_v4, 0.0  ;;  %v2736_v5 = vmul.f32 %v1886_v4, %v983_v11  ;;  %v1699_v12 = vpop.permute.xlu0 %1698 }
 0x129   : > { %v2854_v61 = vadd.f32 %v2853_v52, %v2852_v2  ;;  %v2535_v46 = vadd.f32 %v2534_v51, %v2533_v14  ;;  %2466 = vst.msk [vmem:[%s4510_s12 + $0x110] sm:$0xf] %vm2397_vm4, %v3438_v59  ;;  %5522 = vst [vmem:[#allocation26_spill] sm:$0xff] %v4737_v60  ;;  %v3439_v2 = vpack.c.bf16 %v4737_v60, %v4737_v60 }
 0x12a   : > { %2413 = vst.msk [vmem:[%s4510_s12 + $0x3c] sm:$0xf] %vm2397_vm4, %v3385_v62  ;;  %v2855_v58 = vsel %vm2504_vm5, %v2736_v5, 0.0  ;;  %v4746_v9 = vmul.f32 %v4737_v60, %v1199_v3 }
 0x12b   : > { %v2856_v37 = vadd.f32 %v2855_v58, %v2854_v61  ;;  %v988_v20 = vpop.f32.mrb[32].mxu0  ;;  %v1204_v14 = vpop.f32.mrb[32].mxu1  ;;  %2467 = vst.msk [vmem:[%s4510_s12 + $0x114] sm:$0xf] %vm2397_vm4, %v3439_v2 }
 0x12c   : > { %v1887_v11 = vmul.f32 %v4316_v19, %v988_v20  ;;  %v3565_v4 = vpop.f32.mrb[33].mxu0  ;;  %5523 = vst [vmem:[#allocation27_spill] sm:$0xff] %v4746_v9  ;;  %v4750_v31 = vmul.f32 %v1699_v12, %v1204_v14  ;;  %v3673_v22 = vpop.f32.mrb[33].mxu1 }
 0x12d   : > { %v991_v59 = vpop.f32.mrb[34].mxu0  ;;  %v1704_v58 = vpop.permute.xlu1 %1703 }
 0x12e   : > { %v3386_v5 = vpack.c.bf16 %v1887_v11, %v1887_v11  ;;  %v2536_v52 = vsel %vm2504_vm5, %v1887_v11, 0.0  ;;  %v2737_v62 = vmul.f32 %v1887_v11, %v988_v20  ;;  %v1888_v51 = vmul.f32 %v4314_v18, %v991_v59  ;;  %v3566_v61 = vpop.f32.mrb[35].mxu0  ;;  %v1207_v60 = vpop.f32.mrb[34].mxu1 }
 0x12f   : > { %v2537_v19 = vadd.f32 %v2536_v52, %v2535_v46  ;;  %v3440_v3 = vpack.c.bf16 %v4750_v31, %v4750_v31  ;;  %v4763_v18 = vmul.f32 %v4750_v31, %v1204_v14  ;;  %v4765_v46 = vmul.f32 %v1704_v58, %v1207_v60  ;;  %v3674_v52 = vpop.f32.mrb[35].mxu1 }
 0x130   : > { %2414 = vst.msk [vmem:[%s4510_s12 + $0x40] sm:$0xf] %vm2397_vm4, %v3386_v5  ;;  %v2857_v12 = vsel %vm2504_vm5, %v2737_v62, 0.0  ;;  %v3387_v2 = vpack.c.bf16 %v1888_v51, %v1888_v51  ;;  %v2538_v4 = vsel %vm2504_vm5, %v1888_v51, 0.0  ;;  %v2738_v9 = vmul.f32 %v1888_v51, %v991_v59  ;;  %v1709_v62 = vpop.permute.xlu0 %1708 }
 0x131   : > { %v2858_v20 = vadd.f32 %v2857_v12, %v2856_v37  ;;  %v2539_v11 = vadd.f32 %v2538_v4, %v2537_v19  ;;  %2468 = vst.msk [vmem:[%s4510_s12 + $0x118] sm:$0xf] %vm2397_vm4, %v3440_v3  ;;  %5524 = vst [vmem:[#allocation28_spill] sm:$0xff] %v4765_v46  ;;  %v3441_v37 = vpack.c.bf16 %v4765_v46, %v4765_v46 }
 0x132   : > { %2415 = vst.msk [vmem:[%s4510_s12 + $0x44] sm:$0xf] %vm2397_vm4, %v3387_v2  ;;  %v2859_v5 = vsel %vm2504_vm5, %v2738_v9, 0.0  ;;  %v4774_v14 = vmul.f32 %v4765_v46, %v1207_v60 }
 0x133   : > { %v2860_v61 = vadd.f32 %v2859_v5, %v2858_v20  ;;  %v996_v22 = vpop.f32.mrb[36].mxu0  ;;  %v1212_v19 = vpop.f32.mrb[36].mxu1  ;;  %2469 = vst.msk [vmem:[%s4510_s12 + $0x11c] sm:$0xf] %vm2397_vm4, %v3441_v37 }
 0x134   : > { %v1889_v59 = vmul.f32 %v4329_v24, %v996_v22  ;;  %v3569_v51 = vpop.f32.mrb[37].mxu0  ;;  %5525 = vst [vmem:[#allocation29_spill] sm:$0xff] %v4774_v14  ;;  %v4778_v58 = vmul.f32 %v1709_v62, %v1212_v19  ;;  %v3677_v52 = vpop.f32.mrb[37].mxu1 }
 0x135   : > { %v999_v3 = vpop.f32.mrb[38].mxu0  ;;  %v1714_v5 = vpop.permute.xlu1 %1713 }
 0x136   : > { %v3388_v9 = vpack.c.bf16 %v1889_v59, %v1889_v59  ;;  %v2540_v12 = vsel %vm2504_vm5, %v1889_v59, 0.0  ;;  %v2739_v2 = vmul.f32 %v1889_v59, %v996_v22  ;;  %v1890_v4 = vmul.f32 %v4327_v23, %v999_v3  ;;  %v3570_v20 = vpop.f32.mrb[39].mxu0  ;;  %v1215_v46 = vpop.f32.mrb[38].mxu1 }
 0x137   : > { %v2541_v24 = vadd.f32 %v2540_v12, %v2539_v11  ;;  %v3442_v60 = vpack.c.bf16 %v4778_v58, %v4778_v58  ;;  %v4791_v23 = vmul.f32 %v4778_v58, %v1212_v19  ;;  %v4793_v11 = vmul.f32 %v1714_v5, %v1215_v46  ;;  %v3678_v12 = vpop.f32.mrb[39].mxu1 }
 0x138   : > { %2416 = vst.msk [vmem:[%s4510_s12 + $0x48] sm:$0xf] %vm2397_vm4, %v3388_v9  ;;  %v2861_v62 = vsel %vm2504_vm5, %v2739_v2, 0.0  ;;  %v3389_v37 = vpack.c.bf16 %v1890_v4, %v1890_v4  ;;  %v2542_v51 = vsel %vm2504_vm5, %v1890_v4, 0.0  ;;  %v2740_v14 = vmul.f32 %v1890_v4, %v999_v3  ;;  %v1719_v2 = vpop.permute.xlu0 %1718 }
 0x139   : > { %v2862_v22 = vadd.f32 %v2861_v62, %v2860_v61  ;;  %v2543_v59 = vadd.f32 %v2542_v51, %v2541_v24  ;;  %2470 = vst.msk [vmem:[%s4510_s12 + $0x120] sm:$0xf] %vm2397_vm4, %v3442_v60  ;;  %5526 = vst [vmem:[#allocation30_spill] sm:$0xff] %v4793_v11  ;;  %v3443_v61 = vpack.c.bf16 %v4793_v11, %v4793_v11 }
 0x13a   : > { %2417 = vst.msk [vmem:[%s4510_s12 + $0x4c] sm:$0xf] %vm2397_vm4, %v3389_v37  ;;  %v2863_v9 = vsel %vm2504_vm5, %v2740_v14, 0.0  ;;  %v4802_v19 = vmul.f32 %v4793_v11, %v1215_v46 }
 0x13b   : > { %v2864_v20 = vadd.f32 %v2863_v9, %v2862_v22  ;;  %v1004_v52 = vpop.f32.mrb[40].mxu0  ;;  %v1220_v24 = vpop.f32.mrb[40].mxu1  ;;  %2471 = vst.msk [vmem:[%s4510_s12 + $0x124] sm:$0xf] %vm2397_vm4, %v3443_v61 }
 0x13c   : > { %v1891_v3 = vmul.f32 %v4344_v29, %v1004_v52  ;;  %v3573_v4 = vpop.f32.mrb[41].mxu0  ;;  %5527 = vst [vmem:[#allocation31_spill] sm:$0xff] %v4802_v19  ;;  %v4806_v5 = vmul.f32 %v1719_v2, %v1220_v24  ;;  %v3681_v12 = vpop.f32.mrb[41].mxu1 }
 0x13d   : > { %v1007_v60 = vpop.f32.mrb[42].mxu0  ;;  %v1724_v9 = vpop.permute.xlu1 %1723 }
 0x13e   : > { %v3390_v14 = vpack.c.bf16 %v1891_v3, %v1891_v3  ;;  %v2544_v62 = vsel %vm2504_vm5, %v1891_v3, 0.0  ;;  %v2741_v37 = vmul.f32 %v1891_v3, %v1004_v52  ;;  %v1892_v51 = vmul.f32 %v4342_v28, %v1007_v60  ;;  %v3574_v22 = vpop.f32.mrb[43].mxu0  ;;  %v1223_v11 = vpop.f32.mrb[42].mxu1 }
 0x13f   : > { %v2545_v29 = vadd.f32 %v2544_v62, %v2543_v59  ;;  %v3444_v46 = vpack.c.bf16 %v4806_v5, %v4806_v5  ;;  %v4819_v28 = vmul.f32 %v4806_v5, %v1220_v24  ;;  %v4821_v59 = vmul.f32 %v1724_v9, %v1223_v11  ;;  %v3682_v62 = vpop.f32.mrb[43].mxu1 }
 0x140   : > { %2418 = vst.msk [vmem:[%s4510_s12 + $0x50] sm:$0xf] %vm2397_vm4, %v3390_v14  ;;  %v2865_v2 = vsel %vm2504_vm5, %v2741_v37, 0.0  ;;  %v3391_v61 = vpack.c.bf16 %v1892_v51, %v1892_v51  ;;  %v2546_v4 = vsel %vm2504_vm5, %v1892_v51, 0.0  ;;  %v2742_v19 = vmul.f32 %v1892_v51, %v1007_v60  ;;  %v1729_v37 = vpop.permute.xlu0 %1728 }
 0x141   : > { %v2866_v52 = vadd.f32 %v2865_v2, %v2864_v20  ;;  %v2547_v3 = vadd.f32 %v2546_v4, %v2545_v29  ;;  %2472 = vst.msk [vmem:[%s4510_s12 + $0x128] sm:$0xf] %vm2397_vm4, %v3444_v46  ;;  %5528 = vst [vmem:[#allocation32_spill] sm:$0xff] %v4821_v59  ;;  %v3445_v20 = vpack.c.bf16 %v4821_v59, %v4821_v59 }
 0x142   : > { %2419 = vst.msk [vmem:[%s4510_s12 + $0x54] sm:$0xf] %vm2397_vm4, %v3391_v61  ;;  %v2867_v14 = vsel %vm2504_vm5, %v2742_v19, 0.0  ;;  %v4830_v24 = vmul.f32 %v4821_v59, %v1223_v11 }
 0x143   : > { %v2868_v22 = vadd.f32 %v2867_v14, %v2866_v52  ;;  %v1012_v12 = vpop.f32.mrb[44].mxu0  ;;  %v1228_v29 = vpop.f32.mrb[44].mxu1  ;;  %2473 = vst.msk [vmem:[%s4510_s12 + $0x12c] sm:$0xf] %vm2397_vm4, %v3445_v20 }
 0x144   : > { %v1893_v60 = vmul.f32 %v4357_v34, %v1012_v12  ;;  %v3577_v51 = vpop.f32.mrb[45].mxu0  ;;  %5529 = vst [vmem:[#allocation33_spill] sm:$0xff] %v4830_v24  ;;  %v4834_v9 = vmul.f32 %v1729_v37, %v1228_v29  ;;  %v3685_v62 = vpop.f32.mrb[45].mxu1 }
 0x145   : > { %v1015_v46 = vpop.f32.mrb[46].mxu0  ;;  %v1734_v14 = vpop.permute.xlu1 %1733 }
 0x146   : > { %v3392_v19 = vpack.c.bf16 %v1893_v60, %v1893_v60  ;;  %v2548_v2 = vsel %vm2504_vm5, %v1893_v60, 0.0  ;;  %v2743_v61 = vmul.f32 %v1893_v60, %v1012_v12  ;;  %v1894_v4 = vmul.f32 %v4355_v33, %v1015_v46  ;;  %v3578_v52 = vpop.f32.mrb[47].mxu0  ;;  %v1231_v59 = vpop.f32.mrb[46].mxu1 }
 0x147   : > { %v2549_v34 = vadd.f32 %v2548_v2, %v2547_v3  ;;  %v3446_v11 = vpack.c.bf16 %v4834_v9, %v4834_v9  ;;  %v4847_v33 = vmul.f32 %v4834_v9, %v1228_v29  ;;  %v4849_v3 = vmul.f32 %v1734_v14, %v1231_v59  ;;  %v3686_v2 = vpop.f32.mrb[47].mxu1 }
 0x148   : > { %2420 = vst.msk [vmem:[%s4510_s12 + $0x58] sm:$0xf] %vm2397_vm4, %v3392_v19  ;;  %v2869_v37 = vsel %vm2504_vm5, %v2743_v61, 0.0  ;;  %v3393_v20 = vpack.c.bf16 %v1894_v4, %v1894_v4  ;;  %v2550_v51 = vsel %vm2504_vm5, %v1894_v4, 0.0  ;;  %v2744_v24 = vmul.f32 %v1894_v4, %v1015_v46  ;;  %v1739_v61 = vpop.permute.xlu0 %1738 }
 0x149   : > { %v2870_v12 = vadd.f32 %v2869_v37, %v2868_v22  ;;  %v2551_v60 = vadd.f32 %v2550_v51, %v2549_v34  ;;  %2474 = vst.msk [vmem:[%s4510_s12 + $0x130] sm:$0xf] %vm2397_vm4, %v3446_v11  ;;  %5530 = vst [vmem:[#allocation34_spill] sm:$0xff] %v4849_v3  ;;  %v3447_v22 = vpack.c.bf16 %v4849_v3, %v4849_v3 }
 0x14a   : > { %2421 = vst.msk [vmem:[%s4510_s12 + $0x5c] sm:$0xf] %vm2397_vm4, %v3393_v20  ;;  %v2871_v19 = vsel %vm2504_vm5, %v2744_v24, 0.0  ;;  %v4858_v29 = vmul.f32 %v4849_v3, %v1231_v59 }
 0x14b   : > { %v2872_v52 = vadd.f32 %v2871_v19, %v2870_v12  ;;  %v1020_v62 = vpop.f32.mrb[48].mxu0  ;;  %v1236_v34 = vpop.f32.mrb[48].mxu1  ;;  %2475 = vst.msk [vmem:[%s4510_s12 + $0x134] sm:$0xf] %vm2397_vm4, %v3447_v22 }
 0x14c   : > { %v1895_v46 = vmul.f32 %v4372_v39, %v1020_v62  ;;  %v3581_v4 = vpop.f32.mrb[49].mxu0  ;;  %5531 = vst [vmem:[#allocation35_spill] sm:$0xff] %v4858_v29  ;;  %v4862_v14 = vmul.f32 %v1739_v61, %v1236_v34  ;;  %v3689_v2 = vpop.f32.mrb[49].mxu1 }
 0x14d   : > { %v1023_v11 = vpop.f32.mrb[50].mxu0  ;;  %v1744_v19 = vpop.permute.xlu1 %1743 }
 0x14e   : > { %v3394_v24 = vpack.c.bf16 %v1895_v46, %v1895_v46  ;;  %v2552_v37 = vsel %vm2504_vm5, %v1895_v46, 0.0  ;;  %v2745_v20 = vmul.f32 %v1895_v46, %v1020_v62  ;;  %v1896_v51 = vmul.f32 %v4370_v38, %v1023_v11  ;;  %v3582_v12 = vpop.f32.mrb[51].mxu0  ;;  %v1239_v3 = vpop.f32.mrb[50].mxu1 }
 0x14f   : > { %v2553_v39 = vadd.f32 %v2552_v37, %v2551_v60  ;;  %v3448_v59 = vpack.c.bf16 %v4862_v14, %v4862_v14  ;;  %v4875_v60 = vmul.f32 %v4862_v14, %v1236_v34  ;;  %v4877_v46 = vmul.f32 %v1744_v19, %v1239_v3  ;;  %v3690_v37 = vpop.f32.mrb[51].mxu1 }
 0x150   : > { %2422 = vst.msk [vmem:[%s4510_s12 + $0x60] sm:$0xf] %vm2397_vm4, %v3394_v24  ;;  %v2873_v61 = vsel %vm2504_vm5, %v2745_v20, 0.0  ;;  %v3395_v22 = vpack.c.bf16 %v1896_v51, %v1896_v51  ;;  %v2554_v4 = vsel %vm2504_vm5, %v1896_v51, 0.0  ;;  %v2746_v29 = vmul.f32 %v1896_v51, %v1023_v11  ;;  %v1749_v20 = vpop.permute.xlu0 %1748 }
 0x151   : > { %v2874_v62 = vadd.f32 %v2873_v61, %v2872_v52  ;;  %v2555_v38 = vadd.f32 %v2554_v4, %v2553_v39  ;;  %2476 = vst.msk [vmem:[%s4510_s12 + $0x138] sm:$0xf] %vm2397_vm4, %v3448_v59  ;;  %v3449_v11 = vpack.c.bf16 %v4877_v46, %v4877_v46  ;;  %v4885_v51 = vmul.f32 %v4877_v46, %v1239_v3  ;;  %v1754_v3 = vpop.permute.xlu1 %1753 }
 0x152   : > { %2423 = vst.msk [vmem:[%s4510_s12 + $0x64] sm:$0xf] %vm2397_vm4, %v3395_v22  ;;  %v2875_v24 = vsel %vm2504_vm5, %v2746_v29, 0.0 }
 0x153   : > { %v2876_v12 = vadd.f32 %v2875_v24, %v2874_v62  ;;  %v1028_v52 = vpop.f32.mrb[52].mxu0  ;;  %v1244_v34 = vpop.f32.mrb[52].mxu1  ;;  %2477 = vst.msk [vmem:[%s4510_s12 + $0x13c] sm:$0xf] %vm2397_vm4, %v3449_v11 }
 0x154   : > { %v1897_v39 = vmul.f32 %v4385_v48, %v1028_v52  ;;  %v3585_v59 = vpop.f32.mrb[53].mxu0  ;;  %v4890_v2 = vmul.f32 %v1749_v20, %v1244_v34  ;;  %v3693_v19 = vpop.f32.mrb[53].mxu1 }
 0x155   : > { %v1031_v29 = vpop.f32.mrb[54].mxu0  ;;  %v1247_v62 = vpop.f32.mrb[54].mxu1 }
 0x156   : > { %5532 = vst [vmem:[#allocation36_spill] sm:$0xff] %v4890_v2  ;;  %v3396_v61 = vpack.c.bf16 %v1897_v39, %v1897_v39  ;;  %v2556_v22 = vsel %vm2504_vm5, %v1897_v39, 0.0  ;;  %v2747_v4 = vmul.f32 %v1897_v39, %v1028_v52  ;;  %v3586_v37 = vpop.f32.mrb[55].mxu0  ;;  %v3450_v48 = vpack.c.bf16 %v4890_v2, %v4890_v2  ;;  %v3694_v52 = vpop.f32.mrb[55].mxu1 }
 0x157   : > { %v2557_v24 = vadd.f32 %v2556_v22, %v2555_v38  ;;  %v4896_v59 = vmul.f32 %v4890_v2, %v1244_v34  ;;  %v1898_v11 = vmul.f32 %v4383_v45, %v1031_v29  ;;  %v4902_v19 = vmul.f32 %v1754_v3, %v1247_v62 }
 0x158   : > { %2424 = vst.msk [vmem:[%s4510_s12 + $0x68] sm:$0xf] %vm2397_vm4, %v3396_v61  ;;  %v2877_v20 = vsel %vm2504_vm5, %v2747_v4, 0.0  ;;  %2478 = vst.msk [vmem:[%s4510_s12 + $0x140] sm:$0xf] %vm2397_vm4, %v3450_v48 }
 0x159   : > { %5533 = vst [vmem:[#allocation37_spill] sm:$0xff] %v4896_v59  ;;  %v2878_v39 = vadd.f32 %v2877_v20, %v2876_v12  ;;  %v3397_v38 = vpack.c.bf16 %v1898_v11, %v1898_v11  ;;  %v2558_v22 = vsel %vm2504_vm5, %v1898_v11, 0.0  ;;  %v2748_v37 = vmul.f32 %v1898_v11, %v1031_v29  ;;  %v1759_v59 = vpop.permute.xlu0 %1758 }
 0x15a   : > { %v3451_v34 = vpack.c.bf16 %v4902_v19, %v4902_v19  ;;  %v2559_v61 = vadd.f32 %v2558_v22, %v2557_v24  ;;  %v4910_v2 = vmul.f32 %v4902_v19, %v1247_v62 }
 0x15b   : > { %2425 = vst.msk [vmem:[%s4510_s12 + $0x6c] sm:$0xf] %vm2397_vm4, %v3397_v38  ;;  %v2879_v45 = vsel %vm2504_vm5, %v2748_v37, 0.0  ;;  %v1036_v12 = vpop.f32.mrb[56].mxu0  ;;  %v1252_v4 = vpop.f32.mrb[56].mxu1 }
 0x15c   : > { %5534 = vst [vmem:[#allocation38_spill] sm:$0xff] %v4910_v2  ;;  %2479 = vst.msk [vmem:[%s4510_s12 + $0x144] sm:$0xf] %vm2397_vm4, %v3451_v34  ;;  %v2880_v3 = vadd.f32 %v2879_v45, %v2878_v39  ;;  %v1899_v48 = vmul.f32 %v4400_v55, %v1036_v12  ;;  %v4918_v29 = vmul.f32 %v1759_v59, %v1252_v4  ;;  %v3589_v20 = vpop.f32.mrb[57].mxu0  ;;  %v3697_v24 = vpop.f32.mrb[57].mxu1 }
 0x15d   : > { %v1039_v11 = vpop.f32.mrb[58].mxu0  ;;  %v1255_v62 = vpop.f32.mrb[58].mxu1 }
 0x15e   : > { %v3398_v52 = vpack.c.bf16 %v1899_v48, %v1899_v48  ;;  %v2560_v38 = vsel %vm2504_vm5, %v1899_v48, 0.0  ;;  %v2749_v22 = vmul.f32 %v1899_v48, %v1036_v12  ;;  %v3452_v37 = vpack.c.bf16 %v4918_v29, %v4918_v29  ;;  %v3590_v34 = vpop.f32.mrb[59].mxu0  ;;  %v1764_v2 = vpop.permute.xlu1 %1763 }
 0x15f   : > { %v2561_v39 = vadd.f32 %v2560_v38, %v2559_v61  ;;  %v4924_v55 = vmul.f32 %v4918_v29, %v1252_v4  ;;  %v1900_v59 = vmul.f32 %v4398_v54, %v1039_v11  ;;  %v3698_v45 = vpop.f32.mrb[59].mxu1  ;;  %v4932_v12 = vmul.f32 %v1764_v2, %v1255_v62  ;;  %v1769_v38 = vpop.permute.xlu0 %1768 }
 0x160   : > { %2426 = vst.msk [vmem:[%s4510_s12 + $0x70] sm:$0xf] %vm2397_vm4, %v3398_v52  ;;  %v2881_v20 = vsel %vm2504_vm5, %v2749_v22, 0.0  ;;  %2480 = vst.msk [vmem:[%s4510_s12 + $0x148] sm:$0xf] %vm2397_vm4, %v3452_v37 }
 0x161   : > { %5535 = vst [vmem:[#allocation39_spill] sm:$0xff] %v4924_v55  ;;  %5536 = vst [vmem:[#allocation40_spill] sm:$0xff] %v4932_v12  ;;  %v2882_v48 = vadd.f32 %v2881_v20, %v2880_v3  ;;  %v3399_v24 = vpack.c.bf16 %v1900_v59, %v1900_v59  ;;  %v2562_v61 = vsel %vm2504_vm5, %v1900_v59, 0.0  ;;  %v2750_v4 = vmul.f32 %v1900_v59, %v1039_v11 }
 0x162   : > { %v2563_v34 = vadd.f32 %v2562_v61, %v2561_v39  ;;  %v3453_v54 = vpack.c.bf16 %v4932_v12, %v4932_v12  ;;  %v4940_v52 = vmul.f32 %v4932_v12, %v1255_v62  ;;  %v1774_v12 = vpop.permute.xlu1 %1773 }
 0x163   : > { %v1044_v45 = vpop.f32.mrb[60].mxu0  ;;  %2427 = vst.msk [vmem:[%s4510_s12 + $0x74] sm:$0xf] %vm2397_vm4, %v3399_v24  ;;  %v1260_v2 = vpop.f32.mrb[60].mxu1  ;;  %v2883_v3 = vsel %vm2504_vm5, %v2750_v4, 0.0 }
 0x164   : > { %5537 = vst [vmem:[#allocation41_spill] sm:$0xff] %v4940_v52  ;;  %v1901_v22 = vmul.f32 %v4413_v0, %v1044_v45  ;;  %v3593_v37 = vpop.f32.mrb[61].mxu0  ;;  %2481 = vst.msk [vmem:[%s4510_s12 + $0x14c] sm:$0xf] %vm2397_vm4, %v3453_v54  ;;  %v4946_v39 = vmul.f32 %v1769_v38, %v1260_v2  ;;  %v3701_v11 = vpop.f32.mrb[61].mxu1  ;;  %v2884_v20 = vadd.f32 %v2883_v3, %v2882_v48 }
 0x165   : > { %v1047_v59 = vpop.f32.mrb[62].mxu0  ;;  %v1263_v62 = vpop.f32.mrb[62].mxu1 }
 0x166   : > { %v3400_v61 = vpack.c.bf16 %v1901_v22, %v1901_v22  ;;  %v2564_v24 = vsel %vm2504_vm5, %v1901_v22, 0.0  ;;  %v3594_v52 = vpop.f32.mrb[63].mxu0  ;;  %v2751_v55 = vmul.f32 %v1901_v22, %v1044_v45  ;;  %v3454_v37 = vpack.c.bf16 %v4946_v39, %v4946_v39  ;;  %v3702_v4 = vpop.f32.mrb[63].mxu1 }
 0x167   : > { %v2565_v0 = vadd.f32 %v2564_v24, %v2563_v34  ;;  %v4954_v38 = vmul.f32 %v4946_v39, %v1260_v2  ;;  %v1902_v48 = vmul.f32 %v4411_v63, %v1047_v59  ;;  %v4957_v54 = vmul.f32 %v1774_v12, %v1263_v62  ;;  %v1779_v22 = vpop.permute.xlu0 %1778 }
 0x168   : > { %2428 = vst.msk [vmem:[%s4510_s12 + $0x78] sm:$0xf] %vm2397_vm4, %v3400_v61  ;;  %v2885_v3 = vsel %vm2504_vm5, %v2751_v55, 0.0  ;;  %2482 = vst.msk [vmem:[%s4510_s12 + $0x150] sm:$0xf] %vm2397_vm4, %v3454_v37 }
 0x169   : > { %5538 = vst [vmem:[#allocation42_spill] sm:$0xff] %v4957_v54  ;;  %v2886_v34 = vadd.f32 %v2885_v3, %v2884_v20  ;;  %v3401_v45 = vpack.c.bf16 %v1902_v48, %v1902_v48  ;;  %v2566_v52 = vsel %vm2504_vm5, %v1902_v48, 0.0  ;;  %v2752_v24 = vmul.f32 %v1902_v48, %v1047_v59 }
 0x16a   : > { %v2567_v11 = vadd.f32 %v2566_v52, %v2565_v0  ;;  %v3455_v2 = vpack.c.bf16 %v4957_v54, %v4957_v54  ;;  %v4968_v63 = vmul.f32 %v4957_v54, %v1263_v62 }
 0x16b   : > { %v1052_v61 = vpop.f32.mrb[64].mxu0  ;;  %2429 = vst.msk [vmem:[%s4510_s12 + $0x7c] sm:$0xf] %vm2397_vm4, %v3401_v45  ;;  %v1268_v12 = vpop.f32.mrb[64].mxu1  ;;  %v2887_v20 = vsel %vm2504_vm5, %v2752_v24, 0.0 }
 0x16c   : > { %5539 = vst [vmem:[#allocation43_spill] sm:$0xff] %v4968_v63  ;;  %v1903_v55 = vmul.f32 %v4428_v10, %v1052_v61  ;;  %v3597_v37 = vpop.f32.mrb[65].mxu0  ;;  %2483 = vst.msk [vmem:[%s4510_s12 + $0x154] sm:$0xf] %vm2397_vm4, %v3455_v2  ;;  %v4974_v0 = vmul.f32 %v1779_v22, %v1268_v12  ;;  %v3705_v59 = vpop.f32.mrb[65].mxu1  ;;  %v2888_v48 = vadd.f32 %v2887_v20, %v2886_v34 }
 0x16d   : > { %v1055_v4 = vpop.f32.mrb[66].mxu0  ;;  %v1271_v62 = vpop.f32.mrb[66].mxu1 }
 0x16e   : > { %v3402_v3 = vpack.c.bf16 %v1903_v55, %v1903_v55  ;;  %v2568_v45 = vsel %vm2504_vm5, %v1903_v55, 0.0  ;;  %v3598_v52 = vpop.f32.mrb[67].mxu0  ;;  %v1784_v63 = vpop.permute.xlu1 %1783  ;;  %v2753_v54 = vmul.f32 %v1903_v55, %v1052_v61  ;;  %v3456_v37 = vpack.c.bf16 %v4974_v0, %v4974_v0 }
 0x16f   : > { %v2569_v10 = vadd.f32 %v2568_v45, %v2567_v11  ;;  %v3706_v24 = vpop.f32.mrb[67].mxu1  ;;  %v4982_v22 = vmul.f32 %v4974_v0, %v1268_v12  ;;  %v1904_v34 = vmul.f32 %v4426_v7, %v1055_v4  ;;  %v4985_v2 = vmul.f32 %v1784_v63, %v1271_v62  ;;  %v1789_v59 = vpop.permute.xlu0 %1788 }
 0x170   : > { %2430 = vst.msk [vmem:[%s4510_s12 + $0x80] sm:$0xf] %vm2397_vm4, %v3402_v3  ;;  %v2889_v20 = vsel %vm2504_vm5, %v2753_v54, 0.0  ;;  %2484 = vst.msk [vmem:[%s4510_s12 + $0x158] sm:$0xf] %vm2397_vm4, %v3456_v37 }
 0x171   : > { %5540 = vst [vmem:[#allocation44_spill] sm:$0xff] %v4985_v2  ;;  %v2890_v11 = vadd.f32 %v2889_v20, %v2888_v48  ;;  %v3403_v61 = vpack.c.bf16 %v1904_v34, %v1904_v34  ;;  %v2570_v55 = vsel %vm2504_vm5, %v1904_v34, 0.0  ;;  %v2754_v52 = vmul.f32 %v1904_v34, %v1055_v4 }
 0x172   : > { %v2571_v45 = vadd.f32 %v2570_v55, %v2569_v10  ;;  %v3457_v12 = vpack.c.bf16 %v4985_v2, %v4985_v2  ;;  %v4996_v7 = vmul.f32 %v4985_v2, %v1271_v62 }
 0x173   : > { %v1060_v3 = vpop.f32.mrb[68].mxu0  ;;  %2431 = vst.msk [vmem:[%s4510_s12 + $0x84] sm:$0xf] %vm2397_vm4, %v3403_v61  ;;  %v1276_v63 = vpop.f32.mrb[68].mxu1  ;;  %v2891_v48 = vsel %vm2504_vm5, %v2754_v52, 0.0 }
 0x174   : > { %5541 = vst [vmem:[#allocation45_spill] sm:$0xff] %v4996_v7  ;;  %v1905_v54 = vmul.f32 %v4441_v17, %v1060_v3  ;;  %v3601_v37 = vpop.f32.mrb[69].mxu0  ;;  %2485 = vst.msk [vmem:[%s4510_s12 + $0x15c] sm:$0xf] %vm2397_vm4, %v3457_v12  ;;  %v5002_v10 = vmul.f32 %v1789_v59, %v1276_v63  ;;  %v3709_v4 = vpop.f32.mrb[69].mxu1  ;;  %v2892_v34 = vadd.f32 %v2891_v48, %v2890_v11 }
 0x175   : > { %v1063_v24 = vpop.f32.mrb[70].mxu0  ;;  %v1279_v62 = vpop.f32.mrb[70].mxu1 }
 0x176   : > { %v3404_v20 = vpack.c.bf16 %v1905_v54, %v1905_v54  ;;  %v2572_v61 = vsel %vm2504_vm5, %v1905_v54, 0.0  ;;  %v3602_v55 = vpop.f32.mrb[71].mxu0  ;;  %v1794_v7 = vpop.permute.xlu1 %1793  ;;  %v2755_v2 = vmul.f32 %v1905_v54, %v1060_v3  ;;  %v3458_v37 = vpack.c.bf16 %v5002_v10, %v5002_v10 }
 0x177   : > { %v2573_v17 = vadd.f32 %v2572_v61, %v2571_v45  ;;  %v3710_v52 = vpop.f32.mrb[71].mxu1  ;;  %v5010_v59 = vmul.f32 %v5002_v10, %v1276_v63  ;;  %v1906_v11 = vmul.f32 %v4439_v16, %v1063_v24  ;;  %v5013_v12 = vmul.f32 %v1794_v7, %v1279_v62  ;;  %v1799_v4 = vpop.permute.xlu0 %1798 }
 0x178   : > { %2432 = vst.msk [vmem:[%s4510_s12 + $0x88] sm:$0xf] %vm2397_vm4, %v3404_v20  ;;  %v2893_v48 = vsel %vm2504_vm5, %v2755_v2, 0.0  ;;  %2486 = vst.msk [vmem:[%s4510_s12 + $0x160] sm:$0xf] %vm2397_vm4, %v3458_v37 }
 0x179   : > { %5542 = vst [vmem:[#allocation46_spill] sm:$0xff] %v5013_v12  ;;  %v2894_v45 = vadd.f32 %v2893_v48, %v2892_v34  ;;  %v3405_v3 = vpack.c.bf16 %v1906_v11, %v1906_v11  ;;  %v2574_v54 = vsel %vm2504_vm5, %v1906_v11, 0.0  ;;  %v2756_v55 = vmul.f32 %v1906_v11, %v1063_v24 }
 0x17a   : > { %v2575_v61 = vadd.f32 %v2574_v54, %v2573_v17  ;;  %v3459_v63 = vpack.c.bf16 %v5013_v12, %v5013_v12  ;;  %v5024_v16 = vmul.f32 %v5013_v12, %v1279_v62 }
 0x17b   : > { %v1068_v20 = vpop.f32.mrb[72].mxu0  ;;  %2433 = vst.msk [vmem:[%s4510_s12 + $0x8c] sm:$0xf] %vm2397_vm4, %v3405_v3  ;;  %v1284_v7 = vpop.f32.mrb[72].mxu1  ;;  %v2895_v34 = vsel %vm2504_vm5, %v2756_v55, 0.0 }
 0x17c   : > { %5543 = vst [vmem:[#allocation47_spill] sm:$0xff] %v5024_v16  ;;  %v1907_v2 = vmul.f32 %v4456_v26, %v1068_v20  ;;  %v3605_v37 = vpop.f32.mrb[73].mxu0  ;;  %2487 = vst.msk [vmem:[%s4510_s12 + $0x164] sm:$0xf] %vm2397_vm4, %v3459_v63  ;;  %v5030_v17 = vmul.f32 %v1799_v4, %v1284_v7  ;;  %v3713_v24 = vpop.f32.mrb[73].mxu1  ;;  %v2896_v11 = vadd.f32 %v2895_v34, %v2894_v45 }
 0x17d   : > { %v1071_v52 = vpop.f32.mrb[74].mxu0  ;;  %v1287_v62 = vpop.f32.mrb[74].mxu1 }
 0x17e   : > { %v3406_v48 = vpack.c.bf16 %v1907_v2, %v1907_v2  ;;  %v2576_v3 = vsel %vm2504_vm5, %v1907_v2, 0.0  ;;  %v3606_v54 = vpop.f32.mrb[75].mxu0  ;;  %v1804_v16 = vpop.permute.xlu1 %1803  ;;  %v2757_v12 = vmul.f32 %v1907_v2, %v1068_v20  ;;  %v3460_v37 = vpack.c.bf16 %v5030_v17, %v5030_v17 }
 0x17f   : > { %v2577_v26 = vadd.f32 %v2576_v3, %v2575_v61  ;;  %v3714_v55 = vpop.f32.mrb[75].mxu1  ;;  %v5038_v4 = vmul.f32 %v5030_v17, %v1284_v7  ;;  %v1908_v45 = vmul.f32 %v4454_v25, %v1071_v52  ;;  %v5041_v63 = vmul.f32 %v1804_v16, %v1287_v62  ;;  %v1809_v24 = vpop.permute.xlu0 %1808 }
 0x180   : > { %2434 = vst.msk [vmem:[%s4510_s12 + $0x90] sm:$0xf] %vm2397_vm4, %v3406_v48  ;;  %v2897_v34 = vsel %vm2504_vm5, %v2757_v12, 0.0  ;;  %2488 = vst.msk [vmem:[%s4510_s12 + $0x168] sm:$0xf] %vm2397_vm4, %v3460_v37 }
 0x181   : > { %5544 = vst [vmem:[#allocation48_spill] sm:$0xff] %v5041_v63  ;;  %v2898_v61 = vadd.f32 %v2897_v34, %v2896_v11  ;;  %v3407_v20 = vpack.c.bf16 %v1908_v45, %v1908_v45  ;;  %v2578_v2 = vsel %vm2504_vm5, %v1908_v45, 0.0  ;;  %v2758_v54 = vmul.f32 %v1908_v45, %v1071_v52 }
 0x182   : > { %v2579_v3 = vadd.f32 %v2578_v2, %v2577_v26  ;;  %v3461_v7 = vpack.c.bf16 %v5041_v63, %v5041_v63  ;;  %v5052_v25 = vmul.f32 %v5041_v63, %v1287_v62 }
 0x183   : > { %v1076_v48 = vpop.f32.mrb[76].mxu0  ;;  %2435 = vst.msk [vmem:[%s4510_s12 + $0x94] sm:$0xf] %vm2397_vm4, %v3407_v20  ;;  %v1292_v16 = vpop.f32.mrb[76].mxu1  ;;  %v2899_v11 = vsel %vm2504_vm5, %v2758_v54, 0.0 }
 0x184   : > { %5545 = vst [vmem:[#allocation49_spill] sm:$0xff] %v5052_v25  ;;  %v1909_v12 = vmul.f32 %v4469_v35, %v1076_v48  ;;  %v3609_v37 = vpop.f32.mrb[77].mxu0  ;;  %2489 = vst.msk [vmem:[%s4510_s12 + $0x16c] sm:$0xf] %vm2397_vm4, %v3461_v7  ;;  %v5058_v26 = vmul.f32 %v1809_v24, %v1292_v16  ;;  %v3717_v52 = vpop.f32.mrb[77].mxu1  ;;  %v2900_v45 = vadd.f32 %v2899_v11, %v2898_v61 }
 0x185   : > { %v1079_v55 = vpop.f32.mrb[78].mxu0  ;;  %v1295_v62 = vpop.f32.mrb[78].mxu1 }
 0x186   : > { %v3408_v34 = vpack.c.bf16 %v1909_v12, %v1909_v12  ;;  %v2580_v20 = vsel %vm2504_vm5, %v1909_v12, 0.0  ;;  %v3610_v2 = vpop.f32.mrb[79].mxu0  ;;  %v1814_v25 = vpop.permute.xlu1 %1813  ;;  %v2759_v63 = vmul.f32 %v1909_v12, %v1076_v48  ;;  %v3462_v37 = vpack.c.bf16 %v5058_v26, %v5058_v26 }
 0x187   : > { %v2581_v35 = vadd.f32 %v2580_v20, %v2579_v3  ;;  %v3718_v54 = vpop.f32.mrb[79].mxu1  ;;  %v5066_v24 = vmul.f32 %v5058_v26, %v1292_v16  ;;  %v1910_v61 = vmul.f32 %v4467_v32, %v1079_v55  ;;  %v5069_v7 = vmul.f32 %v1814_v25, %v1295_v62  ;;  %v1819_v52 = vpop.permute.xlu0 %1818 }
 0x188   : > { %2436 = vst.msk [vmem:[%s4510_s12 + $0x98] sm:$0xf] %vm2397_vm4, %v3408_v34  ;;  %v2901_v11 = vsel %vm2504_vm5, %v2759_v63, 0.0  ;;  %2490 = vst.msk [vmem:[%s4510_s12 + $0x170] sm:$0xf] %vm2397_vm4, %v3462_v37 }
 0x189   : > { %5546 = vst [vmem:[#allocation50_spill] sm:$0xff] %v5069_v7  ;;  %v2902_v3 = vadd.f32 %v2901_v11, %v2900_v45  ;;  %v3409_v48 = vpack.c.bf16 %v1910_v61, %v1910_v61  ;;  %v2582_v12 = vsel %vm2504_vm5, %v1910_v61, 0.0  ;;  %v2760_v2 = vmul.f32 %v1910_v61, %v1079_v55 }
 0x18a   : > { %v2583_v20 = vadd.f32 %v2582_v12, %v2581_v35  ;;  %v3463_v16 = vpack.c.bf16 %v5069_v7, %v5069_v7  ;;  %v5080_v32 = vmul.f32 %v5069_v7, %v1295_v62 }
 0x18b   : > { %v1084_v34 = vpop.f32.mrb[80].mxu0  ;;  %2437 = vst.msk [vmem:[%s4510_s12 + $0x9c] sm:$0xf] %vm2397_vm4, %v3409_v48  ;;  %v1300_v25 = vpop.f32.mrb[80].mxu1  ;;  %v2903_v45 = vsel %vm2504_vm5, %v2760_v2, 0.0 }
 0x18c   : > { %5547 = vst [vmem:[#allocation51_spill] sm:$0xff] %v5080_v32  ;;  %v1911_v63 = vmul.f32 %v4481_v43, %v1084_v34  ;;  %v3613_v37 = vpop.f32.mrb[81].mxu0  ;;  %2491 = vst.msk [vmem:[%s4510_s12 + $0x174] sm:$0xf] %vm2397_vm4, %v3463_v16  ;;  %v5086_v35 = vmul.f32 %v1819_v52, %v1300_v25  ;;  %v3721_v55 = vpop.f32.mrb[81].mxu1  ;;  %v2904_v61 = vadd.f32 %v2903_v45, %v2902_v3 }
 0x18d   : > { %v1087_v54 = vpop.f32.mrb[82].mxu0  ;;  %v1303_v62 = vpop.f32.mrb[82].mxu1 }
 0x18e   : > { %v3410_v11 = vpack.c.bf16 %v1911_v63, %v1911_v63  ;;  %v2584_v48 = vsel %vm2504_vm5, %v1911_v63, 0.0  ;;  %v3614_v12 = vpop.f32.mrb[83].mxu0  ;;  %v1824_v32 = vpop.permute.xlu1 %1823  ;;  %v2761_v7 = vmul.f32 %v1911_v63, %v1084_v34  ;;  %v3464_v37 = vpack.c.bf16 %v5086_v35, %v5086_v35 }
 0x18f   : > { %v2585_v43 = vadd.f32 %v2584_v48, %v2583_v20  ;;  %v3722_v2 = vpop.f32.mrb[83].mxu1  ;;  %v5094_v52 = vmul.f32 %v5086_v35, %v1300_v25  ;;  %v1912_v3 = vmul.f32 %v4479_v40, %v1087_v54  ;;  %v5097_v16 = vmul.f32 %v1824_v32, %v1303_v62  ;;  %v1829_v55 = vpop.permute.xlu0 %1828 }
 0x190   : > { %2438 = vst.msk [vmem:[%s4510_s12 + $0xa0] sm:$0xf] %vm2397_vm4, %v3410_v11  ;;  %v2905_v45 = vsel %vm2504_vm5, %v2761_v7, 0.0  ;;  %2492 = vst.msk [vmem:[%s4510_s12 + $0x178] sm:$0xf] %vm2397_vm4, %v3464_v37 }
 0x191   : > { %5548 = vst [vmem:[#allocation52_spill] sm:$0xff] %v5097_v16  ;;  %v2906_v20 = vadd.f32 %v2905_v45, %v2904_v61  ;;  %v3411_v34 = vpack.c.bf16 %v1912_v3, %v1912_v3  ;;  %v2586_v63 = vsel %vm2504_vm5, %v1912_v3, 0.0  ;;  %v2762_v12 = vmul.f32 %v1912_v3, %v1087_v54 }
 0x192   : > { %v2587_v48 = vadd.f32 %v2586_v63, %v2585_v43  ;;  %v3465_v25 = vpack.c.bf16 %v5097_v16, %v5097_v16  ;;  %v5108_v40 = vmul.f32 %v5097_v16, %v1303_v62 }
 0x193   : > { %v1092_v11 = vpop.f32.mrb[84].mxu0  ;;  %2439 = vst.msk [vmem:[%s4510_s12 + $0xa4] sm:$0xf] %vm2397_vm4, %v3411_v34  ;;  %v1308_v32 = vpop.f32.mrb[84].mxu1  ;;  %v2907_v61 = vsel %vm2504_vm5, %v2762_v12, 0.0 }
 0x194   : > { %5549 = vst [vmem:[#allocation53_spill] sm:$0xff] %v5108_v40  ;;  %v1913_v7 = vmul.f32 %v4488_v50, %v1092_v11  ;;  %v3617_v37 = vpop.f32.mrb[85].mxu0  ;;  %2493 = vst.msk [vmem:[%s4510_s12 + $0x17c] sm:$0xf] %vm2397_vm4, %v3465_v25  ;;  %v5114_v43 = vmul.f32 %v1829_v55, %v1308_v32  ;;  %v3725_v54 = vpop.f32.mrb[85].mxu1  ;;  %v2908_v3 = vadd.f32 %v2907_v61, %v2906_v20 }
 0x195   : > { %v1095_v2 = vpop.f32.mrb[86].mxu0  ;;  %v1311_v62 = vpop.f32.mrb[86].mxu1 }
 0x196   : > { %v3412_v45 = vpack.c.bf16 %v1913_v7, %v1913_v7  ;;  %v2588_v34 = vsel %vm2504_vm5, %v1913_v7, 0.0  ;;  %v3618_v63 = vpop.f32.mrb[87].mxu0  ;;  %v1834_v40 = vpop.permute.xlu1 %1833  ;;  %v2763_v16 = vmul.f32 %v1913_v7, %v1092_v11  ;;  %v3466_v37 = vpack.c.bf16 %v5114_v43, %v5114_v43 }
 0x197   : > { %v2589_v50 = vadd.f32 %v2588_v34, %v2587_v48  ;;  %v3726_v12 = vpop.f32.mrb[87].mxu1  ;;  %v5122_v55 = vmul.f32 %v5114_v43, %v1308_v32  ;;  %v1914_v20 = vmul.f32 %v4486_v49, %v1095_v2  ;;  %v5125_v25 = vmul.f32 %v1834_v40, %v1311_v62  ;;  %v1839_v54 = vpop.permute.xlu0 %1838 }
 0x198   : > { %2440 = vst.msk [vmem:[%s4510_s12 + $0xa8] sm:$0xf] %vm2397_vm4, %v3412_v45  ;;  %v2909_v61 = vsel %vm2504_vm5, %v2763_v16, 0.0  ;;  %2494 = vst.msk [vmem:[%s4510_s12 + $0x180] sm:$0xf] %vm2397_vm4, %v3466_v37  ;;  %v5553_v16 = vld [vmem:[#allocation3_spill] sm:$0xff] }
 0x199   : > { %5550 = vst [vmem:[#allocation54_spill] sm:$0xff] %v5122_v55  ;;  %5551 = vst [vmem:[#allocation55_spill] sm:$0xff] %v5125_v25  ;;  %v2910_v48 = vadd.f32 %v2909_v61, %v2908_v3  ;;  %v3413_v11 = vpack.c.bf16 %v1914_v20, %v1914_v20  ;;  %v2590_v7 = vsel %vm2504_vm5, %v1914_v20, 0.0  ;;  %v2764_v63 = vmul.f32 %v1914_v20, %v1095_v2 }
 0x19a   : > { %v2591_v34 = vadd.f32 %v2590_v7, %v2589_v50  ;;  %v3467_v32 = vpack.c.bf16 %v5125_v25, %v5125_v25  ;;  %v5136_v49 = vmul.f32 %v5125_v25, %v1311_v62  ;;  %v1844_v25 = vpop.permute.xlu1 %1843 }
 0x19b   : > { %v1100_v45 = vpop.f32.mrb[88].mxu0  ;;  %2441 = vst.msk [vmem:[%s4510_s12 + $0xac] sm:$0xf] %vm2397_vm4, %v3413_v11  ;;  %v1316_v12 = vpop.f32.mrb[88].mxu1  ;;  %v2911_v3 = vsel %vm2504_vm5, %v2764_v63, 0.0 }
 0x19c   : > { %5552 = vst [vmem:[#allocation56_spill] sm:$0xff] %v5136_v49  ;;  %v1915_v40 = vmul.f32 %v5553_v16, %v1100_v45  ;;  %v3621_v37 = vpop.f32.mrb[89].mxu0  ;;  %2495 = vst.msk [vmem:[%s4510_s12 + $0x184] sm:$0xf] %vm2397_vm4, %v3467_v32  ;;  %v5142_v50 = vmul.f32 %v1839_v54, %v1316_v12  ;;  %v3729_v2 = vpop.f32.mrb[89].mxu1  ;;  %v2912_v61 = vadd.f32 %v2911_v3, %v2910_v48  ;;  %v5556_v32 = vld [vmem:[#allocation2_spill] sm:$0xff] }
 0x19d   : > { %v1103_v20 = vpop.f32.mrb[90].mxu0  ;;  %v1319_v62 = vpop.f32.mrb[90].mxu1 }
 0x19e   : > { %5554 = vst [vmem:[#allocation3_spill] sm:$0xff] %v5142_v50  ;;  %v3414_v7 = vpack.c.bf16 %v1915_v40, %v1915_v40  ;;  %v2592_v11 = vsel %vm2504_vm5, %v1915_v40, 0.0  ;;  %v3622_v49 = vpop.f32.mrb[91].mxu0  ;;  %v2765_v55 = vmul.f32 %v1915_v40, %v1100_v45  ;;  %v3468_v37 = vpack.c.bf16 %v5142_v50, %v5142_v50  ;;  %v3730_v63 = vpop.f32.mrb[91].mxu1 }
 0x19f   : > { %v2593_v16 = vadd.f32 %v2592_v11, %v2591_v34  ;;  %v5150_v54 = vmul.f32 %v5142_v50, %v1316_v12  ;;  %v1916_v48 = vmul.f32 %v5556_v32, %v1103_v20  ;;  %v5153_v3 = vmul.f32 %v1844_v25, %v1319_v62  ;;  %v1849_v40 = vpop.permute.xlu0 %1848 }
 0x1a0   : > { %2442 = vst.msk [vmem:[%s4510_s12 + $0xb0] sm:$0xf] %vm2397_vm4, %v3414_v7  ;;  %v2913_v2 = vsel %vm2504_vm5, %v2765_v55, 0.0  ;;  %2496 = vst.msk [vmem:[%s4510_s12 + $0x188] sm:$0xf] %vm2397_vm4, %v3468_v37  ;;  %v5559_v55 = vld [vmem:[#allocation5_spill] sm:$0xff] }
 0x1a1   : > { %5555 = vst [vmem:[#allocation57_spill] sm:$0xff] %v5150_v54  ;;  %5557 = vst [vmem:[#allocation2_spill] sm:$0xff] %v5153_v3  ;;  %v2914_v34 = vadd.f32 %v2913_v2, %v2912_v61  ;;  %v3415_v45 = vpack.c.bf16 %v1916_v48, %v1916_v48  ;;  %v2594_v49 = vsel %vm2504_vm5, %v1916_v48, 0.0  ;;  %v2766_v63 = vmul.f32 %v1916_v48, %v1103_v20 }
 0x1a2   : > { %v2595_v11 = vadd.f32 %v2594_v49, %v2593_v16  ;;  %v3469_v12 = vpack.c.bf16 %v5153_v3, %v5153_v3  ;;  %v5164_v25 = vmul.f32 %v5153_v3, %v1319_v62  ;;  %v1854_v3 = vpop.permute.xlu1 %1853 }
 0x1a3   : > { %v1108_v7 = vpop.f32.mrb[92].mxu0  ;;  %2443 = vst.msk [vmem:[%s4510_s12 + $0xb4] sm:$0xf] %vm2397_vm4, %v3415_v45  ;;  %v1324_v54 = vpop.f32.mrb[92].mxu1  ;;  %v2915_v61 = vsel %vm2504_vm5, %v2766_v63, 0.0 }
 0x1a4   : > { %5558 = vst [vmem:[#allocation58_spill] sm:$0xff] %v5164_v25  ;;  %v1917_v32 = vmul.f32 %v5559_v55, %v1108_v7  ;;  %v3625_v37 = vpop.f32.mrb[93].mxu0  ;;  %2497 = vst.msk [vmem:[%s4510_s12 + $0x18c] sm:$0xf] %vm2397_vm4, %v3469_v12  ;;  %v5170_v16 = vmul.f32 %v1849_v40, %v1324_v54  ;;  %v3733_v20 = vpop.f32.mrb[93].mxu1  ;;  %v2916_v2 = vadd.f32 %v2915_v61, %v2914_v34  ;;  %v5562_v12 = vld [vmem:[#allocation4_spill] sm:$0xff] }
 0x1a5   : > { %v1111_v48 = vpop.f32.mrb[94].mxu0  ;;  %v1327_v62 = vpop.f32.mrb[94].mxu1 }
 0x1a6   : > { %5560 = vst [vmem:[#allocation5_spill] sm:$0xff] %v5170_v16  ;;  %v3416_v49 = vpack.c.bf16 %v1917_v32, %v1917_v32  ;;  %v2596_v45 = vsel %vm2504_vm5, %v1917_v32, 0.0  ;;  %v3626_v25 = vpop.f32.mrb[95].mxu0  ;;  %v2767_v50 = vmul.f32 %v1917_v32, %v1108_v7  ;;  %v3470_v37 = vpack.c.bf16 %v5170_v16, %v5170_v16  ;;  %v3734_v63 = vpop.f32.mrb[95].mxu1 }
 0x1a7   : > { %v2597_v55 = vadd.f32 %v2596_v45, %v2595_v11  ;;  %v5178_v40 = vmul.f32 %v5170_v16, %v1324_v54  ;;  %v1918_v34 = vmul.f32 %v5562_v12, %v1111_v48  ;;  %v5181_v61 = vmul.f32 %v1854_v3, %v1327_v62  ;;  %v1859_v32 = vpop.permute.xlu0 %1858 }
 0x1a8   : > { %2444 = vst.msk [vmem:[%s4510_s12 + $0xb8] sm:$0xf] %vm2397_vm4, %v3416_v49  ;;  %v2917_v20 = vsel %vm2504_vm5, %v2767_v50, 0.0  ;;  %2498 = vst.msk [vmem:[%s4510_s12 + $0x190] sm:$0xf] %vm2397_vm4, %v3470_v37  ;;  %v5565_v50 = vld [vmem:[#allocation7_spill] sm:$0xff] }
 0x1a9   : > { %5561 = vst [vmem:[#allocation59_spill] sm:$0xff] %v5178_v40  ;;  %5563 = vst [vmem:[#allocation4_spill] sm:$0xff] %v5181_v61  ;;  %v2918_v11 = vadd.f32 %v2917_v20, %v2916_v2  ;;  %v3417_v7 = vpack.c.bf16 %v1918_v34, %v1918_v34  ;;  %v2598_v25 = vsel %vm2504_vm5, %v1918_v34, 0.0  ;;  %v2768_v63 = vmul.f32 %v1918_v34, %v1111_v48 }
 0x1aa   : > { %v2599_v45 = vadd.f32 %v2598_v25, %v2597_v55  ;;  %v3471_v54 = vpack.c.bf16 %v5181_v61, %v5181_v61  ;;  %v5192_v3 = vmul.f32 %v5181_v61, %v1327_v62  ;;  %v1864_v61 = vpop.permute.xlu1 %1863 }
 0x1ab   : > { %v1116_v49 = vpop.f32.mrb[96].mxu0  ;;  %2445 = vst.msk [vmem:[%s4510_s12 + $0xbc] sm:$0xf] %vm2397_vm4, %v3417_v7  ;;  %v1332_v40 = vpop.f32.mrb[96].mxu1  ;;  %v2919_v2 = vsel %vm2504_vm5, %v2768_v63, 0.0 }
 0x1ac   : > { %5564 = vst [vmem:[#allocation60_spill] sm:$0xff] %v5192_v3  ;;  %v1919_v12 = vmul.f32 %v5565_v50, %v1116_v49  ;;  %v3629_v37 = vpop.f32.mrb[97].mxu0  ;;  %2499 = vst.msk [vmem:[%s4510_s12 + $0x194] sm:$0xf] %vm2397_vm4, %v3471_v54  ;;  %v5198_v55 = vmul.f32 %v1859_v32, %v1332_v40  ;;  %v3737_v48 = vpop.f32.mrb[97].mxu1  ;;  %v2920_v20 = vadd.f32 %v2919_v2, %v2918_v11  ;;  %v5567_v54 = vld [vmem:[#allocation6_spill] sm:$0xff] }
 0x1ad   : > { %v1119_v34 = vpop.f32.mrb[98].mxu0  ;;  %v1335_v62 = vpop.f32.mrb[98].mxu1 }
 0x1ae   : > { %v3418_v25 = vpack.c.bf16 %v1919_v12, %v1919_v12  ;;  %v2600_v7 = vsel %vm2504_vm5, %v1919_v12, 0.0  ;;  %v3630_v3 = vpop.f32.mrb[99].mxu0  ;;  %v2769_v16 = vmul.f32 %v1919_v12, %v1116_v49  ;;  %v3472_v37 = vpack.c.bf16 %v5198_v55, %v5198_v55  ;;  %v3738_v63 = vpop.f32.mrb[99].mxu1 }
 0x1af   : > { %v2601_v50 = vadd.f32 %v2600_v7, %v2599_v45  ;;  %v5206_v32 = vmul.f32 %v5198_v55, %v1332_v40  ;;  %v1920_v11 = vmul.f32 %v5567_v54, %v1119_v34  ;;  %v5209_v2 = vmul.f32 %v1864_v61, %v1335_v62  ;;  %v1869_v12 = vpop.permute.xlu0 %1868 }
 0x1b0   : > { %2446 = vst.msk [vmem:[%s4510_s12 + $0xc0] sm:$0xf] %vm2397_vm4, %v3418_v25  ;;  %v2921_v48 = vsel %vm2504_vm5, %v2769_v16, 0.0  ;;  %2500 = vst.msk [vmem:[%s4510_s12 + $0x198] sm:$0xf] %vm2397_vm4, %v3472_v37  ;;  %v5570_v16 = vld [vmem:[#allocation9_spill] sm:$0xff] }
 0x1b1   : > { %5566 = vst [vmem:[#allocation7_spill] sm:$0xff] %v5206_v32  ;;  %5568 = vst [vmem:[#allocation6_spill] sm:$0xff] %v5209_v2  ;;  %v2922_v45 = vadd.f32 %v2921_v48, %v2920_v20  ;;  %v3419_v49 = vpack.c.bf16 %v1920_v11, %v1920_v11  ;;  %v2602_v3 = vsel %vm2504_vm5, %v1920_v11, 0.0  ;;  %v2770_v63 = vmul.f32 %v1920_v11, %v1119_v34 }
 0x1b2   : > { %v2603_v7 = vadd.f32 %v2602_v3, %v2601_v50  ;;  %v3473_v40 = vpack.c.bf16 %v5209_v2, %v5209_v2  ;;  %v5220_v61 = vmul.f32 %v5209_v2, %v1335_v62 }
 0x1b3   : > { %v1124_v25 = vpop.f32.mrb[100].mxu0  ;;  %2447 = vst.msk [vmem:[%s4510_s12 + $0xc4] sm:$0xf] %vm2397_vm4, %v3419_v49  ;;  %v1340_v32 = vpop.f32.mrb[100].mxu1  ;;  %v2923_v20 = vsel %vm2504_vm5, %v2770_v63, 0.0 }
 0x1b4   : > { %5569 = vst [vmem:[#allocation61_spill] sm:$0xff] %v5220_v61  ;;  %v1921_v54 = vmul.f32 %v5570_v16, %v1124_v25  ;;  %v3633_v37 = vpop.f32.mrb[101].mxu0  ;;  %2501 = vst.msk [vmem:[%s4510_s12 + $0x19c] sm:$0xf] %vm2397_vm4, %v3473_v40  ;;  %v5226_v50 = vmul.f32 %v1869_v12, %v1340_v32  ;;  %v3741_v11 = vpop.f32.mrb[101].mxu1  ;;  %v2924_v48 = vadd.f32 %v2923_v20, %v2922_v45  ;;  %v5573_v40 = vld [vmem:[#allocation8_spill] sm:$0xff] }
 0x1b5   : > { %v1127_v34 = vpop.f32.mrb[102].mxu0  ;;  %v1343_v61 = vpop.f32.mrb[102].mxu1 }
 0x1b6   : > { %5571 = vst [vmem:[#allocation9_spill] sm:$0xff] %v5226_v50  ;;  %v3420_v3 = vpack.c.bf16 %v1921_v54, %v1921_v54  ;;  %v2604_v49 = vsel %vm2504_vm5, %v1921_v54, 0.0  ;;  %v3634_v62 = vpop.f32.mrb[103].mxu0  ;;  %v2771_v37 = vmul.f32 %v1921_v54, %v1124_v25  ;;  %v3474_v63 = vpack.c.bf16 %v5226_v50, %v5226_v50  ;;  %v3742_v2 = vpop.f32.mrb[103].mxu1 }
 0x1b7   : > { %v2605_v16 = vadd.f32 %v2604_v49, %v2603_v7  ;;  %v5234_v12 = vmul.f32 %v5226_v50, %v1340_v32  ;;  %v1922_v45 = vmul.f32 %v5573_v40, %v1127_v34  ;;  %v5574_v50 = vld [vmem:[#allocation10_spill] sm:$0xff] }
 0x1b8   : > { %2448 = vst.msk [vmem:[%s4510_s12 + $0xc8] sm:$0xf] %vm2397_vm4, %v3420_v3  ;;  %v2925_v20 = vsel %vm2504_vm5, %v2771_v37, 0.0 }
 0x1b9   : > { %5572 = vst [vmem:[#allocation62_spill] sm:$0xff] %v5234_v12  ;;  %2503 = vst.msk [vmem:[%s4510_s12 + $0x1a0] sm:$0x7] %vm2502_vm6, %v3474_v63  ;;  %v2926_v11 = vadd.f32 %v2925_v20, %v2924_v48  ;;  %v3421_v62 = vpack.c.bf16 %v1922_v45, %v1922_v45  ;;  %v2606_v61 = vsel %vm2504_vm5, %v1922_v45, 0.0  ;;  %v2772_v25 = vmul.f32 %v1922_v45, %v1127_v34 }
 0x1ba   : > { %v2607_v7 = vadd.f32 %v2606_v61, %v2605_v16 }
 0x1bb   : > { %v1132_v54 = vpop.f32.mrb[104].mxu0  ;;  %2449 = vst.msk [vmem:[%s4510_s12 + $0xcc] sm:$0xf] %vm2397_vm4, %v3421_v62  ;;  %v2927_v32 = vsel %vm2504_vm5, %v2772_v25, 0.0 }
 0x1bc   : > { %v1923_v2 = vmul.f32 %v4534_v15, %v1132_v54  ;;  %v3637_v3 = vpop.f32.mrb[105].mxu0  ;;  %v2928_v40 = vadd.f32 %v2927_v32, %v2926_v11  ;;  %v2612_v11 = vsel %vm2504_vm5, %v4546_v21, 0.0  ;;  %v5576_v32 = vld [vmem:[#allocation11_spill] sm:$0xff]  ;;  %v2616_v21 = vsel %vm2504_vm5, %v4566_v36, 0.0 }
 0x1bd   : > { %v1135_v49 = vpop.f32.mrb[106].mxu0 }
 0x1be   : > { %v3422_v37 = vpack.c.bf16 %v1923_v2, %v1923_v2  ;;  %v2608_v48 = vsel %vm2504_vm5, %v1923_v2, 0.0  ;;  %v2773_v63 = vmul.f32 %v1923_v2, %v1132_v54  ;;  %v3638_v20 = vpop.f32.mrb[107].mxu0  ;;  %v1924_v16 = vmul.f32 %v5574_v50, %v1135_v49  ;;  %v5575_v50 = vld [vmem:[#allocation13_spill] sm:$0xff] }
 0x1bf   : > { %v2609_v12 = vadd.f32 %v2608_v48, %v2607_v7  ;;  %v2933_v3 = vsel %vm2504_vm5, %v5575_v50, 0.0  ;;  %v2622_v50 = vsel %vm2504_vm5, %v4586_v30, 0.0 }
 0x1c0   : > { %2450 = vst.msk [vmem:[%s4510_s12 + $0xd0] sm:$0xf] %vm2397_vm4, %v3422_v37  ;;  %v2929_v34 = vsel %vm2504_vm5, %v2773_v63, 0.0  ;;  %v3423_v15 = vpack.c.bf16 %v1924_v16, %v1924_v16  ;;  %v2610_v62 = vsel %vm2504_vm5, %v1924_v16, 0.0  ;;  %v2774_v61 = vmul.f32 %v1924_v16, %v1135_v49  ;;  %v5577_v63 = vld [vmem:[#allocation12_spill] sm:$0xff] }
 0x1c1   : > { %v2930_v45 = vadd.f32 %v2929_v34, %v2928_v40  ;;  %v2611_v25 = vadd.f32 %v2610_v62, %v2609_v12  ;;  %v2614_v40 = vsel %vm2504_vm5, %v5576_v32, 0.0  ;;  %v2935_v12 = vsel %vm2504_vm5, %v5577_v63, 0.0  ;;  %v5578_v62 = vld [vmem:[#allocation15_spill] sm:$0xff]  ;;  %v5581_v63 = vld [vmem:[#allocation17_spill] sm:$0xff] }
 0x1c2   : > { %2451 = vst.msk [vmem:[%s4510_s12 + $0xd4] sm:$0xf] %vm2397_vm4, %v3423_v15  ;;  %v2931_v54 = vsel %vm2504_vm5, %v2774_v61, 0.0  ;;  %v2937_v16 = vsel %vm2504_vm5, %v4578_v47, 0.0  ;;  %v2618_v34 = vsel %vm2504_vm5, %v4580_v6, 0.0  ;;  %v2939_v61 = vsel %vm2504_vm5, %v5578_v62, 0.0 }
 0x1c3   : > { %v2613_v7 = vadd.f32 %v2612_v11, %v2611_v25  ;;  %v2932_v2 = vadd.f32 %v2931_v54, %v2930_v45  ;;  %v5579_v25 = vld [vmem:[#allocation14_spill] sm:$0xff]  ;;  %v2943_v6 = vsel %vm2504_vm5, %v4614_v27, 0.0  ;;  %v2624_v32 = vsel %vm2504_vm5, %v4619_v57, 0.0 }
 0x1c4   : > { %v2620_v11 = vsel %vm2504_vm5, %v5579_v25, 0.0  ;;  %v5585_v25 = vld [vmem:[#allocation21_spill] sm:$0xff] }
 0x1c5   : > { %v2615_v37 = vadd.f32 %v2614_v40, %v2613_v7  ;;  %v2934_v48 = vadd.f32 %v2933_v3, %v2932_v2  ;;  %v5580_v2 = vld [vmem:[#allocation16_spill] sm:$0xff] }
 0x1c6   : > { %v2941_v36 = vsel %vm2504_vm5, %v5580_v2, 0.0 }
 0x1c7   : > { %v2617_v49 = vadd.f32 %v2616_v21, %v2615_v37  ;;  %v2936_v20 = vadd.f32 %v2935_v12, %v2934_v48  ;;  %v2945_v48 = vsel %vm2504_vm5, %v4627_v44, 0.0  ;;  %v2626_v12 = vsel %vm2504_vm5, %v5581_v63, 0.0  ;;  %v5588_v63 = vld [vmem:[#allocation24_spill] sm:$0xff] }
 0x1c9   : > { %v2619_v45 = vadd.f32 %v2618_v34, %v2617_v49  ;;  %v2938_v15 = vadd.f32 %v2937_v16, %v2936_v20  ;;  %v5582_v20 = vld [vmem:[#allocation18_spill] sm:$0xff]  ;;  %v2628_v16 = vsel %vm2504_vm5, %v4634_v56, 0.0  ;;  %v2953_v56 = vsel %vm2504_vm5, %v4679_v42, 0.0 }
 0x1ca   : > { %v2947_v30 = vsel %vm2504_vm5, %v5582_v20, 0.0 }
 0x1cb   : > { %v2621_v54 = vadd.f32 %v2620_v11, %v2619_v45  ;;  %v2940_v7 = vadd.f32 %v2939_v61, %v2938_v15  ;;  %v5583_v45 = vld [vmem:[#allocation19_spill] sm:$0xff]  ;;  %v5584_v15 = vld [vmem:[#allocation20_spill] sm:$0xff]  ;;  %v2951_v11 = vsel %vm2504_vm5, %v5585_v25, 0.0 }
 0x1cc   : > { %v2949_v57 = vsel %vm2504_vm5, %v5583_v45, 0.0  ;;  %v2630_v62 = vsel %vm2504_vm5, %v5584_v15, 0.0  ;;  %v5591_v15 = vld [vmem:[#allocation27_spill] sm:$0xff] }
 0x1cd   : > { %v2623_v47 = vadd.f32 %v2622_v50, %v2621_v54  ;;  %v2942_v3 = vadd.f32 %v2941_v36, %v2940_v7  ;;  %v2632_v54 = vsel %vm2504_vm5, %v4664_v41, 0.0  ;;  %v5586_v36 = vld [vmem:[#allocation22_spill] sm:$0xff]  ;;  %v2957_v41 = vsel %vm2504_vm5, %v4707_v8, 0.0 }
 0x1ce   : > { %v2634_v50 = vsel %vm2504_vm5, %v5586_v36, 0.0  ;;  %v2648_v36 = vsel %vm2504_vm5, %v4778_v58, 0.0  ;;  %v2973_v58 = vsel %vm2504_vm5, %v4819_v28, 0.0 }
 0x1cf   : > { %v2625_v40 = vadd.f32 %v2624_v32, %v2623_v47  ;;  %v2944_v37 = vadd.f32 %v2943_v6, %v2942_v3  ;;  %v5587_v6 = vld [vmem:[#allocation23_spill] sm:$0xff] }
 0x1d0   : > { %v2955_v32 = vsel %vm2504_vm5, %v5587_v6, 0.0 }
 0x1d1   : > { %v2627_v21 = vadd.f32 %v2626_v12, %v2625_v40  ;;  %v2946_v49 = vadd.f32 %v2945_v48, %v2944_v37  ;;  %v2636_v40 = vsel %vm2504_vm5, %v4694_v1, 0.0  ;;  %v2638_v12 = vsel %vm2504_vm5, %v5588_v63, 0.0 }
 0x1d2   : > { %v2961_v1 = vsel %vm2504_vm5, %v4735_v13, 0.0 }
 0x1d3   : > { %v2629_v27 = vadd.f32 %v2628_v16, %v2627_v21  ;;  %v2948_v34 = vadd.f32 %v2947_v30, %v2946_v49  ;;  %v5589_v49 = vld [vmem:[#allocation25_spill] sm:$0xff]  ;;  %v2640_v30 = vsel %vm2504_vm5, %v4722_v53, 0.0  ;;  %v2965_v53 = vsel %vm2504_vm5, %v4763_v18, 0.0 }
 0x1d4   : > { %v2959_v20 = vsel %vm2504_vm5, %v5589_v49, 0.0  ;;  %v5597_v49 = vld [vmem:[#allocation33_spill] sm:$0xff] }
 0x1d5   : > { %v2631_v44 = vadd.f32 %v2630_v62, %v2629_v27  ;;  %v2950_v61 = vadd.f32 %v2949_v57, %v2948_v34  ;;  %v5590_v34 = vld [vmem:[#allocation26_spill] sm:$0xff]  ;;  %v2963_v62 = vsel %vm2504_vm5, %v5591_v15, 0.0  ;;  %v2660_v15 = vsel %vm2504_vm5, %v4862_v14, 0.0 }
 0x1d6   : > { %v2642_v45 = vsel %vm2504_vm5, %v5590_v34, 0.0 }
 0x1d7   : > { %v2633_v7 = vadd.f32 %v2632_v54, %v2631_v44  ;;  %v2952_v2 = vadd.f32 %v2951_v11, %v2950_v61  ;;  %v2644_v44 = vsel %vm2504_vm5, %v4750_v31, 0.0  ;;  %v5592_v11 = vld [vmem:[#allocation28_spill] sm:$0xff]  ;;  %v2969_v31 = vsel %vm2504_vm5, %v4791_v23, 0.0 }
 0x1d8   : > { %v2646_v54 = vsel %vm2504_vm5, %v5592_v11, 0.0  ;;  %v5600_v11 = vld [vmem:[#allocation36_spill] sm:$0xff] }
 0x1d9   : > { %v2635_v47 = vadd.f32 %v2634_v50, %v2633_v7  ;;  %v2954_v3 = vadd.f32 %v2953_v56, %v2952_v2  ;;  %v5593_v2 = vld [vmem:[#allocation29_spill] sm:$0xff] }
 0x1da   : > { %v2967_v56 = vsel %vm2504_vm5, %v5593_v2, 0.0  ;;  %v5601_v2 = vld [vmem:[#allocation37_spill] sm:$0xff] }
 0x1db   : > { %v2637_v37 = vadd.f32 %v2636_v40, %v2635_v47  ;;  %v2956_v48 = vadd.f32 %v2955_v32, %v2954_v3  ;;  %v5594_v3 = vld [vmem:[#allocation30_spill] sm:$0xff]  ;;  %v5595_v40 = vld [vmem:[#allocation31_spill] sm:$0xff]  ;;  %v2985_v14 = vsel %vm2504_vm5, %v5601_v2, 0.0  ;;  %v5613_v2 = vld [vmem:[#allocation49_spill] sm:$0xff] }
 0x1dc   : > { %v2650_v6 = vsel %vm2504_vm5, %v5594_v3, 0.0  ;;  %v5603_v3 = vld [vmem:[#allocation39_spill] sm:$0xff] }
 0x1dd   : > { %v2639_v42 = vadd.f32 %v2638_v12, %v2637_v37  ;;  %v2958_v21 = vadd.f32 %v2957_v41, %v2956_v48  ;;  %v2971_v37 = vsel %vm2504_vm5, %v5595_v40, 0.0  ;;  %v2652_v48 = vsel %vm2504_vm5, %v4806_v5, 0.0  ;;  %v5596_v12 = vld [vmem:[#allocation32_spill] sm:$0xff] }
 0x1de   : > { %v2977_v5 = vsel %vm2504_vm5, %v4847_v33, 0.0 }
 0x1df   : > { %v2641_v16 = vadd.f32 %v2640_v30, %v2639_v42  ;;  %v2960_v27 = vadd.f32 %v2959_v20, %v2958_v21  ;;  %v2654_v42 = vsel %vm2504_vm5, %v5596_v12, 0.0  ;;  %v2975_v20 = vsel %vm2504_vm5, %v5597_v49, 0.0  ;;  %v5606_v12 = vld [vmem:[#allocation42_spill] sm:$0xff]  ;;  %v5607_v49 = vld [vmem:[#allocation43_spill] sm:$0xff] }
 0x1e0   : > { %v2656_v30 = vsel %vm2504_vm5, %v4834_v9, 0.0  ;;  %v2981_v9 = vsel %vm2504_vm5, %v4875_v60, 0.0 }
 0x1e1   : > { %v2643_v8 = vadd.f32 %v2642_v45, %v2641_v16  ;;  %v2962_v57 = vadd.f32 %v2961_v1, %v2960_v27  ;;  %v5598_v1 = vld [vmem:[#allocation34_spill] sm:$0xff] }
 0x1e2   : > { %v2658_v34 = vsel %vm2504_vm5, %v5598_v1, 0.0 }
 0x1e3   : > { %v2645_v61 = vadd.f32 %v2644_v44, %v2643_v8  ;;  %v2964_v25 = vadd.f32 %v2963_v62, %v2962_v57  ;;  %v5599_v8 = vld [vmem:[#allocation35_spill] sm:$0xff] }
 0x1e4   : > { %v2979_v57 = vsel %vm2504_vm5, %v5599_v8, 0.0  ;;  %v2680_v8 = vsel %vm2504_vm5, %v5002_v10, 0.0  ;;  %v3005_v10 = vsel %vm2504_vm5, %v5038_v4, 0.0 }
 0x1e5   : > { %v2647_v13 = vadd.f32 %v2646_v54, %v2645_v61  ;;  %v2966_v7 = vadd.f32 %v2965_v53, %v2964_v25  ;;  %v2662_v61 = vsel %vm2504_vm5, %v4877_v46, 0.0  ;;  %v2983_v53 = vsel %vm2504_vm5, %v4885_v51, 0.0 }
 0x1e6   : > { %v2664_v54 = vsel %vm2504_vm5, %v5600_v11, 0.0 }
 0x1e7   : > { %v2649_v50 = vadd.f32 %v2648_v36, %v2647_v13  ;;  %v2968_v47 = vadd.f32 %v2967_v56, %v2966_v7  ;;  %v2666_v56 = vsel %vm2504_vm5, %v4902_v19, 0.0 }
 0x1e9   : > { %v2651_v18 = vadd.f32 %v2650_v6, %v2649_v50  ;;  %v2970_v32 = vadd.f32 %v2969_v31, %v2968_v47  ;;  %v5602_v50 = vld [vmem:[#allocation38_spill] sm:$0xff]  ;;  %v2668_v47 = vsel %vm2504_vm5, %v4918_v29, 0.0  ;;  %v2989_v6 = vsel %vm2504_vm5, %v5603_v3, 0.0 }
 0x1ea   : > { %v2987_v46 = vsel %vm2504_vm5, %v5602_v50, 0.0  ;;  %v2993_v29 = vsel %vm2504_vm5, %v4954_v38, 0.0  ;;  %v5614_v50 = vld [vmem:[#allocation50_spill] sm:$0xff]  ;;  %v2692_v3 = vsel %vm2504_vm5, %v5086_v35, 0.0 }
 0x1eb   : > { %v2653_v41 = vadd.f32 %v2652_v48, %v2651_v18  ;;  %v2972_v63 = vadd.f32 %v2971_v37, %v2970_v32  ;;  %v5604_v18 = vld [vmem:[#allocation40_spill] sm:$0xff]  ;;  %v5605_v48 = vld [vmem:[#allocation41_spill] sm:$0xff] }
 0x1ec   : > { %v2670_v32 = vsel %vm2504_vm5, %v5604_v18, 0.0  ;;  %v2991_v19 = vsel %vm2504_vm5, %v5605_v48, 0.0  ;;  %v5617_v48 = vld [vmem:[#allocation53_spill] sm:$0xff] }
 0x1ed   : > { %v2655_v23 = vadd.f32 %v2654_v42, %v2653_v41  ;;  %v2974_v21 = vadd.f32 %v2973_v58, %v2972_v63  ;;  %v2672_v41 = vsel %vm2504_vm5, %v4946_v39, 0.0  ;;  %v2674_v42 = vsel %vm2504_vm5, %v5606_v12, 0.0  ;;  %v5619_v12 = vld [vmem:[#allocation55_spill] sm:$0xff] }
 0x1ee   : > { %v2997_v39 = vsel %vm2504_vm5, %v4982_v22, 0.0 }
 0x1ef   : > { %v2657_v16 = vadd.f32 %v2656_v30, %v2655_v23  ;;  %v2976_v27 = vadd.f32 %v2975_v20, %v2974_v21  ;;  %v2995_v20 = vsel %vm2504_vm5, %v5607_v49, 0.0  ;;  %v2676_v30 = vsel %vm2504_vm5, %v4974_v0, 0.0 }
 0x1f0   : > { %v3001_v0 = vsel %vm2504_vm5, %v5010_v59, 0.0 }
 0x1f1   : > { %v2659_v28 = vadd.f32 %v2658_v34, %v2657_v16  ;;  %v2978_v45 = vadd.f32 %v2977_v5, %v2976_v27  ;;  %v5608_v5 = vld [vmem:[#allocation44_spill] sm:$0xff] }
 0x1f2   : > { %v2678_v1 = vsel %vm2504_vm5, %v5608_v5, 0.0  ;;  %v5623_v5 = vld [vmem:[#allocation2_spill] sm:$0xff] }
 0x1f3   : > { %v2661_v62 = vadd.f32 %v2660_v15, %v2659_v28  ;;  %v2980_v44 = vadd.f32 %v2979_v57, %v2978_v45  ;;  %v5609_v28 = vld [vmem:[#allocation45_spill] sm:$0xff] }
 0x1f4   : > { %v2999_v45 = vsel %vm2504_vm5, %v5609_v28, 0.0  ;;  %v5624_v28 = vld [vmem:[#allocation58_spill] sm:$0xff] }
 0x1f5   : > { %v2663_v33 = vadd.f32 %v2662_v61, %v2661_v62  ;;  %v2982_v25 = vadd.f32 %v2981_v9, %v2980_v44  ;;  %v5610_v62 = vld [vmem:[#allocation46_spill] sm:$0xff]  ;;  %v5611_v61 = vld [vmem:[#allocation47_spill] sm:$0xff] }
 0x1f6   : > { %v2682_v44 = vsel %vm2504_vm5, %v5610_v62, 0.0  ;;  %v5626_v62 = vld [vmem:[#allocation59_spill] sm:$0xff] }
 0x1f7   : > { %v2665_v13 = vadd.f32 %v2664_v54, %v2663_v33  ;;  %v2984_v7 = vadd.f32 %v2983_v53, %v2982_v25  ;;  %v3003_v33 = vsel %vm2504_vm5, %v5611_v61, 0.0  ;;  %v2684_v25 = vsel %vm2504_vm5, %v5030_v17, 0.0  ;;  %v5612_v54 = vld [vmem:[#allocation48_spill] sm:$0xff] }
 0x1f8   : > { %v3009_v17 = vsel %vm2504_vm5, %v5066_v24, 0.0 }
 0x1f9   : > { %v2667_v60 = vadd.f32 %v2666_v56, %v2665_v13  ;;  %v2986_v36 = vadd.f32 %v2985_v14, %v2984_v7  ;;  %v2686_v13 = vsel %vm2504_vm5, %v5612_v54, 0.0  ;;  %v3007_v14 = vsel %vm2504_vm5, %v5613_v2, 0.0 }
 0x1fa   : > { %v2688_v56 = vsel %vm2504_vm5, %v5058_v26, 0.0  ;;  %v3013_v26 = vsel %vm2504_vm5, %v5094_v52, 0.0 }
 0x1fb   : > { %v2669_v51 = vadd.f32 %v2668_v47, %v2667_v60  ;;  %v2988_v31 = vadd.f32 %v2987_v46, %v2986_v36  ;;  %v2690_v46 = vsel %vm2504_vm5, %v5614_v50, 0.0 }
 0x1fd   : > { %v2671_v40 = vadd.f32 %v2670_v32, %v2669_v51  ;;  %v2990_v37 = vadd.f32 %v2989_v6, %v2988_v31  ;;  %v5615_v51 = vld [vmem:[#allocation51_spill] sm:$0xff]  ;;  %v5616_v32 = vld [vmem:[#allocation52_spill] sm:$0xff] }
 0x1fe   : > { %v3011_v31 = vsel %vm2504_vm5, %v5615_v51, 0.0 }
 0x1ff   : > { %v2673_v63 = vadd.f32 %v2672_v41, %v2671_v40  ;;  %v2992_v58 = vadd.f32 %v2991_v19, %v2990_v37  ;;  %v2694_v40 = vsel %vm2504_vm5, %v5616_v32, 0.0  ;;  %v3015_v19 = vsel %vm2504_vm5, %v5617_v48, 0.0 }
 0x200   : > { %v2696_v41 = vsel %vm2504_vm5, %v5114_v43, 0.0 }
 0x201   : > { %v2675_v23 = vadd.f32 %v2674_v42, %v2673_v63  ;;  %v2994_v21 = vadd.f32 %v2993_v29, %v2992_v58  ;;  %v5618_v29 = vld [vmem:[#allocation54_spill] sm:$0xff]  ;;  %v2698_v42 = vsel %vm2504_vm5, %v5619_v12, 0.0 }
 0x202   : > { %v3017_v35 = vsel %vm2504_vm5, %v5618_v29, 0.0 }
 0x203   : > { %v2677_v16 = vadd.f32 %v2676_v30, %v2675_v23  ;;  %v2996_v27 = vadd.f32 %v2995_v20, %v2994_v21  ;;  %v5620_v21 = vld [vmem:[#allocation56_spill] sm:$0xff]  ;;  %v5621_v20 = vld [vmem:[#allocation3_spill] sm:$0xff] }
 0x204   : > { %v3019_v49 = vsel %vm2504_vm5, %v5620_v21, 0.0  ;;  %v2700_v30 = vsel %vm2504_vm5, %v5621_v20, 0.0 }
 0x205   : > { %v2679_v38 = vadd.f32 %v2678_v1, %v2677_v16  ;;  %v2998_v34 = vadd.f32 %v2997_v39, %v2996_v27  ;;  %v5622_v39 = vld [vmem:[#allocation57_spill] sm:$0xff]  ;;  %v2702_v1 = vsel %vm2504_vm5, %v5623_v5, 0.0 }
 0x206   : > { %v3021_v43 = vsel %vm2504_vm5, %v5622_v39, 0.0 }
 0x207   : > { %v2681_v57 = vadd.f32 %v2680_v8, %v2679_v38  ;;  %v3000_v15 = vadd.f32 %v2999_v45, %v2998_v34  ;;  %v3023_v45 = vsel %vm2504_vm5, %v5624_v28, 0.0  ;;  %v5625_v8 = vld [vmem:[#allocation5_spill] sm:$0xff] }
 0x209   : > { %v2683_v22 = vadd.f32 %v2682_v44, %v2681_v57  ;;  %v3002_v9 = vadd.f32 %v3001_v0, %v3000_v15  ;;  %v2704_v57 = vsel %vm2504_vm5, %v5625_v8, 0.0  ;;  %v3025_v44 = vsel %vm2504_vm5, %v5626_v62, 0.0 }
 0x20b   : > { %v2685_v53 = vadd.f32 %v2684_v25, %v2683_v22  ;;  %v3004_v11 = vadd.f32 %v3003_v33, %v3002_v9  ;;  %v5627_v22 = vld [vmem:[#allocation4_spill] sm:$0xff] }
 0x20c   : > { %v2706_v9 = vsel %vm2504_vm5, %v5627_v22, 0.0  ;;  %v5628_v25 = vld [vmem:[#allocation60_spill] sm:$0xff] }
 0x20d   : > { %v2687_v59 = vadd.f32 %v2686_v13, %v2685_v53  ;;  %v3006_v7 = vadd.f32 %v3005_v10, %v3004_v11  ;;  %v3027_v53 = vsel %vm2504_vm5, %v5628_v25, 0.0  ;;  %v2708_v11 = vsel %vm2504_vm5, %v5198_v55, 0.0  ;;  %v5629_v13 = vld [vmem:[#allocation7_spill] sm:$0xff]  ;;  %v5633_v55 = vld [vmem:[#allocation62_spill] sm:$0xff] }
 0x20f   : > { %v2689_v60 = vadd.f32 %v2688_v56, %v2687_v59  ;;  %v3008_v36 = vadd.f32 %v3007_v14, %v3006_v7  ;;  %v3029_v59 = vsel %vm2504_vm5, %v5629_v13, 0.0  ;;  %v5630_v7 = vld [vmem:[#allocation6_spill] sm:$0xff] }
 0x210   : > { %v2710_v2 = vsel %vm2504_vm5, %v5630_v7, 0.0 }
 0x211   : > { %v2691_v4 = vadd.f32 %v2690_v46, %v2689_v60  ;;  %v3010_v47 = vadd.f32 %v3009_v17, %v3008_v36  ;;  %v5631_v60 = vld [vmem:[#allocation61_spill] sm:$0xff] }
 0x212   : > { %v3031_v36 = vsel %vm2504_vm5, %v5631_v60, 0.0  ;;  %v5632_v17 = vld [vmem:[#allocation9_spill] sm:$0xff] }
 0x213   : > { %v2693_v6 = vadd.f32 %v2692_v3, %v2691_v4  ;;  %v3012_v18 = vadd.f32 %v3011_v31, %v3010_v47  ;;  %v2713_v50 = vsel %vm2712_vm7, %v5632_v17, 0.0  ;;  %v3033_v47 = vsel %vm2712_vm7, %v5633_v55, 0.0 }
 0x215   : > { %v2695_v24 = vadd.f32 %v2694_v40, %v2693_v6  ;;  %v3014_v37 = vadd.f32 %v3013_v26, %v3012_v18 }
 0x217   : > { %v2697_v63 = vadd.f32 %v2696_v41, %v2695_v24  ;;  %v3016_v58 = vadd.f32 %v3015_v19, %v3014_v37 }
 0x219   : > { %v2699_v52 = vadd.f32 %v2698_v42, %v2697_v63  ;;  %v3018_v23 = vadd.f32 %v3017_v35, %v3016_v58 }
 0x21b   : > { %v2701_v16 = vadd.f32 %v2700_v30, %v2699_v52  ;;  %v3020_v27 = vadd.f32 %v3019_v49, %v3018_v23 }
 0x21d   : > { %v2703_v38 = vadd.f32 %v2702_v1, %v2701_v16  ;;  %v3022_v34 = vadd.f32 %v3021_v43, %v3020_v27 }
 0x21f   : > { %v2705_v15 = vadd.f32 %v2704_v57, %v2703_v38  ;;  %v3024_v0 = vadd.f32 %v3023_v45, %v3022_v34 }
 0x221   : > { %v2707_v61 = vadd.f32 %v2706_v9, %v2705_v15  ;;  %v3026_v33 = vadd.f32 %v3025_v44, %v3024_v0 }
 0x223   : > { %v2709_v10 = vadd.f32 %v2708_v11, %v2707_v61  ;;  %v3028_v54 = vadd.f32 %v3027_v53, %v3026_v33 }
 0x225   : > { %v2711_v14 = vadd.f32 %v2710_v2, %v2709_v10  ;;  %v3030_v56 = vadd.f32 %v3029_v59, %v3028_v54 }
 0x227   : > { %v2714_v46 = vadd.f32 %v2713_v50, %v2711_v14  ;;  %v3032_v4 = vadd.f32 %v3031_v36, %v3030_v56 }
 0x229   : > { %v2715_v51 = vrot.slane %v2714_v46, 4  ;;  %v3034_v31 = vadd.f32 %v3033_v47, %v3032_v4 }
 0x22b   : > { %v2716_v3 = vadd.f32 %v2715_v51, %v2714_v46  ;;  %v3035_v6 = vrot.slane %v3034_v31, 4 }
 0x22d   : > { %v2717_v18 = vrot.slane %v2716_v3, 2  ;;  %v3036_v26 = vadd.f32 %v3035_v6, %v3034_v31 }
 0x22f   : > { %v2718_v32 = vadd.f32 %v2717_v18, %v2716_v3  ;;  %v3037_v40 = vrot.slane %v3036_v26, 2 }
 0x231   : > { %v2719_v24 = vrot.slane %v2718_v32, 1  ;;  %v3038_v37 = vadd.f32 %v3037_v40, %v3036_v26 }
 0x233   : > { %v2720_v48 = vadd.f32 %v2719_v24, %v2718_v32  ;;  %v3039_v19 = vrot.slane %v3038_v37, 1 }
 0x235   : > { %v3040_v41 = vadd.f32 %v3039_v19, %v3038_v37  ;;  %3042 = vst.msk [vmem:[%s238_s27] sm:$0x1] %vm3041_vm8, %v2720_v48 }
 0x237   : > { %3043 = vst.msk [vmem:[%s241_s30] sm:$0x1] %vm3041_vm8, %v3040_v41 }
 0x238 PF: > { %s16_s18 = sadd.s32 1, %s3820_s18  }
 0x239   : > { %p13_p4 = scmp.ge.s32.totalorder %s16_s18, 4  }
 0x23b   :  { %15 = sbr.rel (!%p13_p4) target bundleno = 1 (0x1), region = 86 }

// kernel: _lambda_.9
= control target key start
LH: loop header
LB: loop body
LE: loop exit
PB: predicated region body
PF: predicated region fallthrough
CT: control target
= control target key end

     0   :  { %s4488_s15 = smov 0   ;;  %s6808_s0 = inlined_call_operand.vmem [shape: bf16[2,838,64], index: 0, kind: input, shape index: {}]   ;;  %s6809_s1 = inlined_call_operand.vmem [shape: f32[1,64], index: 1, kind: input, shape index: {}]   ;;  %s6810_s2 = inlined_call_operand.vmem [shape: f32[1,64], index: 2, kind: input, shape index: {}]   ;;  %s6811_s3 = inlined_call_operand.vmem [shape: bf16[256,807], index: 3, kind: input, shape index: {}]   ;;  %s6812_s4 = inlined_call_operand.vmem [shape: bf16[2,256,64], index: 4, kind: output, shape index: {}]  }
   0x1 LB: > { %s3406_s16 = sadd.s32 4294967295, %s4460_s15   ;;  %p3410_p0 = scmp.ge.s32.totalorder %s4460_s15, 1  ;;  %s4460_s15 = sphi %s4488_s15, %s14_s15  }
   0x2   : > { %p162_p1 = scmp.lt.s32.totalorder %s4460_s15, 3 }
   0x4   : > { %p163_p2 = pnand %p3410_p0, %p162_p1 }
   0x6   : > { %166 = sbr.rel (%p163_p2) target bundleno = 656 (0x290), region = 36 }
   0xd   : > { %p188_p3 = scmp.lt.s32.totalorder %s3406_s16, 1  ;;  %v4291_v0 = vld [vmem:[%s6811_s3 + $0x4] ss:$28 sps:$4 sm:$0xff]   ;;  %vm968_vm0 = vcmask 1041408   ;;  %vm1475_vm1 = vcmask 1046528   ;;  %vm2539_vm2 = vcmask 1042432  }
   0xe   : > { %v4294_v1 = vld [vmem:[%s6811_s3 + $0x2a4] ss:$28 sps:$4 sm:$0xff]   ;;  %2578 = vmatprep.mubr.bf16.mxu0 %v4291_v0  ;;  %vm2540_vm3 = vcmask 1043456   ;;  %vm2490_vm4 = vcmask 318464   ;;  %vm3318_vm5 = vcmask 519168  }
   0xf   : > { %s6960_s16 = smov (!%p188_p3, %s3406_s16), 1  ;;  %v4508_v2 = vld [vmem:[%s6809_s1] ss:$0 sm:$0xff]  ;;  %2674 = vmatprep.mubr.bf16.mxu1 %v4294_v1 }
  0x10   : > { %s4279_s21 = smul.u32 420, %s6960_s16  ;;  %v4525_v12 = vld [vmem:[%s6810_s2] ss:$0 sm:$0xff]  ;;  %s3578_s20 = sshll.u32 %s6960_s16, 7 }
  0x11   : > { %s6687_s23 = scalar_lea.vmem %s6812_s4, %s3578_s20 }
  0x12   : > { %s4513_s26 = scalar_lea.vmem %s6808_s0, %s4279_s21 }
  0x13   : > { %v3826_v3 = vld [vmem:[%s4513_s26 + $0x40] sm:$0xff]   ;;  %v3827_v4 = vld [vmem:[%s4513_s26 + $0x48] sm:$0xff]   ;;  %v3828_v5 = vld [vmem:[%s4513_s26 + $0x50] sm:$0xff]  }
  0x14   : > { %v3645_v6 = vunpack.c.l.bf16 %v3826_v3  ;;  %v3646_v7 = vunpack.c.h.bf16 %v3826_v3  ;;  %v3649_v8 = vunpack.c.l.bf16 %v3827_v4  ;;  %v3650_v9 = vunpack.c.h.bf16 %v3827_v4  ;;  %v4519_v10 = vld [vmem:[%s4513_s26 + $0x58] sm:$0xff]   ;;  %v3612_v11 = vld [vmem:[%s4513_s26] sm:$0xff]   ;;  %v3819_v29 = vld [vmem:[%s4513_s26 + $0x8] sm:$0xff]  }
  0x15   : > { %v3653_v13 = vunpack.c.l.bf16 %v3828_v5  ;;  %v3654_v14 = vunpack.c.h.bf16 %v3828_v5  ;;  %v3657_v15 = vunpack.c.l.bf16 %v4519_v10  ;;  %v3613_v16 = vunpack.c.l.bf16 %v3612_v11  ;;  %v3820_v38 = vld [vmem:[%s4513_s26 + $0x10] sm:$0xff]   ;;  %v4557_v43 = vld [vmem:[%s4513_s26 + $0x18] sm:$0xff]  }
  0x16   : > { %v561_v17 = vmul.f32 %v3645_v6, %v4508_v2  ;;  %v562_v18 = vmul.f32 %v3646_v7, %v4508_v2  ;;  %v563_v19 = vmul.f32 %v3649_v8, %v4508_v2  ;;  %v564_v20 = vmul.f32 %v3650_v9, %v4508_v2  ;;  %v3830_v9 = vld [vmem:[%s4513_s26 + $0x60] sm:$0xff]  }
  0x17   : > { %v565_v21 = vmul.f32 %v3653_v13, %v4508_v2  ;;  %v566_v22 = vmul.f32 %v3654_v14, %v4508_v2  ;;  %v567_v23 = vmul.f32 %v3657_v15, %v4508_v2  ;;  %v3614_v24 = vunpack.c.h.bf16 %v3612_v11 }
  0x18   : > { %v672_v25 = vadd.f32 %v4525_v12, %v561_v17  ;;  %v673_v26 = vadd.f32 %v4525_v12, %v562_v18  ;;  %v674_v27 = vadd.f32 %v4525_v12, %v563_v19  ;;  %v4539_v28 = vadd.f32 %v4525_v12, %v564_v20  ;;  %v4624_v20 = vld [vmem:[%s4513_s26 + $0x20] sm:$0xff]  }
  0x19   : > { %v4543_v30 = vadd.f32 %v4525_v12, %v565_v21  ;;  %v4546_v31 = vadd.f32 %v4525_v12, %v566_v22  ;;  %v4549_v32 = vadd.f32 %v4525_v12, %v567_v23  ;;  %v3617_v33 = vunpack.c.l.bf16 %v3819_v29 }
  0x1a   : > { %v777_v34 = vmax.f32 %v672_v25, 0.0  ;;  %v778_v35 = vmax.f32 %v673_v26, 0.0  ;;  %v779_v36 = vmax.f32 %v674_v27, 0.0  ;;  %v780_v37 = vmax.f32 %v4539_v28, 0.0 }
  0x1b   : > { %v781_v39 = vmax.f32 %v4543_v30, 0.0  ;;  %v782_v40 = vmax.f32 %v4546_v31, 0.0  ;;  %v783_v41 = vmax.f32 %v4549_v32, 0.0  ;;  %v3618_v42 = vunpack.c.h.bf16 %v3819_v29 }
  0x1c   : > { %v4559_v44 = vrot.slane %v777_v34, 6  ;;  %v4561_v45 = vrot.slane %v778_v35, 6  ;;  %v4563_v46 = vrot.slane %v779_v36, 6  ;;  %v4567_v47 = vrot.slane %v780_v37, 6 }
  0x1d   : > { %v1002_v48 = vrot.slane %v781_v39, 6  ;;  %v1004_v49 = vrot.slane %v782_v40, 6  ;;  %v4575_v50 = vrot.slane %v783_v41, 6  ;;  %v3621_v51 = vunpack.c.l.bf16 %v3820_v38 }
  0x1e   : > { %v4580_v52 = vsel %vm968_vm0, %v4561_v45, %v4563_v46  ;;  %v3622_v53 = vunpack.c.h.bf16 %v3820_v38  ;;  %v3625_v54 = vunpack.c.l.bf16 %v4557_v43  ;;  %v545_v55 = vmul.f32 %v3613_v16, %v4508_v2 }
  0x1f   : > { %v1003_v56 = vsel %vm968_vm0, %v4567_v47, %v1002_v48  ;;  %v1005_v57 = vsel %vm968_vm0, %v1002_v48, %v1004_v49  ;;  %v1007_v58 = vsel %vm968_vm0, %v1004_v49, %v4575_v50  ;;  %v546_v59 = vmul.f32 %v3614_v24, %v4508_v2 }
  0x20   : > { %v4590_v60 = vmax.f32 %v777_v34, %v1003_v56  ;;  %v1290_v61 = vmax.f32 %v778_v35, %v1005_v57  ;;  %v4592_v62 = vmax.f32 %v779_v36, %v1007_v58  ;;  %v547_v63 = vmul.f32 %v3617_v33, %v4508_v2 }
  0x21   : > { %v548_v0 = vmul.f32 %v3618_v42, %v4508_v2  ;;  %v549_v1 = vmul.f32 %v3621_v51, %v4508_v2  ;;  %v550_v3 = vmul.f32 %v3622_v53, %v4508_v2  ;;  %v551_v4 = vmul.f32 %v3625_v54, %v4508_v2 }
  0x22   : > { %v1507_v5 = vrot.slane %v4590_v60, 1  ;;  %v1509_v6 = vrot.slane %v1290_v61, 1  ;;  %v1511_v7 = vrot.slane %v4592_v62, 1  ;;  %v656_v8 = vadd.f32 %v4525_v12, %v545_v55 }
  0x23   : > { %v657_v11 = vadd.f32 %v4525_v12, %v546_v59  ;;  %v658_v13 = vadd.f32 %v4525_v12, %v547_v63  ;;  %v4606_v14 = vadd.f32 %v4525_v12, %v548_v0  ;;  %v4609_v15 = vadd.f32 %v4525_v12, %v549_v1  ;;  %v4646_v59 = vld [vmem:[%s4513_s26 + $0x68] sm:$0xff]  }
  0x24   : > { %v1510_v16 = vsel %vm1475_vm1, %v1507_v5, %v1509_v6  ;;  %v1512_v17 = vsel %vm1475_vm1, %v1509_v6, %v1511_v7  ;;  %v4618_v18 = vadd.f32 %v4525_v12, %v550_v3  ;;  %v4621_v19 = vadd.f32 %v4525_v12, %v551_v4 }
  0x25   : > { %v1794_v21 = vmax.f32 %v4590_v60, %v1510_v16  ;;  %v1795_v22 = vmax.f32 %v1290_v61, %v1512_v17  ;;  %v761_v23 = vmax.f32 %v656_v8, 0.0  ;;  %v762_v24 = vmax.f32 %v657_v11, 0.0  ;;  %v5021_v60 = vld [vmem:[%s6809_s1] ss:$0 sm:$0xff] }
  0x26   : > { %v763_v25 = vmax.f32 %v658_v13, 0.0  ;;  %v764_v26 = vmax.f32 %v4606_v14, 0.0  ;;  %v765_v27 = vmax.f32 %v4609_v15, 0.0  ;;  %v766_v29 = vmax.f32 %v4618_v18, 0.0  ;;  %v3832_v15 = vld [vmem:[%s4513_s26 + $0x70] sm:$0xff]  }
  0x27   : > { %v1887_v33 = vpack.c.bf16 %v1795_v22, %v1794_v21  ;;  %v767_v34 = vmax.f32 %v4621_v19, 0.0  ;;  %v3658_v35 = vunpack.c.h.bf16 %v4519_v10  ;;  %v3661_v36 = vunpack.c.l.bf16 %v3830_v9 }
  0x28   : > { %v969_v38 = vrot.slane %v764_v26, 6  ;;  %v970_v42 = vrot.slane %v765_v27, 6  ;;  %v972_v48 = vrot.slane %v766_v29, 6  ;;  %v3626_v49 = vunpack.c.h.bf16 %v4557_v43 }
  0x29   : > { %3870 = vmatprep.subr.bf16.mxu0 %v1887_v33  ;;  %4263 = vmatprep.subr.bf16.mxu1 %v1887_v33  ;;  %v974_v51 = vrot.slane %v767_v34, 6  ;;  %v568_v53 = vmul.f32 %v3658_v35, %v4508_v2  ;;  %v569_v10 = vmul.f32 %v3661_v36, %v4508_v2  ;;  %v3629_v54 = vunpack.c.l.bf16 %v4624_v20 }
  0x2a   : > { %v971_v55 = vsel %vm968_vm0, %v969_v38, %v970_v42  ;;  %v973_v56 = vsel %vm968_vm0, %v970_v42, %v972_v48  ;;  %v552_v57 = vmul.f32 %v3626_v49, %v4508_v2  ;;  %v3662_v58 = vunpack.c.h.bf16 %v3830_v9 }
  0x2b   : > { %v975_v43 = vsel %vm968_vm0, %v972_v48, %v974_v51  ;;  %v1273_v61 = vmax.f32 %v761_v23, %v971_v55  ;;  %v1274_v63 = vmax.f32 %v762_v24, %v973_v56  ;;  %v4650_v0 = vadd.f32 %v4525_v12, %v568_v53 }
  0x2c   : > { %v4652_v1 = vmax.f32 %v763_v25, %v975_v43  ;;  %v4655_v3 = vadd.f32 %v4525_v12, %v569_v10  ;;  %v553_v4 = vmul.f32 %v3629_v54, %v4508_v2  ;;  %v4659_v6 = vadd.f32 %v4525_v12, %v552_v57  ;;  %v4686_v10 = vld [vmem:[%s4513_s26 + $0x28] sm:$0xff]  }
  0x2d   : > { %v1476_v8 = vrot.slane %v1273_v61, 1  ;;  %v1477_v9 = vrot.slane %v1274_v63, 1  ;;  %v784_v11 = vmax.f32 %v4650_v0, 0.0  ;;  %v3665_v13 = vunpack.c.l.bf16 %v4646_v59 }
  0x2e   : > { %v1479_v14 = vrot.slane %v4652_v1, 1  ;;  %v785_v16 = vmax.f32 %v4655_v3, 0.0  ;;  %v4666_v17 = vadd.f32 %v4525_v12, %v553_v4  ;;  %v768_v21 = vmax.f32 %v4659_v6, 0.0 }
  0x2f   : > { %v1478_v22 = vsel %vm1475_vm1, %v1476_v8, %v1477_v9  ;;  %v1008_v23 = vrot.slane %v784_v11, 6  ;;  %v570_v24 = vmul.f32 %v3662_v58, %v4508_v2  ;;  %v571_v25 = vmul.f32 %v3665_v13, %v4508_v2 }
  0x30   : > { %v1480_v33 = vsel %vm1475_vm1, %v1477_v9, %v1479_v14  ;;  %v1778_v35 = vmax.f32 %v1273_v61, %v1478_v22  ;;  %v1010_v36 = vrot.slane %v785_v16, 6  ;;  %v769_v38 = vmax.f32 %v4666_v17, 0.0 }
  0x31   : > { %v1779_v42 = vmax.f32 %v1274_v63, %v1480_v33  ;;  %v1009_v48 = vsel %vm968_vm0, %v4575_v50, %v1008_v23  ;;  %v976_v49 = vrot.slane %v768_v21, 6  ;;  %v4683_v53 = vadd.f32 %v4525_v12, %v570_v24 }
  0x32   : > { %v1011_v54 = vsel %vm968_vm0, %v1008_v23, %v1010_v36  ;;  %v1292_v55 = vmax.f32 %v780_v37, %v1009_v48  ;;  %v4693_v56 = vrot.slane %v769_v38, 6  ;;  %v4696_v57 = vadd.f32 %v4525_v12, %v571_v25 }
  0x33   : > { %v1879_v50 = vpack.c.bf16 %v1779_v42, %v1778_v35  ;;  %v1293_v58 = vmax.f32 %v781_v39, %v1011_v54  ;;  %v977_v43 = vsel %vm968_vm0, %v974_v51, %v976_v49  ;;  %v786_v61 = vmax.f32 %v4683_v53, 0.0 }
  0x34   : > { %v1513_v63 = vrot.slane %v1292_v55, 1  ;;  %v979_v28 = vsel %vm968_vm0, %v976_v49, %v4693_v56  ;;  %v1276_v37 = vmax.f32 %v764_v26, %v977_v43  ;;  %v787_v4 = vmax.f32 %v4696_v57, 0.0 }
  0x35   : > { %3871 = vmatpush3.bf16.msra.mxu0 %v1879_v50  ;;  %4271 = vmatpush3.bf16.msra.mxu1 %v1879_v50  ;;  %v1515_v8 = vrot.slane %v1293_v58, 1  ;;  %v4707_v9 = vmax.f32 %v765_v27, %v979_v28  ;;  %v1012_v30 = vrot.slane %v786_v61, 6  ;;  %v3630_v39 = vunpack.c.h.bf16 %v4624_v20 }
  0x36   : > { %v1514_v51 = vsel %vm1475_vm1, %v1511_v7, %v1513_v63  ;;  %v1481_v13 = vrot.slane %v1276_v37, 1  ;;  %v4717_v26 = vrot.slane %v787_v4, 6  ;;  %v3633_v22 = vunpack.c.l.bf16 %v4686_v10 }
  0x37   : > { %v1516_v27 = vsel %vm1475_vm1, %v1513_v63, %v1515_v8  ;;  %v1796_v23 = vmax.f32 %v4592_v62, %v1514_v51  ;;  %v1483_v24 = vrot.slane %v4707_v9, 1  ;;  %v1013_v20 = vsel %vm968_vm0, %v1010_v36, %v1012_v30 }
  0x38   : > { %v1797_v25 = vmax.f32 %v1292_v55, %v1516_v27  ;;  %v1482_v7 = vsel %vm1475_vm1, %v1479_v14, %v1481_v13  ;;  %v1015_v33 = vsel %vm968_vm0, %v1012_v30, %v4717_v26  ;;  %v1294_v35 = vmax.f32 %v782_v40, %v1013_v20  ;;  %v4740_v14 = vld [vmem:[%s4513_s26 + $0x30] sm:$0xff]  }
  0x39   : > { %v1484_v42 = vsel %vm1475_vm1, %v1481_v13, %v1483_v24  ;;  %v1780_v48 = vmax.f32 %v4652_v1, %v1482_v7  ;;  %v4736_v62 = vmax.f32 %v783_v41, %v1015_v33  ;;  %v554_v36 = vmul.f32 %v3630_v39, %v4508_v2 }
  0x3a   : > { %v1888_v49 = vpack.c.bf16 %v1797_v25, %v1796_v23  ;;  %v1781_v54 = vmax.f32 %v1276_v37, %v1484_v42  ;;  %v1517_v55 = vrot.slane %v1294_v35, 1  ;;  %v555_v31 = vmul.f32 %v3633_v22, %v4508_v2  ;;  %v4754_v37 = vld [vmem:[%s4513_s26 + $0x78] sm:$0xff]  }
  0x3b   : > { %v1519_v40 = vrot.slane %v4736_v62, 1  ;;  %v4745_v50 = vadd.f32 %v4525_v12, %v554_v36  ;;  %v3666_v1 = vunpack.c.h.bf16 %v4646_v59  ;;  %v3669_v32 = vunpack.c.l.bf16 %v3832_v15 }
  0x3c   : > { %3872 = vmatprep.subr.bf16.mxu0 %v1888_v49  ;;  %4264 = vmatprep.subr.bf16.mxu1 %v1888_v49  ;;  %v1880_v41 = vpack.c.bf16 %v1781_v54, %v1780_v48  ;;  %v1518_v43 = vsel %vm1475_vm1, %v1515_v8, %v1517_v55  ;;  %v4750_v63 = vadd.f32 %v4525_v12, %v555_v31  ;;  %v3634_v28 = vunpack.c.h.bf16 %v4686_v10 }
  0x3d   : > { %v1520_v30 = vsel %vm1475_vm1, %v1517_v55, %v1519_v40  ;;  %v1798_v39 = vmax.f32 %v1293_v58, %v1518_v43  ;;  %v770_v59 = vmax.f32 %v4745_v50, 0.0  ;;  %v572_v51 = vmul.f32 %v3666_v1, %v4508_v2 }
  0x3e   : > { %3873 = vmatpush3.bf16.msra.mxu0 %v1880_v41  ;;  %4272 = vmatpush3.bf16.msra.mxu1 %v1880_v41  ;;  %v1799_v13 = vmax.f32 %v1294_v35, %v1520_v30  ;;  %v771_v8 = vmax.f32 %v4750_v63, 0.0  ;;  %v573_v22 = vmul.f32 %v3669_v32, %v4508_v2  ;;  %v3637_v10 = vunpack.c.l.bf16 %v4740_v14 }
  0x3f   : > { %v980_v27 = vrot.slane %v770_v59, 6  ;;  %v4767_v23 = vadd.f32 %v4525_v12, %v572_v51  ;;  %v556_v58 = vmul.f32 %v3634_v28, %v4508_v2  ;;  %v3670_v20 = vunpack.c.h.bf16 %v3832_v15 }
  0x40   : > { %v1889_v25 = vpack.c.bf16 %v1799_v13, %v1798_v39  ;;  %v982_v7 = vrot.slane %v771_v8, 6  ;;  %v4773_v33 = vadd.f32 %v4525_v12, %v573_v22  ;;  %v557_v35 = vmul.f32 %v3637_v10, %v4508_v2 }
  0x41   : > { %v981_v42 = vsel %vm968_vm0, %v4693_v56, %v980_v27  ;;  %v788_v48 = vmax.f32 %v4767_v23, 0.0  ;;  %v4780_v36 = vadd.f32 %v4525_v12, %v556_v58  ;;  %v3673_v49 = vunpack.c.l.bf16 %v4754_v37 }
  0x42   : > { %3874 = vmatprep.subr.bf16.mxu0 %v1889_v25  ;;  %4265 = vmatprep.subr.bf16.mxu1 %v1889_v25  ;;  %v983_v15 = vsel %vm968_vm0, %v980_v27, %v982_v7  ;;  %v1278_v54 = vmax.f32 %v766_v29, %v981_v42  ;;  %v789_v55 = vmax.f32 %v4773_v33, 0.0  ;;  %v4788_v31 = vadd.f32 %v4525_v12, %v557_v35 }
  0x43   : > { %v1279_v56 = vmax.f32 %v767_v34, %v983_v15  ;;  %v1016_v1 = vrot.slane %v788_v48, 6  ;;  %v772_v32 = vmax.f32 %v4780_v36, 0.0  ;;  %v574_v41 = vmul.f32 %v3670_v20, %v4508_v2 }
  0x44   : > { %v1485_v43 = vrot.slane %v1278_v54, 1  ;;  %v1018_v18 = vrot.slane %v789_v55, 6  ;;  %v773_v29 = vmax.f32 %v4788_v31, 0.0  ;;  %v575_v28 = vmul.f32 %v3673_v49, %v4508_v2 }
  0x45   : > { %v1487_v30 = vrot.slane %v1279_v56, 1  ;;  %v1017_v19 = vsel %vm968_vm0, %v4717_v26, %v1016_v1  ;;  %v984_v34 = vrot.slane %v772_v32, 6  ;;  %v4805_v39 = vadd.f32 %v4525_v12, %v574_v41 }
  0x46   : > { %v1486_v51 = vsel %vm1475_vm1, %v1483_v24, %v1485_v43  ;;  %v1019_v13 = vsel %vm968_vm0, %v1016_v1, %v1018_v18  ;;  %v1296_v22 = vmax.f32 %v784_v11, %v1017_v19  ;;  %v4815_v10 = vrot.slane %v773_v29, 6  ;;  %v3825_v24 = vld [vmem:[%s4513_s26 + $0x38] sm:$0xff]  }
  0x47   : > { %v1488_v26 = vsel %vm1475_vm1, %v1485_v43, %v1487_v30  ;;  %v1782_v27 = vmax.f32 %v4707_v9, %v1486_v51  ;;  %v4821_v58 = vmax.f32 %v785_v16, %v1019_v13  ;;  %v985_v20 = vsel %vm968_vm0, %v982_v7, %v984_v34 }
  0x48   : > { %v1783_v25 = vmax.f32 %v1278_v54, %v1488_v26  ;;  %v1521_v35 = vrot.slane %v1296_v22, 1  ;;  %v987_v0 = vsel %vm968_vm0, %v984_v34, %v4815_v10  ;;  %v1280_v11 = vmax.f32 %v768_v21, %v985_v20  ;;  %v3834_v34 = vld [vmem:[%s4513_s26 + $0x80] sm:$0xff]  }
  0x49   : > { %v1523_v42 = vrot.slane %v4821_v58, 1  ;;  %v4832_v9 = vmax.f32 %v769_v38, %v987_v0  ;;  %v4835_v3 = vadd.f32 %v4525_v12, %v575_v28  ;;  %v790_v16 = vmax.f32 %v4805_v39, 0.0 }
  0x4a   : > { %v1881_v7 = vpack.c.bf16 %v1783_v25, %v1782_v27  ;;  %v1522_v49 = vsel %vm1475_vm1, %v1519_v40, %v1521_v35  ;;  %v1489_v15 = vrot.slane %v1280_v11, 1  ;;  %v3638_v6 = vunpack.c.h.bf16 %v4740_v14 }
  0x4b   : > { %v1524_v21 = vsel %vm1475_vm1, %v1521_v35, %v1523_v42  ;;  %v1800_v17 = vmax.f32 %v4736_v62, %v1522_v49  ;;  %v1491_v38 = vrot.slane %v4832_v9, 1  ;;  %v791_v54 = vmax.f32 %v4835_v3, 0.0 }
  0x4c   : > { %3875 = vmatpush3.bf16.msra.mxu0 %v1881_v7  ;;  %4273 = vmatpush3.bf16.msra.mxu1 %v1881_v7  ;;  %v1801_v1 = vmax.f32 %v1296_v22, %v1524_v21  ;;  %v1490_v41 = vsel %vm1475_vm1, %v1487_v30, %v1489_v15  ;;  %v1020_v40 = vrot.slane %v790_v16, 6  ;;  %v3641_v43 = vunpack.c.l.bf16 %v3825_v24 }
  0x4d   : > { %v1492_v14 = vsel %vm1475_vm1, %v1489_v15, %v1491_v38  ;;  %v1784_v28 = vmax.f32 %v1279_v56, %v1490_v41  ;;  %v1022_v62 = vrot.slane %v791_v54, 6  ;;  %v558_v19 = vmul.f32 %v3638_v6, %v4508_v2 }
  0x4e   : > { %v1890_v51 = vpack.c.bf16 %v1801_v1, %v1800_v17  ;;  %v1785_v13 = vmax.f32 %v1280_v11, %v1492_v14  ;;  %v1021_v22 = vsel %vm968_vm0, %v1018_v18, %v1020_v40  ;;  %v559_v30 = vmul.f32 %v3641_v43, %v4508_v2  ;;  %v4883_v1 = vld [vmem:[%s4513_s26 + $0x88] sm:$0xff]  }
  0x4f   : > { %v1023_v26 = vsel %vm968_vm0, %v1020_v40, %v1022_v62  ;;  %v1298_v27 = vmax.f32 %v786_v61, %v1021_v22  ;;  %v4862_v20 = vadd.f32 %v4525_v12, %v558_v19  ;;  %v3674_v56 = vunpack.c.h.bf16 %v4754_v37 }
  0x50   : > { %3876 = vmatprep.subr.bf16.mxu0 %v1890_v51  ;;  %4266 = vmatprep.subr.bf16.mxu1 %v1890_v51  ;;  %v1882_v25 = vpack.c.bf16 %v1785_v13, %v1784_v28  ;;  %v4867_v35 = vmax.f32 %v787_v4, %v1023_v26  ;;  %v4870_v18 = vadd.f32 %v4525_v12, %v559_v30  ;;  %v3677_v0 = vunpack.c.l.bf16 %v3834_v34 }
  0x51   : > { %v1525_v11 = vrot.slane %v1298_v27, 1  ;;  %v774_v53 = vmax.f32 %v4862_v20, 0.0  ;;  %v576_v61 = vmul.f32 %v3674_v56, %v4508_v2  ;;  %v3642_v7 = vunpack.c.h.bf16 %v3825_v24 }
  0x52   : > { %3877 = vmatpush3.bf16.msra.mxu0 %v1882_v25  ;;  %4274 = vmatpush3.bf16.msra.mxu1 %v1882_v25  ;;  %v1527_v37 = vrot.slane %v4867_v35, 1  ;;  %v775_v49 = vmax.f32 %v4870_v18, 0.0  ;;  %v577_v57 = vmul.f32 %v3677_v0, %v4508_v2  ;;  %v3678_v4 = vunpack.c.h.bf16 %v3834_v34 }
  0x53   : > { %v1526_v15 = vsel %vm1475_vm1, %v1523_v42, %v1525_v11  ;;  %v988_v6 = vrot.slane %v774_v53, 6  ;;  %v4879_v21 = vadd.f32 %v4525_v12, %v576_v61  ;;  %v560_v17 = vmul.f32 %v3642_v7, %v4508_v2 }
  0x54   : > { %v1528_v24 = vsel %vm1475_vm1, %v1525_v11, %v1527_v37  ;;  %v1802_v41 = vmax.f32 %v4821_v58, %v1526_v15  ;;  %v990_v40 = vrot.slane %v775_v49, 6  ;;  %v4890_v43 = vadd.f32 %v4525_v12, %v577_v57 }
  0x55   : > { %v1803_v14 = vmax.f32 %v1298_v27, %v1528_v24  ;;  %v989_v42 = vsel %vm968_vm0, %v4815_v10, %v988_v6  ;;  %v792_v28 = vmax.f32 %v4879_v21, 0.0  ;;  %v4896_v19 = vadd.f32 %v4525_v12, %v560_v17 }
  0x56   : > { %v991_v34 = vsel %vm968_vm0, %v988_v6, %v990_v40  ;;  %v1282_v58 = vmax.f32 %v770_v59, %v989_v42  ;;  %v793_v51 = vmax.f32 %v4890_v43, 0.0  ;;  %v3681_v13 = vunpack.c.l.bf16 %v4883_v1  ;;  %v5047_v43 = vld [vmem:[%s6810_s2] ss:$0 sm:$0xff] }
  0x57   : > { %v1891_v22 = vpack.c.bf16 %v1803_v14, %v1802_v41  ;;  %v1283_v30 = vmax.f32 %v771_v8, %v991_v34  ;;  %v1024_v10 = vrot.slane %v792_v28, 6  ;;  %v776_v26 = vmax.f32 %v4896_v19, 0.0 }
  0x58   : > { %v1493_v27 = vrot.slane %v1282_v58, 1  ;;  %v1026_v20 = vrot.slane %v793_v51, 6  ;;  %v578_v50 = vmul.f32 %v3678_v4, %v4508_v2  ;;  %v579_v59 = vmul.f32 %v3681_v13, %v4508_v2  ;;  %v4961_v13 = vld [vmem:[%s4513_s26 + $0x90] sm:$0xff]  }
  0x59   : > { %3878 = vmatprep.subr.bf16.mxu0 %v1891_v22  ;;  %4267 = vmatprep.subr.bf16.mxu1 %v1891_v22  ;;  %v1495_v56 = vrot.slane %v1283_v30, 1  ;;  %v1025_v25 = vsel %vm968_vm0, %v1022_v62, %v1024_v10  ;;  %v992_v63 = vrot.slane %v776_v26, 6  ;;  %v997_v8 = vsel %vm968_vm0, %v4559_v44, %v4561_v45 }
  0x5a   : > { %v1494_v0 = vsel %vm1475_vm1, %v1491_v38, %v1493_v27  ;;  %v1027_v11 = vsel %vm968_vm0, %v1024_v10, %v1026_v20  ;;  %v1300_v61 = vmax.f32 %v788_v48, %v1025_v25  ;;  %v4925_v7 = vadd.f32 %v4525_v12, %v578_v50 }
  0x5b   : > { %v1496_v62 = vsel %vm1475_vm1, %v1493_v27, %v1495_v56  ;;  %v1786_v57 = vmax.f32 %v4832_v9, %v1494_v0  ;;  %v4931_v4 = vmax.f32 %v789_v55, %v1027_v11  ;;  %v993_v45 = vsel %vm968_vm0, %v990_v40, %v992_v63  ;;  %v4978_v0 = vld [vmem:[%s4513_s26 + $0xb8] sm:$0xff]  }
  0x5c   : > { %v1787_v15 = vmax.f32 %v1282_v58, %v1496_v62  ;;  %v1529_v38 = vrot.slane %v1300_v61, 1  ;;  %v995_v6 = vsel %vm968_vm0, %v992_v63, %v4559_v44  ;;  %v1284_v23 = vmax.f32 %v772_v32, %v993_v45 }
  0x5d   : > { %v1531_v48 = vrot.slane %v4931_v4, 1  ;;  %v1285_v17 = vmax.f32 %v773_v29, %v995_v6  ;;  %v4942_v9 = vadd.f32 %v4525_v12, %v579_v59  ;;  %v6829_v33 = vmax.f32 %v4925_v7, 0.0  ;;  %v3844_v6 = vld [vmem:[%s4513_s26 + $0xd0] sm:$0xff]  }
  0x5e   : > { %v1883_v55 = vpack.c.bf16 %v1787_v15, %v1786_v57  ;;  %v1530_v24 = vsel %vm1475_vm1, %v1527_v37, %v1529_v38  ;;  %v1497_v41 = vrot.slane %v1284_v23, 1  ;;  %v1286_v40 = vmax.f32 %v774_v53, %v997_v8 }
  0x5f   : > { %v1532_v44 = vsel %vm1475_vm1, %v1529_v38, %v1531_v48  ;;  %v1804_v36 = vmax.f32 %v4867_v35, %v1530_v24  ;;  %v1499_v32 = vrot.slane %v1285_v17, 1  ;;  %v6828_v14 = vmax.f32 %v4942_v9, 0.0  ;;  %v3843_v38 = vld [vmem:[%s4513_s26 + $0xc8] sm:$0xff]  }
  0x60   : > { %3879 = vmatpush3.bf16.msra.mxu0 %v1883_v55  ;;  %4275 = vmatpush3.bf16.msra.mxu1 %v1883_v55  ;;  %v1805_v31 = vmax.f32 %v1300_v61, %v1532_v44  ;;  %v1498_v29 = vsel %vm1475_vm1, %v1495_v56, %v1497_v41  ;;  %v1028_v42 = vrot.slane %v6829_v33, 6  ;;  %v4955_v37 = vmax.f32 %v775_v49, %v4580_v52  ;;  %v5003_v44 = vld [vmem:[%s4513_s26 + $0xd8] sm:$0xff]  }
  0x61   : > { %v1500_v53 = vsel %vm1475_vm1, %v1497_v41, %v1499_v32  ;;  %v1788_v34 = vmax.f32 %v1283_v30, %v1498_v29  ;;  %v1030_v35 = vrot.slane %v6828_v14, 6  ;;  %v1501_v58 = vrot.slane %v1286_v40, 1 }
  0x62   : > { %v1892_v22 = vpack.c.bf16 %v1805_v31, %v1804_v36  ;;  %v1789_v10 = vmax.f32 %v1284_v23, %v1500_v53  ;;  %v1029_v27 = vsel %vm968_vm0, %v1026_v20, %v1028_v42  ;;  %v1503_v50 = vrot.slane %v4955_v37, 1 }
  0x63   : > { %v1031_v52 = vsel %vm968_vm0, %v1028_v42, %v1030_v35  ;;  %v1302_v18 = vmax.f32 %v790_v16, %v1029_v27  ;;  %v1502_v49 = vsel %vm1475_vm1, %v1499_v32, %v1501_v58  ;;  %v3682_v30 = vunpack.c.h.bf16 %v4883_v1  ;;  %v3842_v1 = vld [vmem:[%s4513_s26 + $0xc0] sm:$0xff]  }
  0x64   : > { %3880 = vmatprep.subr.bf16.mxu0 %v1892_v22  ;;  %4268 = vmatprep.subr.bf16.mxu1 %v1892_v22  ;;  %v1884_v59 = vpack.c.bf16 %v1789_v10, %v1788_v34  ;;  %v4972_v56 = vmax.f32 %v791_v54, %v1031_v52  ;;  %v1504_v20 = vsel %vm1475_vm1, %v1501_v58, %v1503_v50  ;;  %v3685_v25 = vunpack.c.l.bf16 %v4961_v13  ;;  %v5026_v10 = vld [vmem:[%s4513_s26 + $0x138] sm:$0xff]  }
  0x65   : > { %v1533_v63 = vrot.slane %v1302_v18, 1  ;;  %v1790_v8 = vmax.f32 %v1285_v17, %v1502_v49  ;;  %v1791_v39 = vmax.f32 %v1286_v40, %v1504_v20  ;;  %v580_v16 = vmul.f32 %v3682_v30, %v4508_v2 }
  0x66   : > { %3881 = vmatpush3.bf16.msra.mxu0 %v1884_v59  ;;  %4276 = vmatpush3.bf16.msra.mxu1 %v1884_v59  ;;  %v1535_v3 = vrot.slane %v4972_v56, 1  ;;  %v581_v54 = vmul.f32 %v3685_v25, %v4508_v2  ;;  %v1001_v11 = vsel %vm968_vm0, %v4563_v46, %v4567_v47  ;;  %v3706_v61 = vunpack.c.h.bf16 %v4978_v0 }
  0x67   : > { %v1534_v62 = vsel %vm1475_vm1, %v1531_v48, %v1533_v63  ;;  %v1885_v57 = vpack.c.bf16 %v1791_v39, %v1790_v8  ;;  %v4989_v45 = vadd.f32 %v4525_v12, %v580_v16  ;;  %v1288_v15 = vmax.f32 %v776_v26, %v1001_v11 }
  0x68   : > { %v1536_v2 = vsel %vm1475_vm1, %v1533_v63, %v1535_v3  ;;  %v1806_v23 = vmax.f32 %v4931_v4, %v1534_v62  ;;  %v4998_v46 = vadd.f32 %v4525_v12, %v581_v54  ;;  %v3709_v47 = vunpack.c.l.bf16 %v3842_v1 }
  0x69   : > { %v1807_v17 = vmax.f32 %v1302_v18, %v1536_v2  ;;  %v6824_v48 = vmax.f32 %v4989_v45, 0.0  ;;  %v1505_v55 = vrot.slane %v1288_v15, 1  ;;  %v3710_v24 = vunpack.c.h.bf16 %v3842_v1 }
  0x6a   : > { %v6823_v41 = vmax.f32 %v4998_v46, 0.0  ;;  %v3713_v19 = vunpack.c.l.bf16 %v3843_v38  ;;  %v3714_v40 = vunpack.c.h.bf16 %v3843_v38  ;;  %v3717_v26 = vunpack.c.l.bf16 %v3844_v6 }
  0x6b   : > { %v1893_v36 = vpack.c.bf16 %v1807_v17, %v1806_v23  ;;  %v1032_v4 = vrot.slane %v6824_v48, 6  ;;  %v1506_v12 = vsel %vm1475_vm1, %v1503_v50, %v1505_v55  ;;  %v1508_v32 = vsel %vm1475_vm1, %v1505_v55, %v1507_v5 }
  0x6c   : > { %v5013_v31 = vrot.slane %v6823_v41, 6  ;;  %v1792_v29 = vmax.f32 %v4955_v37, %v1506_v12  ;;  %v1793_v42 = vmax.f32 %v1288_v15, %v1508_v32  ;;  %v3718_v53 = vunpack.c.h.bf16 %v3844_v6  ;;  %v4305_v41 = vld [vmem:[%s6811_s3 + $0x70] ss:$28 sps:$4 sm:$0xff]  }
  0x6d   : > { %3882 = vmatprep.subr.bf16.mxu0 %v1893_v36  ;;  %4269 = vmatprep.subr.bf16.mxu1 %v1893_v36  ;;  %v1033_v34 = vsel %vm968_vm0, %v1030_v35, %v1032_v4  ;;  %v3721_v58 = vunpack.c.l.bf16 %v5003_v44  ;;  %v592_v5 = vmul.f32 %v5021_v60, %v3706_v61  ;;  %v593_v22 = vmul.f32 %v5021_v60, %v3709_v47 }
  0x6e   : > { %3883 = vmatpush3.bf16.msra.mxu0 %v1885_v57  ;;  %4277 = vmatpush3.bf16.msra.mxu1 %v1885_v57  ;;  %v1035_v37 = vsel %vm968_vm0, %v1032_v4, %v5013_v31  ;;  %v1304_v35 = vmax.f32 %v792_v28, %v1033_v34  ;;  %v1886_v27 = vpack.c.bf16 %v1793_v42, %v1792_v29  ;;  %v3770_v50 = vunpack.c.h.bf16 %v5026_v10  ;;  %v3859_v29 = vld [vmem:[%s4513_s26 + $0x148] sm:$0xff]   ;;  %v4292_v42 = vld [vmem:[%s6811_s3 + $0x2a0] ss:$28 sps:$4 sm:$0xff]  }
  0x6f   : > { %v5035_v52 = vmax.f32 %v793_v51, %v1035_v37  ;;  %v594_v18 = vmul.f32 %v5021_v60, %v3710_v24  ;;  %v595_v49 = vmul.f32 %v5021_v60, %v3713_v19  ;;  %v596_v30 = vmul.f32 %v5021_v60, %v3714_v40  ;;  %v4289_v24 = vld [vmem:[%s6811_s3] ss:$28 sps:$4 sm:$0xff]  }
  0x70   : > { %v1537_v59 = vrot.slane %v1304_v35, 1  ;;  %v597_v20 = vmul.f32 %v5021_v60, %v3717_v26  ;;  %v598_v25 = vmul.f32 %v5021_v60, %v3718_v53  ;;  %v599_v21 = vmul.f32 %v5021_v60, %v3721_v58 }
  0x71   : > { %v6827_v28 = vrot.slane %v5035_v52, 1  ;;  %v5050_v51 = vadd.f32 %v5047_v43, %v592_v5  ;;  %v704_v63 = vadd.f32 %v5047_v43, %v593_v22  ;;  %v705_v8 = vadd.f32 %v5047_v43, %v594_v18  ;;  %v3860_v22 = vld [vmem:[%s4513_s26 + $0x150] sm:$0xff]  }
  0x72   : > { %v1538_v39 = vsel %vm1475_vm1, %v1535_v3, %v1537_v59  ;;  %v706_v16 = vadd.f32 %v5047_v43, %v595_v49  ;;  %v5057_v1 = vadd.f32 %v5047_v43, %v596_v30  ;;  %v5060_v54 = vadd.f32 %v5047_v43, %v597_v20  ;;  %v5121_v30 = vld [vmem:[%s4513_s26 + $0x158] sm:$0xff]  }
  0x73   : > { %6870 = vst [vmem:[#allocation2_spill] sm:$0xff] %v5050_v51  ;;  %v1540_v11 = vsel %vm1475_vm1, %v1537_v59, %v6827_v28  ;;  %v1808_v61 = vmax.f32 %v4972_v56, %v1538_v39  ;;  %v5067_v62 = vadd.f32 %v5047_v43, %v598_v25  ;;  %v5070_v3 = vadd.f32 %v5047_v43, %v599_v21  ;;  %v3858_v56 = vld [vmem:[%s4513_s26 + $0x140] sm:$0xff]   ;;  %v4295_v59 = vld [vmem:[%s6811_s3 + $0x3c] ss:$28 sps:$4 sm:$0xff]  }
  0x74   : > { %v1809_v57 = vmax.f32 %v1304_v35, %v1540_v11  ;;  %v6815_v15 = vmax.f32 %v5050_v51, 0.0  ;;  %v809_v38 = vmax.f32 %v704_v63, 0.0  ;;  %v810_v6 = vmax.f32 %v705_v8, 0.0  ;;  %v5246_v28 = vld [vmem:[%s4513_s26 + $0x118] sm:$0xff]  }
  0x75   : > { %v811_v2 = vmax.f32 %v706_v16, 0.0  ;;  %v6826_v23 = vmax.f32 %v5057_v1, 0.0  ;;  %v6825_v47 = vmax.f32 %v5060_v54, 0.0  ;;  %v6821_v17 = vmax.f32 %v5067_v62, 0.0 }
  0x76   : > { %v1894_v55 = vpack.c.bf16 %v1809_v57, %v1808_v61  ;;  %v6819_v19 = vmax.f32 %v5070_v3, 0.0  ;;  %v5083_v40 = vrot.slane %v6815_v15, 6  ;;  %v5085_v26 = vrot.slane %v809_v38, 6 }
  0x77   : > { %v5087_v36 = vrot.slane %v810_v6, 6  ;;  %v5089_v4 = vrot.slane %v811_v2, 6  ;;  %v5093_v12 = vrot.slane %v6826_v23, 6  ;;  %v1066_v32 = vrot.slane %v6825_v47, 6 }
  0x78   : > { %3884 = vmatprep.subr.bf16.mxu0 %v1894_v55  ;;  %4270 = vmatprep.subr.bf16.mxu1 %v1894_v55  ;;  %v5104_v53 = vsel %vm968_vm0, %v5083_v40, %v5085_v26  ;;  %v1068_v34 = vrot.slane %v6821_v17, 6  ;;  %v5110_v58 = vrot.slane %v6819_v19, 6  ;;  %v3773_v5 = vunpack.c.l.bf16 %v3858_v56 }
  0x79   : > { %3885 = vmatpush3.bf16.msra.mxu0 %v1886_v27  ;;  %4278 = vmatpush3.bf16.msra.mxu1 %v1886_v27  ;;  %v5116_v37 = vsel %vm968_vm0, %v5087_v36, %v5089_v4  ;;  %v1067_v35 = vsel %vm968_vm0, %v5093_v12, %v1066_v32  ;;  %v3774_v18 = vunpack.c.h.bf16 %v3858_v56  ;;  %v3777_v49 = vunpack.c.l.bf16 %v3859_v29  ;;  %v4297_v27 = vld [vmem:[%s6811_s3 + $0x2dc] ss:$28 sps:$4 sm:$0xff]  }
  0x7a   : > { %v1069_v20 = vsel %vm968_vm0, %v1066_v32, %v1068_v34  ;;  %v1071_v25 = vsel %vm968_vm0, %v1068_v34, %v5110_v58  ;;  %v5132_v21 = vmax.f32 %v809_v38, %v1067_v35  ;;  %v3778_v63 = vunpack.c.h.bf16 %v3859_v29 }
  0x7b   : > { %v1322_v8 = vmax.f32 %v810_v6, %v1069_v20  ;;  %v5134_v39 = vmax.f32 %v811_v2, %v1071_v25  ;;  %v3781_v16 = vunpack.c.l.bf16 %v3860_v22  ;;  %v3782_v11 = vunpack.c.h.bf16 %v3860_v22 }
  0x7c   : > { %6871 = vst [vmem:[#allocation3_spill] sm:$0xff] %v5132_v21  ;;  %2579 = vmatmul.mubr.bf16.vlgmr.msra.gmra.mrb[0].mxu0 %v4289_v24  ;;  %2675 = vmatmul.mubr.bf16.vlgmr.msra.gmra.mrb[0].mxu1 %v4292_v42  ;;  %v6813_v61 = vrot.slane %v5132_v21, 1  ;;  %v3785_v57 = vunpack.c.l.bf16 %v5121_v30  ;;  %v624_v56 = vmul.f32 %v5021_v60, %v3770_v50  ;;  %v625_v55 = vmul.f32 %v5021_v60, %v3773_v5 }
  0x7d   : > { %v1573_v38 = vrot.slane %v1322_v8, 1  ;;  %v6822_v32 = vrot.slane %v5134_v39, 1  ;;  %v626_v6 = vmul.f32 %v5021_v60, %v3774_v18  ;;  %v627_v2 = vmul.f32 %v5021_v60, %v3777_v49  ;;  %2586 = vmatprep.mubr.bf16.mxu0 %v4295_v59  ;;  %2682 = vmatprep.mubr.bf16.mxu1 %v4297_v27  ;;  %v4299_v27 = vld [vmem:[%s6811_s3 + $0x38] ss:$28 sps:$4 sm:$0xff]  }
  0x7e   : > { %v628_v24 = vmul.f32 %v5021_v60, %v3778_v63  ;;  %v629_v29 = vmul.f32 %v5021_v60, %v3781_v16  ;;  %v630_v42 = vmul.f32 %v5021_v60, %v3782_v11  ;;  %v631_v10 = vmul.f32 %v5021_v60, %v3785_v57  ;;  %v4300_v16 = vld [vmem:[%s6811_s3 + $0x2d8] ss:$28 sps:$4 sm:$0xff]  }
  0x7f   : > { %v1574_v50 = vsel %vm1475_vm1, %v6813_v61, %v1573_v38  ;;  %v1576_v34 = vsel %vm1475_vm1, %v1573_v38, %v6822_v32  ;;  %v5156_v5 = vadd.f32 %v5047_v43, %v624_v56  ;;  %v736_v22 = vadd.f32 %v5047_v43, %v625_v55  ;;  %v4301_v11 = vld [vmem:[%s6811_s3 + $0x74] ss:$28 sps:$4 sm:$0xff]  }
  0x80   : > { %v1826_v35 = vmax.f32 %v5132_v21, %v1574_v50  ;;  %v1827_v18 = vmax.f32 %v1322_v8, %v1576_v34  ;;  %v737_v49 = vadd.f32 %v5047_v43, %v626_v6  ;;  %v738_v59 = vadd.f32 %v5047_v43, %v627_v2  ;;  %v4303_v6 = vld [vmem:[%s6811_s3 + $0x314] ss:$28 sps:$4 sm:$0xff]  }
  0x81   : > { %6872 = vst [vmem:[#allocation4_spill] sm:$0xff] %v5156_v5  ;;  %v5166_v20 = vadd.f32 %v5047_v43, %v628_v24  ;;  %v5169_v25 = vadd.f32 %v5047_v43, %v629_v29  ;;  %v5172_v63 = vadd.f32 %v5047_v43, %v630_v42  ;;  %v5175_v8 = vadd.f32 %v5047_v43, %v631_v10  ;;  %v5191_v10 = vld [vmem:[%s4513_s26 + $0x98] sm:$0xff]  }
  0x82   : > { %v1903_v57 = vpack.c.bf16 %v1827_v18, %v1826_v35  ;;  %v6814_v56 = vmax.f32 %v5156_v5, 0.0  ;;  %v841_v55 = vmax.f32 %v736_v22, 0.0  ;;  %v842_v38 = vmax.f32 %v737_v49, 0.0  ;;  %v3850_v18 = vld [vmem:[%s4513_s26 + $0x100] sm:$0xff]  }
  0x83   : > { %v843_v2 = vmax.f32 %v738_v59, 0.0  ;;  %v6816_v24 = vmax.f32 %v5166_v20, 0.0  ;;  %v6817_v29 = vmax.f32 %v5169_v25, 0.0  ;;  %v6818_v42 = vmax.f32 %v5172_v63, 0.0 }
  0x84   : > { %3982 = vmatprep.subr.bf16.mxu1 %v1903_v57  ;;  %v6820_v50 = vmax.f32 %v5175_v8, 0.0  ;;  %v5196_v34 = vrot.slane %v6814_v56, 6  ;;  %v5198_v22 = vrot.slane %v841_v55, 6  ;;  %v5200_v35 = vrot.slane %v842_v38, 6  ;;  %2587 = vmatmul.mubr.bf16.gmra.mrb[4].mxu0 %v4299_v27 }
  0x85   : > { %v5203_v49 = vrot.slane %v843_v2, 6  ;;  %v5207_v59 = vrot.slane %v6816_v24, 6  ;;  %v1130_v57 = vrot.slane %v6817_v29, 6  ;;  %v1132_v61 = vrot.slane %v6818_v42, 6  ;;  %2683 = vmatmul.mubr.bf16.gmra.mrb[4].mxu1 %v4300_v16  ;;  %2594 = vmatprep.mubr.bf16.mxu0 %v4301_v11  ;;  %v3851_v29 = vld [vmem:[%s4513_s26 + $0x108] sm:$0xff]  }
  0x86   : > { %6873 = vst [vmem:[#allocation5_spill] sm:$0xff] %v5196_v34  ;;  %6874 = vst [vmem:[#allocation6_spill] sm:$0xff] %v5198_v22  ;;  %v5216_v56 = vsel %vm968_vm0, %v5196_v34, %v5198_v22  ;;  %v5220_v27 = vrot.slane %v6820_v50, 6  ;;  %v3686_v15 = vunpack.c.h.bf16 %v4961_v13  ;;  %v3689_v24 = vunpack.c.l.bf16 %v5191_v10  ;;  %2690 = vmatprep.mubr.bf16.mxu1 %v4303_v6  ;;  %v3852_v6 = vld [vmem:[%s4513_s26 + $0x110] sm:$0xff]  }
  0x87   : > { %6875 = vst [vmem:[#allocation7_spill] sm:$0xff] %v5200_v35  ;;  %6876 = vst [vmem:[#allocation8_spill] sm:$0xff] %v5203_v49  ;;  %v5228_v16 = vsel %vm968_vm0, %v5200_v35, %v5203_v49  ;;  %v1131_v11 = vsel %vm968_vm0, %v5207_v59, %v1130_v57  ;;  %v1133_v42 = vsel %vm968_vm0, %v1130_v57, %v1132_v61  ;;  %v3741_v19 = vunpack.c.l.bf16 %v3850_v18 }
  0x88   : > { %6877 = vst [vmem:[#allocation9_spill] sm:$0xff] %v5207_v59  ;;  %6878 = vst [vmem:[#allocation10_spill] sm:$0xff] %v5216_v56  ;;  %v1135_v50 = vsel %vm968_vm0, %v1132_v61, %v5220_v27  ;;  %v5235_v13 = vmax.f32 %v841_v55, %v1131_v11  ;;  %v1354_v17 = vmax.f32 %v842_v38, %v1133_v42  ;;  %v3742_v23 = vunpack.c.h.bf16 %v3850_v18  ;;  %v4306_v61 = vld [vmem:[%s6811_s3 + $0x310] ss:$28 sps:$4 sm:$0xff]  }
  0x89   : > { %6879 = vst [vmem:[#allocation11_spill] sm:$0xff] %v5228_v16  ;;  %v582_v32 = vmul.f32 %v5021_v60, %v3686_v15  ;;  %v5242_v48 = vmax.f32 %v843_v2, %v1135_v50  ;;  %v583_v47 = vmul.f32 %v5021_v60, %v3689_v24  ;;  %v3745_v57 = vunpack.c.l.bf16 %v3851_v29  ;;  %v4307_v15 = vld [vmem:[%s6811_s3 + $0xac] ss:$28 sps:$4 sm:$0xff]  }
  0x8a   : > { %6880 = vst [vmem:[#allocation12_spill] sm:$0xff] %v5235_v13  ;;  %v6833_v55 = vrot.slane %v5235_v13, 1  ;;  %v1637_v38 = vrot.slane %v1354_v17, 1  ;;  %v3746_v42 = vunpack.c.h.bf16 %v3851_v29  ;;  %v4309_v24 = vld [vmem:[%s6811_s3 + $0x34c] ss:$28 sps:$4 sm:$0xff]   ;;  %v3749_v11 = vunpack.c.l.bf16 %v3852_v6 }
  0x8b   : > { %v5256_v2 = vadd.f32 %v5047_v43, %v582_v32  ;;  %v6835_v50 = vrot.slane %v5242_v48, 1  ;;  %v5263_v18 = vadd.f32 %v5047_v43, %v583_v47  ;;  %v3750_v14 = vunpack.c.h.bf16 %v3852_v6 }
  0x8c   : > { %v1638_v33 = vsel %vm1475_vm1, %v6833_v55, %v1637_v38  ;;  %v3753_v32 = vunpack.c.l.bf16 %v5246_v28  ;;  %v609_v29 = vmul.f32 %v5021_v60, %v3741_v19  ;;  %2595 = vmatmul.mubr.bf16.gmra.mrb[8].mxu0 %v4305_v41  ;;  %v610_v6 = vmul.f32 %v5021_v60, %v3742_v23 }
  0x8d   : > { %v6837_v5 = vmax.f32 %v5256_v2, 0.0  ;;  %v1640_v49 = vsel %vm1475_vm1, %v1637_v38, %v6835_v50  ;;  %v1858_v47 = vmax.f32 %v5235_v13, %v1638_v33  ;;  %v6836_v59 = vmax.f32 %v5263_v18, 0.0  ;;  %2691 = vmatmul.mubr.bf16.gmra.mrb[8].mxu1 %v4306_v61  ;;  %2602 = vmatprep.mubr.bf16.mxu0 %v4307_v15  ;;  %v4311_v15 = vld [vmem:[%s6811_s3 + $0xa8] ss:$28 sps:$4 sm:$0xff]  }
  0x8e   : > { %v1859_v55 = vmax.f32 %v1354_v17, %v1640_v49  ;;  %v611_v22 = vmul.f32 %v5021_v60, %v3745_v57  ;;  %v612_v41 = vmul.f32 %v5021_v60, %v3746_v42  ;;  %2698 = vmatprep.mubr.bf16.mxu1 %v4309_v24  ;;  %v613_v33 = vmul.f32 %v5021_v60, %v3749_v11  ;;  %v4312_v11 = vld [vmem:[%s6811_s3 + $0x348] ss:$28 sps:$4 sm:$0xff]  }
  0x8f   : > { %v1036_v16 = vrot.slane %v6837_v5, 6  ;;  %v5283_v19 = vrot.slane %v6836_v59, 6  ;;  %v614_v38 = vmul.f32 %v5021_v60, %v3750_v14  ;;  %v615_v23 = vmul.f32 %v5021_v60, %v3753_v32  ;;  %v4313_v32 = vld [vmem:[%s6811_s3 + $0xe4] ss:$28 sps:$4 sm:$0xff]  }
  0x90   : > { %v1919_v61 = vpack.c.bf16 %v1859_v55, %v1858_v47  ;;  %v720_v49 = vadd.f32 %v5047_v43, %v609_v29  ;;  %v5292_v57 = vadd.f32 %v5047_v43, %v610_v6  ;;  %v6881_v14 = vmax.f32 %v4925_v7, 0.0  ;;  %v4317_v6 = vld [vmem:[%s6811_s3 + $0xc] ss:$28 sps:$4 sm:$0xff]  }
  0x91   : > { %v1037_v17 = vsel %vm968_vm0, %v5013_v31, %v1036_v16  ;;  %v1039_v42 = vsel %vm968_vm0, %v1036_v16, %v5283_v19  ;;  %v5302_v55 = vadd.f32 %v5047_v43, %v611_v22  ;;  %v5305_v31 = vadd.f32 %v5047_v43, %v612_v41 }
  0x92   : > { %v1306_v24 = vmax.f32 %v6881_v14, %v1037_v17  ;;  %4094 = vmatprep.subr.bf16.mxu0 %v1919_v61  ;;  %v6882_v16 = vmax.f32 %v4942_v9, 0.0  ;;  %v5318_v22 = vadd.f32 %v5047_v43, %v613_v33  ;;  %v5321_v29 = vadd.f32 %v5047_v43, %v614_v38  ;;  %v3846_v14 = vld [vmem:[%s4513_s26 + $0xe0] sm:$0xff]  }
  0x93   : > { %v5324_v47 = vadd.f32 %v5047_v43, %v615_v23  ;;  %v825_v61 = vmax.f32 %v720_v49, 0.0  ;;  %v3722_v5 = vunpack.c.h.bf16 %v5003_v44  ;;  %v5344_v17 = vld [vmem:[%s4513_s26 + $0xa0] sm:$0xff]   ;;  %v6890_v35 = vmax.f32 %v5302_v55, 0.0 }
  0x94   : > { %v5315_v7 = vmax.f32 %v6882_v16, %v1039_v42  ;;  %6883 = vst [vmem:[#allocation13_spill] sm:$0xff] %v5321_v29  ;;  %v1541_v41 = vrot.slane %v1306_v24, 1  ;;  %v6839_v42 = vmax.f32 %v5305_v31, 0.0  ;;  %v6840_v38 = vmax.f32 %v5318_v22, 0.0  ;;  %2603 = vmatmul.mubr.bf16.gmra.mrb[12].mxu0 %v4311_v15 }
  0x95   : > { %6884 = vst [vmem:[#allocation14_spill] sm:$0xff] %v5324_v47  ;;  %v6885_v16 = vrot.slane %v5035_v52, 1  ;;  %v5340_v59 = vrot.slane %v825_v61, 6  ;;  %2699 = vmatmul.mubr.bf16.gmra.mrb[12].mxu1 %v4312_v11  ;;  %2610 = vmatprep.mubr.bf16.mxu0 %v4313_v32  ;;  %v6886_v44 = vmax.f32 %v5321_v29, 0.0  ;;  %v6887_v11 = vmax.f32 %v5324_v47, 0.0 }
  0x96   : > { %v6841_v33 = vrot.slane %v5315_v7, 1  ;;  %v5352_v23 = vrot.slane %v6839_v42, 6  ;;  %2739 = vmatprep.mubr.bf16.mxu1 %v4317_v6  ;;  %v3690_v42 = vunpack.c.h.bf16 %v5191_v10  ;;  %v6889_v10 = vmax.f32 %v5292_v57, 0.0 }
  0x97   : > { %v1542_v50 = vsel %vm1475_vm1, %v6885_v16, %v1541_v41  ;;  %v1098_v16 = vrot.slane %v6840_v38, 6  ;;  %v1100_v13 = vrot.slane %v6886_v44, 6  ;;  %v5360_v32 = vrot.slane %v6887_v11, 6 }
  0x98   : > { %v1544_v9 = vsel %vm1475_vm1, %v1541_v41, %v6841_v33  ;;  %v1810_v15 = vmax.f32 %v5035_v52, %v1542_v50  ;;  %v3725_v41 = vunpack.c.l.bf16 %v3846_v14  ;;  %v600_v50 = vmul.f32 %v5021_v60, %v3722_v5  ;;  %v4319_v5 = vld [vmem:[%s6811_s3 + $0x11c] ss:$28 sps:$4 sm:$0xff]  }
  0x99   : > { %v1811_v49 = vmax.f32 %v1306_v24, %v1544_v9  ;;  %v1099_v52 = vsel %vm968_vm0, %v5352_v23, %v1098_v16  ;;  %v3693_v38 = vunpack.c.l.bf16 %v5344_v17  ;;  %v4318_v24 = vld [vmem:[%s6811_s3 + $0xe0] ss:$28 sps:$4 sm:$0xff]   ;;  %v1101_v9 = vsel %vm968_vm0, %v1098_v16, %v1100_v13  ;;  %v5389_v16 = vld [vmem:[%s4513_s26 + $0xe8] sm:$0xff]  }
  0x9a   : > { %v1103_v44 = vsel %vm968_vm0, %v1100_v13, %v5360_v32  ;;  %v5373_v11 = vmax.f32 %v825_v61, %v1099_v52  ;;  %v1338_v33 = vmax.f32 %v6889_v10, %v1101_v9  ;;  %v584_v61 = vmul.f32 %v5021_v60, %v3690_v42 }
  0x9b   : > { %v1895_v6 = vpack.c.bf16 %v1811_v49, %v1810_v15  ;;  %v5382_v34 = vmax.f32 %v6890_v35, %v1103_v44  ;;  %v601_v49 = vmul.f32 %v5021_v60, %v3725_v41  ;;  %v5386_v15 = vadd.f32 %v5047_v43, %v600_v50 }
  0x9c   : > { %6888 = vst [vmem:[#allocation15_spill] sm:$0xff] %v5373_v11  ;;  %v6845_v13 = vrot.slane %v5373_v11, 1  ;;  %v585_v52 = vmul.f32 %v5021_v60, %v3693_v38  ;;  %v3726_v56 = vunpack.c.h.bf16 %v3846_v14  ;;  %v1605_v9 = vrot.slane %v1338_v33, 1  ;;  %2611 = vmatmul.mubr.bf16.gmra.mrb[16].mxu0 %v4318_v24 }
  0x9d   : > { %3983 = vmatpush3.bf16.msra.mxu1 %v1895_v6  ;;  %v6846_v10 = vrot.slane %v5382_v34, 1  ;;  %v5396_v35 = vadd.f32 %v5047_v43, %v601_v49  ;;  %v6847_v41 = vmax.f32 %v5386_v15, 0.0  ;;  %v5400_v50 = vadd.f32 %v5047_v43, %v584_v61  ;;  %2618 = vmatprep.mubr.bf16.mxu0 %v4319_v5 }
  0x9e   : > { %v5403_v6 = vadd.f32 %v5047_v43, %v585_v52  ;;  %v3729_v42 = vunpack.c.l.bf16 %v5389_v16  ;;  %v602_v38 = vmul.f32 %v5021_v60, %v3726_v56  ;;  %v1606_v14 = vsel %vm1475_vm1, %v6845_v13, %v1605_v9 }
  0x9f   : > { %v1608_v44 = vsel %vm1475_vm1, %v1605_v9, %v6846_v10  ;;  %v6849_v24 = vmax.f32 %v5396_v35, 0.0  ;;  %v1072_v49 = vrot.slane %v6847_v41, 6  ;;  %v1842_v61 = vmax.f32 %v5373_v11, %v1606_v14 }
  0xa0   : > { %v1843_v52 = vmax.f32 %v1338_v33, %v1608_v44  ;;  %v6850_v21 = vmax.f32 %v5400_v50, 0.0  ;;  %v603_v9 = vmul.f32 %v5021_v60, %v3729_v42  ;;  %v5425_v10 = vadd.f32 %v5047_v43, %v602_v38  ;;  %v4323_v33 = vld [vmem:[%s6811_s3 + $0x118] ss:$28 sps:$4 sm:$0xff]  }
  0xa1   : > { %v1073_v5 = vsel %vm968_vm0, %v5110_v58, %v1072_v49  ;;  %v1074_v13 = vrot.slane %v6849_v24, 6  ;;  %v6891_v44 = vmax.f32 %v5057_v1, 0.0  ;;  %v6892_v58 = vmax.f32 %v5403_v6, 0.0  ;;  %v4325_v42 = vld [vmem:[%s6811_s3 + $0x154] ss:$28 sps:$4 sm:$0xff]  }
  0xa2   : > { %v1911_v14 = vpack.c.bf16 %v1843_v52, %v1842_v61  ;;  %v1040_v56 = vrot.slane %v6850_v21, 6  ;;  %v5443_v24 = vadd.f32 %v5047_v43, %v603_v9  ;;  %v3694_v1 = vunpack.c.h.bf16 %v5344_v17  ;;  %v5448_v52 = vld [vmem:[%s4513_s26 + $0xa8] sm:$0xff]  }
  0xa3   : > { %v1324_v41 = vmax.f32 %v6891_v44, %v1073_v5  ;;  %v5436_v47 = vrot.slane %v6892_v58, 6  ;;  %v1075_v38 = vsel %vm968_vm0, %v1072_v49, %v1074_v13  ;;  %v6893_v5 = vmax.f32 %v5060_v54, 0.0 }
  0xa4   : > { %4095 = vmatpush3.bf16.msra.mxu0 %v1911_v14  ;;  %v1041_v21 = vsel %vm968_vm0, %v5283_v19, %v1040_v56  ;;  %v6894_v9 = vmax.f32 %v4989_v45, 0.0  ;;  %v6895_v61 = vmax.f32 %v4998_v46, 0.0  ;;  %v6854_v14 = vmax.f32 %v5443_v24, 0.0 }
  0xa5   : > { %v5452_v44 = vmax.f32 %v6893_v5, %v1075_v38  ;;  %v1577_v58 = vrot.slane %v1324_v41, 1  ;;  %v1043_v49 = vsel %vm968_vm0, %v1040_v56, %v5436_v47  ;;  %v6896_v54 = vmax.f32 %v5425_v10, 0.0  ;;  %2619 = vmatmul.mubr.bf16.gmra.mrb[20].mxu0 %v4323_v33 }
  0xa6   : > { %v1308_v29 = vmax.f32 %v6894_v9, %v1041_v21  ;;  %v5462_v17 = vmax.f32 %v6895_v61, %v1043_v49  ;;  %v6897_v5 = vrot.slane %v5134_v39, 1  ;;  %v3697_v45 = vunpack.c.l.bf16 %v5448_v52  ;;  %2626 = vmatprep.mubr.bf16.mxu0 %v4325_v42 }
  0xa7   : > { %v1076_v38 = vrot.slane %v6896_v54, 6  ;;  %v1579_v51 = vrot.slane %v5452_v44, 1  ;;  %v586_v21 = vmul.f32 %v5021_v60, %v3694_v1  ;;  %v5479_v9 = vrot.slane %v6854_v14, 6 }
  0xa8   : > { %v1578_v19 = vsel %vm1475_vm1, %v6897_v5, %v1577_v58  ;;  %v1545_v56 = vrot.slane %v1308_v29, 1  ;;  %v6855_v61 = vrot.slane %v5462_v17, 1  ;;  %v6898_v54 = vmax.f32 %v5067_v62, 0.0  ;;  %v4329_v62 = vld [vmem:[%s6811_s3 + $0x150] ss:$28 sps:$4 sm:$0xff]  }
  0xa9   : > { %v1828_v46 = vmax.f32 %v5134_v39, %v1578_v19  ;;  %v1077_v49 = vsel %vm968_vm0, %v1074_v13, %v1076_v38  ;;  %v1580_v33 = vsel %vm1475_vm1, %v1577_v58, %v1579_v51  ;;  %v587_v11 = vmul.f32 %v5021_v60, %v3697_v45  ;;  %v5494_v19 = vld [vmem:[%s4513_s26 + $0xf0] sm:$0xff]  }
  0xaa   : > { %v1326_v5 = vmax.f32 %v6898_v54, %v1077_v49  ;;  %v1829_v42 = vmax.f32 %v1324_v41, %v1580_v33  ;;  %v6899_v39 = vrot.slane %v5315_v7, 1  ;;  %v1548_v13 = vsel %vm1475_vm1, %v1545_v56, %v6855_v61 }
  0xab   : > { %v5491_v58 = vadd.f32 %v5047_v43, %v586_v21  ;;  %v1813_v41 = vmax.f32 %v1308_v29, %v1548_v13  ;;  %v1079_v49 = vsel %vm968_vm0, %v1076_v38, %v5479_v9  ;;  %v6900_v21 = vmax.f32 %v5070_v3, 0.0 }
  0xac   : > { %v1546_v1 = vsel %vm1475_vm1, %v6899_v39, %v1545_v56  ;;  %v1581_v33 = vrot.slane %v1326_v5, 1  ;;  %v4331_v56 = vld [vmem:[%s6811_s3 + $0x18c] ss:$28 sps:$4 sm:$0xff]   ;;  %v1904_v54 = vpack.c.bf16 %v1829_v42, %v1828_v46  ;;  %v5510_v14 = vadd.f32 %v5047_v43, %v587_v11 }
  0xad   : > { %v1812_v45 = vmax.f32 %v5315_v7, %v1546_v1  ;;  %v5507_v39 = vmax.f32 %v6900_v21, %v1079_v49  ;;  %v6857_v61 = vmax.f32 %v5491_v58, 0.0  ;;  %v5514_v7 = vld [vmem:[%s4513_s26 + $0x160] sm:$0xff]   ;;  %v3730_v1 = vunpack.c.h.bf16 %v5389_v16  ;;  %2627 = vmatmul.mubr.bf16.gmra.mrb[24].mxu0 %v4329_v62  ;;  %v5529_v49 = vld [vmem:[%s4513_s26 + $0xb0] sm:$0xff]  }
  0xae   : > { %v1582_v38 = vsel %vm1475_vm1, %v1579_v51, %v1581_v33  ;;  %v3733_v13 = vunpack.c.l.bf16 %v5494_v19  ;;  %3984 = vmatprep.subr.bf16.mxu1 %v1904_v54  ;;  %v6856_v11 = vmax.f32 %v5510_v14, 0.0  ;;  %v3786_v16 = vunpack.c.h.bf16 %v5121_v30  ;;  %2634 = vmatprep.mubr.bf16.mxu0 %v4331_v56 }
  0xaf   : > { %v1896_v29 = vpack.c.bf16 %v1813_v41, %v1812_v45  ;;  %v6860_v3 = vrot.slane %v5507_v39, 1  ;;  %v1830_v46 = vmax.f32 %v5452_v44, %v1582_v38  ;;  %v1044_v42 = vrot.slane %v6857_v61, 6 }
  0xb0   : > { %v604_v45 = vmul.f32 %v5021_v60, %v3730_v1  ;;  %v605_v51 = vmul.f32 %v5021_v60, %v3733_v13  ;;  %v3789_v41 = vunpack.c.l.bf16 %v5514_v7  ;;  %v5538_v62 = vrot.slane %v6856_v11, 6 }
  0xb1   : > { %3985 = vmatpush3.bf16.msra.mxu1 %v1896_v29  ;;  %v1584_v44 = vsel %vm1475_vm1, %v1581_v33, %v6860_v3  ;;  %v1045_v54 = vsel %vm968_vm0, %v5436_v47, %v1044_v42  ;;  %v3698_v21 = vunpack.c.h.bf16 %v5448_v52  ;;  %v6901_v30 = vmax.f32 %v5256_v2, 0.0  ;;  %v4335_v2 = vld [vmem:[%s6811_s3 + $0x188] ss:$28 sps:$4 sm:$0xff]  }
  0xb2   : > { %v1831_v29 = vmax.f32 %v1326_v5, %v1584_v44  ;;  %v5544_v1 = vadd.f32 %v5047_v43, %v604_v45  ;;  %v5547_v56 = vadd.f32 %v5047_v43, %v605_v51  ;;  %v1047_v33 = vsel %vm968_vm0, %v1044_v42, %v5538_v62  ;;  %v4337_v42 = vld [vmem:[%s6811_s3 + $0x1c4] ss:$28 sps:$4 sm:$0xff]  }
  0xb3   : > { %v1310_v38 = vmax.f32 %v6901_v30, %v1045_v54  ;;  %v632_v47 = vmul.f32 %v5021_v60, %v3786_v16  ;;  %v633_v13 = vmul.f32 %v5021_v60, %v3789_v41  ;;  %v3701_v11 = vunpack.c.l.bf16 %v5529_v49 }
  0xb4   : > { %v1905_v52 = vpack.c.bf16 %v1831_v29, %v1830_v46  ;;  %v6902_v5 = vmax.f32 %v5263_v18, 0.0  ;;  %v6858_v44 = vmax.f32 %v5544_v1, 0.0  ;;  %v6859_v16 = vmax.f32 %v5547_v56, 0.0 }
  0xb5   : > { %v1549_v51 = vrot.slane %v1310_v38, 1  ;;  %v5567_v41 = vadd.f32 %v5047_v43, %v632_v47  ;;  %v5570_v54 = vadd.f32 %v5047_v43, %v633_v13  ;;  %v588_v46 = vmul.f32 %v5021_v60, %v3698_v21  ;;  %2635 = vmatmul.mubr.bf16.gmra.mrb[28].mxu0 %v4335_v2 }
  0xb6   : > { %v5559_v45 = vmax.f32 %v6902_v5, %v1047_v33  ;;  %3986 = vmatprep.subr.bf16.mxu1 %v1905_v52  ;;  %v6905_v18 = vrot.slane %v5462_v17, 1  ;;  %v1080_v33 = vrot.slane %v6858_v44, 6  ;;  %v589_v5 = vmul.f32 %v5021_v60, %v3701_v11  ;;  %2642 = vmatprep.mubr.bf16.mxu0 %v4337_v42 }
  0xb7   : > { %6903 = vst [vmem:[#allocation16_spill] sm:$0xff] %v5567_v41  ;;  %6904 = vst [vmem:[#allocation17_spill] sm:$0xff] %v5570_v54  ;;  %v5583_v13 = vrot.slane %v6859_v16, 6  ;;  %v6862_v21 = vmax.f32 %v5567_v41, 0.0  ;;  %v6861_v52 = vmax.f32 %v5570_v54, 0.0  ;;  %v5591_v44 = vadd.f32 %v5047_v43, %v588_v46 }
  0xb8   : > { %v1550_v29 = vsel %vm1475_vm1, %v6905_v18, %v1549_v51  ;;  %v1551_v30 = vrot.slane %v5559_v45, 1  ;;  %v1081_v61 = vsel %vm968_vm0, %v5479_v9, %v1080_v33  ;;  %v6906_v16 = vmax.f32 %v5386_v15, 0.0 }
  0xb9   : > { %v1814_v47 = vmax.f32 %v5462_v17, %v1550_v29  ;;  %v5594_v17 = vadd.f32 %v5047_v43, %v589_v5  ;;  %v1083_v29 = vsel %vm968_vm0, %v1080_v33, %v5583_v13  ;;  %v1136_v2 = vrot.slane %v6862_v21, 6  ;;  %v5613_v5 = vld [vmem:[%s4513_s26 + $0x120] sm:$0xff]  }
  0xba   : > { %v1552_v18 = vsel %vm1475_vm1, %v1549_v51, %v1551_v30  ;;  %v1328_v3 = vmax.f32 %v6906_v16, %v1081_v61  ;;  %v6907_v51 = vmax.f32 %v5396_v35, 0.0  ;;  %v5608_v46 = vrot.slane %v6861_v52, 6  ;;  %v4341_v35 = vld [vmem:[%s6811_s3 + $0x1c0] ss:$28 sps:$4 sm:$0xff]  }
  0xbb   : > { %v1815_v11 = vmax.f32 %v1310_v38, %v1552_v18  ;;  %v6863_v42 = vmax.f32 %v5591_v44, 0.0  ;;  %v6864_v38 = vmax.f32 %v5594_v17, 0.0  ;;  %v1137_v61 = vsel %vm968_vm0, %v5220_v27, %v1136_v2  ;;  %v4343_v27 = vld [vmem:[%s6811_s3 + $0x1fc] ss:$28 sps:$4 sm:$0xff]  }
  0xbc   : > { %v5604_v9 = vmax.f32 %v6907_v51, %v1083_v29  ;;  %v1585_v15 = vrot.slane %v1328_v3, 1  ;;  %v3754_v16 = vunpack.c.h.bf16 %v5246_v28  ;;  %v1139_v29 = vsel %vm968_vm0, %v1136_v2, %v5608_v46 }
  0xbd   : > { %v1897_v33 = vpack.c.bf16 %v1815_v11, %v1814_v47  ;;  %v6908_v51 = vmax.f32 %v5166_v20, 0.0  ;;  %v1048_v47 = vrot.slane %v6863_v42, 6  ;;  %v6909_v28 = vrot.slane %v5507_v39, 1  ;;  %2643 = vmatmul.mubr.bf16.gmra.mrb[32].mxu0 %v4341_v35 }
  0xbe   : > { %v6910_v21 = vmax.f32 %v5169_v25, 0.0  ;;  %v5640_v20 = vrot.slane %v6864_v38, 6  ;;  %v3757_v2 = vunpack.c.l.bf16 %v5613_v5  ;;  %v6912_v38 = vmax.f32 %v5400_v50, 0.0  ;;  %2650 = vmatprep.mubr.bf16.mxu0 %v4343_v27 }
  0xbf   : > { %v1356_v52 = vmax.f32 %v6908_v51, %v1137_v61  ;;  %3987 = vmatpush3.bf16.msra.mxu1 %v1897_v33  ;;  %v1586_v11 = vsel %vm1475_vm1, %v6909_v28, %v1585_v15  ;;  %v6911_v61 = vrot.slane %v5604_v9, 1  ;;  %v1049_v28 = vsel %vm968_vm0, %v5538_v62, %v1048_v47 }
  0xc0   : > { %v5636_v18 = vmax.f32 %v6910_v21, %v1139_v29  ;;  %v1832_v33 = vmax.f32 %v5507_v39, %v1586_v11  ;;  %v1051_v29 = vsel %vm968_vm0, %v1048_v47, %v5640_v20  ;;  %v1312_v54 = vmax.f32 %v6912_v38, %v1049_v28 }
  0xc1   : > { %v1588_v51 = vsel %vm1475_vm1, %v1585_v15, %v6911_v61  ;;  %v1641_v42 = vrot.slane %v1356_v52, 1  ;;  %v6913_v41 = vrot.slane %v5242_v48, 1  ;;  %v6914_v39 = vmax.f32 %v5403_v6, 0.0  ;;  %v3849_v61 = vld [vmem:[%s4513_s26 + $0xf8] sm:$0xff]  }
  0xc2   : > { %v1833_v25 = vmax.f32 %v1328_v3, %v1588_v51  ;;  %v1643_v21 = vrot.slane %v5636_v18, 1  ;;  %v616_v62 = vmul.f32 %v5021_v60, %v3754_v16  ;;  %v617_v3 = vmul.f32 %v5021_v60, %v3757_v2 }
  0xc3   : > { %v1642_v15 = vsel %vm1475_vm1, %v6913_v41, %v1641_v42  ;;  %v5659_v11 = vmax.f32 %v6914_v39, %v1051_v29  ;;  %v1553_v35 = vrot.slane %v1312_v54, 1  ;;  %v3734_v2 = vunpack.c.h.bf16 %v5494_v19  ;;  %v4349_v19 = vld [vmem:[%s6811_s3 + $0x234] ss:$28 sps:$4 sm:$0xff]  }
  0xc4   : > { %v1906_v51 = vpack.c.bf16 %v1833_v25, %v1832_v33  ;;  %v1644_v50 = vsel %vm1475_vm1, %v1641_v42, %v1643_v21  ;;  %v1860_v38 = vmax.f32 %v5242_v48, %v1642_v15  ;;  %v5670_v6 = vadd.f32 %v5047_v43, %v616_v62  ;;  %v4347_v48 = vld [vmem:[%s6811_s3 + $0x1f8] ss:$28 sps:$4 sm:$0xff]  }
  0xc5   : > { %v1861_v47 = vmax.f32 %v1356_v52, %v1644_v50  ;;  %v1555_v41 = vrot.slane %v5659_v11, 1  ;;  %v5673_v16 = vadd.f32 %v5047_v43, %v617_v3  ;;  %v1554_v27 = vsel %vm1475_vm1, %v1551_v30, %v1553_v35  ;;  %2651 = vmatmul.mubr.bf16.gmra.mrb[36].mxu0 %v4347_v48 }
  0xc6   : > { %3988 = vmatprep.subr.bf16.mxu1 %v1906_v51  ;;  %v3737_v33 = vunpack.c.l.bf16 %v3849_v61  ;;  %v3702_v42 = vunpack.c.h.bf16 %v5529_v49  ;;  %v1816_v25 = vmax.f32 %v5559_v45, %v1554_v27  ;;  %v6868_v29 = vmax.f32 %v5670_v6, 0.0  ;;  %2658 = vmatprep.mubr.bf16.mxu0 %v4349_v19 }
  0xc7   : > { %v1920_v52 = vpack.c.bf16 %v1861_v47, %v1860_v38  ;;  %v1556_v28 = vsel %vm1475_vm1, %v1553_v35, %v1555_v41  ;;  %v6867_v49 = vmax.f32 %v5673_v16, 0.0  ;;  %v606_v15 = vmul.f32 %v5021_v60, %v3734_v2 }
  0xc8   : > { %v1817_v30 = vmax.f32 %v1312_v54, %v1556_v28  ;;  %v607_v39 = vmul.f32 %v5021_v60, %v3737_v33  ;;  %v1104_v62 = vrot.slane %v6868_v29, 6  ;;  %v3705_v3 = vunpack.c.l.bf16 %v4978_v0 }
  0xc9   : > { %4096 = vmatprep.subr.bf16.mxu0 %v1920_v52  ;;  %v590_v45 = vmul.f32 %v5021_v60, %v3702_v42  ;;  %v3738_v51 = vunpack.c.h.bf16 %v3849_v61  ;;  %v5698_v38 = vrot.slane %v6867_v49, 6  ;;  %v5701_v54 = vadd.f32 %v5047_v43, %v606_v15 }
  0xca   : > { %v1898_v50 = vpack.c.bf16 %v1817_v30, %v1816_v25  ;;  %v5704_v35 = vadd.f32 %v5047_v43, %v607_v39  ;;  %v1105_v47 = vsel %vm968_vm0, %v5360_v32, %v1104_v62  ;;  %v591_v0 = vmul.f32 %v5021_v60, %v3705_v3 }
  0xcb   : > { %v5710_v27 = vadd.f32 %v5047_v43, %v590_v45  ;;  %v608_v61 = vmul.f32 %v5021_v60, %v3738_v51  ;;  %v1107_v2 = vsel %vm968_vm0, %v1104_v62, %v5698_v38  ;;  %v6915_v33 = vmax.f32 %v5305_v31, 0.0 }
  0xcc   : > { %3989 = vmatpush3.bf16.msra.mxu1 %v1898_v50  ;;  %v822_v48 = vmax.f32 %v5701_v54, 0.0  ;;  %v823_v52 = vmax.f32 %v5704_v35, 0.0  ;;  %v6916_v32 = vmax.f32 %v5318_v22, 0.0  ;;  %v5724_v25 = vadd.f32 %v5047_v43, %v591_v0  ;;  %v4353_v22 = vld [vmem:[%s6811_s3 + $0x230] ss:$28 sps:$4 sm:$0xff]  }
  0xcd   : > { %v1340_v42 = vmax.f32 %v6915_v33, %v1105_v47  ;;  %v806_v60 = vmax.f32 %v5710_v27, 0.0  ;;  %v5728_v19 = vadd.f32 %v5047_v43, %v608_v61  ;;  %v6917_v39 = vmax.f32 %v5594_v17, 0.0  ;;  %v4355_v50 = vld [vmem:[%s6811_s3 + $0x26c] ss:$28 sps:$4 sm:$0xff]   ;;  %2659 = vmatmul.mubr.bf16.gmra.mrb[40].mxu0 %v4353_v22 }
  0xce   : > { %v5721_v28 = vmax.f32 %v6916_v32, %v1107_v2  ;;  %v1084_v15 = vrot.slane %v822_v48, 6  ;;  %v1086_v31 = vrot.slane %v823_v52, 6  ;;  %v807_v45 = vmax.f32 %v5724_v25, 0.0  ;;  %2666 = vmatprep.mubr.bf16.mxu0 %v4355_v50 }
  0xcf   : > { %v1609_v30 = vrot.slane %v1340_v42, 1  ;;  %v5735_v62 = vmax.f32 %v6917_v39, %v5104_v53  ;;  %v1052_v43 = vrot.slane %v806_v60, 6  ;;  %v824_v51 = vmax.f32 %v5728_v19, 0.0 }
  0xd0   : > { %v6869_v3 = vrot.slane %v5721_v28, 1  ;;  %v6918_v53 = vrot.slane %v5382_v34, 1  ;;  %v1085_v54 = vsel %vm968_vm0, %v5583_v13, %v1084_v15  ;;  %v1087_v47 = vsel %vm968_vm0, %v1084_v15, %v1086_v31 }
  0xd1   : > { %v1563_v0 = vrot.slane %v5735_v62, 1  ;;  %v6919_v33 = vmax.f32 %v5425_v10, 0.0  ;;  %v6920_v39 = vmax.f32 %v5443_v24, 0.0  ;;  %v1053_v13 = vsel %vm968_vm0, %v5640_v20, %v1052_v43 }
  0xd2   : > { %v1610_v17 = vsel %vm1475_vm1, %v6918_v53, %v1609_v30  ;;  %v1612_v61 = vsel %vm1475_vm1, %v1609_v30, %v6869_v3  ;;  %v1054_v15 = vrot.slane %v807_v45, 6  ;;  %v1088_v29 = vrot.slane %v824_v51, 6 }
  0xd3   : > { %v1844_v2 = vmax.f32 %v5382_v34, %v1610_v17  ;;  %v1330_v32 = vmax.f32 %v6919_v33, %v1085_v54  ;;  %v1331_v49 = vmax.f32 %v6920_v39, %v1087_v47  ;;  %v1845_v53 = vmax.f32 %v1340_v42, %v1612_v61 }
  0xd4   : > { %v6921_v34 = vmax.f32 %v5491_v58, 0.0  ;;  %v6922_v17 = vmax.f32 %v5292_v57, 0.0  ;;  %v1055_v54 = vsel %vm968_vm0, %v1052_v43, %v1054_v15  ;;  %v1089_v20 = vsel %vm968_vm0, %v1086_v31, %v1088_v29 }
  0xd5   : > { %v1589_v30 = vrot.slane %v1330_v32, 1  ;;  %v1591_v3 = vrot.slane %v1331_v49, 1  ;;  %v1912_v42 = vpack.c.bf16 %v1845_v53, %v1844_v2  ;;  %v1091_v47 = vsel %vm968_vm0, %v1088_v29, %v5340_v59 }
  0xd6   : > { %v1314_v10 = vmax.f32 %v6921_v34, %v1053_v13  ;;  %v1092_v24 = vrot.slane %v6922_v17, 6  ;;  %v6923_v61 = vrot.slane %v5604_v9, 1  ;;  %v6924_v58 = vmax.f32 %v5510_v14, 0.0  ;;  %v4359_v13 = vld [vmem:[%s6811_s3 + $0x268] ss:$28 sps:$4 sm:$0xff]  }
  0xd7   : > { %v1592_v33 = vsel %vm1475_vm1, %v1589_v30, %v1591_v3  ;;  %4097 = vmatpush3.bf16.msra.mxu0 %v1912_v42  ;;  %v6925_v43 = vmax.f32 %v5544_v1, 0.0  ;;  %v6926_v53 = vmax.f32 %v5547_v56, 0.0  ;;  %v4365_v56 = vld [vmem:[%s6811_s3 + $0x14] ss:$28 sps:$4 sm:$0xff]  }
  0xd8   : > { %v1590_v22 = vsel %vm1475_vm1, %v6923_v61, %v1589_v30  ;;  %v1315_v39 = vmax.f32 %v6924_v58, %v1055_v54  ;;  %v1557_v57 = vrot.slane %v1314_v10, 1  ;;  %v1835_v2 = vmax.f32 %v1330_v32, %v1592_v33  ;;  %v5808_v61 = vld [vmem:[%s4513_s26 + $0x168] sm:$0xff]   ;;  %2667 = vmatmul.mubr.bf16.gmra.mrb[44].mxu0 %v4359_v13 }
  0xd9   : > { %v1834_v50 = vmax.f32 %v5604_v9, %v1590_v22  ;;  %v1332_v31 = vmax.f32 %v6925_v43, %v1089_v20  ;;  %v1333_v29 = vmax.f32 %v6926_v53, %v1091_v47  ;;  %v1057_v9 = vsel %vm968_vm0, %v1054_v15, %v5083_v40  ;;  %2900 = vmatprep.mubr.bf16.mxu0 %v4365_v56 }
  0xda   : > { %v1558_v14 = vsel %vm1475_vm1, %v1555_v41, %v1557_v57  ;;  %v1559_v30 = vrot.slane %v1315_v39, 1  ;;  %v1093_v1 = vsel %vm968_vm0, %v5340_v59, %v1092_v24  ;;  %v6927_v41 = vmax.f32 %v5591_v44, 0.0 }
  0xdb   : > { %v1907_v32 = vpack.c.bf16 %v1835_v2, %v1834_v50  ;;  %v1818_v34 = vmax.f32 %v5659_v11, %v1558_v14  ;;  %v1593_v17 = vrot.slane %v1332_v31, 1  ;;  %v1595_v42 = vrot.slane %v1333_v29, 1 }
  0xdc   : > { %v1560_v54 = vsel %vm1475_vm1, %v1557_v57, %v1559_v30  ;;  %v1316_v20 = vmax.f32 %v6927_v41, %v1057_v9  ;;  %v6928_v47 = vmax.f32 %v5302_v55, 0.0  ;;  %v1334_v15 = vmax.f32 %v822_v48, %v1093_v1  ;;  %v5844_v1 = vld [vmem:[%s4513_s26 + $0x128] sm:$0xff]  }
  0xdd   : > { %3990 = vmatprep.subr.bf16.mxu1 %v1907_v32  ;;  %v1819_v59 = vmax.f32 %v1314_v10, %v1560_v54  ;;  %v1594_v22 = vsel %vm1475_vm1, %v1591_v3, %v1593_v17  ;;  %v1596_v33 = vsel %vm1475_vm1, %v1593_v17, %v1595_v42  ;;  %v3790_v11 = vunpack.c.h.bf16 %v5514_v7 }
  0xde   : > { %v1094_v40 = vrot.slane %v6928_v47, 6  ;;  %v1836_v58 = vmax.f32 %v1331_v49, %v1594_v22  ;;  %v1837_v57 = vmax.f32 %v1332_v31, %v1596_v33  ;;  %v1561_v50 = vrot.slane %v1316_v20, 1  ;;  %v5826_v49 = vld [vmem:[%s6809_s1] ss:$0 sm:$0xff] }
  0xdf   : > { %v1899_v55 = vpack.c.bf16 %v1819_v59, %v1818_v34  ;;  %v1597_v2 = vrot.slane %v1334_v15, 1  ;;  %v3793_v10 = vunpack.c.l.bf16 %v5808_v61  ;;  %v634_v35 = vmul.f32 %v5826_v49, %v3790_v11 }
  0xe0   : > { %v1095_v44 = vsel %vm968_vm0, %v1092_v24, %v1094_v40  ;;  %v1908_v3 = vpack.c.bf16 %v1837_v57, %v1836_v58  ;;  %v1562_v43 = vsel %vm1475_vm1, %v1559_v30, %v1561_v50  ;;  %v1564_v7 = vsel %vm1475_vm1, %v1561_v50, %v1563_v0  ;;  %v5835_v30 = vld [vmem:[%s6810_s2] ss:$0 sm:$0xff]  ;;  %v5890_v57 = vld [vmem:[%s4513_s26 + $0x170] sm:$0xff]  }
  0xe1   : > { %v5816_v48 = vmax.f32 %v823_v52, %v1095_v44  ;;  %3991 = vmatpush3.bf16.msra.mxu1 %v1899_v55  ;;  %v1820_v52 = vmax.f32 %v1315_v39, %v1562_v43  ;;  %v1821_v24 = vmax.f32 %v1316_v20, %v1564_v7  ;;  %v1598_v31 = vsel %vm1475_vm1, %v1595_v42, %v1597_v2  ;;  %v6931_v7 = vld [vmem:[#allocation15_spill] sm:$0xff] }
  0xe2   : > { %3992 = vmatprep.subr.bf16.mxu1 %v1908_v3  ;;  %v1838_v13 = vmax.f32 %v1333_v29, %v1598_v31  ;;  %v635_v14 = vmul.f32 %v5826_v49, %v3793_v10  ;;  %v5838_v9 = vadd.f32 %v5835_v30, %v634_v35  ;;  %v1061_v39 = vsel %vm968_vm0, %v5085_v26, %v5087_v36 }
  0xe3   : > { %v1599_v53 = vrot.slane %v5816_v48, 1  ;;  %v1900_v56 = vpack.c.bf16 %v1821_v24, %v1820_v52  ;;  %v1318_v29 = vmax.f32 %v806_v60, %v1061_v39  ;;  %v5852_v34 = vmax.f32 %v807_v45, %v5116_v37  ;;  %v6933_v24 = vld [vmem:[#allocation2_spill] sm:$0xff] }
  0xe4   : > { %v5855_v42 = vadd.f32 %v5835_v30, %v635_v14  ;;  %v850_v54 = vmax.f32 %v5838_v9, 0.0  ;;  %v3758_v26 = vunpack.c.h.bf16 %v5613_v5  ;;  %v3761_v27 = vunpack.c.l.bf16 %v5844_v1 }
  0xe5   : > { %v1600_v32 = vsel %vm1475_vm1, %v1597_v2, %v1599_v53  ;;  %3993 = vmatpush3.bf16.msra.mxu1 %v1900_v56  ;;  %v1565_v36 = vrot.slane %v1318_v29, 1  ;;  %v1567_v41 = vrot.slane %v5852_v34, 1  ;;  %v1097_v60 = vsel %vm968_vm0, %v1094_v40, %v5352_v23 }
  0xe6   : > { %v1839_v17 = vmax.f32 %v1334_v15, %v1600_v32  ;;  %v851_v37 = vmax.f32 %v5855_v42, 0.0  ;;  %v1140_v45 = vrot.slane %v850_v54, 6  ;;  %v618_v20 = vmul.f32 %v5826_v49, %v3758_v26  ;;  %v4339_v42 = vld [vmem:[%s6811_s3 + $0xec] ss:$28 sps:$4 sm:$0xff]  }
  0xe7   : > { %v1566_v5 = vsel %vm1475_vm1, %v1563_v0, %v1565_v36  ;;  %v1568_v47 = vsel %vm1475_vm1, %v1565_v36, %v1567_v41  ;;  %v619_v15 = vmul.f32 %v5826_v49, %v3761_v27  ;;  %v1336_v23 = vmax.f32 %v824_v51, %v1097_v60  ;;  %v6935_v27 = vld [vmem:[#allocation13_spill] sm:$0xff] }
  0xe8   : > { %v1909_v25 = vpack.c.bf16 %v1839_v17, %v1838_v13  ;;  %v1141_v40 = vsel %vm968_vm0, %v5608_v46, %v1140_v45  ;;  %v5878_v59 = vrot.slane %v851_v37, 6  ;;  %v1822_v22 = vmax.f32 %v5735_v62, %v1566_v5  ;;  %v3866_v5 = vld [vmem:[%s4513_s26 + $0x180] sm:$0xff]  }
  0xe9   : > { %v1823_v33 = vmax.f32 %v1318_v29, %v1568_v47  ;;  %v6929_v0 = vmax.f32 %v5172_v63, 0.0  ;;  %v5884_v58 = vadd.f32 %v5835_v30, %v618_v20  ;;  %v5887_v19 = vadd.f32 %v5835_v30, %v619_v15  ;;  %v6939_v15 = vld [vmem:[#allocation3_spill] sm:$0xff] }
  0xea   : > { %3994 = vmatprep.subr.bf16.mxu1 %v1909_v25  ;;  %v1601_v51 = vrot.slane %v1336_v23, 1  ;;  %v1143_v46 = vsel %vm968_vm0, %v1140_v45, %v5878_v59  ;;  %v1065_v62 = vsel %vm968_vm0, %v5089_v4, %v5093_v12  ;;  %v3794_v63 = vunpack.c.h.bf16 %v5808_v61 }
  0xeb   : > { %v1358_v11 = vmax.f32 %v6929_v0, %v1141_v40  ;;  %v1901_v50 = vpack.c.bf16 %v1823_v33, %v1822_v22  ;;  %v6930_v44 = vmax.f32 %v5175_v8, 0.0  ;;  %v834_v10 = vmax.f32 %v5884_v58, 0.0  ;;  %v3867_v33 = vld [vmem:[%s4513_s26 + $0x188] sm:$0xff]  }
  0xec   : > { %v835_v3 = vmax.f32 %v5887_v19, 0.0  ;;  %v1602_v43 = vsel %vm1475_vm1, %v1599_v53, %v1601_v51  ;;  %v6932_v35 = vrot.slane %v6931_v7, 1  ;;  %v6934_v4 = vmax.f32 %v6933_v24, 0.0 }
  0xed   : > { %v5900_v55 = vmax.f32 %v6930_v44, %v1143_v46  ;;  %v1645_v2 = vrot.slane %v1358_v11, 1  ;;  %3995 = vmatpush3.bf16.msra.mxu1 %v1901_v50  ;;  %v3797_v61 = vunpack.c.l.bf16 %v5890_v57  ;;  %v1108_v13 = vrot.slane %v834_v10, 6  ;;  %v3868_v44 = vld [vmem:[%s4513_s26 + $0x190] sm:$0xff]  }
  0xee   : > { %v1604_v52 = vsel %vm1475_vm1, %v1601_v51, %v6932_v35  ;;  %v1320_v12 = vmax.f32 %v6934_v4, %v1065_v62  ;;  %v5919_v53 = vrot.slane %v835_v3, 6  ;;  %v1840_v39 = vmax.f32 %v5816_v48, %v1602_v43  ;;  %v6937_v48 = vld [vmem:[#allocation14_spill] sm:$0xff] }
  0xef   : > { %v1646_v8 = vsel %vm1475_vm1, %v1643_v21, %v1645_v2  ;;  %v1647_v31 = vrot.slane %v5900_v55, 1  ;;  %v1841_v56 = vmax.f32 %v1336_v23, %v1604_v52  ;;  %v1109_v29 = vsel %vm968_vm0, %v5698_v38, %v1108_v13 }
  0xf0   : > { %v1862_v14 = vmax.f32 %v5636_v18, %v1646_v8  ;;  %v1569_v32 = vrot.slane %v1320_v12, 1  ;;  %v1111_v17 = vsel %vm968_vm0, %v1108_v13, %v5919_v53  ;;  %v636_v26 = vmul.f32 %v5826_v49, %v3794_v63  ;;  %v4315_v8 = vld [vmem:[%s6811_s3 + $0x8] ss:$28 sps:$4 sm:$0xff]  }
  0xf1   : > { %v1648_v21 = vsel %vm1475_vm1, %v1645_v2, %v1647_v31  ;;  %v6936_v18 = vmax.f32 %v6935_v27, 0.0  ;;  %v6938_v25 = vmax.f32 %v6937_v48, 0.0  ;;  %v1910_v20 = vpack.c.bf16 %v1841_v56, %v1840_v39  ;;  %v6942_v48 = vld [vmem:[#allocation16_spill] sm:$0xff] }
  0xf2   : > { %v1863_v36 = vmax.f32 %v1358_v11, %v1648_v21  ;;  %v1570_v47 = vsel %vm1475_vm1, %v1567_v41, %v1569_v32  ;;  %v6940_v38 = vrot.slane %v6939_v15, 1  ;;  %v637_v40 = vmul.f32 %v5826_v49, %v3797_v61  ;;  %v6944_v15 = vld [vmem:[#allocation17_spill] sm:$0xff] }
  0xf3   : > { %v1342_v60 = vmax.f32 %v6936_v18, %v1109_v29  ;;  %v5935_v45 = vmax.f32 %v6938_v25, %v1111_v17  ;;  %v5944_v22 = vadd.f32 %v5835_v30, %v636_v26  ;;  %3996 = vmatprep.subr.bf16.mxu1 %v1910_v20  ;;  %v1824_v46 = vmax.f32 %v5852_v34, %v1570_v47  ;;  %v5961_v34 = vld [vmem:[%s4513_s26 + $0x198] sm:$0xff]   ;;  %v4321_v17 = vld [vmem:[%s6811_s3 + $0x44] ss:$28 sps:$4 sm:$0xff]  }
  0xf4   : > { %v1572_v23 = vsel %vm1475_vm1, %v1569_v32, %v6940_v38  ;;  %v1921_v0 = vpack.c.bf16 %v1863_v36, %v1862_v14  ;;  %v5950_v41 = vadd.f32 %v5835_v30, %v637_v40  ;;  %v3805_v63 = vunpack.c.l.bf16 %v3866_v5 }
  0xf5   : > { %v1613_v11 = vrot.slane %v1342_v60, 1  ;;  %v1615_v51 = vrot.slane %v5935_v45, 1  ;;  %v1825_v50 = vmax.f32 %v1320_v12, %v1572_v23  ;;  %v852_v62 = vmax.f32 %v5944_v22, 0.0 }
  0xf6   : > { %4098 = vmatprep.subr.bf16.mxu0 %v1921_v0  ;;  %v6941_v2 = vrot.slane %v5721_v28, 1  ;;  %v3806_v35 = vunpack.c.h.bf16 %v3866_v5  ;;  %v3809_v52 = vunpack.c.l.bf16 %v3867_v33  ;;  %v853_v61 = vmax.f32 %v5950_v41, 0.0 }
  0xf7   : > { %v1616_v7 = vsel %vm1475_vm1, %v1613_v11, %v1615_v51  ;;  %v1902_v12 = vpack.c.bf16 %v1825_v50, %v1824_v46  ;;  %v1144_v13 = vrot.slane %v852_v62, 6  ;;  %v3810_v14 = vunpack.c.h.bf16 %v3867_v33 }
  0xf8   : > { %v1614_v43 = vsel %vm1475_vm1, %v6941_v2, %v1613_v11  ;;  %v1847_v4 = vmax.f32 %v1342_v60, %v1616_v7  ;;  %v3813_v39 = vunpack.c.l.bf16 %v3868_v44  ;;  %v3814_v56 = vunpack.c.h.bf16 %v3868_v44 }
  0xf9   : > { %v1846_v24 = vmax.f32 %v5721_v28, %v1614_v43  ;;  %3997 = vmatpush3.bf16.msra.mxu1 %v1902_v12  ;;  %v5972_v21 = vrot.slane %v853_v61, 6  ;;  %v3817_v28 = vunpack.c.l.bf16 %v5961_v34  ;;  %v641_v29 = vmul.f32 %v5826_v49, %v3805_v63 }
  0xfa   : > { %v1145_v26 = vsel %vm968_vm0, %v5878_v59, %v1144_v13  ;;  %v642_v36 = vmul.f32 %v5826_v49, %v3806_v35  ;;  %v643_v27 = vmul.f32 %v5826_v49, %v3809_v52  ;;  %v644_v18 = vmul.f32 %v5826_v49, %v3810_v14  ;;  %v3856_v14 = vld [vmem:[%s4513_s26 + $0x130] sm:$0xff]  }
  0xfb   : > { %v1913_v32 = vpack.c.bf16 %v1847_v4, %v1846_v24  ;;  %v1147_v60 = vsel %vm968_vm0, %v1144_v13, %v5972_v21  ;;  %v6943_v25 = vmax.f32 %v6942_v48, 0.0  ;;  %v645_v5 = vmul.f32 %v5826_v49, %v3813_v39  ;;  %v4324_v39 = vld [vmem:[%s6811_s3 + $0x40] ss:$28 sps:$4 sm:$0xff]  }
  0xfc   : > { %v646_v47 = vmul.f32 %v5826_v49, %v3814_v56  ;;  %2740 = vmatmul.mubr.bf16.vlgmr.msra.gmra.mrb[16].mxu1 %v4315_v8  ;;  %v6945_v59 = vmax.f32 %v6944_v15, 0.0  ;;  %v647_v23 = vmul.f32 %v5826_v49, %v3817_v28  ;;  %v752_v40 = vadd.f32 %v5835_v30, %v641_v29  ;;  %v6025_v29 = vld [vmem:[%s4513_s26 + $0x178] sm:$0xff]  }
  0xfd   : > { %4099 = vmatpush3.bf16.msra.mxu0 %v1913_v32  ;;  %v1360_v20 = vmax.f32 %v6943_v25, %v1145_v26  ;;  %v753_v33 = vadd.f32 %v5835_v30, %v642_v36  ;;  %v754_v11 = vadd.f32 %v5835_v30, %v643_v27  ;;  %v5999_v46 = vadd.f32 %v5835_v30, %v644_v18  ;;  %v4327_v27 = vld [vmem:[%s6811_s3 + $0x7c] ss:$28 sps:$4 sm:$0xff]  }
  0xfe   : > { %v5992_v38 = vmax.f32 %v6945_v59, %v1147_v60  ;;  %v6002_v50 = vadd.f32 %v5835_v30, %v645_v5  ;;  %2747 = vmatprep.mubr.bf16.mxu1 %v4321_v17  ;;  %v757_v44 = vadd.f32 %v5835_v30, %v646_v47  ;;  %v758_v2 = vadd.f32 %v5835_v30, %v647_v23 }
  0xff   : > { %v1649_v0 = vrot.slane %v1360_v20, 1  ;;  %v857_v43 = vmax.f32 %v752_v40, 0.0  ;;  %v858_v35 = vmax.f32 %v753_v33, 0.0  ;;  %v859_v52 = vmax.f32 %v754_v11, 0.0 }
 0x100   : > { %v1651_v63 = vrot.slane %v5992_v38, 1  ;;  %v860_v24 = vmax.f32 %v5999_v46, 0.0  ;;  %v861_v8 = vmax.f32 %v6002_v50, 0.0  ;;  %v862_v13 = vmax.f32 %v757_v44, 0.0  ;;  %v4369_v46 = vld [vmem:[%s6811_s3 + $0x4c] ss:$28 sps:$4 sm:$0xff]  }
 0x101   : > { %v1650_v7 = vsel %vm1475_vm1, %v1647_v31, %v1649_v0  ;;  %v863_v31 = vmax.f32 %v758_v2, 0.0  ;;  %v6020_v32 = vrot.slane %v857_v43, 6  ;;  %v6022_v28 = vrot.slane %v858_v35, 6 }
 0x102   : > { %v1652_v4 = vsel %vm1475_vm1, %v1649_v0, %v1651_v63  ;;  %v1864_v12 = vmax.f32 %v5900_v55, %v1650_v7  ;;  %v6027_v17 = vrot.slane %v859_v52, 6  ;;  %v6031_v55 = vrot.slane %v860_v24, 6 }
 0x103   : > { %v1865_v56 = vmax.f32 %v1360_v20, %v1652_v4  ;;  %v1162_v26 = vrot.slane %v861_v8, 6  ;;  %v1164_v36 = vrot.slane %v862_v13, 6  ;;  %v6038_v60 = vrot.slane %v863_v31, 6  ;;  %v4330_v4 = vld [vmem:[%s6811_s3 + $0x78] ss:$28 sps:$4 sm:$0xff]  }
 0x104   : > { %v3762_v48 = vunpack.c.h.bf16 %v5844_v1  ;;  %v3765_v25 = vunpack.c.l.bf16 %v3856_v14  ;;  %2748 = vmatmul.mubr.bf16.gmra.mrb[20].mxu1 %v4324_v39  ;;  %v3798_v47 = vunpack.c.h.bf16 %v5890_v57  ;;  %v3801_v15 = vunpack.c.l.bf16 %v6025_v29 }
 0x105   : > { %v1922_v18 = vpack.c.bf16 %v1865_v56, %v1864_v12  ;;  %v1163_v20 = vsel %vm968_vm0, %v6031_v55, %v1162_v26  ;;  %v1165_v5 = vsel %vm968_vm0, %v1162_v26, %v1164_v36  ;;  %v1167_v59 = vsel %vm968_vm0, %v1164_v36, %v6038_v60  ;;  %2755 = vmatprep.mubr.bf16.mxu1 %v4327_v27  ;;  %v4453_v56 = vld [vmem:[%s4513_s26 + $0x138] sm:$0xff]   ;;  %v4333_v36 = vld [vmem:[%s6811_s3 + $0xb4] ss:$28 sps:$4 sm:$0xff]  }
 0x106   : > { %v6048_v23 = vmax.f32 %v857_v43, %v1163_v20  ;;  %v1370_v40 = vmax.f32 %v858_v35, %v1165_v5  ;;  %v620_v1 = vmul.f32 %v5826_v49, %v3762_v48  ;;  %v6051_v33 = vmax.f32 %v859_v52, %v1167_v59 }
 0x107   : > { %4100 = vmatprep.subr.bf16.mxu0 %v1922_v18  ;;  %v621_v0 = vmul.f32 %v5826_v49, %v3765_v25  ;;  %v638_v11 = vmul.f32 %v5826_v49, %v3798_v47  ;;  %v639_v57 = vmul.f32 %v5826_v49, %v3801_v15  ;;  %v3766_v43 = vunpack.c.h.bf16 %v3856_v14 }
 0x108   : > { %v1667_v44 = vrot.slane %v6048_v23, 1  ;;  %v1669_v2 = vrot.slane %v1370_v40, 1  ;;  %v6058_v7 = vadd.f32 %v5835_v30, %v620_v1  ;;  %v1671_v35 = vrot.slane %v6051_v33, 1 }
 0x109   : > { %v732_v52 = vadd.f32 %v5835_v30, %v621_v0  ;;  %v6066_v12 = vadd.f32 %v5835_v30, %v638_v11  ;;  %v6069_v13 = vadd.f32 %v5835_v30, %v639_v57  ;;  %v3769_v31 = vunpack.c.l.bf16 %v4453_v56 }
 0x10a   : > { %v1670_v39 = vsel %vm1475_vm1, %v1667_v44, %v1669_v2  ;;  %v836_v14 = vmax.f32 %v6058_v7, 0.0  ;;  %v622_v26 = vmul.f32 %v5826_v49, %v3766_v43  ;;  %v1672_v27 = vsel %vm1475_vm1, %v1669_v2, %v1671_v35  ;;  %v4342_v7 = vld [vmem:[%s6811_s3 + $0xe8] ss:$28 sps:$4 sm:$0xff]  }
 0x10b   : > { %v1874_v18 = vmax.f32 %v6048_v23, %v1670_v39  ;;  %v837_v48 = vmax.f32 %v732_v52, 0.0  ;;  %v854_v25 = vmax.f32 %v6066_v12, 0.0  ;;  %v1875_v20 = vmax.f32 %v1370_v40, %v1672_v27 }
 0x10c   : > { %v1112_v5 = vrot.slane %v836_v14, 6  ;;  %v855_v47 = vmax.f32 %v6069_v13, 0.0  ;;  %v623_v15 = vmul.f32 %v5826_v49, %v3769_v31  ;;  %2756 = vmatmul.mubr.bf16.gmra.mrb[24].mxu1 %v4330_v4  ;;  %v6092_v0 = vadd.f32 %v5835_v30, %v622_v26 }
 0x10d   : > { %v1114_v59 = vrot.slane %v837_v48, 6  ;;  %v1148_v1 = vrot.slane %v854_v25, 6  ;;  %v3802_v11 = vunpack.c.h.bf16 %v6025_v29  ;;  %v1927_v57 = vpack.c.bf16 %v1875_v20, %v1874_v18  ;;  %2763 = vmatprep.mubr.bf16.mxu1 %v4333_v36 }
 0x10e   : > { %v1113_v40 = vsel %vm968_vm0, %v5919_v53, %v1112_v5  ;;  %v1150_v2 = vrot.slane %v855_v47, 6  ;;  %v6100_v43 = vadd.f32 %v5835_v30, %v623_v15  ;;  %v6946_v4 = vmax.f32 %v5670_v6, 0.0  ;;  %v6948_v15 = vld [vmem:[#allocation10_spill] sm:$0xff] }
 0x10f   : > { %v1115_v52 = vsel %vm968_vm0, %v1112_v5, %v1114_v59  ;;  %v1149_v56 = vsel %vm968_vm0, %v5972_v21, %v1148_v1  ;;  %v838_v29 = vmax.f32 %v6092_v0, 0.0  ;;  %4225 = vmatprep.subr.bf16.mxu1 %v1927_v57  ;;  %v6947_v53 = vmax.f32 %v5673_v16, 0.0  ;;  %v4336_v16 = vld [vmem:[%s6811_s3 + $0xb0] ss:$28 sps:$4 sm:$0xff]  }
 0x110   : > { %v1344_v39 = vmax.f32 %v6946_v4, %v1113_v40  ;;  %v1151_v26 = vsel %vm968_vm0, %v1148_v1, %v1150_v2  ;;  %v1362_v27 = vmax.f32 %v850_v54, %v1149_v56  ;;  %v839_v36 = vmax.f32 %v6100_v43, 0.0  ;;  %4226 = vmatpush3.bf16.msra.mxu1 %v1927_v57  ;;  %v4348_v43 = vld [vmem:[%s6811_s3 + $0x120] ss:$28 sps:$4 sm:$0xff]  }
 0x111   : > { %v1345_v31 = vmax.f32 %v6947_v53, %v1115_v52  ;;  %v6116_v6 = vmax.f32 %v851_v37, %v1151_v26  ;;  %v1116_v21 = vrot.slane %v838_v29, 6  ;;  %v640_v20 = vmul.f32 %v5826_v49, %v3802_v11 }
 0x112   : > { %v1617_v18 = vrot.slane %v1344_v39, 1  ;;  %v1653_v9 = vrot.slane %v1362_v27, 1  ;;  %v1118_v54 = vrot.slane %v839_v36, 6  ;;  %v6127_v1 = vmax.f32 %v837_v48, %v6948_v15  ;;  %v6949_v15 = vld [vmem:[#allocation5_spill] sm:$0xff] }
 0x113   : > { %v1619_v5 = vrot.slane %v1345_v31, 1  ;;  %v1655_v57 = vrot.slane %v6116_v6, 1  ;;  %v1117_v11 = vsel %vm968_vm0, %v1114_v59, %v1116_v21  ;;  %v6138_v40 = vadd.f32 %v5835_v30, %v640_v20 }
 0x114   : > { %v1618_v37 = vsel %vm1475_vm1, %v1615_v51, %v1617_v18  ;;  %v1654_v4 = vsel %vm1475_vm1, %v1651_v63, %v1653_v9  ;;  %v1119_v56 = vsel %vm968_vm0, %v1116_v21, %v1118_v54  ;;  %v1346_v59 = vmax.f32 %v834_v10, %v1117_v11  ;;  %2764 = vmatmul.mubr.bf16.gmra.mrb[28].mxu1 %v4336_v16 }
 0x115   : > { %v1620_v52 = vsel %vm1475_vm1, %v1617_v18, %v1619_v5  ;;  %v1848_v48 = vmax.f32 %v5935_v45, %v1618_v37  ;;  %v1656_v51 = vsel %vm1475_vm1, %v1653_v9, %v1655_v57  ;;  %v1866_v26 = vmax.f32 %v5992_v38, %v1654_v4  ;;  %2771 = vmatprep.mubr.bf16.mxu1 %v4339_v42 }
 0x116   : > { %v1849_v53 = vmax.f32 %v1344_v39, %v1620_v52  ;;  %v1867_v20 = vmax.f32 %v1362_v27, %v1656_v51  ;;  %v1347_v18 = vmax.f32 %v835_v3, %v1119_v56  ;;  %v856_v45 = vmax.f32 %v6138_v40, 0.0  ;;  %v4345_v52 = vld [vmem:[%s6811_s3 + $0x124] ss:$28 sps:$4 sm:$0xff]  }
 0x117   : > { %v1121_v63 = vsel %vm968_vm0, %v1118_v54, %v6949_v15  ;;  %v1621_v39 = vrot.slane %v1346_v59, 1  ;;  %v1627_v38 = vrot.slane %v6127_v1, 1  ;;  %v1157_v19 = vsel %vm968_vm0, %v6020_v32, %v6022_v28  ;;  %v6951_v51 = vld [vmem:[#allocation6_spill] sm:$0xff] }
 0x118   : > { %v1914_v21 = vpack.c.bf16 %v1849_v53, %v1848_v48  ;;  %v1348_v9 = vmax.f32 %v836_v14, %v1121_v63  ;;  %v1923_v58 = vpack.c.bf16 %v1867_v20, %v1866_v26  ;;  %v1623_v10 = vrot.slane %v1347_v18, 1 }
 0x119   : > { %v1152_v27 = vrot.slane %v856_v45, 6  ;;  %v1622_v3 = vsel %vm1475_vm1, %v1619_v5, %v1621_v39  ;;  %v1159_v14 = vsel %vm968_vm0, %v6022_v28, %v6027_v17  ;;  %v1366_v54 = vmax.f32 %v854_v25, %v1157_v19 }
 0x11a   : > { %4101 = vmatpush3.bf16.msra.mxu0 %v1914_v21  ;;  %v1625_v16 = vrot.slane %v1348_v9, 1  ;;  %v1624_v42 = vsel %vm1475_vm1, %v1621_v39, %v1623_v10  ;;  %v1850_v37 = vmax.f32 %v1345_v31, %v1622_v3  ;;  %v3818_v13 = vunpack.c.h.bf16 %v5961_v34 }
 0x11b   : > { %4102 = vmatprep.subr.bf16.mxu0 %v1923_v58  ;;  %v1153_v11 = vsel %vm968_vm0, %v1150_v2, %v1152_v27  ;;  %v1155_v5 = vsel %vm968_vm0, %v1152_v27, %v6020_v32  ;;  %v1851_v48 = vmax.f32 %v1346_v59, %v1624_v42  ;;  %v6189_v32 = vmax.f32 %v855_v47, %v1159_v14  ;;  %v6952_v59 = vld [vmem:[#allocation11_spill] sm:$0xff]  ;;  %v433_v47 = vld [vmem:[%s4513_s26 + $0x1a0] sm:$0x7]  ;;  %v6954_v14 = vld [vmem:[#allocation8_spill] sm:$0xff] }
 0x11c   : > { %v1364_v28 = vmax.f32 %v852_v62, %v1153_v11  ;;  %v1365_v12 = vmax.f32 %v853_v61, %v1155_v5  ;;  %v1626_v25 = vsel %vm1475_vm1, %v1623_v10, %v1625_v16  ;;  %v1628_v2 = vsel %vm1475_vm1, %v1625_v16, %v1627_v38  ;;  %2772 = vmatmul.mubr.bf16.gmra.mrb[32].mxu1 %v4342_v7  ;;  %v6950_v61 = vld [vmem:[#allocation7_spill] sm:$0xff]  ;;  %v6953_v7 = vld [vmem:[#allocation9_spill] sm:$0xff]  ;;  %v6955_v5 = vld [vmem:[#allocation4_spill] sm:$0xff] }
 0x11d   : > { %v1852_v31 = vmax.f32 %v1347_v18, %v1626_v25  ;;  %v1661_v4 = vrot.slane %v1366_v54, 1  ;;  %v1915_v56 = vpack.c.bf16 %v1851_v48, %v1850_v37  ;;  %v1853_v62 = vmax.f32 %v1348_v9, %v1628_v2  ;;  %2779 = vmatprep.mubr.bf16.mxu1 %v4345_v52 }
 0x11e   : > { %v1657_v53 = vrot.slane %v1364_v28, 1  ;;  %v1659_v22 = vrot.slane %v1365_v12, 1  ;;  %v1663_v41 = vrot.slane %v6189_v32, 1  ;;  %v1125_v26 = vsel %vm968_vm0, %v6951_v51, %v6950_v61  ;;  %v6957_v61 = vld [vmem:[#allocation12_spill] sm:$0xff] }
 0x11f   : > { %v6198_v20 = vmax.f32 %v839_v36, %v6952_v59  ;;  %4103 = vmatpush3.bf16.msra.mxu0 %v1915_v56  ;;  %v1916_v63 = vpack.c.bf16 %v1853_v62, %v1852_v31  ;;  %v1350_v36 = vmax.f32 %v838_v29, %v1125_v26  ;;  %v538_v27 = vunpack.c.l.bf16 %v433_v47  ;;  %v4357_v59 = vld [vmem:[%s6811_s3 + $0x194] ss:$28 sps:$4 sm:$0xff]  }
 0x120   : > { %v1658_v18 = vsel %vm1475_vm1, %v1655_v57, %v1657_v53  ;;  %v1660_v15 = vsel %vm1475_vm1, %v1657_v53, %v1659_v22  ;;  %v1662_v21 = vsel %vm1475_vm1, %v1659_v22, %v1661_v4  ;;  %v1664_v58 = vsel %vm1475_vm1, %v1661_v4, %v1663_v41 }
 0x121   : > { %v1868_v39 = vmax.f32 %v6116_v6, %v1658_v18  ;;  %v1869_v9 = vmax.f32 %v1364_v28, %v1660_v15  ;;  %v1870_v10 = vmax.f32 %v1365_v12, %v1662_v21  ;;  %v1871_v34 = vmax.f32 %v1366_v54, %v1664_v58  ;;  %v4351_v6 = vld [vmem:[%s6811_s3 + $0x15c] ss:$28 sps:$4 sm:$0xff]  }
 0x122   : > { %v1631_v57 = vrot.slane %v6198_v20, 1  ;;  %v648_v3 = vmul.f32 %v5826_v49, %v3818_v13  ;;  %v1161_v16 = vsel %vm968_vm0, %v6027_v17, %v6031_v55  ;;  %v1129_v54 = vsel %vm968_vm0, %v6954_v14, %v6953_v7  ;;  %v4371_v7 = vld [vmem:[%s6811_s3 + $0x200] ss:$28 sps:$4 sm:$0xff]  }
 0x123   : > { %v1924_v19 = vpack.c.bf16 %v1869_v9, %v1868_v39  ;;  %v1925_v0 = vpack.c.bf16 %v1871_v34, %v1870_v10  ;;  %v1629_v29 = vrot.slane %v1350_v36, 1  ;;  %v649_v42 = vmul.f32 %v5826_v49, %v538_v27  ;;  %v4360_v10 = vld [vmem:[%s6811_s3 + $0x190] ss:$28 sps:$4 sm:$0xff]   ;;  %v4375_v27 = vld [vmem:[%s6811_s3 + $0x84] ss:$28 sps:$4 sm:$0xff]  }
 0x124   : > { %v1368_v37 = vmax.f32 %v856_v45, %v1161_v16  ;;  %v759_v11 = vadd.f32 %v5835_v30, %v648_v3  ;;  %v6956_v52 = vmax.f32 %v6955_v5, 0.0  ;;  %2780 = vmatmul.mubr.bf16.gmra.mrb[36].mxu1 %v4348_v43  ;;  %v6958_v51 = vrot.slane %v6957_v61, 1  ;;  %v4361_v34 = vld [vmem:[%s6811_s3 + $0x1cc] ss:$28 sps:$4 sm:$0xff]   ;;  %v4378_v3 = vld [vmem:[%s6811_s3 + $0x80] ss:$28 sps:$4 sm:$0xff]  }
 0x125   : > { %4104 = vmatprep.subr.bf16.mxu0 %v1924_v19  ;;  %v1630_v17 = vsel %vm1475_vm1, %v1627_v38, %v1629_v29  ;;  %v1632_v55 = vsel %vm1475_vm1, %v1629_v29, %v1631_v57  ;;  %v760_v28 = vadd.f32 %v5835_v30, %v649_v42  ;;  %2787 = vmatprep.mubr.bf16.mxu1 %v4351_v6  ;;  %v4366_v19 = vld [vmem:[%s6811_s3 + $0x1c8] ss:$28 sps:$4 sm:$0xff]   ;;  %v4381_v16 = vld [vmem:[%s6811_s3 + $0xbc] ss:$28 sps:$4 sm:$0xff]   ;;  %v4379_v42 = vld [vmem:[%s6811_s3 + $0x274] ss:$28 sps:$4 sm:$0xff]  }
 0x126   : > { %v1352_v48 = vmax.f32 %v6956_v52, %v1129_v54  ;;  %4105 = vmatpush3.bf16.msra.mxu0 %v1916_v63  ;;  %v1665_v49 = vrot.slane %v1368_v37, 1  ;;  %v1854_v40 = vmax.f32 %v6127_v1, %v1630_v17  ;;  %v1855_v45 = vmax.f32 %v1350_v36, %v1632_v55  ;;  %v4354_v1 = vld [vmem:[%s6811_s3 + $0x158] ss:$28 sps:$4 sm:$0xff]   ;;  %v4367_v6 = vld [vmem:[%s6811_s3 + $0x204] ss:$28 sps:$4 sm:$0xff]  }
 0x127   : > { %4106 = vmatprep.subr.bf16.mxu0 %v1925_v0  ;;  %v864_v12 = vmax.f32 %v759_v11, 0.0  ;;  %v865_v2 = vmax.f32 %v760_v28, 0.0  ;;  %v4373_v14 = vld [vmem:[%s6811_s3 + $0x23c] ss:$28 sps:$4 sm:$0xff]   ;;  %v4387_v0 = vld [vmem:[%s6811_s3 + $0xf4] ss:$28 sps:$4 sm:$0xff]  }
 0x128   : > { %v1633_v25 = vrot.slane %v1352_v48, 1  ;;  %v1666_v31 = vsel %vm1475_vm1, %v1663_v41, %v1665_v49  ;;  %v1668_v4 = vsel %vm1475_vm1, %v1665_v49, %v1667_v44  ;;  %v1917_v38 = vpack.c.bf16 %v1855_v45, %v1854_v40  ;;  %v4384_v54 = vld [vmem:[%s6811_s3 + $0xb8] ss:$28 sps:$4 sm:$0xff]   ;;  %v4393_v11 = vld [vmem:[%s6811_s3 + $0x12c] ss:$28 sps:$4 sm:$0xff]  }
 0x129   : > { %v1168_v56 = vrot.slane %v864_v12, 6  ;;  %v1872_v53 = vmax.f32 %v6189_v32, %v1666_v31  ;;  %v1873_v30 = vmax.f32 %v1368_v37, %v1668_v4  ;;  %v1170_v22 = vrot.slane %v865_v2, 6  ;;  %v4377_v29 = vld [vmem:[%s6811_s3 + $0x238] ss:$28 sps:$4 sm:$0xff]   ;;  %v4390_v37 = vld [vmem:[%s6811_s3 + $0xf0] ss:$28 sps:$4 sm:$0xff]  }
 0x12a   : > { %v1634_v62 = vsel %vm1475_vm1, %v1631_v57, %v1633_v25  ;;  %v1636_v41 = vsel %vm1475_vm1, %v1633_v25, %v6958_v51  ;;  %4107 = vmatpush3.bf16.msra.mxu0 %v1917_v38  ;;  %v4383_v5 = vld [vmem:[%s6811_s3 + $0x270] ss:$28 sps:$4 sm:$0xff]   ;;  %v4399_v17 = vld [vmem:[%s6811_s3 + $0x164] ss:$28 sps:$4 sm:$0xff]   ;;  %v4397_v61 = vld [vmem:[%s6811_s3 + $0x31c] ss:$28 sps:$4 sm:$0xff]  }
 0x12b   : > { %v1169_v23 = vsel %vm968_vm0, %v6038_v60, %v1168_v56  ;;  %v1926_v44 = vpack.c.bf16 %v1873_v30, %v1872_v53  ;;  %v1856_v26 = vmax.f32 %v6198_v20, %v1634_v62  ;;  %v1857_v32 = vmax.f32 %v1352_v48, %v1636_v41  ;;  %v4363_v20 = vld [vmem:[%s6811_s3 + $0x10] ss:$28 sps:$4 sm:$0xff]   ;;  %v4396_v48 = vld [vmem:[%s6811_s3 + $0x128] ss:$28 sps:$4 sm:$0xff]   ;;  %v4402_v25 = vld [vmem:[%s6811_s3 + $0x160] ss:$28 sps:$4 sm:$0xff]  }
 0x12c   : > { %v1171_v13 = vsel %vm968_vm0, %v1168_v56, %v1170_v22  ;;  %v1372_v47 = vmax.f32 %v860_v24, %v1169_v23  ;;  %2788 = vmatmul.mubr.bf16.gmra.mrb[40].mxu1 %v4354_v1  ;;  %v4462_v24 = vmov 65535   ;;  %v4385_v52 = vld [vmem:[%s6811_s3 + $0x2ac] ss:$28 sps:$4 sm:$0xff]   ;;  %v4391_v28 = vld [vmem:[%s6811_s3 + $0x2e4] ss:$28 sps:$4 sm:$0xff]  }
 0x12d   : > { %v1373_v18 = vmax.f32 %v861_v8, %v1171_v13  ;;  %4108 = vmatprep.subr.bf16.mxu0 %v1926_v44  ;;  %v1918_v15 = vpack.c.bf16 %v1857_v32, %v1856_v26  ;;  %2795 = vmatprep.mubr.bf16.mxu1 %v4357_v59  ;;  %v2541_v21 = vsel %vm2539_vm2, 4294967295, %v4462_v24  ;;  %v4389_v55 = vld [vmem:[%s6811_s3 + $0x2a8] ss:$28 sps:$4 sm:$0xff]   ;;  %v4405_v56 = vld [vmem:[%s6811_s3 + $0x19c] ss:$28 sps:$4 sm:$0xff]  }
 0x12e   : > { %v1673_v60 = vrot.slane %v1372_v47, 1  ;;  %v2542_v43 = vsel %vm2540_vm3, %v2541_v21, 0  ;;  %v4395_v62 = vld [vmem:[%s6811_s3 + $0x2e0] ss:$28 sps:$4 sm:$0xff]   ;;  %v4408_v44 = vld [vmem:[%s6811_s3 + $0x198] ss:$28 sps:$4 sm:$0xff]  }
 0x12f   : > { %v1675_v63 = vrot.slane %v1373_v18, 1  ;;  %4109 = vmatpush3.bf16.msra.mxu0 %v1918_v15  ;;  %v4409_v13 = vld [vmem:[%s6811_s3 + $0x1d4] ss:$28 sps:$4 sm:$0xff]  }
 0x130   : > { %v1674_v50 = vsel %vm1475_vm1, %v1671_v35, %v1673_v60  ;;  %v4403_v24 = vld [vmem:[%s6811_s3 + $0x354] ss:$28 sps:$4 sm:$0xff]  }
 0x131   : > { %v1676_v8 = vsel %vm1475_vm1, %v1673_v60, %v1675_v63  ;;  %v1876_v39 = vmax.f32 %v6051_v33, %v1674_v50  ;;  %v1878_v9 = vmax.f32 %v1373_v18, %v1675_v63  ;;  %v4372_v33 = vld [vmem:[%s6811_s3 + $0x48] ss:$28 sps:$4 sm:$0xff]  }
 0x132   : > { %v1877_v58 = vmax.f32 %v1372_v47, %v1676_v8  ;;  %2901 = vmatmul.mubr.bf16.vlgmr.msra.gmra.mrb[48].mxu0 %v4363_v20 }
 0x133   : > { %2908 = vmatprep.mubr.bf16.mxu0 %v4369_v46  ;;  %v1929_v36 = vpack.c.bf16 %v1878_v9, %v1878_v9  ;;  %v4401_v46 = vld [vmem:[%s6811_s3 + $0x318] ss:$28 sps:$4 sm:$0xff]  }
 0x134   : > { %v1928_v57 = vpack.c.bf16 %v1877_v58, %v1876_v39  ;;  %2796 = vmatmul.mubr.bf16.gmra.mrb[44].mxu1 %v4360_v10  ;;  %v4412_v39 = vld [vmem:[%s6811_s3 + $0x1d0] ss:$28 sps:$4 sm:$0xff]  }
 0x135   : > { %v2544_v35 = vand.u32 %v2542_v43, %v1929_v36  ;;  %2803 = vmatprep.mubr.bf16.mxu1 %v4361_v34  ;;  %v4414_v43 = vld [vmem:[%s6811_s3 + $0x20c] ss:$28 sps:$4 sm:$0xff]  }
 0x136   : > { %4227 = vmatprep.subr.bf16.mxu1 %v1928_v57 }
 0x137   : > { %4228 = vmatpush3.bf16.msra.mxu1 %v1928_v57 }
 0x138   : > { %4229 = vmatprep.subr.bf16.mxu1 %v2544_v35 }
 0x13a   : > { %2909 = vmatmul.mubr.bf16.gmra.mrb[52].mxu0 %v4372_v33 }
 0x13b   : > { %2916 = vmatprep.mubr.bf16.mxu0 %v4375_v27  ;;  %4230 = vmatpush3.bf16.msra.mxu1 %v2544_v35 }
 0x13c   : > { %2804 = vmatmul.mubr.bf16.gmra.mrb[48].mxu1 %v4366_v19  ;;  %v4407_v19 = vld [vmem:[%s6811_s3 + $0x350] ss:$28 sps:$4 sm:$0xff]  }
 0x13d   : > { %2811 = vmatprep.mubr.bf16.mxu1 %v4367_v6  ;;  %v4411_v6 = vld [vmem:[%s6811_s3 + $0x18] ss:$28 sps:$4 sm:$0xff]  }
 0x142   : > { %2917 = vmatmul.mubr.bf16.gmra.mrb[56].mxu0 %v4378_v3 }
 0x143   : > { %2924 = vmatprep.mubr.bf16.mxu0 %v4381_v16 }
 0x144   : > { %2812 = vmatmul.mubr.bf16.gmra.mrb[52].mxu1 %v4371_v7 }
 0x145   : > { %2819 = vmatprep.mubr.bf16.mxu1 %v4373_v14  ;;  %v4417_v14 = vld [vmem:[%s6811_s3 + $0x208] ss:$28 sps:$4 sm:$0xff]  }
 0x14a   : > { %2925 = vmatmul.mubr.bf16.gmra.mrb[60].mxu0 %v4384_v54 }
 0x14b   : > { %2932 = vmatprep.mubr.bf16.mxu0 %v4387_v0 }
 0x14c   : > { %2820 = vmatmul.mubr.bf16.gmra.mrb[56].mxu1 %v4377_v29 }
 0x14d   : > { %2827 = vmatprep.mubr.bf16.mxu1 %v4379_v42  ;;  %v4419_v42 = vld [vmem:[%s6811_s3 + $0x244] ss:$28 sps:$4 sm:$0xff]  }
 0x14f   : > { %v3886_v49 = vpop.f32.mrb[0].mxu0  ;;  %v3958_v40 = vpop.f32.mrb[0].mxu1 }
 0x150   : > { %v3887_v45 = vpop.f32.mrb[1].mxu0  ;;  %v3959_v12 = vpop.f32.mrb[1].mxu1 }
 0x151   : > { %v6338_v2 = vadd.f32 %v3887_v45, %v3886_v49  ;;  %v3889_v31 = vpop.f32.mrb[2].mxu0  ;;  %v6340_v4 = vadd.f32 %v3959_v12, %v3958_v40  ;;  %v3961_v38 = vpop.f32.mrb[2].mxu1  ;;  %v4422_v45 = vld [vmem:[%s6811_s3 + $0x240] ss:$28 sps:$4 sm:$0xff]  }
 0x152   : > { %2933 = vmatmul.mubr.bf16.gmra.mrb[64].mxu0 %v4390_v37  ;;  %v3890_v53 = vpop.f32.mrb[3].mxu0  ;;  %v3962_v30 = vpop.f32.mrb[3].mxu1 }
 0x153   : > { %2940 = vmatprep.mubr.bf16.mxu0 %v4393_v11  ;;  %v6345_v22 = vadd.f32 %v3890_v53, %v3889_v31  ;;  %v6347_v1 = vadd.f32 %v3962_v30, %v3961_v38  ;;  %v4424_v31 = vld [vmem:[%s6811_s3 + $0x27c] ss:$28 sps:$4 sm:$0xff]  }
 0x154   : > { %2828 = vmatmul.mubr.bf16.gmra.mrb[60].mxu1 %v4383_v5  ;;  %v4418_v53 = vld [vmem:[%s6811_s3 + $0xc0] ss:$28 sps:$4 sm:$0xff]   ;;  %v4421_v30 = vld [vmem:[%s6811_s3 + $0xf8] ss:$28 sps:$4 sm:$0xff]  }
 0x155   : > { %2835 = vmatprep.mubr.bf16.mxu1 %v4385_v52 }
 0x157   : > { %v3892_v51 = vpop.f32.mrb[4].mxu0 }
 0x158   : > { %v3893_v41 = vpop.f32.mrb[5].mxu0  ;;  %v3964_v23 = vpop.f32.mrb[4].mxu1 }
 0x159   : > { %v6358_v26 = vadd.f32 %v3893_v41, %v3892_v51  ;;  %v3895_v32 = vpop.f32.mrb[6].mxu0  ;;  %v3965_v59 = vpop.f32.mrb[5].mxu1  ;;  %v4427_v51 = vld [vmem:[%s6811_s3 + $0x278] ss:$28 sps:$4 sm:$0xff]  }
 0x15a   : > { %2941 = vmatmul.mubr.bf16.gmra.mrb[68].mxu0 %v4396_v48  ;;  %v3896_v47 = vpop.f32.mrb[7].mxu0  ;;  %v6363_v18 = vadd.f32 %v3965_v59, %v3964_v23  ;;  %v3967_v15 = vpop.f32.mrb[6].mxu1 }
 0x15b   : > { %2948 = vmatprep.mubr.bf16.mxu0 %v4399_v17  ;;  %v6365_v60 = vadd.f32 %v3896_v47, %v3895_v32  ;;  %v3968_v20 = vpop.f32.mrb[7].mxu1  ;;  %v4426_v47 = vld [vmem:[%s6811_s3 + $0x168] ss:$28 sps:$4 sm:$0xff]  }
 0x15c   : > { %2836 = vmatmul.mubr.bf16.gmra.mrb[64].mxu1 %v4389_v55  ;;  %v6367_v63 = vadd.f32 %v3968_v20, %v3967_v15  ;;  %v4413_v55 = vld [vmem:[%s6811_s3 + $0x50] ss:$28 sps:$4 sm:$0xff]  }
 0x15d   : > { %2843 = vmatprep.mubr.bf16.mxu1 %v4391_v28  ;;  %v4416_v28 = vld [vmem:[%s6811_s3 + $0x88] ss:$28 sps:$4 sm:$0xff]  }
 0x15f   : > { %v3898_v21 = vpop.f32.mrb[8].mxu0 }
 0x160   : > { %v3899_v50 = vpop.f32.mrb[9].mxu0  ;;  %v3970_v8 = vpop.f32.mrb[8].mxu1 }
 0x161   : > { %v6378_v9 = vadd.f32 %v3899_v50, %v3898_v21  ;;  %v3901_v58 = vpop.f32.mrb[10].mxu0  ;;  %v3971_v10 = vpop.f32.mrb[9].mxu1  ;;  %v4434_v50 = vld [vmem:[%s6811_s3 + $0x2ec] ss:$28 sps:$4 sm:$0xff]  }
 0x162   : > { %2949 = vmatmul.mubr.bf16.gmra.mrb[72].mxu0 %v4402_v25  ;;  %v3902_v34 = vpop.f32.mrb[11].mxu0  ;;  %v6383_v36 = vadd.f32 %v3971_v10, %v3970_v8  ;;  %v3973_v57 = vpop.f32.mrb[10].mxu1  ;;  %v4431_v10 = vld [vmem:[%s6811_s3 + $0x1d8] ss:$28 sps:$4 sm:$0xff]  }
 0x163   : > { %2956 = vmatprep.mubr.bf16.mxu0 %v4405_v56  ;;  %v6385_v35 = vadd.f32 %v3902_v34, %v3901_v58  ;;  %v3974_v33 = vpop.f32.mrb[11].mxu1  ;;  %v4428_v58 = vld [vmem:[%s6811_s3 + $0x1a0] ss:$28 sps:$4 sm:$0xff]  }
 0x164   : > { %2844 = vmatmul.mubr.bf16.gmra.mrb[68].mxu1 %v4395_v62  ;;  %v6387_v27 = vadd.f32 %v3974_v33, %v3973_v57  ;;  %v4437_v57 = vld [vmem:[%s6811_s3 + $0x2e8] ss:$28 sps:$4 sm:$0xff]  }
 0x165   : > { %2851 = vmatprep.mubr.bf16.mxu1 %v4397_v61 }
 0x167   : > { %v3904_v3 = vpop.f32.mrb[12].mxu0 }
 0x168   : > { %v3905_v16 = vpop.f32.mrb[13].mxu0  ;;  %v3976_v7 = vpop.f32.mrb[12].mxu1 }
 0x169   : > { %v6398_v54 = vadd.f32 %v3905_v16, %v3904_v3  ;;  %v3907_v0 = vpop.f32.mrb[14].mxu0  ;;  %v3977_v29 = vpop.f32.mrb[13].mxu1 }
 0x16a   : > { %2957 = vmatmul.mubr.bf16.gmra.mrb[76].mxu0 %v4408_v44  ;;  %v3908_v37 = vpop.f32.mrb[15].mxu0  ;;  %v6404_v11 = vadd.f32 %v3977_v29, %v3976_v7  ;;  %v3979_v5 = vpop.f32.mrb[14].mxu1  ;;  %v4429_v44 = vld [vmem:[%s6811_s3 + $0x2b4] ss:$28 sps:$4 sm:$0xff]  }
 0x16b   : > { %2964 = vmatprep.mubr.bf16.mxu0 %v4409_v13  ;;  %v6406_v52 = vadd.f32 %v3908_v37, %v3907_v0  ;;  %v3980_v48 = vpop.f32.mrb[15].mxu1  ;;  %v4423_v13 = vld [vmem:[%s6811_s3 + $0x130] ss:$28 sps:$4 sm:$0xff]  }
 0x16c   : > { %2852 = vmatmul.mubr.bf16.gmra.mrb[72].mxu1 %v4401_v46  ;;  %v6408_v17 = vadd.f32 %v3980_v48, %v3979_v5  ;;  %v4432_v46 = vld [vmem:[%s6811_s3 + $0x2b0] ss:$28 sps:$4 sm:$0xff]   ;;  %v4444_v48 = vld [vmem:[%s6811_s3 + $0x35c] ss:$28 sps:$4 sm:$0xff]  }
 0x16d   : > { %2859 = vmatprep.mubr.bf16.mxu1 %v4403_v24  ;;  %v4433_v7 = vld [vmem:[%s6811_s3 + $0x210] ss:$28 sps:$4 sm:$0xff]  }
 0x16f   : > { %v3910_v49 = vpop.f32.mrb[16].mxu0 }
 0x170   : > { %v3911_v40 = vpop.f32.mrb[17].mxu0 }
 0x171   : > { %v6420_v12 = vadd.f32 %v3911_v40, %v3910_v49  ;;  %v3913_v25 = vpop.f32.mrb[18].mxu0  ;;  %v4438_v49 = vld [vmem:[%s6811_s3 + $0x280] ss:$28 sps:$4 sm:$0xff]   ;;  %v4441_v40 = vld [vmem:[%s6811_s3 + $0x2b8] ss:$28 sps:$4 sm:$0xff]  }
 0x172   : > { %2965 = vmatmul.mubr.bf16.gmra.mrb[80].mxu0 %v4412_v39  ;;  %v3914_v38 = vpop.f32.mrb[19].mxu0 }
 0x173   : > { %2972 = vmatprep.mubr.bf16.mxu0 %v4414_v43  ;;  %v6426_v56 = vadd.f32 %v3914_v38, %v3913_v25 }
 0x174   : > { %2860 = vmatmul.mubr.bf16.gmra.mrb[76].mxu1 %v4407_v19 }
 0x175   : > { %4231 = vmatprep.mubr.msk.bf16.mxu1 %vm2490_vm4, %v4411_v6  ;;  %v4439_v6 = vld [vmem:[%s6811_s3 + $0x324] ss:$28 sps:$4 sm:$0xff]  }
 0x178   : > { %v3916_v62 = vpop.f32.mrb[20].mxu0 }
 0x179   : > { %v3917_v61 = vpop.f32.mrb[21].mxu0 }
 0x17a   : > { %2973 = vmatmul.mubr.bf16.gmra.mrb[84].mxu0 %v4417_v14  ;;  %v6438_v41 = vadd.f32 %v3917_v61, %v3916_v62  ;;  %v3919_v23 = vpop.f32.mrb[22].mxu0  ;;  %v4436_v14 = vld [vmem:[%s6811_s3 + $0x248] ss:$28 sps:$4 sm:$0xff]   ;;  %v4443_v61 = vld [vmem:[%s6811_s3 + $0x2f0] ss:$28 sps:$4 sm:$0xff]  }
 0x17b   : > { %2980 = vmatprep.mubr.bf16.mxu0 %v4419_v42  ;;  %v3920_v32 = vpop.f32.mrb[23].mxu0  ;;  %v4442_v42 = vld [vmem:[%s6811_s3 + $0x320] ss:$28 sps:$4 sm:$0xff]  }
 0x17c   : > { %4232 = vmatmul.mubr.msk.bf16.vlgmr.msra.gmra.mrb[80].mxu1 %vm2490_vm4, %v4413_v55  ;;  %v6444_v59 = vadd.f32 %v3920_v32, %v3919_v23 }
 0x17d   : > { %4235 = vmatprep.mubr.msk.bf16.mxu1 %vm2490_vm4, %v4416_v28 }
 0x180   : > { %v3922_v15 = vpop.f32.mrb[24].mxu0 }
 0x181   : > { %v3923_v20 = vpop.f32.mrb[25].mxu0 }
 0x182   : > { %2981 = vmatmul.mubr.bf16.gmra.mrb[88].mxu0 %v4422_v45  ;;  %v6456_v24 = vadd.f32 %v3923_v20, %v3922_v15  ;;  %v3925_v21 = vpop.f32.mrb[26].mxu0  ;;  %v4448_v20 = vld [vmem:[%s6811_s3 + $0x360] ss:$28 sps:$4 sm:$0xff]  }
 0x183   : > { %2988 = vmatprep.mubr.bf16.mxu0 %v4424_v31  ;;  %v3926_v8 = vpop.f32.mrb[27].mxu0  ;;  %v4447_v31 = vld [vmem:[%s6811_s3 + $0x358] ss:$28 sps:$4 sm:$0xff]  }
 0x184   : > { %4236 = vmatmul.mubr.msk.bf16.gmra.mrb[84].mxu1 %vm2490_vm4, %v4418_v53  ;;  %v6462_v39 = vadd.f32 %v3926_v8, %v3925_v21 }
 0x185   : > { %4239 = vmatprep.mubr.msk.bf16.mxu1 %vm2490_vm4, %v4421_v30 }
 0x188   : > { %v3928_v43 = vpop.f32.mrb[28].mxu0 }
 0x189   : > { %v3929_v34 = vpop.f32.mrb[29].mxu0 }
 0x18a   : > { %2989 = vmatmul.mubr.bf16.gmra.mrb[92].mxu0 %v4427_v51  ;;  %v6474_v33 = vadd.f32 %v3929_v34, %v3928_v43  ;;  %v3931_v19 = vpop.f32.mrb[30].mxu0  ;;  %v4446_v51 = vld [vmem:[%s6811_s3 + $0x328] ss:$28 sps:$4 sm:$0xff]  }
 0x18b   : > { %2996 = vmatprep.mubr.bf16.mxu0 %v4429_v44  ;;  %v3932_v3 = vpop.f32.mrb[31].mxu0 }
 0x18c   : > { %4240 = vmatmul.mubr.msk.bf16.gmra.mrb[88].mxu1 %vm2490_vm4, %v4423_v13  ;;  %v6480_v16 = vadd.f32 %v3932_v3, %v3931_v19 }
 0x18d   : > { %4243 = vmatprep.mubr.msk.bf16.mxu1 %vm2490_vm4, %v4426_v47 }
 0x190   : > { %v3934_v0 = vpop.f32.mrb[32].mxu0 }
 0x191   : > { %v3935_v29 = vpop.f32.mrb[33].mxu0 }
 0x192   : > { %2997 = vmatmul.mubr.bf16.gmra.mrb[96].mxu0 %v4432_v46  ;;  %v6492_v37 = vadd.f32 %v3935_v29, %v3934_v0  ;;  %v3937_v5 = vpop.f32.mrb[34].mxu0 }
 0x193   : > { %3004 = vmatprep.mubr.bf16.mxu0 %v4434_v50  ;;  %v3938_v55 = vpop.f32.mrb[35].mxu0 }
 0x194   : > { %4244 = vmatmul.mubr.msk.bf16.gmra.mrb[92].mxu1 %vm2490_vm4, %v4428_v58  ;;  %v6498_v28 = vadd.f32 %v3938_v55, %v3937_v5 }
 0x195   : > { %4247 = vmatprep.mubr.msk.bf16.mxu1 %vm2490_vm4, %v4431_v10 }
 0x198   : > { %v3940_v45 = vpop.f32.mrb[36].mxu0 }
 0x199   : > { %v3941_v25 = vpop.f32.mrb[37].mxu0 }
 0x19a   : > { %3005 = vmatmul.mubr.bf16.gmra.mrb[100].mxu0 %v4437_v57  ;;  %v6510_v38 = vadd.f32 %v3941_v25, %v3940_v45  ;;  %v3943_v53 = vpop.f32.mrb[38].mxu0 }
 0x19b   : > { %3012 = vmatprep.mubr.bf16.mxu0 %v4439_v6  ;;  %v3944_v30 = vpop.f32.mrb[39].mxu0 }
 0x19c   : > { %4248 = vmatmul.mubr.msk.bf16.gmra.mrb[96].mxu1 %vm2490_vm4, %v4433_v7  ;;  %v6513_v62 = vadd.f32 %v3944_v30, %v3943_v53 }
 0x19d   : > { %4251 = vmatprep.mubr.msk.bf16.mxu1 %vm2490_vm4, %v4436_v14 }
 0x1a0   : > { %v3946_v23 = vpop.f32.mrb[40].mxu0 }
 0x1a1   : > { %v3947_v44 = vpop.f32.mrb[41].mxu0 }
 0x1a2   : > { %3013 = vmatmul.mubr.bf16.gmra.mrb[104].mxu0 %v4442_v42  ;;  %v6522_v32 = vadd.f32 %v3947_v44, %v3946_v23  ;;  %v3949_v13 = vpop.f32.mrb[42].mxu0 }
 0x1a3   : > { %3020 = vmatprep.mubr.bf16.mxu0 %v4444_v48  ;;  %v3950_v47 = vpop.f32.mrb[43].mxu0 }
 0x1a4   : > { %4252 = vmatmul.mubr.msk.bf16.gmra.mrb[100].mxu1 %vm2490_vm4, %v4438_v49  ;;  %v6525_v15 = vadd.f32 %v3950_v47, %v3949_v13 }
 0x1a5   : > { %4255 = vmatprep.mubr.msk.bf16.mxu1 %vm2490_vm4, %v4441_v40 }
 0x1aa   : > { %3021 = vmatmul.mubr.bf16.gmra.mrb[108].mxu0 %v4447_v31 }
 0x1ab   : > { %v3952_v46 = vpop.f32.mrb[44].mxu0 }
 0x1ac   : > { %4256 = vmatmul.mubr.msk.bf16.gmra.mrb[104].mxu1 %vm2490_vm4, %v4443_v61  ;;  %v3953_v21 = vpop.f32.mrb[45].mxu0 }
 0x1ad   : > { %4259 = vmatprep.mubr.msk.bf16.mxu1 %vm2490_vm4, %v4446_v51  ;;  %v6531_v50 = vadd.f32 %v3953_v21, %v3952_v46  ;;  %v3955_v8 = vpop.f32.mrb[46].mxu0 }
 0x1ae   : > { %v3956_v58 = vpop.f32.mrb[47].mxu0 }
 0x1af   : > { %v6533_v10 = vadd.f32 %v3956_v58, %v3955_v8 }
 0x1b4   : > { %4260 = vmatmul.mubr.msk.bf16.gmra.mrb[108].mxu1 %vm2490_vm4, %v4448_v20 }
 0x1cf   : > { %v3998_v43 = vpop.f32.mrb[16].mxu1 }
 0x1d0   : > { %v3999_v34 = vpop.f32.mrb[17].mxu1 }
 0x1d1   : > { %v4000_v57 = vadd.f32 %v3999_v34, %v3998_v43  ;;  %v4001_v19 = vpop.f32.mrb[18].mxu1 }
 0x1d2   : > { %v4002_v6 = vpop.f32.mrb[19].mxu1 }
 0x1d3   : > { %v2742_v3 = vadd.f32 %v4000_v57, %v6338_v2  ;;  %v4003_v7 = vadd.f32 %v4002_v6, %v4001_v19 }
 0x1d5   : > { %v2745_v14 = vadd.f32 %v4003_v7, %v6345_v22 }
 0x1d7   : > { %v4004_v0 = vpop.f32.mrb[20].mxu1 }
 0x1d8   : > { %v4005_v29 = vpop.f32.mrb[21].mxu1 }
 0x1d9   : > { %v4006_v42 = vadd.f32 %v4005_v29, %v4004_v0  ;;  %v4007_v5 = vpop.f32.mrb[22].mxu1 }
 0x1da   : > { %v4008_v48 = vpop.f32.mrb[23].mxu1 }
 0x1db   : > { %v6538_v55 = vadd.f32 %v4006_v42, %v6358_v26  ;;  %v4009_v49 = vadd.f32 %v4008_v48, %v4007_v5 }
 0x1dd   : > { %v6541_v40 = vadd.f32 %v4009_v49, %v6365_v60 }
 0x1df   : > { %v4010_v45 = vpop.f32.mrb[24].mxu1 }
 0x1e0   : > { %v4011_v25 = vpop.f32.mrb[25].mxu1 }
 0x1e1   : > { %v4012_v31 = vadd.f32 %v4011_v25, %v4010_v45  ;;  %v4013_v53 = vpop.f32.mrb[26].mxu1 }
 0x1e2   : > { %v4014_v2 = vpop.f32.mrb[27].mxu1 }
 0x1e3   : > { %v6544_v30 = vadd.f32 %v4012_v31, %v6378_v9  ;;  %v4015_v22 = vadd.f32 %v4014_v2, %v4013_v53 }
 0x1e5   : > { %v6547_v61 = vadd.f32 %v4015_v22, %v6385_v35 }
 0x1e7   : > { %v4016_v51 = vpop.f32.mrb[28].mxu1 }
 0x1e8   : > { %v4017_v23 = vpop.f32.mrb[29].mxu1 }
 0x1e9   : > { %v4018_v26 = vadd.f32 %v4017_v23, %v4016_v51  ;;  %v4019_v44 = vpop.f32.mrb[30].mxu1 }
 0x1ea   : > { %v4020_v13 = vpop.f32.mrb[31].mxu1 }
 0x1eb   : > { %v6550_v60 = vadd.f32 %v4018_v26, %v6398_v54  ;;  %v4021_v47 = vadd.f32 %v4020_v13, %v4019_v44 }
 0x1ed   : > { %v6553_v20 = vadd.f32 %v4021_v47, %v6406_v52 }
 0x1ef   : > { %v4022_v46 = vpop.f32.mrb[32].mxu1 }
 0x1f0   : > { %v4023_v21 = vpop.f32.mrb[33].mxu1 }
 0x1f1   : > { %v4024_v9 = vadd.f32 %v4023_v21, %v4022_v46  ;;  %v4025_v8 = vpop.f32.mrb[34].mxu1 }
 0x1f2   : > { %v4026_v58 = vpop.f32.mrb[35].mxu1 }
 0x1f3   : > { %v6556_v35 = vadd.f32 %v4024_v9, %v6420_v12  ;;  %v4027_v43 = vadd.f32 %v4026_v58, %v4025_v8 }
 0x1f5   : > { %v6559_v34 = vadd.f32 %v4027_v43, %v6426_v56 }
 0x1f7   : > { %v4028_v57 = vpop.f32.mrb[36].mxu1 }
 0x1f8   : > { %v4029_v19 = vpop.f32.mrb[37].mxu1 }
 0x1f9   : > { %v4030_v54 = vadd.f32 %v4029_v19, %v4028_v57  ;;  %v4031_v6 = vpop.f32.mrb[38].mxu1 }
 0x1fa   : > { %v4032_v7 = vpop.f32.mrb[39].mxu1 }
 0x1fb   : > { %v6562_v52 = vadd.f32 %v4030_v54, %v6438_v41  ;;  %v4033_v0 = vadd.f32 %v4032_v7, %v4031_v6 }
 0x1fd   : > { %v6565_v29 = vadd.f32 %v4033_v0, %v6444_v59 }
 0x1ff   : > { %v4034_v42 = vpop.f32.mrb[40].mxu1 }
 0x200   : > { %v4035_v5 = vpop.f32.mrb[41].mxu1 }
 0x201   : > { %v4036_v12 = vadd.f32 %v4035_v5, %v4034_v42  ;;  %v4037_v48 = vpop.f32.mrb[42].mxu1 }
 0x202   : > { %v4038_v49 = vpop.f32.mrb[43].mxu1 }
 0x203   : > { %v6568_v56 = vadd.f32 %v4036_v12, %v6456_v24  ;;  %v4039_v45 = vadd.f32 %v4038_v49, %v4037_v48 }
 0x205   : > { %v4110_v25 = vpop.f32.mrb[48].mxu0  ;;  %v6571_v53 = vadd.f32 %v4039_v45, %v6462_v39 }
 0x206   : > { %v4111_v31 = vpop.f32.mrb[49].mxu0 }
 0x207   : > { %v4112_v41 = vadd.f32 %v4111_v31, %v4110_v25  ;;  %v4113_v2 = vpop.f32.mrb[50].mxu0  ;;  %v4040_v51 = vpop.f32.mrb[44].mxu1 }
 0x208   : > { %v4114_v22 = vpop.f32.mrb[51].mxu0  ;;  %v4041_v26 = vpop.f32.mrb[45].mxu1 }
 0x209   : > { %v4115_v59 = vadd.f32 %v4114_v22, %v4113_v2  ;;  %v6573_v23 = vadd.f32 %v4112_v41, %v2742_v3  ;;  %v4042_v44 = vadd.f32 %v4041_v26, %v4040_v51  ;;  %v4043_v13 = vpop.f32.mrb[46].mxu1 }
 0x20a   : > { %v4044_v24 = vpop.f32.mrb[47].mxu1 }
 0x20b   : > { %v6575_v47 = vadd.f32 %v4115_v59, %v2745_v14  ;;  %v6578_v46 = vadd.f32 %v4042_v44, %v6474_v33  ;;  %v4045_v21 = vadd.f32 %v4044_v24, %v4043_v13 }
 0x20d   : > { %v4116_v9 = vpop.f32.mrb[52].mxu0  ;;  %v6581_v8 = vadd.f32 %v4045_v21, %v6480_v16 }
 0x20e   : > { %v4117_v39 = vpop.f32.mrb[53].mxu0 }
 0x20f   : > { %v4118_v58 = vadd.f32 %v4117_v39, %v4116_v9  ;;  %v4119_v43 = vpop.f32.mrb[54].mxu0  ;;  %v4046_v3 = vpop.f32.mrb[48].mxu1 }
 0x210   : > { %v4120_v57 = vpop.f32.mrb[55].mxu0  ;;  %v4047_v14 = vpop.f32.mrb[49].mxu1 }
 0x211   : > { %v4121_v19 = vadd.f32 %v4120_v57, %v4119_v43  ;;  %v6584_v54 = vadd.f32 %v4118_v58, %v6538_v55  ;;  %v4048_v6 = vadd.f32 %v4047_v14, %v4046_v3  ;;  %v4049_v7 = vpop.f32.mrb[50].mxu1 }
 0x212   : > { %v4050_v0 = vpop.f32.mrb[51].mxu1 }
 0x213   : > { %v6587_v33 = vadd.f32 %v4121_v19, %v6541_v40  ;;  %v6590_v42 = vadd.f32 %v4048_v6, %v6492_v37  ;;  %v4051_v16 = vadd.f32 %v4050_v0, %v4049_v7 }
 0x215   : > { %v4122_v5 = vpop.f32.mrb[56].mxu0  ;;  %v6593_v48 = vadd.f32 %v4051_v16, %v6498_v28 }
 0x216   : > { %v4123_v12 = vpop.f32.mrb[57].mxu0 }
 0x217   : > { %v4124_v49 = vadd.f32 %v4123_v12, %v4122_v5  ;;  %v4125_v45 = vpop.f32.mrb[58].mxu0  ;;  %v4052_v25 = vpop.f32.mrb[52].mxu1 }
 0x218   : > { %v4126_v55 = vpop.f32.mrb[59].mxu0  ;;  %v4053_v40 = vpop.f32.mrb[53].mxu1 }
 0x219   : > { %v4127_v31 = vadd.f32 %v4126_v55, %v4125_v45  ;;  %v6596_v41 = vadd.f32 %v4124_v49, %v6544_v30  ;;  %v4054_v2 = vadd.f32 %v4053_v40, %v4052_v25  ;;  %v4055_v22 = vpop.f32.mrb[54].mxu1 }
 0x21a   : > { %v4056_v51 = vpop.f32.mrb[55].mxu1 }
 0x21b   : > { %v6599_v37 = vadd.f32 %v4127_v31, %v6547_v61  ;;  %v6602_v59 = vadd.f32 %v4054_v2, %v6510_v38  ;;  %v4057_v28 = vadd.f32 %v4056_v51, %v4055_v22 }
 0x21d   : > { %v4128_v26 = vpop.f32.mrb[60].mxu0  ;;  %v6605_v13 = vadd.f32 %v4057_v28, %v6513_v62 }
 0x21e   : > { %v4129_v44 = vpop.f32.mrb[61].mxu0 }
 0x21f   : > { %v4130_v24 = vadd.f32 %v4129_v44, %v4128_v26  ;;  %v4131_v21 = vpop.f32.mrb[62].mxu0  ;;  %v4058_v9 = vpop.f32.mrb[56].mxu1 }
 0x220   : > { %v4132_v30 = vpop.f32.mrb[63].mxu0  ;;  %v4059_v61 = vpop.f32.mrb[57].mxu1 }
 0x221   : > { %v4133_v39 = vadd.f32 %v4132_v30, %v4131_v21  ;;  %v6608_v58 = vadd.f32 %v4130_v24, %v6550_v60  ;;  %v4060_v43 = vadd.f32 %v4059_v61, %v4058_v9  ;;  %v4061_v57 = vpop.f32.mrb[58].mxu1 }
 0x222   : > { %v4062_v3 = vpop.f32.mrb[59].mxu1 }
 0x223   : > { %v6611_v38 = vadd.f32 %v4133_v39, %v6553_v20  ;;  %v6614_v19 = vadd.f32 %v4060_v43, %v6522_v32  ;;  %v4063_v62 = vadd.f32 %v4062_v3, %v4061_v57 }
 0x225   : > { %v4134_v14 = vpop.f32.mrb[64].mxu0  ;;  %v6617_v7 = vadd.f32 %v4063_v62, %v6525_v15 }
 0x226   : > { %v4135_v6 = vpop.f32.mrb[65].mxu0 }
 0x227   : > { %v4136_v0 = vadd.f32 %v4135_v6, %v4134_v14  ;;  %v4137_v16 = vpop.f32.mrb[66].mxu0  ;;  %v4064_v5 = vpop.f32.mrb[60].mxu1 }
 0x228   : > { %v4138_v60 = vpop.f32.mrb[67].mxu0  ;;  %v4065_v20 = vpop.f32.mrb[61].mxu1 }
 0x229   : > { %v4139_v12 = vadd.f32 %v4138_v60, %v4137_v16  ;;  %v6620_v49 = vadd.f32 %v4136_v0, %v6556_v35  ;;  %v4066_v45 = vadd.f32 %v4065_v20, %v4064_v5  ;;  %v4067_v55 = vpop.f32.mrb[62].mxu1 }
 0x22a   : > { %v4068_v25 = vpop.f32.mrb[63].mxu1 }
 0x22b   : > { %v6623_v32 = vadd.f32 %v4139_v12, %v6559_v34  ;;  %v6626_v31 = vadd.f32 %v4066_v45, %v6531_v50  ;;  %v4069_v15 = vadd.f32 %v4068_v25, %v4067_v55 }
 0x22d   : > { %v4140_v40 = vpop.f32.mrb[68].mxu0  ;;  %v6629_v22 = vadd.f32 %v4069_v15, %v6533_v10 }
 0x22e   : > { %v4141_v2 = vpop.f32.mrb[69].mxu0 }
 0x22f   : > { %v4142_v51 = vadd.f32 %v4141_v2, %v4140_v40  ;;  %v4143_v28 = vpop.f32.mrb[70].mxu0  ;;  %v4070_v26 = vpop.f32.mrb[64].mxu1 }
 0x230   : > { %v4144_v35 = vpop.f32.mrb[71].mxu0  ;;  %v4071_v34 = vpop.f32.mrb[65].mxu1 }
 0x231   : > { %v4145_v44 = vadd.f32 %v4144_v35, %v4143_v28  ;;  %v6632_v24 = vadd.f32 %v4142_v51, %v6562_v52  ;;  %v4072_v21 = vadd.f32 %v4071_v34, %v4070_v26  ;;  %v4073_v30 = vpop.f32.mrb[66].mxu1 }
 0x232   : > { %v4074_v9 = vpop.f32.mrb[67].mxu1 }
 0x233   : > { %v6635_v50 = vadd.f32 %v4145_v44, %v6565_v29  ;;  %v6638_v39 = vadd.f32 %v4072_v21, %v6340_v4  ;;  %v4075_v10 = vadd.f32 %v4074_v9, %v4073_v30 }
 0x235   : > { %v4146_v61 = vpop.f32.mrb[72].mxu0  ;;  %v6641_v57 = vadd.f32 %v4075_v10, %v6347_v1 }
 0x236   : > { %v4147_v43 = vpop.f32.mrb[73].mxu0 }
 0x237   : > { %v4148_v3 = vadd.f32 %v4147_v43, %v4146_v61  ;;  %v4149_v62 = vpop.f32.mrb[74].mxu0  ;;  %v4076_v14 = vpop.f32.mrb[68].mxu1 }
 0x238   : > { %v4150_v52 = vpop.f32.mrb[75].mxu0  ;;  %v4077_v29 = vpop.f32.mrb[69].mxu1 }
 0x239   : > { %v4151_v6 = vadd.f32 %v4150_v52, %v4149_v62  ;;  %v6644_v0 = vadd.f32 %v4148_v3, %v6568_v56  ;;  %v4078_v16 = vadd.f32 %v4077_v29, %v4076_v14  ;;  %v4079_v60 = vpop.f32.mrb[70].mxu1 }
 0x23a   : > { %v4080_v5 = vpop.f32.mrb[71].mxu1 }
 0x23b   : > { %v6647_v4 = vadd.f32 %v4151_v6, %v6571_v53  ;;  %v6650_v12 = vadd.f32 %v4078_v16, %v6363_v18  ;;  %v4081_v1 = vadd.f32 %v4080_v5, %v4079_v60 }
 0x23d   : > { %v4152_v20 = vpop.f32.mrb[76].mxu0  ;;  %v6653_v55 = vadd.f32 %v4081_v1, %v6367_v63 }
 0x23e   : > { %v4153_v45 = vpop.f32.mrb[77].mxu0 }
 0x23f   : > { %v4154_v25 = vadd.f32 %v4153_v45, %v4152_v20  ;;  %v4155_v15 = vpop.f32.mrb[78].mxu0  ;;  %v4082_v40 = vpop.f32.mrb[72].mxu1 }
 0x240   : > { %v4156_v56 = vpop.f32.mrb[79].mxu0  ;;  %v4083_v53 = vpop.f32.mrb[73].mxu1 }
 0x241   : > { %v4157_v2 = vadd.f32 %v4156_v56, %v4155_v15  ;;  %v6656_v51 = vadd.f32 %v4154_v25, %v6578_v46  ;;  %v4084_v28 = vadd.f32 %v4083_v53, %v4082_v40  ;;  %v4085_v35 = vpop.f32.mrb[74].mxu1 }
 0x242   : > { %v4086_v26 = vpop.f32.mrb[75].mxu1 }
 0x243   : > { %v6659_v18 = vadd.f32 %v4157_v2, %v6581_v8  ;;  %v6662_v44 = vadd.f32 %v4084_v28, %v6383_v36  ;;  %v4087_v63 = vadd.f32 %v4086_v26, %v4085_v35 }
 0x245   : > { %v4158_v34 = vpop.f32.mrb[80].mxu0  ;;  %v6665_v30 = vadd.f32 %v4087_v63, %v6387_v27 }
 0x246   : > { %v4159_v21 = vpop.f32.mrb[81].mxu0 }
 0x247   : > { %v4160_v9 = vadd.f32 %v4159_v21, %v4158_v34  ;;  %v4161_v10 = vpop.f32.mrb[82].mxu0  ;;  %v4088_v61 = vpop.f32.mrb[76].mxu1 }
 0x248   : > { %v4162_v46 = vpop.f32.mrb[83].mxu0  ;;  %v4089_v8 = vpop.f32.mrb[77].mxu1 }
 0x249   : > { %v4163_v43 = vadd.f32 %v4162_v46, %v4161_v10  ;;  %v6668_v3 = vadd.f32 %v4160_v9, %v6590_v42  ;;  %v4090_v62 = vadd.f32 %v4089_v8, %v4088_v61  ;;  %v4091_v52 = vpop.f32.mrb[78].mxu1 }
 0x24a   : > { %v4092_v14 = vpop.f32.mrb[79].mxu1 }
 0x24b   : > { %v6671_v36 = vadd.f32 %v4163_v43, %v6593_v48  ;;  %v6674_v6 = vadd.f32 %v4090_v62, %v6404_v11  ;;  %v4093_v27 = vadd.f32 %v4092_v14, %v4091_v52 }
 0x24d   : > { %v4164_v29 = vpop.f32.mrb[84].mxu0  ;;  %v6677_v60 = vadd.f32 %v4093_v27, %v6408_v17 }
 0x24e   : > { %v4165_v16 = vpop.f32.mrb[85].mxu0 }
 0x24f   : > { %v4166_v5 = vadd.f32 %v4165_v16, %v4164_v29  ;;  %v4167_v1 = vpop.f32.mrb[86].mxu0  ;;  %v4233_v20 = vpop.f32.mrb[80].mxu1 }
 0x250   : > { %v4168_v42 = vpop.f32.mrb[87].mxu0  ;;  %v3072_v48 = vadd.f32 %v4233_v20, %v6584_v54  ;;  %v3063_v15 = vpop.f32.mrb[81].mxu1 }
 0x251   : > { %v4169_v45 = vadd.f32 %v4168_v42, %v4167_v1  ;;  %v6681_v25 = vadd.f32 %v4166_v5, %v6602_v59  ;;  %v3064_v11 = vadd.f32 %v3063_v15, %v6573_v23  ;;  %v4234_v17 = vpop.f32.mrb[82].mxu1 }
 0x252   : > { %v3581_v59 = vpack.c.bf16 %v3072_v48, %v3072_v48  ;;  %v3075_v54 = vadd.f32 %v4234_v17, %v6587_v33  ;;  %v3066_v40 = vpop.f32.mrb[83].mxu1 }
 0x253   : > { %v6691_v56 = vadd.f32 %v4169_v45, %v6605_v13  ;;  %v3579_v2 = vpack.c.bf16 %v3064_v11, %v3064_v11  ;;  %v3067_v53 = vadd.f32 %v3066_v40, %v6575_v47 }
 0x254   : > { %3321 = vst.msk [vmem:[%s6687_s23 + $0x8] sm:$0xf] %vm3318_vm5, %v3581_v59  ;;  %v3582_v35 = vpack.c.bf16 %v3075_v54, %v3075_v54 }
 0x255   : > { %v4170_v28 = vpop.f32.mrb[88].mxu0  ;;  %3319 = vst.msk [vmem:[%s6687_s23] sm:$0xf] %vm3318_vm5, %v3579_v2  ;;  %v3580_v23 = vpack.c.bf16 %v3067_v53, %v3067_v53 }
 0x256   : > { %v4171_v26 = vpop.f32.mrb[89].mxu0  ;;  %3322 = vst.msk [vmem:[%s6687_s23 + $0xc] sm:$0xf] %vm3318_vm5, %v3582_v35 }
 0x257   : > { %v4172_v63 = vadd.f32 %v4171_v26, %v4170_v28  ;;  %v4173_v34 = vpop.f32.mrb[90].mxu0  ;;  %3320 = vst.msk [vmem:[%s6687_s23 + $0x4] sm:$0xf] %vm3318_vm5, %v3580_v23  ;;  %v4237_v33 = vpop.f32.mrb[84].mxu1 }
 0x258   : > { %v4174_v13 = vpop.f32.mrb[91].mxu0  ;;  %v3088_v9 = vadd.f32 %v4237_v33, %v6608_v58  ;;  %v3079_v10 = vpop.f32.mrb[85].mxu1 }
 0x259   : > { %v4175_v21 = vadd.f32 %v4174_v13, %v4173_v34  ;;  %v6704_v47 = vadd.f32 %v4172_v63, %v6614_v19  ;;  %v3080_v46 = vadd.f32 %v3079_v10, %v6596_v41  ;;  %v4238_v61 = vpop.f32.mrb[86].mxu1 }
 0x25a   : > { %v3585_v8 = vpack.c.bf16 %v3088_v9, %v3088_v9  ;;  %v3091_v62 = vadd.f32 %v4238_v61, %v6611_v38  ;;  %v3082_v52 = vpop.f32.mrb[87].mxu1 }
 0x25b   : > { %v6709_v43 = vadd.f32 %v4175_v21, %v6617_v7  ;;  %v3583_v14 = vpack.c.bf16 %v3080_v46, %v3080_v46  ;;  %v3083_v27 = vadd.f32 %v3082_v52, %v6599_v37 }
 0x25c   : > { %3325 = vst.msk [vmem:[%s6687_s23 + $0x18] sm:$0xf] %vm3318_vm5, %v3585_v8  ;;  %v3586_v58 = vpack.c.bf16 %v3091_v62, %v3091_v62 }
 0x25d   : > { %v4176_v19 = vpop.f32.mrb[92].mxu0  ;;  %3323 = vst.msk [vmem:[%s6687_s23 + $0x10] sm:$0xf] %vm3318_vm5, %v3583_v14  ;;  %v3584_v41 = vpack.c.bf16 %v3083_v27, %v3083_v27 }
 0x25e   : > { %v4177_v29 = vpop.f32.mrb[93].mxu0  ;;  %3326 = vst.msk [vmem:[%s6687_s23 + $0x1c] sm:$0xf] %vm3318_vm5, %v3586_v58 }
 0x25f   : > { %v4178_v16 = vadd.f32 %v4177_v29, %v4176_v19  ;;  %v4179_v5 = vpop.f32.mrb[94].mxu0  ;;  %3324 = vst.msk [vmem:[%s6687_s23 + $0x14] sm:$0xf] %vm3318_vm5, %v3584_v41  ;;  %v4241_v38 = vpop.f32.mrb[88].mxu1 }
 0x260   : > { %v4180_v7 = vpop.f32.mrb[95].mxu0  ;;  %v3104_v42 = vadd.f32 %v4241_v38, %v6632_v24  ;;  %v3095_v20 = vpop.f32.mrb[89].mxu1 }
 0x261   : > { %v4181_v1 = vadd.f32 %v4180_v7, %v4179_v5  ;;  %v6722_v37 = vadd.f32 %v4178_v16, %v6626_v31  ;;  %v3096_v45 = vadd.f32 %v3095_v20, %v6620_v49  ;;  %v4242_v48 = vpop.f32.mrb[90].mxu1 }
 0x262   : > { %v3589_v11 = vpack.c.bf16 %v3104_v42, %v3104_v42  ;;  %v3107_v17 = vadd.f32 %v4242_v48, %v6635_v50  ;;  %v3098_v59 = vpop.f32.mrb[91].mxu1 }
 0x263   : > { %v6727_v15 = vadd.f32 %v4181_v1, %v6629_v22  ;;  %v3587_v54 = vpack.c.bf16 %v3096_v45, %v3096_v45  ;;  %v3099_v40 = vadd.f32 %v3098_v59, %v6623_v32 }
 0x264   : > { %3329 = vst.msk [vmem:[%s6687_s23 + $0x28] sm:$0xf] %vm3318_vm5, %v3589_v11  ;;  %v3590_v24 = vpack.c.bf16 %v3107_v17, %v3107_v17 }
 0x265   : > { %v4182_v31 = vpop.f32.mrb[96].mxu0  ;;  %3327 = vst.msk [vmem:[%s6687_s23 + $0x20] sm:$0xf] %vm3318_vm5, %v3587_v54  ;;  %v3588_v49 = vpack.c.bf16 %v3099_v40, %v3099_v40 }
 0x266   : > { %v4183_v2 = vpop.f32.mrb[97].mxu0  ;;  %3330 = vst.msk [vmem:[%s6687_s23 + $0x2c] sm:$0xf] %vm3318_vm5, %v3590_v24 }
 0x267   : > { %v4184_v53 = vadd.f32 %v4183_v2, %v4182_v31  ;;  %v4185_v28 = vpop.f32.mrb[98].mxu0  ;;  %3328 = vst.msk [vmem:[%s6687_s23 + $0x24] sm:$0xf] %vm3318_vm5, %v3588_v49  ;;  %v4245_v50 = vpop.f32.mrb[92].mxu1 }
 0x268   : > { %v4186_v22 = vpop.f32.mrb[99].mxu0  ;;  %v3120_v26 = vadd.f32 %v4245_v50, %v6656_v51  ;;  %v3111_v23 = vpop.f32.mrb[93].mxu1 }
 0x269   : > { %v4187_v35 = vadd.f32 %v4186_v22, %v4185_v28  ;;  %v6740_v32 = vadd.f32 %v4184_v53, %v6638_v39  ;;  %v3112_v63 = vadd.f32 %v3111_v23, %v6644_v0  ;;  %v4246_v34 = vpop.f32.mrb[94].mxu1 }
 0x26a   : > { %v3593_v33 = vpack.c.bf16 %v3120_v26, %v3120_v26  ;;  %v3123_v21 = vadd.f32 %v4246_v34, %v6659_v18  ;;  %v3114_v9 = vpop.f32.mrb[95].mxu1 }
 0x26b   : > { %v6745_v13 = vadd.f32 %v4187_v35, %v6641_v57  ;;  %v3591_v10 = vpack.c.bf16 %v3112_v63, %v3112_v63  ;;  %v3115_v46 = vadd.f32 %v3114_v9, %v6647_v4 }
 0x26c   : > { %3333 = vst.msk [vmem:[%s6687_s23 + $0x38] sm:$0xf] %vm3318_vm5, %v3593_v33  ;;  %v3594_v51 = vpack.c.bf16 %v3123_v21, %v3123_v21 }
 0x26d   : > { %v4188_v39 = vpop.f32.mrb[100].mxu0  ;;  %3331 = vst.msk [vmem:[%s6687_s23 + $0x30] sm:$0xf] %vm3318_vm5, %v3591_v10  ;;  %v3592_v0 = vpack.c.bf16 %v3115_v46, %v3115_v46 }
 0x26e   : > { %v4189_v61 = vpop.f32.mrb[101].mxu0  ;;  %3334 = vst.msk [vmem:[%s6687_s23 + $0x3c] sm:$0xf] %vm3318_vm5, %v3594_v51 }
 0x26f   : > { %v4190_v8 = vadd.f32 %v4189_v61, %v4188_v39  ;;  %v4191_v62 = vpop.f32.mrb[102].mxu0  ;;  %3332 = vst.msk [vmem:[%s6687_s23 + $0x34] sm:$0xf] %vm3318_vm5, %v3592_v0  ;;  %v4249_v18 = vpop.f32.mrb[96].mxu1 }
 0x270   : > { %v4192_v57 = vpop.f32.mrb[103].mxu0  ;;  %v3136_v14 = vadd.f32 %v4249_v18, %v6681_v25  ;;  %v3127_v27 = vpop.f32.mrb[97].mxu1 }
 0x271   : > { %v4193_v52 = vadd.f32 %v4192_v57, %v4191_v62  ;;  %v3007_v4 = vadd.f32 %v4190_v8, %v6650_v12  ;;  %v3128_v19 = vadd.f32 %v3127_v27, %v6668_v3  ;;  %v4250_v58 = vpop.f32.mrb[98].mxu1 }
 0x272   : > { %v3597_v41 = vpack.c.bf16 %v3136_v14, %v3136_v14  ;;  %v3139_v16 = vadd.f32 %v4250_v58, %v6691_v56  ;;  %v3130_v5 = vpop.f32.mrb[99].mxu1 }
 0x273   : > { %v3010_v29 = vadd.f32 %v4193_v52, %v6653_v55  ;;  %v3595_v7 = vpack.c.bf16 %v3128_v19, %v3128_v19  ;;  %v3131_v38 = vadd.f32 %v3130_v5, %v6671_v36 }
 0x274   : > { %3337 = vst.msk [vmem:[%s6687_s23 + $0x48] sm:$0xf] %vm3318_vm5, %v3597_v41  ;;  %v3598_v12 = vpack.c.bf16 %v3139_v16, %v3139_v16 }
 0x275   : > { %v4194_v1 = vpop.f32.mrb[104].mxu0  ;;  %3335 = vst.msk [vmem:[%s6687_s23 + $0x40] sm:$0xf] %vm3318_vm5, %v3595_v7  ;;  %v3596_v3 = vpack.c.bf16 %v3131_v38, %v3131_v38 }
 0x276   : > { %v4195_v25 = vpop.f32.mrb[105].mxu0  ;;  %3338 = vst.msk [vmem:[%s6687_s23 + $0x4c] sm:$0xf] %vm3318_vm5, %v3598_v12 }
 0x277   : > { %v4196_v42 = vadd.f32 %v4195_v25, %v4194_v1  ;;  %v4197_v20 = vpop.f32.mrb[106].mxu0  ;;  %3336 = vst.msk [vmem:[%s6687_s23 + $0x44] sm:$0xf] %vm3318_vm5, %v3596_v3  ;;  %v4253_v56 = vpop.f32.mrb[100].mxu1 }
 0x278   : > { %v4198_v55 = vpop.f32.mrb[107].mxu0  ;;  %v3152_v48 = vadd.f32 %v4253_v56, %v6722_v37  ;;  %v3143_v11 = vpop.f32.mrb[101].mxu1 }
 0x279   : > { %v4199_v45 = vadd.f32 %v4198_v55, %v4197_v20  ;;  %v3015_v36 = vadd.f32 %v4196_v42, %v6662_v44  ;;  %v3144_v17 = vadd.f32 %v3143_v11, %v6704_v47  ;;  %v4254_v59 = vpop.f32.mrb[102].mxu1 }
 0x27a   : > { %v3601_v40 = vpack.c.bf16 %v3152_v48, %v3152_v48  ;;  %v3155_v31 = vadd.f32 %v4254_v59, %v6727_v15  ;;  %v3146_v24 = vpop.f32.mrb[103].mxu1 }
 0x27b   : > { %v3018_v54 = vadd.f32 %v4199_v45, %v6665_v30  ;;  %v3599_v2 = vpack.c.bf16 %v3144_v17, %v3144_v17  ;;  %v3147_v49 = vadd.f32 %v3146_v24, %v6709_v43 }
 0x27c   : > { %3341 = vst.msk [vmem:[%s6687_s23 + $0x58] sm:$0xf] %vm3318_vm5, %v3601_v40  ;;  %v3602_v44 = vpack.c.bf16 %v3155_v31, %v3155_v31 }
 0x27d   : > { %v4200_v53 = vpop.f32.mrb[108].mxu0  ;;  %3339 = vst.msk [vmem:[%s6687_s23 + $0x50] sm:$0xf] %vm3318_vm5, %v3599_v2  ;;  %v3600_v47 = vpack.c.bf16 %v3147_v49, %v3147_v49 }
 0x27e   : > { %v4201_v37 = vpop.f32.mrb[109].mxu0  ;;  %3342 = vst.msk [vmem:[%s6687_s23 + $0x5c] sm:$0xf] %vm3318_vm5, %v3602_v44 }
 0x27f   : > { %v4202_v28 = vadd.f32 %v4201_v37, %v4200_v53  ;;  %v4203_v22 = vpop.f32.mrb[110].mxu0  ;;  %3340 = vst.msk [vmem:[%s6687_s23 + $0x54] sm:$0xf] %vm3318_vm5, %v3600_v47  ;;  %v4257_v15 = vpop.f32.mrb[104].mxu1 }
 0x280   : > { %v4204_v30 = vpop.f32.mrb[111].mxu0  ;;  %v3168_v35 = vadd.f32 %v4257_v15, %v3007_v4  ;;  %v3159_v26 = vpop.f32.mrb[105].mxu1 }
 0x281   : > { %v3023_v43 = vadd.f32 %v4202_v28, %v6674_v6  ;;  %v4205_v50 = vadd.f32 %v4204_v30, %v4203_v22  ;;  %v3160_v23 = vadd.f32 %v3159_v26, %v6740_v32  ;;  %v4258_v63 = vpop.f32.mrb[106].mxu1 }
 0x282   : > { %v3605_v33 = vpack.c.bf16 %v3168_v35, %v3168_v35  ;;  %v3171_v21 = vadd.f32 %v4258_v63, %v3010_v29  ;;  %v3162_v9 = vpop.f32.mrb[107].mxu1 }
 0x283   : > { %v3026_v34 = vadd.f32 %v4205_v50, %v6677_v60  ;;  %v3603_v10 = vpack.c.bf16 %v3160_v23, %v3160_v23  ;;  %v3163_v46 = vadd.f32 %v3162_v9, %v6745_v13 }
 0x284   : > { %3345 = vst.msk [vmem:[%s6687_s23 + $0x68] sm:$0xf] %vm3318_vm5, %v3605_v33  ;;  %v3606_v6 = vpack.c.bf16 %v3171_v21, %v3171_v21 }
 0x285   : > { %3343 = vst.msk [vmem:[%s6687_s23 + $0x60] sm:$0xf] %vm3318_vm5, %v3603_v10  ;;  %v3604_v39 = vpack.c.bf16 %v3163_v46, %v3163_v46 }
 0x286   : > { %3346 = vst.msk [vmem:[%s6687_s23 + $0x6c] sm:$0xf] %vm3318_vm5, %v3606_v6 }
 0x287   : > { %3344 = vst.msk [vmem:[%s6687_s23 + $0x64] sm:$0xf] %vm3318_vm5, %v3604_v39  ;;  %v4261_v60 = vpop.f32.mrb[108].mxu1 }
 0x288   : > { %v3184_v32 = vadd.f32 %v4261_v60, %v3023_v43  ;;  %v3175_v51 = vpop.f32.mrb[109].mxu1 }
 0x289   : > { %v3176_v61 = vadd.f32 %v3175_v51, %v3015_v36  ;;  %v4262_v0 = vpop.f32.mrb[110].mxu1 }
 0x28a   : > { %v3609_v13 = vpack.c.bf16 %v3184_v32, %v3184_v32  ;;  %v3187_v8 = vadd.f32 %v4262_v0, %v3026_v34  ;;  %v3178_v62 = vpop.f32.mrb[111].mxu1 }
 0x28b   : > { %v3607_v57 = vpack.c.bf16 %v3176_v61, %v3176_v61  ;;  %v3179_v18 = vadd.f32 %v3178_v62, %v3018_v54 }
 0x28c   : > { %3349 = vst.msk [vmem:[%s6687_s23 + $0x78] sm:$0xf] %vm3318_vm5, %v3609_v13  ;;  %v3610_v52 = vpack.c.bf16 %v3187_v8, %v3187_v8 }
 0x28d   : > { %3347 = vst.msk [vmem:[%s6687_s23 + $0x70] sm:$0xf] %vm3318_vm5, %v3607_v57  ;;  %v3608_v4 = vpack.c.bf16 %v3179_v18, %v3179_v18 }
 0x28e   : > { %3350 = vst.msk [vmem:[%s6687_s23 + $0x7c] sm:$0xf] %vm3318_vm5, %v3610_v52 }
 0x28f   : > { %3348 = vst.msk [vmem:[%s6687_s23 + $0x74] sm:$0xf] %vm3318_vm5, %v3608_v4 }
 0x290 PF: > { %s14_s15 = sadd.s32 1, %s4460_s15  }
 0x291   : > { %p11_p4 = scmp.ge.s32.totalorder %s14_s15, 4  }
 0x293   :  { %13 = sbr.rel (!%p11_p4) target bundleno = 1 (0x1), region = 66 }

// kernel: _lambda_.10
= control target key start
LH: loop header
LB: loop body
LE: loop exit
PB: predicated region body
PF: predicated region fallthrough
CT: control target
= control target key end

     0   :  { %s2664_s18 = smov 0   ;;  %s3687_s0 = inlined_call_operand.vmem [shape: bf16[2,256,64], index: 0, kind: input, shape index: {}]   ;;  %s3688_s1 = inlined_call_operand.vmem [shape: bf16[576,64], index: 1, kind: input, shape index: {}]   ;;  %s3689_s2 = inlined_call_operand.vmem [shape: f32[222,1], index: 2, kind: input, shape index: {}]   ;;  %s3690_s3 = inlined_call_operand.vmem [shape: bf16[2,222,64], index: 3, kind: output, shape index: {0}]   ;;  %s3691_s4 = inlined_call_operand.vmem [shape: f32[2,1,64], index: 4, kind: output, shape index: {1}]   ;;  %s3692_s5 = inlined_call_operand.vmem [shape: f32[2,1,64], index: 5, kind: output, shape index: {2}]  }
   0x1 LB: > { %s2151_s19 = sadd.s32 4294967295, %s2630_s18   ;;  %p2155_p0 = scmp.ge.s32.totalorder %s2630_s18, 1  ;;  %s2630_s18 = sphi %s2664_s18, %s16_s18  }
   0x2   : > { %p192_p1 = scmp.lt.s32.totalorder %s2630_s18, 3 }
   0x4   : > { %p193_p2 = pnand %p2155_p0, %p192_p1 }
   0x5   : > { %p226_p3 = scmp.lt.s32.totalorder (!%p193_p2), %s2151_s19, 1  ;;  %v2580_v0 = vld [vmem:[%s3688_s1 + $0x40] sm:$0xff] (!%p193_p2)   ;;  %v2584_v2 = vld [vmem:[%s3688_s1 + $0x48] sm:$0xff] (!%p193_p2)   ;;  %v2586_v4 = vld [vmem:[%s3688_s1 + $0x50] sm:$0xff] (!%p193_p2)   ;;  %s2632_s9 = smov (!%p193_p2), 64   ;;  %vm597_vm1 = vcmask (!%p193_p2), 1046528  }
   0x6   : > { %196 = sbr.rel (%p193_p2) target bundleno = 552 (0x228), region = 32  ;;  %2290 = vmatprep.subr.bf16.mxu0 (!%p193_p2), %v2580_v0  ;;  %v2581_v1 = vld [vmem:[%s3688_s1] sm:$0xff] (!%p193_p2)   ;;  %v2585_v3 = vld [vmem:[%s3688_s1 + $0x8] sm:$0xff] (!%p193_p2)   ;;  %vm454_vm0 = vsmask.f32 (!%p193_p2), 7424  ;;  %v2587_v46 = vld [vmem:[%s3688_s1 + $0x10] sm:$0xff] (!%p193_p2)  }
   0x7   : > { %2291 = vmatpush3.bf16.msra.mxu0 (!%p193_p2), %v2581_v1  ;;  %v2588_v47 = vld [vmem:[%s3688_s1 + $0x58] sm:$0xff] (!%p193_p2)   ;;  %v2590_v56 = vld [vmem:[%s3688_s1 + $0x60] sm:$0xff] (!%p193_p2)   ;;  %vm733_vm2 = vcmask (!%p193_p2), 523264   ;;  %vm1862_vm3 = vcmask (!%p193_p2), 519168   ;;  %vm1890_vm4 = vcmask (!%p193_p2), 518144   ;;  %vm1945_vm5 = vcmask (!%p193_p2), 521216  }
   0x8   : > { %2292 = vmatprep.subr.bf16.mxu0 (!%p193_p2), %v2584_v2  ;;  %v2589_v52 = vld [vmem:[%s3688_s1 + $0x18] sm:$0xff] (!%p193_p2)   ;;  %v2591_v62 = vld [vmem:[%s3688_s1 + $0x20] sm:$0xff] (!%p193_p2)   ;;  %vm2043_vm6 = vcmask (!%p193_p2), 516096  }
   0x9   : > { %v2592_v63 = vld [vmem:[%s3688_s1 + $0xc0] sm:$0xff] (!%p193_p2)  }
   0xa   : > { %2390 = vmatprep.subr.bf16.mxu1 (!%p193_p2), %v2592_v63 }
   0xb   : > { %2293 = vmatpush3.bf16.msra.mxu0 (!%p193_p2), %v2585_v3 }
   0xc   : > { %2294 = vmatprep.subr.bf16.mxu0 (!%p193_p2), %v2586_v4  ;;  %v2593_v4 = vld [vmem:[%s3688_s1 + $0x80] sm:$0xff] (!%p193_p2)  }
   0xd   : > { %s3694_s19 = smov (!%p226_p3, %s2151_s19), 1  ;;  %2391 = vmatpush3.bf16.msra.mxu1 %v2593_v4  ;;  %v2614_v4 = vld [vmem:[%s3688_s1 + $0xb0] sm:$0xff]  }
   0xe   : > { %s2261_s26 = sshll.u32 %s3694_s19, 7  ;;  %s241_s29 = scalar_lea.vmem %s3692_s5, %s3694_s19 }
   0xf   : > { %s2690_s6 = scalar_lea.vmem %s3687_s0, %s2261_s26  ;;  %2295 = vmatpush3.bf16.msra.mxu0 %v2587_v46  ;;  %s238_s26 = scalar_lea.vmem %s3691_s4, %s3694_s19 }
  0x10   : > { %v345_v5 = vld [vmem:[%s2690_s6 + $0x8] sm:$0xf]  ;;  %v346_v6 = vld [vmem:[%s2690_s6 + $0xc] sm:$0xf]  ;;  %v347_v7 = vld [vmem:[%s2690_s6 + $0x10] sm:$0xf]  ;;  %2296 = vmatprep.subr.bf16.mxu0 %v2588_v47 }
  0x11   : > { %v2698_v8 = vcombine.low %v345_v5, %v346_v6  ;;  %v348_v9 = vld [vmem:[%s2690_s6 + $0x14] sm:$0xf]  ;;  %v343_v10 = vld [vmem:[%s2690_s6] sm:$0xf]  ;;  %v2703_v11 = vld [vmem:[%s2690_s6 + $0x4] sm:$0xf] }
  0x12   : > { %v2705_v12 = vcombine.low %v347_v7, %v348_v9  ;;  %v2708_v13 = vcombine.low %v343_v10, %v2703_v11  ;;  %v2711_v14 = vld [vmem:[%s2690_s6 + $0x18] sm:$0xff]   ;;  %v2724_v21 = vld [vmem:[%s2690_s6 + $0x20] sm:$0xff]   ;;  %v2730_v30 = vld [vmem:[%s2690_s6 + $0x28] sm:$0xff]  }
  0x13   : > { %630 = vrot.lane.b32.xlu0 %v2698_v8, %s2632_s9  ;;  %v463_v15 = vshll.u32 %v2698_v8, 16  ;;  %v467_v16 = vshrl.u32 %v2698_v8, 16  ;;  %v479_v23 = vshll.u32 %v2711_v14, 16  ;;  %v483_v28 = vshrl.u32 %v2711_v14, 16  ;;  %v376_v40 = vld [vmem:[%s2690_s6 + $0x8] sm:$0xe]  ;;  %2297 = vmatpush3.bf16.msra.mxu0 %v2589_v52 }
  0x14   : > { %632 = vrot.lane.b32.xlu1 %v2705_v12, %s2632_s9  ;;  %v456_v17 = vshrl.u32 %v2708_v13, 16  ;;  %v458_v18 = vshll.u32 %v2708_v13, 16  ;;  %v471_v19 = vshll.u32 %v2705_v12, 16  ;;  %v475_v20 = vshrl.u32 %v2705_v12, 16  ;;  %v2753_v45 = vld [vmem:[%s2690_s6 + $0x30] sm:$0xff]   ;;  %v2772_v51 = vld [vmem:[%s2690_s6 + $0x38] sm:$0xff]   ;;  %2298 = vmatprep.subr.bf16.mxu0 %v2590_v56 }
  0x15   : > { %v465_v22 = vrot.slane %v463_v15, 1  ;;  %v481_v27 = vrot.slane %v479_v23, 1  ;;  %v487_v29 = vshll.u32 %v2724_v21, 16  ;;  %v491_v35 = vshrl.u32 %v2724_v21, 16  ;;  %v2802_v0 = vld [vmem:[%s2690_s6 + $0x40] sm:$0xff]   ;;  %v2820_v7 = vld [vmem:[%s2690_s6 + $0x48] sm:$0xff]  }
  0x16   : > { %v460_v24 = vrot.slane %v458_v18, 1  ;;  %v473_v25 = vrot.slane %v471_v19, 1  ;;  %v495_v39 = vshll.u32 %v2730_v30, 16  ;;  %v2177_v44 = vcombine.low %v376_v40, %v346_v6  ;;  %v2594_v6 = vld [vmem:[%s3688_s1 + $0x68] sm:$0xff]   ;;  %v2599_v23 = vld [vmem:[%s3688_s1 + $0x30] sm:$0xff]   ;;  %v2606_v40 = vld [vmem:[%s3688_s1 + $0xd8] sm:$0xff]  }
  0x17   : > { %v469_v26 = vor.u32 %v467_v16, %v465_v22  ;;  %v485_v37 = vor.u32 %v483_v28, %v481_v27  ;;  %v489_v38 = vrot.slane %v487_v29, 1  ;;  %v2769_v49 = vrot.slane %v2705_v12, 1  ;;  %2299 = vmatpush3.bf16.msra.mxu0 %v2591_v62  ;;  %v2595_v9 = vld [vmem:[%s3688_s1 + $0x28] sm:$0xff]   ;;  %v2891_v46 = vld [vmem:[%s2690_s6 + $0x58] sm:$0xff]   ;;  %v2896_v47 = vld [vmem:[%s3688_s1 + $0x100] sm:$0xff]  }
  0x18   : > { %v461_v31 = vor.u32 %v460_v24, %v456_v17  ;;  %v477_v32 = vor.u32 %v475_v20, %v473_v25  ;;  %v497_v43 = vrot.slane %v495_v39, 1  ;;  %v672_v50 = vrot.slane %v2177_v44, 1  ;;  %2300 = vmatprep.subr.bf16.mxu0 %v2594_v6  ;;  %v2596_v15 = vld [vmem:[%s3688_s1 + $0xc8] sm:$0xff]   ;;  %v2598_v20 = vld [vmem:[%s3688_s1 + $0x70] sm:$0xff]  }
  0x19   : > { %v2733_v33 = vsel %vm454_vm0, %v469_v26, %v473_v25  ;;  %v2750_v41 = vsel %vm454_vm0, %v485_v37, %v489_v38  ;;  %v493_v42 = vor.u32 %v491_v35, %v489_v38  ;;  %v499_v53 = vshrl.u32 %v2730_v30, 16  ;;  %v2597_v18 = vld [vmem:[%s3688_s1 + $0x88] sm:$0xff]   ;;  %2392 = vmatprep.subr.bf16.mxu1 %v2596_v15  ;;  %v2600_v25 = vld [vmem:[%s3688_s1 + $0xd0] sm:$0xff]   ;;  %v2615_v15 = vld [vmem:[%s3688_s1 + $0xf8] sm:$0xff]  }
  0x1a   : > { %v466_v34 = vsel %vm454_vm0, %v461_v31, %v465_v22  ;;  %568 = vrot.lane.b32.xlu1 %v2733_v33, %s2632_s9  ;;  %v2741_v36 = vsel %vm454_vm0, %v477_v32, %v481_v27  ;;  %v503_v54 = vshll.u32 %v2753_v45, 16  ;;  %v2780_v55 = vrot.slane %v2711_v14, 1  ;;  %2393 = vmatpush3.bf16.msra.mxu1 %v2597_v18  ;;  %v2601_v27 = vld [vmem:[%s3688_s1 + $0x90] sm:$0xff]   ;;  %v2602_v32 = vld [vmem:[%s3688_s1 + $0x78] sm:$0xff]   ;;  %v2950_v18 = vld [vmem:[%s2690_s6 + $0x60] sm:$0xff]  }
  0x1b   : > { %566 = vrot.lane.b32.xlu0 %v466_v34, %s2632_s9  ;;  %v2766_v48 = vsel %vm454_vm0, %v493_v42, %v497_v43  ;;  %v507_v57 = vshrl.u32 %v2753_v45, 16  ;;  %v511_v58 = vshll.u32 %v2772_v51, 16  ;;  %v673_v59 = vsel %vm597_vm1, %v672_v50, %v2769_v49  ;;  %2301 = vmatpush3.bf16.msra.mxu0 %v2595_v9  ;;  %v2604_v34 = vld [vmem:[%s3688_s1 + $0x38] sm:$0xff]   ;;  %v2873_v35 = vld [vmem:[%s2690_s6 + $0x50] sm:$0xff]   ;;  %v2609_v50 = vld [vmem:[%s3688_s1 + $0xe0] sm:$0xff]  }
  0x1c   : > { %v501_v60 = vor.u32 %v499_v53, %v497_v43  ;;  %v505_v61 = vrot.slane %v503_v54, 1  ;;  %v2808_v1 = vsel %vm597_vm1, %v2769_v49, %v2780_v55  ;;  %v605_v10 = vrot.slane %v2724_v21, 1  ;;  %2302 = vmatprep.subr.bf16.mxu0 %v2598_v20  ;;  %2394 = vmatprep.subr.bf16.mxu1 %v2600_v25  ;;  %v2607_v43 = vld [vmem:[%s3688_s1 + $0x98] sm:$0xff]   ;;  %v2610_v54 = vld [vmem:[%s3688_s1 + $0xa0] sm:$0xff]   ;;  %v2613_v62 = vld [vmem:[%s3688_s1 + $0xf0] sm:$0xff]  }
  0x1d   : > { %v513_v3 = vrot.slane %v511_v58, 1  ;;  %v515_v17 = vshrl.u32 %v2772_v51, 16  ;;  %v519_v19 = vshll.u32 %v2802_v0, 16  ;;  %v607_v22 = vrot.slane %v2730_v30, 1  ;;  %v371_v20 = vld [vmem:[%s2690_s6 + $0x6c] sm:$0xf] }
  0x1e   : > { %570 = vrot.lane.b32.xlu1 %v2741_v36, %s2632_s9  ;;  %v509_v2 = vor.u32 %v507_v57, %v505_v61  ;;  %v2814_v5 = vsel %vm454_vm0, %v501_v60, %v505_v61  ;;  %v523_v24 = vshrl.u32 %v2802_v0, 16  ;;  %v527_v26 = vshll.u32 %v2820_v7, 16  ;;  %2395 = vmatpush3.bf16.msra.mxu1 %v2601_v27  ;;  %v2611_v57 = vld [vmem:[%s3688_s1 + $0xe8] sm:$0xff]  }
  0x1f   : > { %634 = vrot.lane.b32.xlu0 %v2711_v14, %s2632_s9  ;;  %2303 = vmatpush3.bf16.msra.mxu0 %v2599_v23  ;;  %v2862_v28 = vsel %vm597_vm1, %v2780_v55, %v605_v10  ;;  %v517_v29 = vor.u32 %v515_v17, %v513_v3  ;;  %v521_v31 = vrot.slane %v519_v19, 1  ;;  %v2878_v37 = vsel %vm597_vm1, %v605_v10, %v607_v22  ;;  %v2612_v60 = vld [vmem:[%s3688_s1 + $0xa8] sm:$0xff]  }
  0x20   : > { %v2834_v16 = vsel %vm454_vm0, %v509_v2, %v513_v3  ;;  %2304 = vmatprep.subr.bf16.mxu0 %v2602_v32  ;;  %v529_v39 = vrot.slane %v527_v26, 1  ;;  %v609_v44 = vrot.slane %v2753_v45, 1  ;;  %2396 = vmatprep.subr.bf16.mxu1 %v2606_v40  ;;  %v531_v53 = vshrl.u32 %v2820_v7, 16  ;;  %v2953_v19 = vld [vmem:[%s2690_s6 + $0x68] sm:$0xf] }
  0x21   : > { %v525_v38 = vor.u32 %v523_v24, %v521_v31  ;;  %v2884_v42 = vsel %vm454_vm0, %v517_v29, %v521_v31  ;;  %v535_v56 = vshll.u32 %v2873_v35, 16  ;;  %v611_v58 = vrot.slane %v2772_v51, 1 }
  0x22   : > { %572 = vrot.lane.b32.xlu1 %v2750_v41, %s2632_s9  ;;  %2397 = vmatpush3.bf16.msra.mxu1 %v2607_v43  ;;  %v543_v61 = vshll.u32 %v2891_v46, 16  ;;  %v2931_v63 = vsel %vm597_vm1, %v607_v22, %v609_v44  ;;  %v533_v2 = vor.u32 %v531_v53, %v529_v39  ;;  %v2616_v22 = vld [vmem:[%s3688_s1 + $0xb8] sm:$0xff]   ;;  %v2967_v24 = vcombine.low %v2953_v19, %v371_v20  ;;  %v375_v53 = vld [vmem:[%s2690_s6 + $0x74] sm:$0xf] }
  0x23   : > { %636 = vrot.lane.b32.xlu0 %v2724_v21, %s2632_s9  ;;  %2305 = vmatpush3.bf16.msra.mxu0 %v2604_v34  ;;  %v2906_v52 = vsel %vm454_vm0, %v525_v38, %v529_v39  ;;  %v537_v3 = vrot.slane %v535_v56, 1  ;;  %v2941_v6 = vsel %vm597_vm1, %v609_v44, %v611_v58  ;;  %v613_v25 = vrot.slane %v2802_v0, 1 }
  0x24   : > { %2508 = vmatprep.subr.bf16.mxu0 %v2896_v47  ;;  %2398 = vmatprep.subr.bf16.mxu1 %v2609_v50  ;;  %v545_v10 = vrot.slane %v543_v61, 1  ;;  %v547_v26 = vshrl.u32 %v2891_v46, 16  ;;  %v551_v27 = vshll.u32 %v2950_v18, 16  ;;  %v615_v29 = vrot.slane %v2820_v7, 1  ;;  %v379_v61 = vld [vmem:[%s2690_s6 + $0x7c] sm:$0xf] }
  0x25   : > { %v2947_v17 = vsel %vm454_vm0, %v533_v2, %v537_v3  ;;  %v555_v31 = vshrl.u32 %v2950_v18, 16  ;;  %v559_v32 = vshll.u32 %v2967_v24, 16  ;;  %v2981_v34 = vsel %vm597_vm1, %v611_v58, %v613_v25 }
  0x26   : > { %574 = vrot.lane.b32.xlu1 %v2766_v48, %s2632_s9  ;;  %2399 = vmatpush3.bf16.msra.mxu1 %v2610_v54  ;;  %v549_v38 = vor.u32 %v547_v26, %v545_v10  ;;  %v553_v39 = vrot.slane %v551_v27, 1  ;;  %v2988_v40 = vsel %vm597_vm1, %v613_v25, %v615_v29  ;;  %v373_v54 = vld [vmem:[%s2690_s6 + $0x70] sm:$0xf]  ;;  %v619_v2 = vrot.slane %v2891_v46, 1 }
  0x27   : > { %638 = vrot.lane.b32.xlu0 %v2730_v30, %s2632_s9  ;;  %2400 = vmatprep.subr.bf16.mxu1 %v2611_v57  ;;  %v561_v44 = vrot.slane %v559_v32, 1  ;;  %v374_v57 = vld [vmem:[%s2690_s6 + $0x74] sm:$0x7]  ;;  %v3003_v58 = vcombine.low %v373_v54, %v375_v53  ;;  %v621_v27 = vrot.slane %v2950_v18, 1 }
  0x28   : > { %v557_v43 = vor.u32 %v555_v31, %v553_v39  ;;  %v2991_v50 = vsel %vm454_vm0, %v549_v38, %v553_v39  ;;  %v3044_v39 = vrot.slane %v2967_v24, 1 }
  0x29   : > { %v666_v25 = vshrl.u32 %v3003_v58, 16  ;;  %v3041_v38 = vsel %vm597_vm1, %v619_v2, %v621_v27 }
  0x2a   : > { %640 = vrot.lane.b32.xlu1 %v2753_v45, %s2632_s9  ;;  %2401 = vmatpush3.bf16.msra.mxu1 %v2612_v60  ;;  %v3000_v56 = vsel %vm454_vm0, %v557_v43, %v561_v44  ;;  %v3007_v60 = vld [vmem:[%s2690_s6 + $0x78] sm:$0xf]  ;;  %v3055_v53 = vsel %vm597_vm1, %v621_v27, %v3044_v39 }
  0x2b   : > { %676 = vrot.lane.b32.xlu0 %v673_v59, %s2632_s9  ;;  %v539_v59 = vshrl.u32 %v2873_v35, 16  ;;  %2402 = vmatprep.subr.bf16.mxu1 %v2613_v62  ;;  %v2175_v62 = vcombine.low %v373_v54, %v374_v57  ;;  %v3058_v54 = vrot.slane %v3003_v58, 1 }
  0x2d   : > { %v541_v9 = vor.u32 %v539_v59, %v537_v3  ;;  %v617_v59 = vrot.slane %v2873_v35, 1  ;;  %v563_v3 = vshrl.u32 %v2967_v24, 16 }
  0x2e   : > { %678 = vrot.lane.b32.xlu1 %v2808_v1, %s2632_s9  ;;  %2403 = vmatpush3.bf16.msra.mxu1 %v2614_v4  ;;  %v662_v4 = vshll.u32 %v3003_v58, 16 }
  0x2f   : > { %576 = vrot.lane.b32.xlu0 %v2814_v5, %s2632_s9  ;;  %v2964_v23 = vsel %vm454_vm0, %v541_v9, %v545_v10  ;;  %2404 = vmatprep.subr.bf16.mxu1 %v2615_v15  ;;  %v3018_v9 = vcombine.low %v3007_v60, %v379_v61  ;;  %v3021_v10 = vsel %vm597_vm1, %v615_v29, %v617_v59  ;;  %v372_v61 = vld [vmem:[%s2690_s6] sm:$0xe] }
  0x30   : > { %v3025_v15 = vsel %vm597_vm1, %v617_v59, %v619_v2  ;;  %v565_v20 = vor.u32 %v563_v3, %v561_v44  ;;  %v3066_v59 = vsel %vm597_vm1, %v3044_v39, %v3058_v54  ;;  %v599_v3 = vrot.slane %v2698_v8, 1 }
  0x31   : > { %v713_v26 = vshll.u32 %v3018_v9, 16  ;;  %v717_v43 = vshrl.u32 %v3018_v9, 16 }
  0x32   : > { %578 = vrot.lane.b32.xlu1 %v2834_v16, %s2632_s9  ;;  %2405 = vmatpush3.bf16.msra.mxu1 %v2616_v22  ;;  %v664_v22 = vrot.slane %v662_v4, 1 }
  0x33   : > { %642 = vrot.lane.b32.xlu0 %v2772_v51, %s2632_s9  ;;  %2544 = vmatprep.subr.bf16.mxu1 %v2896_v47  ;;  %v715_v32 = vrot.slane %v713_v26, 1  ;;  %v602_v26 = vsel %vm597_vm1, %v599_v3, %v2769_v49 }
  0x34   : > { %v3036_v29 = vsel %vm454_vm0, %v565_v20, %v664_v22  ;;  %v3038_v31 = vor.u32 %v666_v25, %v664_v22 }
  0x35   : > { %v719_v57 = vor.u32 %v717_v43, %v715_v32 }
  0x36   : > { %644 = vrot.lane.b32.xlu1 %v2802_v0, %s2632_s9  ;;  %v716_v44 = vsel %vm454_vm0, %v3038_v31, %v715_v32 }
  0x37   : > { %680 = vrot.lane.b32.xlu0 %v2862_v28, %s2632_s9 }
  0x3a   : > { %682 = vrot.lane.b32.xlu1 %v2878_v37, %s2632_s9 }
  0x3b   : > { %580 = vrot.lane.b32.xlu0 %v2884_v42, %s2632_s9 }
  0x3e   : > { %582 = vrot.lane.b32.xlu1 %v2906_v52, %s2632_s9 }
  0x3f   : > { %646 = vrot.lane.b32.xlu0 %v2820_v7, %s2632_s9 }
  0x42   : > { %648 = vrot.lane.b32.xlu1 %v2873_v35, %s2632_s9 }
  0x43   : > { %684 = vrot.lane.b32.xlu0 %v2931_v63, %s2632_s9 }
  0x46   : > { %686 = vrot.lane.b32.xlu1 %v2941_v6, %s2632_s9 }
  0x47   : > { %584 = vrot.lane.b32.xlu0 %v2947_v17, %s2632_s9 }
  0x4a   : > { %586 = vrot.lane.b32.xlu1 %v2964_v23, %s2632_s9 }
  0x4b   : > { %650 = vrot.lane.b32.xlu0 %v2891_v46, %s2632_s9 }
  0x4e   : > { %652 = vrot.lane.b32.xlu1 %v2950_v18, %s2632_s9 }
  0x4f   : > { %688 = vrot.lane.b32.xlu0 %v2981_v34, %s2632_s9 }
  0x52   : > { %690 = vrot.lane.b32.xlu1 %v2988_v40, %s2632_s9 }
  0x53   : > { %588 = vrot.lane.b32.xlu0 %v2991_v50, %s2632_s9 }
  0x56   : > { %590 = vrot.lane.b32.xlu1 %v3000_v56, %s2632_s9 }
  0x57   : > { %654 = vrot.lane.b32.xlu0 %v2967_v24, %s2632_s9 }
  0x5a   : > { %656 = vrot.lane.b32.xlu1 %v2175_v62, %s2632_s9  ;;  %v2174_v62 = vcombine.low %v372_v61, %v2703_v11  ;;  %v2617_v11 = vld [vmem:[%s3688_s1 + $0x108] sm:$0xff]  }
  0x5b   : > { %692 = vrot.lane.b32.xlu0 %v3021_v10, %s2632_s9 }
  0x5c   : > { %v598_v2 = vrot.slane %v2174_v62, 1  ;;  %v2618_v62 = vld [vmem:[%s3688_s1 + $0x110] sm:$0xff]  }
  0x5e   : > { %694 = vrot.lane.b32.xlu1 %v3025_v15, %s2632_s9  ;;  %v600_v4 = vsel %vm597_vm1, %v598_v2, %v599_v3 }
  0x5f   : > { %592 = vrot.lane.b32.xlu0 %v565_v20, %s2632_s9 }
  0x62   : > { %720 = vrot.lane.b32.xlu1 %v3036_v29, %s2632_s9 }
  0x63   : > { %696 = vrot.lane.b32.xlu0 %v3041_v38, %s2632_s9 }
  0x66   : > { %722 = vrot.lane.b32.xlu1 %v716_v44, %s2632_s9 }
  0x67   : > { %698 = vrot.lane.b32.xlu0 %v3055_v53, %s2632_s9 }
  0x6a   : > { %724 = vrot.lane.b32.xlu1 %v719_v57, %s2632_s9 }
  0x6b   : > { %700 = vrot.lane.b32.xlu0 %v3066_v59, %s2632_s9 }
  0x6f   : > { %702 = vrot.lane.b32.xlu0 %v3058_v54, %s2632_s9 }
  0x85   : > { %v631_v20 = vpop.permute.xlu0 %630 }
  0x86   : > { %v779_v22 = vsel %vm733_vm2, %v600_v4, %v631_v20  ;;  %v633_v25 = vpop.permute.xlu1 %632  ;;  %v315_v20 = vld [vmem:[%s3689_s2] sm:$0xff] }
  0x87   : > { %1179 = vmatprep.mubr.bf16.mxu0 %v779_v22  ;;  %v783_v43 = vsel %vm733_vm2, %v602_v26, %v633_v25  ;;  %v2633_v25 = vmov 0  }
  0x88   : > { %2563 = vset.pattern.permute.xlu1 %v2633_v25  ;;  %2564 = vset.pattern.permute.xlu0 %v2633_v25 }
  0x89   : > { %1584 = vperm.xlu1 %2563, %v315_v20   ;;  %v320_v20 = vld [vmem:[%s3689_s2 + $0x28] sm:$0xff] }
  0x8c   : > { %v569_v27 = vpop.permute.xlu1 %568 }
  0x8d   : > { %v567_v32 = vpop.permute.xlu0 %566  ;;  %v738_v2 = vsel %vm733_vm2, %v2698_v8, %v569_v27 }
  0x8e   : > { %v735_v44 = vsel %vm733_vm2, %v2708_v13, %v567_v32 }
  0x8f   : > { %1180 = vmatmul.mubr.bf16.vlgmr.msra.gmra.mrb[0].mxu0 %v735_v44  ;;  %v317_v44 = vld [vmem:[%s3689_s2 + $0x10] sm:$0xff] }
  0x90   : > { %2509 = vmatpush3.bf16.msra.mxu0 %v2896_v47  ;;  %1187 = vmatprep.mubr.bf16.mxu0 %v783_v43  ;;  %v571_v57 = vpop.permute.xlu1 %570 }
  0x91   : > { %v635_v61 = vpop.permute.xlu0 %634  ;;  %v741_v49 = vsel %vm733_vm2, %v2705_v12, %v571_v57  ;;  %2510 = vmatprep.subr.bf16.mxu0 %v2617_v11  ;;  %v2619_v12 = vld [vmem:[%s3688_s1 + $0x118] sm:$0xff]   ;;  %v316_v57 = vld [vmem:[%s3689_s2 + $0x8] sm:$0xff]  ;;  %1594 = vperm.xlu1 %2563, %v317_v44  }
  0x92   : > { %1324 = vmatprep.mubr.bf16.mxu1 %v741_v49  ;;  %v787_v4 = vsel %vm733_vm2, %v2808_v1, %v635_v61  ;;  %1589 = vperm.xlu0 %2564, %v316_v57  }
  0x94   : > { %v573_v3 = vpop.permute.xlu1 %572  ;;  %2511 = vmatpush3.bf16.msra.mxu0 %v2617_v11 }
  0x95   : > { %v637_v13 = vpop.permute.xlu0 %636  ;;  %2512 = vmatprep.subr.bf16.mxu0 %v2618_v62  ;;  %v744_v32 = vsel %vm733_vm2, %v2711_v14, %v573_v3  ;;  %v318_v14 = vld [vmem:[%s3689_s2 + $0x18] sm:$0xff] }
  0x96   : > { %v791_v27 = vsel %vm733_vm2, %v2862_v28, %v637_v13  ;;  %1599 = vperm.xlu1 %2563, %v318_v14   ;;  %v328_v14 = vld [vmem:[%s3689_s2 + $0x68] sm:$0xff] }
  0x97   : > { %1188 = vmatmul.mubr.bf16.gmra.mrb[4].mxu0 %v738_v2 }
  0x98   : > { %v575_v22 = vpop.permute.xlu1 %574  ;;  %1195 = vmatprep.mubr.bf16.mxu0 %v787_v4  ;;  %2513 = vmatpush3.bf16.msra.mxu0 %v2618_v62 }
  0x99   : > { %v639_v8 = vpop.permute.xlu0 %638  ;;  %2514 = vmatprep.subr.bf16.mxu0 %v2619_v12 }
  0x9a   : > { %v795_v13 = vsel %vm733_vm2, %v2878_v37, %v639_v8  ;;  %1609 = vperm.xlu1 %2563, %v320_v20  }
  0x9c   : > { %v641_v1 = vpop.permute.xlu1 %640  ;;  %2515 = vmatpush3.bf16.msra.mxu0 %v2619_v12 }
  0x9d   : > { %v677_v26 = vpop.permute.xlu0 %676 }
  0x9e   : > { %v835_v43 = vsel %vm733_vm2, %v2733_v33, %v677_v26  ;;  %v319_v33 = vld [vmem:[%s3689_s2 + $0x20] sm:$0xff]  ;;  %v799_v26 = vsel %vm733_vm2, %v2931_v63, %v641_v1 }
  0x9f   : > { %1196 = vmatmul.mubr.bf16.gmra.mrb[8].mxu0 %v741_v49  ;;  %1325 = vmatmul.mubr.bf16.vlgmr.msra.gmra.mrb[0].mxu1 %v835_v43  ;;  %v327_v43 = vld [vmem:[%s3689_s2 + $0x60] sm:$0xff] }
  0xa0   : > { %1203 = vmatprep.mubr.bf16.mxu0 %v791_v27  ;;  %1332 = vmatprep.mubr.bf16.mxu1 %v744_v32  ;;  %v679_v61 = vpop.permute.xlu1 %678 }
  0xa1   : > { %v577_v2 = vpop.permute.xlu0 %576  ;;  %2548 = vmatpush3.bf16.msra.mxu1 %v2896_v47  ;;  %v839_v49 = vsel %vm733_vm2, %v2741_v36, %v679_v61  ;;  %v747_v47 = vsel %vm733_vm2, %v2724_v21, %v575_v22  ;;  %1604 = vperm.xlu0 %2564, %v319_v33   ;;  %v321_v36 = vld [vmem:[%s3689_s2 + $0x30] sm:$0xff]  ;;  %v322_v21 = vld [vmem:[%s3689_s2 + $0x38] sm:$0xff]  ;;  %v323_v22 = vld [vmem:[%s3689_s2 + $0x40] sm:$0xff] }
  0xa2   : > { %2545 = vmatprep.subr.bf16.mxu1 %v2617_v11  ;;  %1619 = vperm.xlu1 %2563, %v322_v21   ;;  %v329_v33 = vld [vmem:[%s3689_s2 + $0x70] sm:$0xff] }
  0xa4   : > { %v579_v4 = vpop.permute.xlu1 %578 }
  0xa5   : > { %v643_v3 = vpop.permute.xlu0 %642  ;;  %2549 = vmatpush3.bf16.msra.mxu1 %v2617_v11  ;;  %1614 = vperm.xlu0 %2564, %v321_v36   ;;  %v332_v36 = vld [vmem:[%s3689_s2 + $0x88] sm:$0xff] }
  0xa6   : > { %2546 = vmatprep.subr.bf16.mxu1 %v2618_v62  ;;  %v803_v57 = vsel %vm733_vm2, %v2941_v6, %v643_v3  ;;  %v331_v3 = vld [vmem:[%s3689_s2 + $0x80] sm:$0xff] }
  0xa7   : > { %1204 = vmatmul.mubr.bf16.gmra.mrb[12].mxu0 %v744_v32  ;;  %1333 = vmatmul.mubr.bf16.gmra.mrb[4].mxu1 %v839_v49  ;;  %v324_v32 = vld [vmem:[%s3689_s2 + $0x48] sm:$0xff] }
  0xa8   : > { %1211 = vmatprep.mubr.bf16.mxu0 %v795_v13  ;;  %1340 = vmatprep.mubr.bf16.mxu1 %v747_v47  ;;  %v645_v11 = vpop.permute.xlu1 %644 }
  0xa9   : > { %v681_v8 = vpop.permute.xlu0 %680  ;;  %2550 = vmatpush3.bf16.msra.mxu1 %v2618_v62  ;;  %v750_v62 = vsel %vm733_vm2, %v2730_v30, %v577_v2  ;;  %1624 = vperm.xlu0 %2564, %v323_v22   ;;  %v326_v30 = vld [vmem:[%s3689_s2 + $0x58] sm:$0xff]  ;;  %v753_v2 = vsel %vm733_vm2, %v2753_v45, %v579_v4  ;;  %v807_v4 = vsel %vm733_vm2, %v2981_v34, %v645_v11  ;;  %v335_v11 = vld [vmem:[%s3689_s2 + $0xa0] sm:$0xff] }
  0xaa   : > { %2547 = vmatprep.subr.bf16.mxu1 %v2619_v12  ;;  %v843_v25 = vsel %vm733_vm2, %v2750_v41, %v681_v8  ;;  %v325_v41 = vld [vmem:[%s3689_s2 + $0x50] sm:$0xff]  ;;  %1629 = vperm.xlu1 %2563, %v324_v32   ;;  %v330_v45 = vld [vmem:[%s3689_s2 + $0x78] sm:$0xff] }
  0xab   : > { %v333_v8 = vld [vmem:[%s3689_s2 + $0x90] sm:$0xff] }
  0xac   : > { %v683_v1 = vpop.permute.xlu1 %682  ;;  %v337_v32 = vld [vmem:[%s3689_s2 + $0xb0] sm:$0xff] }
  0xad   : > { %v581_v27 = vpop.permute.xlu0 %580  ;;  %2551 = vmatpush3.bf16.msra.mxu1 %v2619_v12  ;;  %1634 = vperm.xlu0 %2564, %v325_v41   ;;  %v847_v44 = vsel %vm733_vm2, %v2766_v48, %v683_v1  ;;  %v339_v1 = vld [vmem:[%s3689_s2 + $0xc0] sm:$0xff] }
  0xae   : > { %1639 = vperm.xlu1 %2563, %v326_v30   ;;  %v756_v20 = vsel %vm733_vm2, %v2772_v51, %v581_v27  ;;  %v334_v51 = vld [vmem:[%s3689_s2 + $0x98] sm:$0xff] }
  0xaf   : > { %1212 = vmatmul.mubr.bf16.gmra.mrb[16].mxu0 %v747_v47  ;;  %1341 = vmatmul.mubr.bf16.gmra.mrb[8].mxu1 %v843_v25 }
  0xb0   : > { %1219 = vmatprep.mubr.bf16.mxu0 %v799_v26  ;;  %1348 = vmatprep.mubr.bf16.mxu1 %v750_v62  ;;  %v583_v61 = vpop.permute.xlu1 %582 }
  0xb1   : > { %v647_v12 = vpop.permute.xlu0 %646  ;;  %1644 = vperm.xlu0 %2564, %v327_v43   ;;  %v759_v27 = vsel %vm733_vm2, %v2802_v0, %v583_v61  ;;  %v338_v0 = vld [vmem:[%s3689_s2 + $0xb8] sm:$0xff]  ;;  %v341_v61 = vld [vmem:[%s3689_s2 + $0xd0] sm:$0xff] }
  0xb2   : > { %1649 = vperm.xlu1 %2563, %v328_v14   ;;  %v811_v25 = vsel %vm733_vm2, %v2988_v40, %v647_v12 }
  0xb4   : > { %v649_v49 = vpop.permute.xlu1 %648 }
  0xb5   : > { %v685_v48 = vpop.permute.xlu0 %684  ;;  %1654 = vperm.xlu0 %2564, %v329_v33   ;;  %v815_v12 = vsel %vm733_vm2, %v3021_v10, %v649_v49 }
  0xb6   : > { %v851_v13 = vsel %vm733_vm2, %v2814_v5, %v685_v48  ;;  %1659 = vperm.xlu1 %2563, %v330_v45  }
  0xb7   : > { %1220 = vmatmul.mubr.bf16.gmra.mrb[20].mxu0 %v750_v62  ;;  %1349 = vmatmul.mubr.bf16.gmra.mrb[12].mxu1 %v847_v44  ;;  %v336_v62 = vld [vmem:[%s3689_s2 + $0xa8] sm:$0xff] }
  0xb8   : > { %1227 = vmatprep.mubr.bf16.mxu0 %v803_v57  ;;  %1356 = vmatprep.mubr.bf16.mxu1 %v753_v2  ;;  %v687_v5 = vpop.permute.xlu1 %686  ;;  %v340_v57 = vld [vmem:[%s3689_s2 + $0xc8] sm:$0xff] }
  0xb9   : > { %v585_v47 = vpop.permute.xlu0 %584  ;;  %1664 = vperm.xlu0 %2564, %v331_v3   ;;  %v855_v22 = vsel %vm733_vm2, %v2834_v16, %v687_v5  ;;  %v380_v5 = vld [vmem:[%s2690_s6 + $0x10] sm:$0xe] }
  0xba   : > { %1669 = vperm.xlu1 %2563, %v332_v36   ;;  %v762_v44 = vsel %vm733_vm2, %v2820_v7, %v585_v47  ;;  %v342_v7 = vld [vmem:[%s3689_s2 + $0xd8] sm:$0x3f] }
  0xbc   : > { %v587_v26 = vpop.permute.xlu1 %586 }
  0xbd   : > { %1674 = vperm.xlu0 %2564, %v333_v8   ;;  %v651_v21 = vpop.permute.xlu0 %650  ;;  %v765_v45 = vsel %vm733_vm2, %v2873_v35, %v587_v26 }
  0xbe   : > { %1679 = vperm.xlu1 %2563, %v334_v51   ;;  %v819_v33 = vsel %vm733_vm2, %v3025_v15, %v651_v21 }
  0xbf   : > { %1228 = vmatmul.mubr.bf16.gmra.mrb[24].mxu0 %v753_v2  ;;  %1357 = vmatmul.mubr.bf16.gmra.mrb[16].mxu1 %v851_v13 }
  0xc0   : > { %1235 = vmatprep.mubr.bf16.mxu0 %v807_v4  ;;  %1364 = vmatprep.mubr.bf16.mxu1 %v756_v20  ;;  %v653_v41 = vpop.permute.xlu1 %652 }
  0xc1   : > { %1684 = vperm.xlu0 %2564, %v335_v11   ;;  %v689_v16 = vpop.permute.xlu0 %688  ;;  %v370_v11 = vld [vmem:[%s2690_s6 + $0x6c] sm:$0x7] }
  0xc2   : > { %1689 = vperm.xlu1 %2563, %v336_v62   ;;  %v859_v30 = vsel %vm733_vm2, %v2884_v42, %v689_v16  ;;  %v378_v16 = vld [vmem:[%s2690_s6 + $0x7c] sm:$0x7] }
  0xc4   : > { %v691_v42 = vpop.permute.xlu1 %690 }
  0xc5   : > { %1694 = vperm.xlu0 %2564, %v337_v32   ;;  %v589_v43 = vpop.permute.xlu0 %588  ;;  %v863_v14 = vsel %vm733_vm2, %v2906_v52, %v691_v42  ;;  %v823_v52 = vsel %vm733_vm2, %v3041_v38, %v653_v41 }
  0xc6   : > { %1699 = vperm.xlu1 %2563, %v338_v0   ;;  %v768_v4 = vsel %vm733_vm2, %v2891_v46, %v589_v43  ;;  %v2178_v0 = vcombine.low %v3007_v60, %v378_v16 }
  0xc7   : > { %1236 = vmatmul.mubr.bf16.gmra.mrb[28].mxu0 %v756_v20  ;;  %1365 = vmatmul.mubr.bf16.gmra.mrb[20].mxu1 %v855_v22  ;;  %v2623_v22 = vld [vmem:[%s2690_s6 + $0x14] sm:$0xf]  ;;  %s2552_s6 = smul.u32 112, %s3694_s19 }
  0xc8   : > { %1243 = vmatprep.mubr.bf16.mxu0 %v811_v25  ;;  %1372 = vmatprep.mubr.bf16.mxu1 %v759_v27  ;;  %v591_v48 = vpop.permute.xlu1 %590  ;;  %v2172_v25 = vcombine.low %v2953_v19, %v370_v11 }
  0xc9   : > { %1704 = vperm.xlu0 %2564, %v339_v1   ;;  %v655_v2 = vpop.permute.xlu0 %654  ;;  %v771_v36 = vsel %vm733_vm2, %v2950_v18, %v591_v48  ;;  %v2180_v18 = vcombine.low %v380_v5, %v2623_v22  ;;  %s3388_s24 = scalar_lea.vmem %s3690_s3, %s2552_s6 }
  0xca   : > { %1709 = vperm.xlu1 %2563, %v340_v57  }
  0xcc   : > { %v657_v3 = vpop.permute.xlu1 %656 }
  0xcd   : > { %1714 = vperm.xlu0 %2564, %v341_v61   ;;  %v693_v49 = vpop.permute.xlu0 %692  ;;  %v831_v21 = vsel %vm733_vm2, %v3044_v39, %v657_v3 }
  0xce   : > { %1719 = vperm.xlu1 %2563, %v342_v7   ;;  %v867_v13 = vsel %vm733_vm2, %v2947_v17, %v693_v49  ;;  %v827_v17 = vsel %vm733_vm2, %v3055_v53, %v655_v2 }
  0xcf   : > { %1244 = vmatmul.mubr.bf16.gmra.mrb[32].mxu0 %v759_v27  ;;  %1373 = vmatmul.mubr.bf16.gmra.mrb[24].mxu1 %v859_v30  ;;  %v729_v27 = vrot.slane %v2180_v18, 1 }
  0xd0   : > { %1251 = vmatprep.mubr.bf16.mxu0 %v815_v12  ;;  %1380 = vmatprep.mubr.bf16.mxu1 %v762_v44  ;;  %v695_v35 = vpop.permute.xlu1 %694 }
  0xd1   : > { %v593_v47 = vpop.permute.xlu0 %592  ;;  %v871_v20 = vsel %vm733_vm2, %v2964_v23, %v695_v35  ;;  %v730_v32 = vsel %vm597_vm1, %v729_v27, %v2780_v55 }
  0xd4   : > { %v721_v8 = vpop.permute.xlu1 %720 }
  0xd5   : > { %v697_v46 = vpop.permute.xlu0 %696  ;;  %v890_v23 = vsel %vm733_vm2, %v2967_v24, %v721_v8 }
  0xd6   : > { %v875_v51 = vsel %vm733_vm2, %v2991_v50, %v697_v46  ;;  %v775_v50 = vsel %vm733_vm2, %v2172_v25, %v593_v47 }
  0xd7   : > { %1252 = vmatmul.mubr.bf16.gmra.mrb[36].mxu0 %v762_v44  ;;  %1381 = vmatmul.mubr.bf16.gmra.mrb[28].mxu1 %v863_v14 }
  0xd8   : > { %1259 = vmatprep.mubr.bf16.mxu0 %v819_v33  ;;  %1388 = vmatprep.mubr.bf16.mxu1 %v765_v45  ;;  %v723_v62 = vpop.permute.xlu1 %722 }
  0xd9   : > { %v699_v26 = vpop.permute.xlu0 %698  ;;  %v893_v24 = vsel %vm733_vm2, %v3003_v58, %v723_v62 }
  0xda   : > { %v879_v39 = vsel %vm733_vm2, %v3000_v56, %v699_v26 }
  0xdc   : > { %v725_v41 = vpop.permute.xlu1 %724 }
  0xdd   : > { %v701_v19 = vpop.permute.xlu0 %700  ;;  %v897_v56 = vsel %vm733_vm2, %v2178_v0, %v725_v41 }
  0xde   : > { %v883_v1 = vsel %vm733_vm2, %v3036_v29, %v701_v19 }
  0xdf   : > { %1260 = vmatmul.mubr.bf16.gmra.mrb[40].mxu0 %v765_v45  ;;  %1389 = vmatmul.mubr.bf16.gmra.mrb[32].mxu1 %v867_v13 }
  0xe0   : > { %1267 = vmatprep.mubr.bf16.mxu0 %v823_v52  ;;  %1396 = vmatprep.mubr.bf16.mxu1 %v768_v4 }
  0xe1   : > { %v703_v55 = vpop.permute.xlu0 %702 }
  0xe2   : > { %v887_v58 = vsel %vm733_vm2, %v3038_v31, %v703_v55 }
  0xe7   : > { %1268 = vmatmul.mubr.bf16.gmra.mrb[44].mxu0 %v768_v4  ;;  %1397 = vmatmul.mubr.bf16.gmra.mrb[36].mxu1 %v871_v20 }
  0xe8   : > { %1275 = vmatprep.mubr.bf16.mxu0 %v827_v17  ;;  %1404 = vmatprep.mubr.bf16.mxu1 %v771_v36 }
  0xef   : > { %1276 = vmatmul.mubr.bf16.gmra.mrb[48].mxu0 %v771_v36  ;;  %1405 = vmatmul.mubr.bf16.gmra.mrb[40].mxu1 %v875_v51 }
  0xf0   : > { %1283 = vmatprep.mubr.bf16.mxu0 %v831_v21  ;;  %1412 = vmatprep.mubr.bf16.mxu1 %v890_v23 }
  0xf7   : > { %1284 = vmatmul.mubr.bf16.gmra.mrb[52].mxu0 %v775_v50  ;;  %1413 = vmatmul.mubr.bf16.gmra.mrb[44].mxu1 %v879_v39 }
  0xf8   : > { %1420 = vmatprep.mubr.bf16.mxu1 %v893_v24  ;;  %2516 = vmatprep.mubr.msk.bf16.mxu0 %vm733_vm2, %v730_v32 }
  0xff   : > { %1421 = vmatmul.mubr.bf16.gmra.mrb[48].mxu1 %v883_v1  ;;  %2517 = vmatmul.mubr.msk.bf16.vlgmr.msra.gmra.mrb[56].mxu0 %vm733_vm2, %v2862_v28  ;;  %v731_v28 = vrot.slane %v3018_v9, 1 }
 0x100   : > { %1428 = vmatprep.mubr.bf16.mxu1 %v897_v56  ;;  %2520 = vmatprep.mubr.msk.bf16.mxu0 %vm733_vm2, %v2878_v37 }
 0x101   : > { %v732_v37 = vsel %vm597_vm1, %v3058_v54, %v731_v28 }
 0x107   : > { %1429 = vmatmul.mubr.bf16.gmra.mrb[52].mxu1 %v887_v58  ;;  %2521 = vmatmul.mubr.msk.bf16.gmra.mrb[60].mxu0 %vm733_vm2, %v2931_v63 }
 0x108   : > { %2524 = vmatprep.mubr.msk.bf16.mxu0 %vm733_vm2, %v2941_v6  ;;  %2532 = vmatprep.mubr.msk.bf16.mxu1 %vm733_vm2, %v3025_v15 }
 0x10f   : > { %2525 = vmatmul.mubr.msk.bf16.gmra.mrb[64].mxu0 %vm733_vm2, %v2981_v34  ;;  %2533 = vmatmul.mubr.msk.bf16.vlgmr.msra.gmra.mrb[56].mxu1 %vm733_vm2, %v3041_v38 }
 0x110   : > { %2528 = vmatprep.mubr.msk.bf16.mxu0 %vm733_vm2, %v2988_v40  ;;  %2536 = vmatprep.mubr.msk.bf16.mxu1 %vm733_vm2, %v3055_v53 }
 0x117   : > { %2529 = vmatmul.mubr.msk.bf16.gmra.mrb[68].mxu0 %vm733_vm2, %v3021_v10  ;;  %2537 = vmatmul.mubr.msk.bf16.gmra.mrb[60].mxu1 %vm733_vm2, %v3066_v59 }
 0x118   : > { %2540 = vmatprep.mubr.msk.bf16.mxu1 %vm733_vm2, %v732_v37 }
 0x11f   : > { %2541 = vmatmul.mubr.msk.bf16.gmra.mrb[64].mxu1 %vm733_vm2, %v731_v28 }
 0x162   : > { %v2306_v63 = vpop.f32.mrb[0].mxu0 }
 0x163   : > { %v2307_v6 = vpop.f32.mrb[1].mxu0 }
 0x164   : > { %v2308_v34 = vadd.f32 %v2307_v6, %v2306_v63  ;;  %v2309_v40 = vpop.f32.mrb[2].mxu0 }
 0x165   : > { %v2310_v60 = vpop.f32.mrb[3].mxu0 }
 0x166   : > { %v2311_v15 = vadd.f32 %v2310_v60, %v2309_v40 }
 0x16a   : > { %v2312_v9 = vpop.f32.mrb[4].mxu0 }
 0x16b   : > { %v2313_v29 = vpop.f32.mrb[5].mxu0 }
 0x16c   : > { %v2314_v31 = vadd.f32 %v2313_v29, %v2312_v9  ;;  %v2315_v38 = vpop.f32.mrb[6].mxu0 }
 0x16d   : > { %v2316_v53 = vpop.f32.mrb[7].mxu0 }
 0x16e   : > { %v2317_v54 = vadd.f32 %v2316_v53, %v2315_v38 }
 0x172   : > { %v2318_v10 = vpop.f32.mrb[8].mxu0  ;;  %v2406_v30 = vpop.f32.mrb[0].mxu1 }
 0x173   : > { %v2319_v12 = vpop.f32.mrb[9].mxu0  ;;  %v2407_v59 = vpop.f32.mrb[1].mxu1 }
 0x174   : > { %v2320_v43 = vadd.f32 %v2319_v12, %v2318_v10  ;;  %v2408_v44 = vadd.f32 %v2407_v59, %v2406_v30  ;;  %v2321_v57 = vpop.f32.mrb[10].mxu0  ;;  %v2409_v61 = vpop.f32.mrb[2].mxu1 }
 0x175   : > { %v2322_v42 = vpop.f32.mrb[11].mxu0  ;;  %v2410_v7 = vpop.f32.mrb[3].mxu1 }
 0x176   : > { %v2323_v2 = vadd.f32 %v2322_v42, %v2321_v57  ;;  %v2411_v14 = vadd.f32 %v2410_v7, %v2409_v61  ;;  %v3296_v33 = vadd.f32 %v2408_v44, %v2308_v34  ;;  %v3316_v57 = vpop.permute.xlu1 %1584 }
 0x178   : > { %v3298_v48 = vadd.f32 %v2411_v14, %v2311_v15 }
 0x17a   : > { %v2324_v45 = vpop.f32.mrb[12].mxu0  ;;  %v2412_v49 = vpop.f32.mrb[4].mxu1 }
 0x17b   : > { %v2325_v3 = vpop.f32.mrb[13].mxu0  ;;  %v2413_v13 = vpop.f32.mrb[5].mxu1 }
 0x17c   : > { %v2326_v52 = vadd.f32 %v2325_v3, %v2324_v45  ;;  %v2414_v4 = vadd.f32 %v2413_v13, %v2412_v49  ;;  %v2327_v35 = vpop.f32.mrb[14].mxu0  ;;  %v2415_v47 = vpop.f32.mrb[6].mxu1 }
 0x17d   : > { %v2328_v20 = vpop.f32.mrb[15].mxu0  ;;  %v2416_v17 = vpop.f32.mrb[7].mxu1 }
 0x17e   : > { %v2329_v36 = vadd.f32 %v2328_v20, %v2327_v35  ;;  %v2417_v46 = vadd.f32 %v2416_v17, %v2415_v47  ;;  %v3300_v8 = vadd.f32 %v2414_v4, %v2314_v31  ;;  %v3322_v17 = vpop.permute.xlu1 %1594 }
 0x180   : > { %v3302_v5 = vadd.f32 %v2417_v46, %v2317_v54 }
 0x182   : > { %v2330_v51 = vpop.f32.mrb[16].mxu0  ;;  %v2418_v21 = vpop.f32.mrb[8].mxu1 }
 0x183   : > { %v2331_v23 = vpop.f32.mrb[17].mxu0  ;;  %v2419_v11 = vpop.f32.mrb[9].mxu1 }
 0x184   : > { %v2332_v22 = vadd.f32 %v2331_v23, %v2330_v51  ;;  %v2420_v18 = vadd.f32 %v2419_v11, %v2418_v21  ;;  %v2333_v25 = vpop.f32.mrb[18].mxu0  ;;  %v2421_v26 = vpop.f32.mrb[10].mxu1 }
 0x185   : > { %v2334_v27 = vpop.f32.mrb[19].mxu0  ;;  %v2422_v62 = vpop.f32.mrb[11].mxu1 }
 0x186   : > { %v2335_v50 = vadd.f32 %v2334_v27, %v2333_v25  ;;  %v2423_v39 = vadd.f32 %v2422_v62, %v2421_v26  ;;  %v3304_v24 = vadd.f32 %v2420_v18, %v2320_v43 }
 0x188   : > { %v3306_v32 = vadd.f32 %v2423_v39, %v2323_v2 }
 0x18a   : > { %v2336_v16 = vpop.f32.mrb[20].mxu0  ;;  %v2424_v19 = vpop.f32.mrb[12].mxu1 }
 0x18b   : > { %v2337_v0 = vpop.f32.mrb[21].mxu0  ;;  %v2425_v41 = vpop.f32.mrb[13].mxu1 }
 0x18c   : > { %v2338_v1 = vadd.f32 %v2337_v0, %v2336_v16  ;;  %v2426_v56 = vadd.f32 %v2425_v41, %v2424_v19  ;;  %v2339_v55 = vpop.f32.mrb[22].mxu0  ;;  %v2427_v58 = vpop.f32.mrb[14].mxu1 }
 0x18d   : > { %v2340_v28 = vpop.f32.mrb[23].mxu0  ;;  %v2428_v37 = vpop.f32.mrb[15].mxu1 }
 0x18e   : > { %v2341_v63 = vadd.f32 %v2340_v28, %v2339_v55  ;;  %v2429_v6 = vadd.f32 %v2428_v37, %v2427_v58  ;;  %v3308_v34 = vadd.f32 %v2426_v56, %v2326_v52  ;;  %v3330_v19 = vpop.permute.xlu1 %1599 }
 0x190   : > { %v3310_v40 = vadd.f32 %v2429_v6, %v2329_v36  ;;  %v3324_v36 = vpop.permute.xlu0 %1589 }
 0x192   : > { %v2342_v60 = vpop.f32.mrb[24].mxu0  ;;  %v2430_v15 = vpop.f32.mrb[16].mxu1 }
 0x193   : > { %v2343_v9 = vpop.f32.mrb[25].mxu0  ;;  %v2431_v29 = vpop.f32.mrb[17].mxu1 }
 0x194   : > { %v2344_v31 = vadd.f32 %v2343_v9, %v2342_v60  ;;  %v2432_v38 = vadd.f32 %v2431_v29, %v2430_v15  ;;  %v2345_v53 = vpop.f32.mrb[26].mxu0  ;;  %v2433_v54 = vpop.f32.mrb[18].mxu1 }
 0x195   : > { %v2346_v10 = vpop.f32.mrb[27].mxu0  ;;  %v2434_v30 = vpop.f32.mrb[19].mxu1 }
 0x196   : > { %v2347_v12 = vadd.f32 %v2346_v10, %v2345_v53  ;;  %v2435_v59 = vadd.f32 %v2434_v30, %v2433_v54  ;;  %v3312_v43 = vadd.f32 %v2432_v38, %v2332_v22  ;;  %v3332_v0 = vpop.permute.xlu0 %1604  ;;  %v3338_v38 = vpop.permute.xlu1 %1609 }
 0x198   : > { %v3314_v44 = vadd.f32 %v2435_v59, %v2335_v50 }
 0x19a   : > { %v2348_v61 = vpop.f32.mrb[28].mxu0  ;;  %v2436_v42 = vpop.f32.mrb[20].mxu1 }
 0x19b   : > { %v2349_v7 = vpop.f32.mrb[29].mxu0  ;;  %v2437_v2 = vpop.f32.mrb[21].mxu1 }
 0x19c   : > { %v2350_v14 = vadd.f32 %v2349_v7, %v2348_v61  ;;  %v2438_v45 = vadd.f32 %v2437_v2, %v2436_v42  ;;  %v2351_v49 = vpop.f32.mrb[30].mxu0  ;;  %v2439_v3 = vpop.f32.mrb[22].mxu1 }
 0x19d   : > { %v2352_v13 = vpop.f32.mrb[31].mxu0  ;;  %v2440_v52 = vpop.f32.mrb[23].mxu1 }
 0x19e   : > { %v2353_v4 = vadd.f32 %v2352_v13, %v2351_v49  ;;  %v2441_v35 = vadd.f32 %v2440_v52, %v2439_v3  ;;  %v3318_v47 = vadd.f32 %v2438_v45, %v2338_v1  ;;  %v3340_v53 = vpop.permute.xlu0 %1614  ;;  %v3346_v52 = vpop.permute.xlu1 %1619 }
 0x1a0   : > { %v3320_v20 = vadd.f32 %v2441_v35, %v2341_v63 }
 0x1a2   : > { %v2354_v46 = vpop.f32.mrb[32].mxu0  ;;  %v2442_v51 = vpop.f32.mrb[24].mxu1 }
 0x1a3   : > { %v2355_v21 = vpop.f32.mrb[33].mxu0  ;;  %v2443_v23 = vpop.f32.mrb[25].mxu1 }
 0x1a4   : > { %v2356_v11 = vadd.f32 %v2355_v21, %v2354_v46  ;;  %v2444_v22 = vadd.f32 %v2443_v23, %v2442_v51  ;;  %v2357_v18 = vpop.f32.mrb[34].mxu0  ;;  %v2445_v25 = vpop.f32.mrb[26].mxu1 }
 0x1a5   : > { %v2358_v26 = vpop.f32.mrb[35].mxu0  ;;  %v2446_v27 = vpop.f32.mrb[27].mxu1 }
 0x1a6   : > { %v2359_v62 = vadd.f32 %v2358_v26, %v2357_v18  ;;  %v2447_v50 = vadd.f32 %v2446_v27, %v2445_v25  ;;  %v3326_v39 = vadd.f32 %v2444_v22, %v2344_v31 }
 0x1a8   : > { %v3328_v16 = vadd.f32 %v2447_v50, %v2347_v12 }
 0x1aa   : > { %v2360_v41 = vpop.f32.mrb[36].mxu0  ;;  %v2448_v1 = vpop.f32.mrb[28].mxu1 }
 0x1ab   : > { %v2361_v56 = vpop.f32.mrb[37].mxu0  ;;  %v2449_v55 = vpop.f32.mrb[29].mxu1 }
 0x1ac   : > { %v2362_v58 = vadd.f32 %v2361_v56, %v2360_v41  ;;  %v2450_v28 = vadd.f32 %v2449_v55, %v2448_v1  ;;  %v2363_v37 = vpop.f32.mrb[38].mxu0  ;;  %v2451_v63 = vpop.f32.mrb[30].mxu1 }
 0x1ad   : > { %v2364_v6 = vpop.f32.mrb[39].mxu0  ;;  %v2452_v60 = vpop.f32.mrb[31].mxu1 }
 0x1ae   : > { %v2365_v15 = vadd.f32 %v2364_v6, %v2363_v37  ;;  %v2453_v9 = vadd.f32 %v2452_v60, %v2451_v63  ;;  %v3334_v29 = vadd.f32 %v2450_v28, %v2350_v14  ;;  %v3354_v1 = vpop.permute.xlu1 %1629 }
 0x1b0   : > { %v3336_v31 = vadd.f32 %v2453_v9, %v2353_v4  ;;  %v3348_v4 = vpop.permute.xlu0 %1624 }
 0x1b2   : > { %v2366_v54 = vpop.f32.mrb[40].mxu0  ;;  %v2454_v10 = vpop.f32.mrb[32].mxu1 }
 0x1b3   : > { %v2367_v30 = vpop.f32.mrb[41].mxu0  ;;  %v2455_v12 = vpop.f32.mrb[33].mxu1 }
 0x1b4   : > { %v2368_v59 = vadd.f32 %v2367_v30, %v2366_v54  ;;  %v2456_v61 = vadd.f32 %v2455_v12, %v2454_v10  ;;  %v2369_v42 = vpop.f32.mrb[42].mxu0  ;;  %v2457_v7 = vpop.f32.mrb[34].mxu1 }
 0x1b5   : > { %v2370_v2 = vpop.f32.mrb[43].mxu0  ;;  %v2458_v45 = vpop.f32.mrb[35].mxu1 }
 0x1b6   : > { %v2371_v49 = vadd.f32 %v2370_v2, %v2369_v42  ;;  %v2459_v3 = vadd.f32 %v2458_v45, %v2457_v7  ;;  %v3342_v14 = vadd.f32 %v2456_v61, %v2356_v11  ;;  %v3356_v56 = vpop.permute.xlu0 %1634  ;;  %v3364_v42 = vpop.permute.xlu1 %1639 }
 0x1b8   : > { %v3344_v13 = vadd.f32 %v2459_v3, %v2359_v62 }
 0x1ba   : > { %v2372_v35 = vpop.f32.mrb[44].mxu0  ;;  %v2460_v46 = vpop.f32.mrb[36].mxu1 }
 0x1bb   : > { %v2373_v51 = vpop.f32.mrb[45].mxu0  ;;  %v2461_v21 = vpop.f32.mrb[37].mxu1 }
 0x1bc   : > { %v2374_v23 = vadd.f32 %v2373_v51, %v2372_v35  ;;  %v2462_v22 = vadd.f32 %v2461_v21, %v2460_v46  ;;  %v2375_v18 = vpop.f32.mrb[46].mxu0  ;;  %v2463_v25 = vpop.f32.mrb[38].mxu1 }
 0x1bd   : > { %v2376_v26 = vpop.f32.mrb[47].mxu0  ;;  %v2464_v27 = vpop.f32.mrb[39].mxu1 }
 0x1be   : > { %v2377_v50 = vadd.f32 %v2376_v26, %v2375_v18  ;;  %v2465_v41 = vadd.f32 %v2464_v27, %v2463_v25  ;;  %v3350_v11 = vadd.f32 %v2462_v22, %v2362_v58  ;;  %v3366_v7 = vpop.permute.xlu0 %1644 }
 0x1c0   : > { %v3352_v62 = vadd.f32 %v2465_v41, %v2365_v15  ;;  %v3376_v41 = vpop.permute.xlu1 %1649 }
 0x1c2   : > { %v2378_v55 = vpop.f32.mrb[48].mxu0  ;;  %v2466_v28 = vpop.f32.mrb[40].mxu1 }
 0x1c3   : > { %v2379_v37 = vpop.f32.mrb[49].mxu0  ;;  %v2467_v63 = vpop.f32.mrb[41].mxu1 }
 0x1c4   : > { %v2380_v6 = vadd.f32 %v2379_v37, %v2378_v55  ;;  %v2468_v60 = vadd.f32 %v2467_v63, %v2466_v28  ;;  %v2381_v9 = vpop.f32.mrb[50].mxu0  ;;  %v2469_v54 = vpop.f32.mrb[42].mxu1 }
 0x1c5   : > { %v2382_v10 = vpop.f32.mrb[51].mxu0  ;;  %v2470_v30 = vpop.f32.mrb[43].mxu1 }
 0x1c6   : > { %v3358_v12 = vadd.f32 %v2382_v10, %v2381_v9  ;;  %v2471_v58 = vadd.f32 %v2470_v30, %v2469_v54  ;;  %v3360_v61 = vadd.f32 %v2468_v60, %v2368_v59  ;;  %v3378_v55 = vpop.permute.xlu0 %1654 }
 0x1c8   : > { %v3362_v15 = vadd.f32 %v2471_v58, %v2371_v49 }
 0x1ca   : > { %v2384_v2 = vpop.f32.mrb[52].mxu0  ;;  %v2472_v45 = vpop.f32.mrb[44].mxu1 }
 0x1cb   : > { %v2385_v3 = vpop.f32.mrb[53].mxu0  ;;  %v2473_v35 = vpop.f32.mrb[45].mxu1 }
 0x1cc   : > { %v3368_v46 = vadd.f32 %v2385_v3, %v2384_v2  ;;  %v2474_v51 = vadd.f32 %v2473_v35, %v2472_v45  ;;  %v2387_v21 = vpop.f32.mrb[54].mxu0  ;;  %v2475_v22 = vpop.f32.mrb[46].mxu1 }
 0x1cd   : > { %v2388_v18 = vpop.f32.mrb[55].mxu0  ;;  %v2476_v25 = vpop.f32.mrb[47].mxu1 }
 0x1ce   : > { %v3370_v59 = vadd.f32 %v2388_v18, %v2387_v21  ;;  %v2477_v49 = vadd.f32 %v2476_v25, %v2475_v22  ;;  %v3372_v26 = vadd.f32 %v2474_v51, %v2374_v23  ;;  %v3396_v25 = vpop.permute.xlu1 %1659 }
 0x1d0   : > { %v3374_v27 = vadd.f32 %v2477_v49, %v2377_v50  ;;  %v3398_v49 = vpop.permute.xlu0 %1664 }
 0x1d2   : > { %v2478_v28 = vpop.f32.mrb[48].mxu1  ;;  %v2518_v37 = vpop.f32.mrb[56].mxu0 }
 0x1d3   : > { %v1480_v63 = vadd.f32 %v2518_v37, %v3300_v8  ;;  %v2479_v60 = vpop.f32.mrb[49].mxu1  ;;  %v1471_v9 = vpop.f32.mrb[57].mxu0 }
 0x1d4   : > { %v2480_v54 = vadd.f32 %v2479_v60, %v2478_v28  ;;  %v1472_v10 = vadd.f32 %v1471_v9, %v3296_v33  ;;  %v2481_v30 = vpop.f32.mrb[50].mxu1  ;;  %v2519_v58 = vpop.f32.mrb[58].mxu0 }
 0x1d5   : > { %v1724_v23 = vmul.f32 %v3322_v17, %v1480_v63  ;;  %v1483_v50 = vadd.f32 %v2519_v58, %v3302_v5  ;;  %v2482_v2 = vpop.f32.mrb[51].mxu1  ;;  %v1474_v45 = vpop.f32.mrb[59].mxu0 }
 0x1d6   : > { %v1722_v8 = vmul.f32 %v3316_v57, %v1472_v10  ;;  %v2483_v3 = vadd.f32 %v2482_v2, %v2481_v30  ;;  %v1475_v33 = vadd.f32 %v1474_v45, %v3298_v48  ;;  %v3392_v35 = vadd.f32 %v2480_v54, %v2380_v6 }
 0x1d7   : > { %v2264_v17 = vpack.c.bf16 %v1724_v23, %v1724_v23  ;;  %v1956_v51 = vmul.f32 %v1724_v23, %v1480_v63  ;;  %v1725_v5 = vmul.f32 %v3330_v19, %v1483_v50  ;;  %v1895_v57 = vsel %vm733_vm2, %v1724_v23, 0.0 }
 0x1d8   : > { %v2262_v21 = vpack.c.bf16 %v1722_v8, %v1722_v8  ;;  %v1954_v22 = vmul.f32 %v1722_v8, %v1472_v10  ;;  %v1723_v18 = vmul.f32 %v3324_v36, %v1475_v33  ;;  %v1892_v48 = vsel %vm733_vm2, %v1722_v8, 0.0 }
 0x1d9   : > { %1865 = vst.msk [vmem:[%s3388_s24 + $0x8] sm:$0xf] %vm1862_vm3, %v2264_v17  ;;  %v2265_v6 = vpack.c.bf16 %v1725_v5, %v1725_v5  ;;  %v1985_v28 = vsel %vm733_vm2, %v1956_v51, 0.0  ;;  %v1957_v9 = vmul.f32 %v1725_v5, %v1483_v50  ;;  %v3412_v23 = vadd.f32 %v2483_v3, %v3358_v12 }
 0x1da   : > { %1863 = vst.msk [vmem:[%s3388_s24] sm:$0xf] %vm1862_vm3, %v2262_v21  ;;  %v2263_v19 = vpack.c.bf16 %v1723_v18, %v1723_v18  ;;  %v1893_v37 = vsel %vm733_vm2, %v1723_v18, 0.0  ;;  %v1955_v36 = vmul.f32 %v1723_v18, %v1475_v33  ;;  %v2484_v63 = vpop.f32.mrb[52].mxu1  ;;  %v2522_v60 = vpop.f32.mrb[60].mxu0  ;;  %v1982_v2 = vsel %vm733_vm2, %v1954_v22, 0.0 }
 0x1db   : > { %1866 = vst.msk [vmem:[%s3388_s24 + $0xc] sm:$0xf] %vm1862_vm3, %v2265_v6  ;;  %v1894_v54 = vadd.f32 %v1893_v37, %v1892_v48  ;;  %v1496_v10 = vadd.f32 %v2522_v60, %v3308_v34  ;;  %v2485_v30 = vpop.f32.mrb[53].mxu1  ;;  %v1487_v58 = vpop.f32.mrb[61].mxu0 }
 0x1dc   : > { %1864 = vst.msk [vmem:[%s3388_s24 + $0x4] sm:$0xf] %vm1862_vm3, %v2263_v19  ;;  %v1983_v45 = vsel %vm733_vm2, %v1955_v36, 0.0  ;;  %v2486_v8 = vadd.f32 %v2485_v30, %v2484_v63  ;;  %v1488_v33 = vadd.f32 %v1487_v58, %v3304_v24  ;;  %v2487_v17 = vpop.f32.mrb[54].mxu1  ;;  %v2523_v51 = vpop.f32.mrb[62].mxu0  ;;  %v1897_v24 = vsel %vm733_vm2, %v1725_v5, 0.0 }
 0x1dd   : > { %v1896_v50 = vadd.f32 %v1895_v57, %v1894_v54  ;;  %v1984_v21 = vadd.f32 %v1983_v45, %v1982_v2  ;;  %v1728_v34 = vmul.f32 %v3340_v53, %v1496_v10  ;;  %v1499_v18 = vadd.f32 %v2523_v51, %v3310_v40  ;;  %v2488_v48 = vpop.f32.mrb[55].mxu1  ;;  %v1490_v12 = vpop.f32.mrb[63].mxu0 }
 0x1de   : > { %v1726_v3 = vmul.f32 %v3332_v0, %v1488_v33  ;;  %v2489_v22 = vadd.f32 %v2488_v48, %v2487_v17  ;;  %v1491_v6 = vadd.f32 %v1490_v12, %v3306_v32  ;;  %v3424_v19 = vadd.f32 %v2486_v8, %v3368_v46  ;;  %v3429_v54 = vpop.permute.xlu1 %1669  ;;  %v1675_v0 = vpop.permute.xlu0 %1674 }
 0x1df   : > { %v1987_v57 = vsel %vm733_vm2, %v1957_v9, 0.0  ;;  %v1986_v37 = vadd.f32 %v1985_v28, %v1984_v21  ;;  %v2268_v53 = vpack.c.bf16 %v1728_v34, %v1728_v34  ;;  %v1898_v40 = vadd.f32 %v1897_v24, %v1896_v50 }
 0x1e0   : > { %v2266_v36 = vpack.c.bf16 %v1726_v3, %v1726_v3  ;;  %v1899_v63 = vsel %vm733_vm2, %v1726_v3, 0.0  ;;  %v1958_v60 = vmul.f32 %v1726_v3, %v1488_v33  ;;  %v1729_v46 = vmul.f32 %v3346_v52, %v1499_v18 }
 0x1e1   : > { %1869 = vst.msk [vmem:[%s3388_s24 + $0x18] sm:$0xf] %vm1862_vm3, %v2268_v53  ;;  %v1988_v32 = vadd.f32 %v1987_v57, %v1986_v37  ;;  %v1727_v30 = vmul.f32 %v3338_v38, %v1491_v6  ;;  %v1900_v5 = vadd.f32 %v1899_v63, %v1898_v40  ;;  %v3439_v2 = vadd.f32 %v2489_v22, %v3370_v59 }
 0x1e2   : > { %1867 = vst.msk [vmem:[%s3388_s24 + $0x10] sm:$0xf] %vm1862_vm3, %v2266_v36  ;;  %v1989_v28 = vsel %vm733_vm2, %v1958_v60, 0.0  ;;  %v2526_v9 = vpop.f32.mrb[64].mxu0  ;;  %v2534_v58 = vpop.f32.mrb[56].mxu1  ;;  %v1903_v45 = vsel %vm733_vm2, %v1728_v34, 0.0  ;;  %v1960_v8 = vmul.f32 %v1728_v34, %v1496_v10  ;;  %v2269_v17 = vpack.c.bf16 %v1729_v46, %v1729_v46 }
 0x1e3   : > { %v1990_v33 = vadd.f32 %v1989_v28, %v1988_v32  ;;  %v1503_v52 = vpop.f32.mrb[65].mxu0  ;;  %v1535_v51 = vpop.f32.mrb[57].mxu1  ;;  %v2267_v38 = vpack.c.bf16 %v1727_v30, %v1727_v30  ;;  %v1901_v50 = vsel %vm733_vm2, %v1727_v30, 0.0  ;;  %v1959_v21 = vmul.f32 %v1727_v30, %v1491_v6 }
 0x1e4   : > { %v3444_v48 = vadd.f32 %v2526_v9, %v3318_v47  ;;  %v2527_v12 = vpop.f32.mrb[66].mxu0  ;;  %v2535_v3 = vpop.f32.mrb[58].mxu1  ;;  %1870 = vst.msk [vmem:[%s3388_s24 + $0x1c] sm:$0xf] %vm1862_vm3, %v2269_v17  ;;  %v1961_v59 = vmul.f32 %v1729_v46, %v1499_v18  ;;  %v1902_v22 = vadd.f32 %v1901_v50, %v1900_v5  ;;  %v3449_v10 = vadd.f32 %v2534_v58, %v3350_v11 }
 0x1e5   : > { %v1504_v34 = vadd.f32 %v1503_v52, %v3312_v43  ;;  %v1506_v24 = vpop.f32.mrb[67].mxu0  ;;  %v1538_v57 = vpop.f32.mrb[59].mxu1  ;;  %1868 = vst.msk [vmem:[%s3388_s24 + $0x14] sm:$0xf] %vm1862_vm3, %v2267_v38  ;;  %v1991_v6 = vsel %vm733_vm2, %v1959_v21, 0.0  ;;  %v3458_v37 = vadd.f32 %v1535_v51, %v3342_v14  ;;  %v1515_v18 = vadd.f32 %v2527_v12, %v3320_v20 }
 0x1e6   : > { %v1732_v47 = vmul.f32 %v3356_v56, %v3444_v48  ;;  %v1904_v53 = vadd.f32 %v1903_v45, %v1902_v22  ;;  %v1992_v11 = vadd.f32 %v1991_v6, %v1990_v33  ;;  %v3462_v36 = vmul.f32 %v1675_v0, %v3449_v10  ;;  %v1680_v60 = vpop.permute.xlu1 %1679  ;;  %v1685_v14 = vpop.permute.xlu0 %1684 }
 0x1e7   : > { %v1730_v43 = vmul.f32 %v3348_v4, %v1504_v34  ;;  %v1993_v40 = vsel %vm733_vm2, %v1960_v8, 0.0  ;;  %v3468_v56 = vmul.f32 %v3398_v49, %v3458_v37  ;;  %v1905_v32 = vsel %vm733_vm2, %v1729_v46, 0.0 }
 0x1e8   : > { %v2272_v63 = vpack.c.bf16 %v1732_v47, %v1732_v47  ;;  %v1994_v20 = vadd.f32 %v1993_v40, %v1992_v11  ;;  %v2280_v0 = vpack.c.bf16 %v3462_v36, %v3462_v36  ;;  %v1995_v30 = vsel %vm733_vm2, %v1961_v59, 0.0 }
 0x1e9   : > { %v2270_v4 = vpack.c.bf16 %v1730_v43, %v1730_v43  ;;  %v1906_v5 = vadd.f32 %v1905_v32, %v1904_v53  ;;  %v1907_v28 = vsel %vm733_vm2, %v1730_v43, 0.0  ;;  %v1962_v58 = vmul.f32 %v1730_v43, %v1504_v34 }
 0x1ea   : > { %1873 = vst.msk [vmem:[%s3388_s24 + $0x28] sm:$0xf] %vm1862_vm3, %v2272_v63  ;;  %v2530_v49 = vpop.f32.mrb[68].mxu0  ;;  %v2538_v9 = vpop.f32.mrb[60].mxu1  ;;  %1881 = vst.msk [vmem:[%s3388_s24 + $0x48] sm:$0xf] %vm1862_vm3, %v2280_v0  ;;  %v1996_v46 = vadd.f32 %v1995_v30, %v1994_v20  ;;  %v2278_v45 = vpack.c.bf16 %v3468_v56, %v3468_v56  ;;  %v1733_v52 = vmul.f32 %v3364_v42, %v1515_v18 }
 0x1eb   : > { %v1519_v8 = vpop.f32.mrb[69].mxu0  ;;  %v1551_v33 = vpop.f32.mrb[61].mxu1  ;;  %1871 = vst.msk [vmem:[%s3388_s24 + $0x20] sm:$0xf] %vm1862_vm3, %v2270_v4  ;;  %v1908_v17 = vadd.f32 %v1907_v28, %v1906_v5  ;;  %v1997_v50 = vsel %vm733_vm2, %v1962_v58, 0.0  ;;  %v3492_v21 = vadd.f32 %v2535_v3, %v3352_v62  ;;  %v1507_v12 = vadd.f32 %v1506_v24, %v3314_v44 }
 0x1ec   : > { %v3484_v51 = vpop.f32.mrb[70].mxu0  ;;  %v3486_v38 = vpop.f32.mrb[62].mxu1  ;;  %1879 = vst.msk [vmem:[%s3388_s24 + $0x40] sm:$0xf] %vm1862_vm3, %v2278_v45  ;;  %v3496_v59 = vadd.f32 %v1538_v57, %v3344_v13  ;;  %v1998_v6 = vadd.f32 %v1997_v50, %v1996_v46  ;;  %v2273_v42 = vpack.c.bf16 %v1733_v52, %v1733_v52  ;;  %v3509_v44 = vadd.f32 %v2530_v49, %v3334_v29 }
 0x1ed   : > { %v1522_v22 = vpop.f32.mrb[71].mxu0  ;;  %v1554_v34 = vpop.f32.mrb[63].mxu1  ;;  %v3499_v53 = vmul.f32 %v1680_v60, %v3492_v21  ;;  %v1731_v11 = vmul.f32 %v3354_v1, %v1507_v12  ;;  %v3512_v13 = vadd.f32 %v2538_v9, %v3372_v26  ;;  %v1520_v62 = vadd.f32 %v1519_v8, %v3326_v39 }
 0x1ee   : > { %v3504_v43 = vmul.f32 %v3429_v54, %v3496_v59  ;;  %1874 = vst.msk [vmem:[%s3388_s24 + $0x2c] sm:$0xf] %vm1862_vm3, %v2273_v42  ;;  %v3516_v3 = vadd.f32 %v1551_v33, %v3360_v61  ;;  %v1690_v1 = vpop.permute.xlu1 %1689  ;;  %v1695_v24 = vpop.permute.xlu0 %1694  ;;  %v1964_v54 = vmul.f32 %v1732_v47, %v3444_v48  ;;  %v1911_v60 = vsel %vm733_vm2, %v1732_v47, 0.0 }
 0x1ef   : > { %v2281_v57 = vpack.c.bf16 %v3499_v53, %v3499_v53  ;;  %v2271_v40 = vpack.c.bf16 %v1731_v11, %v1731_v11  ;;  %v1909_v29 = vsel %vm733_vm2, %v1731_v11, 0.0  ;;  %v1963_v63 = vmul.f32 %v1731_v11, %v1507_v12 }
 0x1f0   : > { %v2279_v26 = vpack.c.bf16 %v3504_v43, %v3504_v43  ;;  %v1965_v61 = vmul.f32 %v1733_v52, %v1515_v18  ;;  %v1910_v32 = vadd.f32 %v1909_v29, %v1908_v17  ;;  %v1736_v0 = vmul.f32 %v3378_v55, %v3509_v44 }
 0x1f1   : > { %1882 = vst.msk [vmem:[%s3388_s24 + $0x4c] sm:$0xf] %vm1862_vm3, %v2281_v57  ;;  %1872 = vst.msk [vmem:[%s3388_s24 + $0x24] sm:$0xf] %vm1862_vm3, %v2271_v40  ;;  %v1999_v48 = vsel %vm733_vm2, %v1963_v63, 0.0  ;;  %v3535_v30 = vmul.f32 %v1695_v24, %v3512_v13  ;;  %v1734_v47 = vmul.f32 %v3366_v7, %v1520_v62  ;;  %v3539_v28 = vmul.f32 %v1685_v14, %v3516_v3 }
 0x1f2   : > { %v2542_v39 = vpop.f32.mrb[64].mxu1  ;;  %1880 = vst.msk [vmem:[%s3388_s24 + $0x44] sm:$0xf] %vm1862_vm3, %v2279_v26  ;;  %v1912_v4 = vadd.f32 %v1911_v60, %v1910_v32  ;;  %v2000_v5 = vadd.f32 %v1999_v48, %v1998_v6  ;;  %v2001_v9 = vsel %vm733_vm2, %v1964_v54, 0.0  ;;  %v2276_v58 = vpack.c.bf16 %v1736_v0, %v1736_v0  ;;  %v1700_v46 = vpop.permute.xlu1 %1699 }
 0x1f3   : > { %v1567_v20 = vpop.f32.mrb[65].mxu1  ;;  %v2284_v55 = vpack.c.bf16 %v3535_v30, %v3535_v30  ;;  %v1705_v45 = vpop.permute.xlu0 %1704  ;;  %v1913_v8 = vsel %vm733_vm2, %v1733_v52, 0.0  ;;  %v2274_v33 = vpack.c.bf16 %v1734_v47, %v1734_v47  ;;  %v2003_v17 = vsel %vm733_vm2, %v1965_v61, 0.0 }
 0x1f4   : > { %v2543_v18 = vpop.f32.mrb[66].mxu1  ;;  %v2002_v7 = vadd.f32 %v2001_v9, %v2000_v5  ;;  %1877 = vst.msk [vmem:[%s3388_s24 + $0x38] sm:$0xf] %vm1862_vm3, %v2276_v58  ;;  %v1914_v14 = vadd.f32 %v1913_v8, %v1912_v4  ;;  %v1915_v50 = vsel %vm733_vm2, %v1734_v47, 0.0  ;;  %v1966_v12 = vmul.f32 %v1734_v47, %v1520_v62 }
 0x1f5   : > { %v1570_v49 = vpop.f32.mrb[67].mxu1  ;;  %1885 = vst.msk [vmem:[%s3388_s24 + $0x58] sm:$0xf] %vm1862_vm3, %v2284_v55  ;;  %1875 = vst.msk [vmem:[%s3388_s24 + $0x30] sm:$0xf] %vm1862_vm3, %v2274_v33  ;;  %v2282_v42 = vpack.c.bf16 %v3539_v28, %v3539_v28  ;;  %v1531_v24 = vadd.f32 %v3484_v51, %v3336_v31  ;;  %v3562_v57 = vadd.f32 %v3486_v38, %v3374_v27  ;;  %v1919_v60 = vsel %vm733_vm2, %v1736_v0, 0.0 }
 0x1f6   : > { %v2004_v6 = vadd.f32 %v2003_v17, %v2002_v7  ;;  %v1916_v52 = vadd.f32 %v1915_v50, %v1914_v14  ;;  %v2005_v11 = vsel %vm733_vm2, %v1966_v12, 0.0  ;;  %v1523_v62 = vadd.f32 %v1522_v22, %v3328_v16  ;;  %v1710_v51 = vpop.permute.xlu1 %1709 }
 0x1f7   : > { %1883 = vst.msk [vmem:[%s3388_s24 + $0x50] sm:$0xf] %vm1862_vm3, %v2282_v42  ;;  %v3566_v40 = vadd.f32 %v1554_v34, %v3362_v15  ;;  %v1737_v29 = vmul.f32 %v3396_v25, %v1531_v24  ;;  %v3570_v63 = vadd.f32 %v2542_v39, %v3424_v19  ;;  %v3573_v31 = vadd.f32 %v1567_v20, %v3392_v35  ;;  %v1715_v26 = vpop.permute.xlu0 %1714 }
 0x1f8   : > { %v2006_v54 = vadd.f32 %v2005_v11, %v2004_v6  ;;  %v3576_v27 = vmul.f32 %v1700_v46, %v3562_v57  ;;  %v1735_v16 = vmul.f32 %v3376_v41, %v1523_v62  ;;  %v3583_v25 = vadd.f32 %v2543_v18, %v3439_v2 }
 0x1f9   : > { %v3580_v15 = vmul.f32 %v1690_v1, %v3566_v40  ;;  %v2277_v19 = vpack.c.bf16 %v1737_v29, %v1737_v29  ;;  %v3586_v35 = vmul.f32 %v1715_v26, %v3570_v63  ;;  %v1968_v34 = vmul.f32 %v1736_v0, %v3509_v44 }
 0x1fa   : > { %v2285_v38 = vpack.c.bf16 %v3576_v27, %v3576_v27  ;;  %v2275_v22 = vpack.c.bf16 %v1735_v16, %v1735_v16  ;;  %v1917_v41 = vsel %vm733_vm2, %v1735_v16, 0.0  ;;  %v1967_v1 = vmul.f32 %v1735_v16, %v1523_v62  ;;  %v1720_v20 = vpop.permute.xlu1 %1719 }
 0x1fb   : > { %1878 = vst.msk [vmem:[%s3388_s24 + $0x3c] sm:$0xf] %vm1862_vm3, %v2277_v19  ;;  %v2283_v2 = vpack.c.bf16 %v3580_v15, %v3580_v15  ;;  %v1918_v39 = vadd.f32 %v1917_v41, %v1916_v52  ;;  %v1969_v61 = vmul.f32 %v1737_v29, %v1531_v24  ;;  %v2288_v44 = vpack.c.bf16 %v3586_v35, %v3586_v35 }
 0x1fc   : > { %1886 = vst.msk [vmem:[%s3388_s24 + $0x5c] sm:$0xf] %vm1862_vm3, %v2285_v38  ;;  %1876 = vst.msk [vmem:[%s3388_s24 + $0x34] sm:$0xf] %vm1862_vm3, %v2275_v22  ;;  %v2007_v32 = vsel %vm733_vm2, %v1967_v1, 0.0  ;;  %v1970_v48 = vmul.f32 %v3468_v56, %v3458_v37  ;;  %v1746_v4 = vmul.f32 %v1705_v45, %v3573_v31  ;;  %v2009_v5 = vsel %vm733_vm2, %v1968_v34, 0.0 }
 0x1fd   : > { %1884 = vst.msk [vmem:[%s3388_s24 + $0x54] sm:$0xf] %vm1862_vm3, %v2283_v2  ;;  %v1920_v47 = vadd.f32 %v1919_v60, %v1918_v39  ;;  %v2008_v18 = vadd.f32 %v2007_v32, %v2006_v54  ;;  %v1921_v0 = vsel %vm733_vm2, %v1737_v29, 0.0  ;;  %1889 = vst.msk [vmem:[%s3388_s24 + $0x68] sm:$0xf] %vm1862_vm3, %v2288_v44  ;;  %v3614_v9 = vmul.f32 %v1720_v20, %v3583_v25 }
 0x1fe   : > { %v1571_v58 = vadd.f32 %v1570_v49, %v3412_v23  ;;  %v2286_v37 = vpack.c.bf16 %v1746_v4, %v1746_v4  ;;  %v1923_v45 = vsel %vm733_vm2, %v3468_v56, 0.0  ;;  %v1971_v8 = vmul.f32 %v3504_v43, %v3496_v59 }
 0x1ff   : > { %v1922_v55 = vadd.f32 %v1921_v0, %v1920_v47  ;;  %v2010_v46 = vadd.f32 %v2009_v5, %v2008_v18  ;;  %v2011_v7 = vsel %vm733_vm2, %v1969_v61, 0.0  ;;  %v2289_v33 = vpack.c.bf16 %v3614_v9, %v3614_v9 }
 0x200   : > { %1887 = vst.msk [vmem:[%s3388_s24 + $0x60] sm:$0xf] %vm1862_vm3, %v2286_v37  ;;  %v1747_v23 = vmul.f32 %v1710_v51, %v1571_v58  ;;  %v1972_v49 = vmul.f32 %v3462_v36, %v3449_v10  ;;  %v2013_v50 = vsel %vm733_vm2, %v1970_v48, 0.0  ;;  %v1925_v56 = vsel %vm733_vm2, %v3504_v43, 0.0 }
 0x201   : > { %v1924_v17 = vadd.f32 %v1923_v45, %v1922_v55  ;;  %v2012_v14 = vadd.f32 %v2011_v7, %v2010_v46  ;;  %1891 = vst.msk [vmem:[%s3388_s24 + $0x6c] sm:$0x7] %vm1890_vm4, %v2289_v33  ;;  %v1927_v42 = vsel %vm733_vm2, %v3462_v36, 0.0  ;;  %v1973_v52 = vmul.f32 %v3499_v53, %v3492_v21 }
 0x202   : > { %v2287_v6 = vpack.c.bf16 %v1747_v23, %v1747_v23  ;;  %v2015_v11 = vsel %vm733_vm2, %v1971_v8, 0.0  ;;  %v2017_v10 = vsel %vm733_vm2, %v1972_v49, 0.0  ;;  %v1929_v43 = vsel %vm733_vm2, %v3499_v53, 0.0 }
 0x203   : > { %v2014_v59 = vadd.f32 %v2013_v50, %v2012_v14  ;;  %v1926_v12 = vadd.f32 %v1925_v56, %v1924_v17  ;;  %v1974_v62 = vmul.f32 %v3539_v28, %v3516_v3  ;;  %v2019_v36 = vsel %vm733_vm2, %v1973_v52, 0.0 }
 0x204   : > { %1888 = vst.msk [vmem:[%s3388_s24 + $0x64] sm:$0xf] %vm1862_vm3, %v2287_v6  ;;  %v1931_v21 = vsel %vm733_vm2, %v3539_v28, 0.0  ;;  %v1975_v26 = vmul.f32 %v3580_v15, %v3566_v40  ;;  %v1976_v38 = vmul.f32 %v3535_v30, %v3512_v13  ;;  %v1933_v3 = vsel %vm733_vm2, %v3580_v15, 0.0 }
 0x205   : > { %v1928_v24 = vadd.f32 %v1927_v42, %v1926_v12  ;;  %v2016_v54 = vadd.f32 %v2015_v11, %v2014_v59  ;;  %v2021_v53 = vsel %vm733_vm2, %v1974_v62, 0.0  ;;  %v1935_v41 = vsel %vm733_vm2, %v3535_v30, 0.0 }
 0x206   : > { %v1977_v28 = vmul.f32 %v3576_v27, %v3562_v57  ;;  %v2023_v40 = vsel %vm733_vm2, %v1975_v26, 0.0  ;;  %v2025_v39 = vsel %vm733_vm2, %v1976_v38, 0.0  ;;  %v1937_v13 = vsel %vm733_vm2, %v3576_v27, 0.0 }
 0x207   : > { %v1930_v29 = vadd.f32 %v1929_v43, %v1928_v24  ;;  %v2018_v51 = vadd.f32 %v2017_v10, %v2016_v54  ;;  %v1978_v60 = vmul.f32 %v1746_v4, %v3573_v31  ;;  %v1939_v30 = vsel %vm733_vm2, %v1746_v4, 0.0 }
 0x208   : > { %v2027_v32 = vsel %vm733_vm2, %v1977_v28, 0.0  ;;  %v1979_v44 = vmul.f32 %v1747_v23, %v1571_v58  ;;  %v1980_v48 = vmul.f32 %v3586_v35, %v3570_v63  ;;  %v1941_v18 = vsel %vm733_vm2, %v1747_v23, 0.0 }
 0x209   : > { %v1932_v16 = vadd.f32 %v1931_v21, %v1930_v29  ;;  %v2020_v19 = vadd.f32 %v2019_v36, %v2018_v51  ;;  %v2029_v47 = vsel %vm733_vm2, %v1978_v60, 0.0  ;;  %v1943_v31 = vsel %vm733_vm2, %v3586_v35, 0.0 }
 0x20a   : > { %v1981_v0 = vmul.f32 %v3614_v9, %v3583_v25  ;;  %v2031_v4 = vsel %vm733_vm2, %v1979_v44, 0.0  ;;  %v2033_v63 = vsel %vm733_vm2, %v1980_v48, 0.0  ;;  %v1946_v46 = vsel %vm1945_vm5, %v3614_v9, 0.0 }
 0x20b   : > { %v1934_v22 = vadd.f32 %v1933_v3, %v1932_v16  ;;  %v2022_v34 = vadd.f32 %v2021_v53, %v2020_v19 }
 0x20c   : > { %v2035_v8 = vsel %vm1945_vm5, %v1981_v0, 0.0 }
 0x20d   : > { %v1936_v1 = vadd.f32 %v1935_v41, %v1934_v22  ;;  %v2024_v2 = vadd.f32 %v2023_v40, %v2022_v34 }
 0x20f   : > { %v2026_v15 = vadd.f32 %v2025_v39, %v2024_v2  ;;  %v1938_v61 = vadd.f32 %v1937_v13, %v1936_v1 }
 0x211   : > { %v1940_v20 = vadd.f32 %v1939_v30, %v1938_v61  ;;  %v2028_v57 = vadd.f32 %v2027_v32, %v2026_v15 }
 0x213   : > { %v2030_v5 = vadd.f32 %v2029_v47, %v2028_v57  ;;  %v1942_v27 = vadd.f32 %v1941_v18, %v1940_v20 }
 0x215   : > { %v1944_v58 = vadd.f32 %v1943_v31, %v1942_v27  ;;  %v2032_v55 = vadd.f32 %v2031_v4, %v2030_v5 }
 0x217   : > { %v1947_v37 = vadd.f32 %v1946_v46, %v1944_v58  ;;  %v2034_v45 = vadd.f32 %v2033_v63, %v2032_v55 }
 0x219   : > { %v1948_v7 = vrot.slane %v1947_v37, 4  ;;  %v2036_v33 = vadd.f32 %v2035_v8, %v2034_v45 }
 0x21b   : > { %v1949_v17 = vadd.f32 %v1948_v7, %v1947_v37  ;;  %v2037_v35 = vrot.slane %v2036_v33, 4 }
 0x21d   : > { %v1950_v14 = vrot.slane %v1949_v17, 2  ;;  %v2038_v23 = vadd.f32 %v2037_v35, %v2036_v33 }
 0x21f   : > { %v1951_v25 = vadd.f32 %v1950_v14, %v1949_v17  ;;  %v2039_v49 = vrot.slane %v2038_v23, 2 }
 0x221   : > { %v1952_v50 = vrot.slane %v1951_v25, 1  ;;  %v2040_v56 = vadd.f32 %v2039_v49, %v2038_v23 }
 0x223   : > { %v1953_v9 = vadd.f32 %v1952_v50, %v1951_v25  ;;  %v2041_v59 = vrot.slane %v2040_v56, 1 }
 0x225   : > { %v2042_v12 = vadd.f32 %v2041_v59, %v2040_v56  ;;  %2044 = vst.msk [vmem:[%s238_s26] sm:$0x1] %vm2043_vm6, %v1953_v9 }
 0x227   : > { %2045 = vst.msk [vmem:[%s241_s29] sm:$0x1] %vm2043_vm6, %v2042_v12 }
 0x228 PF: > { %s16_s18 = sadd.s32 1, %s2630_s18  }
 0x229   : > { %p13_p4 = scmp.ge.s32.totalorder %s16_s18, 4  }
 0x22b   :  { %15 = sbr.rel (!%p13_p4) target bundleno = 1 (0x1), region = 86 }

// kernel: _lambda_.12
= control target key start
LH: loop header
LB: loop body
LE: loop exit
PB: predicated region body
PF: predicated region fallthrough
CT: control target
= control target key end

     0   :  { %s1606_s18 = smov 0   ;;  %s2027_s0 = inlined_call_operand.vmem [shape: bf16[2,81,64], index: 0, kind: input, shape index: {}]   ;;  %s2028_s1 = inlined_call_operand.vmem [shape: bf16[576,64], index: 1, kind: input, shape index: {}]   ;;  %s2029_s2 = inlined_call_operand.vmem [shape: f32[61,1], index: 2, kind: input, shape index: {}]   ;;  %s2030_s3 = inlined_call_operand.vmem [shape: bf16[2,61,64], index: 3, kind: output, shape index: {0}]   ;;  %s2031_s4 = inlined_call_operand.vmem [shape: f32[2,1,64], index: 4, kind: output, shape index: {1}]   ;;  %s2032_s5 = inlined_call_operand.vmem [shape: f32[2,1,64], index: 5, kind: output, shape index: {2}]  }
   0x1 LB: > { %s1306_s19 = sadd.s32 4294967295, %s1572_s18   ;;  %p1310_p0 = scmp.ge.s32.totalorder %s1572_s18, 1  ;;  %s1572_s18 = sphi %s1606_s18, %s16_s18  }
   0x2   : > { %p192_p1 = scmp.lt.s32.totalorder %s1572_s18, 3 }
   0x4   : > { %p193_p2 = pnand %p1310_p0, %p192_p1 }
   0x5   : > { %p226_p3 = scmp.lt.s32.totalorder (!%p193_p2), %s1306_s19, 1  ;;  %v1527_v0 = vld [vmem:[%s2028_s1 + $0x40] sm:$0xff] (!%p193_p2)   ;;  %v1529_v2 = vld [vmem:[%s2028_s1 + $0x48] sm:$0xff] (!%p193_p2)   ;;  %vm360_vm0 = vsmask.f32 (!%p193_p2), 7424  ;;  %v1533_v27 = vld [vmem:[%s2028_s1 + $0x50] sm:$0xff] (!%p193_p2)  }
   0x6   : > { %196 = sbr.rel (%p193_p2) target bundleno = 430 (0x1ae), region = 32  ;;  %v1528_v1 = vld [vmem:[%s2028_s1] sm:$0xff] (!%p193_p2)   ;;  %1389 = vmatprep.subr.bf16.mxu0 (!%p193_p2), %v1527_v0  ;;  %v1530_v3 = vld [vmem:[%s2028_s1 + $0x8] sm:$0xff] (!%p193_p2)   ;;  %vm472_vm1 = vsmask.f32 (!%p193_p2), 6400  ;;  %v1534_v32 = vld [vmem:[%s2028_s1 + $0x10] sm:$0xff] (!%p193_p2)  }
   0x7   : > { %1390 = vmatpush3.bf16.msra.mxu0 (!%p193_p2), %v1528_v1  ;;  %v1531_v4 = vld [vmem:[%s2028_s1 + $0xc0] sm:$0xff] (!%p193_p2)   ;;  %v1535_v42 = vld [vmem:[%s2028_s1 + $0xc8] sm:$0xff] (!%p193_p2)   ;;  %s1574_s17 = smov (!%p193_p2), 64   ;;  %v1537_v62 = vld [vmem:[%s2028_s1 + $0x58] sm:$0xff] (!%p193_p2)   ;;  %vm406_vm2 = vcmask (!%p193_p2), 1046528   ;;  %vm560_vm3 = vcmask (!%p193_p2), 1045504  }
   0x8   : > { %1391 = vmatprep.subr.bf16.mxu0 (!%p193_p2), %v1529_v2  ;;  %v1532_v5 = vld [vmem:[%s2028_s1 + $0x80] sm:$0xff] (!%p193_p2)   ;;  %1429 = vmatprep.subr.bf16.mxu1 (!%p193_p2), %v1531_v4  ;;  %v1536_v56 = vld [vmem:[%s2028_s1 + $0x88] sm:$0xff] (!%p193_p2)   ;;  %vm570_vm4 = vcmask (!%p193_p2), 523264   ;;  %vm1133_vm5 = vcmask (!%p193_p2), 519168   ;;  %vm1141_vm6 = vcmask (!%p193_p2), 518144   ;;  %vm1160_vm9 = vcmask (!%p193_p2), 520192  }
   0x9   : > { %1430 = vmatpush3.bf16.msra.mxu1 (!%p193_p2), %v1532_v5  ;;  %vm1142_vm7 = vsmask.f32 (!%p193_p2), 2304  ;;  %vm1198_vm10 = vcmask (!%p193_p2), 516096  }
   0xa   : > { %1431 = vmatprep.subr.bf16.mxu1 (!%p193_p2), %v1535_v42  ;;  %vm1143_vm8 = vmand (!%p193_p2), %vm1141_vm6, %vm1142_vm7 }
   0xb   : > { %1392 = vmatpush3.bf16.msra.mxu0 (!%p193_p2), %v1530_v3 }
   0xc   : > { %1393 = vmatprep.subr.bf16.mxu0 (!%p193_p2), %v1533_v27 }
   0xd   : > { %s2034_s19 = smov (!%p226_p3, %s1306_s19), 1  ;;  %1432 = vmatpush3.bf16.msra.mxu1 %v1536_v56 }
   0xe   : > { %s1501_s26 = smul.u32 44, %s2034_s19  ;;  %s1380_s25 = sshll.u32 %s2034_s19, 5 }
   0xf   : > { %1394 = vmatpush3.bf16.msra.mxu0 %v1534_v32  ;;  %v1540_v32 = vld [vmem:[%s2028_s1 + $0x90] sm:$0xff]   ;;  %s238_s30 = scalar_lea.vmem %s2031_s4, %s2034_s19 }
  0x10   : > { %s1635_s8 = scalar_lea.vmem %s2027_s0, %s1501_s26  ;;  %1395 = vmatprep.subr.bf16.mxu0 %v1537_v62  ;;  %v1546_v62 = vld [vmem:[%s2028_s1 + $0x28] sm:$0xff]  }
  0x11   : > { %v1641_v6 = vld [vmem:[%s1635_s8 + $0xc] sm:$0xf]  ;;  %v327_v7 = vld [vmem:[%s1635_s8 + $0x10] sm:$0xf]  ;;  %v328_v8 = vld [vmem:[%s1635_s8 + $0x14] sm:$0xf] }
  0x12   : > { %v1646_v9 = vld [vmem:[%s1635_s8 + $0x18] sm:$0xf]  ;;  %v1649_v10 = vld [vmem:[%s1635_s8 + $0x1c] sm:$0xf]  ;;  %v1651_v11 = vcombine.low %v327_v7, %v328_v8  ;;  %v1654_v12 = vcombine.low %v1641_v6, %v327_v7  ;;  %v1657_v13 = vld [vmem:[%s1635_s8 + $0x4] sm:$0xf] }
  0x13   : > { %v1661_v14 = vcombine.low %v1646_v9, %v1649_v10  ;;  %v1664_v15 = vcombine.low %v328_v8, %v1646_v9  ;;  %v325_v16 = vld [vmem:[%s1635_s8 + $0x8] sm:$0xf]  ;;  %v323_v18 = vld [vmem:[%s1635_s8] sm:$0xf]  ;;  %v334_v37 = vld [vmem:[%s1635_s8 + $0x4] sm:$0xe] }
  0x14   : > { %v336_v17 = vld [vmem:[%s1635_s8 + $0x8] sm:$0xe]  ;;  %v428_v19 = vshll.u32 %v1654_v12, 16  ;;  %v432_v20 = vshrl.u32 %v1654_v12, 16  ;;  %v1672_v21 = vcombine.low %v325_v16, %v1641_v6  ;;  %v1320_v22 = vcombine.low %v1657_v13, %v325_v16  ;;  %v333_v51 = vld [vmem:[%s1635_s8 + $0x20] sm:$0x7] }
  0x15   : > { %v436_v23 = vshll.u32 %v1664_v15, 16  ;;  %v377_v24 = vshll.u32 %v1651_v11, 16  ;;  %v381_v25 = vshrl.u32 %v1651_v11, 16  ;;  %v1679_v26 = vcombine.low %v336_v17, %v1641_v6  ;;  %v330_v61 = vld [vmem:[%s1635_s8 + $0x1c] sm:$0x7] }
  0x16   : > { %v430_v28 = vrot.slane %v428_v19, 1  ;;  %v421_v29 = vshrl.u32 %v1320_v22, 16  ;;  %v423_v30 = vshll.u32 %v1320_v22, 16  ;;  %v1685_v31 = vcombine.low %v323_v18, %v1657_v13  ;;  %v335_v8 = vld [vmem:[%s1635_s8 + $0x20] sm:$0xf]  ;;  %v1538_v17 = vld [vmem:[%s2028_s1 + $0x18] sm:$0xff]  }
  0x17   : > { %v1692_v33 = vrot.slane %v436_v23, 1  ;;  %v517_v34 = vshrl.u32 %v1679_v26, 16  ;;  %v520_v35 = vshll.u32 %v1679_v26, 16  ;;  %v524_v36 = vrot.slane %v381_v25, 1  ;;  %1396 = vmatpush3.bf16.msra.mxu0 %v1538_v17 }
  0x18   : > { %v434_v38 = vor.u32 %v432_v20, %v430_v28  ;;  %v425_v39 = vrot.slane %v423_v30, 1  ;;  %v525_v40 = vrot.slane %v377_v24, 2  ;;  %v362_v41 = vshrl.u32 %v1685_v31, 16 }
  0x19   : > { %v519_v43 = vrot.slane %v517_v34, 1  ;;  %v522_v44 = vrot.slane %v520_v35, 2  ;;  %v364_v45 = vshll.u32 %v1685_v31, 16  ;;  %v369_v46 = vshll.u32 %v1672_v21, 16 }
  0x1a   : > { %v439_v47 = vsel %vm360_vm0, %v434_v38, %v1692_v33  ;;  %v426_v48 = vor.u32 %v425_v39, %v421_v29  ;;  %v1707_v49 = vor.u32 %v525_v40, %v524_v36  ;;  %v1709_v50 = vcombine.low %v334_v37, %v325_v16  ;;  %v337_v16 = vld [vmem:[%s1635_s8 + $0x24] sm:$0xf] }
  0x1b   : > { %453 = vrot.lane.b32.xlu1 %v439_v47, %s1574_s17  ;;  %v523_v52 = vor.u32 %v522_v44, %v519_v43  ;;  %v366_v53 = vrot.slane %v364_v45, 1  ;;  %v371_v54 = vrot.slane %v369_v46, 1  ;;  %v481_v55 = vrot.slane %v432_v20, 1  ;;  %v1541_v40 = vld [vmem:[%s2028_s1 + $0x60] sm:$0xff]   ;;  %v1543_v47 = vld [vmem:[%s2028_s1 + $0xd8] sm:$0xff]  }
  0x1c   : > { %v431_v57 = vsel %vm360_vm0, %v426_v48, %v430_v28  ;;  %v474_v58 = vshrl.u32 %v1709_v50, 16  ;;  %v477_v59 = vshll.u32 %v1709_v50, 16  ;;  %v482_v60 = vrot.slane %v428_v19, 2  ;;  %1397 = vmatprep.subr.bf16.mxu0 %v1541_v40  ;;  %v1559_v40 = vld [vmem:[%s2028_s1 + $0xf8] sm:$0xff]  }
  0x1d   : > { %451 = vrot.lane.b32.xlu0 %v431_v57, %s1574_s17  ;;  %v527_v63 = vsel %vm472_vm1, %v523_v52, %v1707_v49  ;;  %v367_v0 = vor.u32 %v366_v53, %v362_v41  ;;  %v373_v1 = vshrl.u32 %v1672_v21, 16  ;;  %v379_v2 = vrot.slane %v377_v24, 1  ;;  %v1539_v24 = vld [vmem:[%s2028_s1 + $0xd0] sm:$0xff]  }
  0x1e   : > { %v476_v3 = vrot.slane %v474_v58, 1  ;;  %v479_v4 = vrot.slane %v477_v59, 2  ;;  %v483_v5 = vor.u32 %v482_v60, %v481_v55  ;;  %v529_v7 = vshrl.u32 %v1661_v14, 16  ;;  %1433 = vmatprep.subr.bf16.mxu1 %v1539_v24  ;;  %v1545_v58 = vld [vmem:[%s2028_s1 + $0x68] sm:$0xff]   ;;  %v1553_v24 = vld [vmem:[%s2028_s1 + $0x78] sm:$0xff]  }
  0x1f   : > { %546 = vrot.lane.b32.xlu1 %v527_v63, %s1574_s17  ;;  %v372_v18 = vsel %vm360_vm0, %v367_v0, %v371_v54  ;;  %v375_v19 = vor.u32 %v373_v1, %v371_v54  ;;  %v532_v20 = vshll.u32 %v1661_v14, 16  ;;  %v1737_v22 = vcombine.low %v1649_v10, %v333_v51  ;;  %1434 = vmatpush3.bf16.msra.mxu1 %v1540_v32  ;;  %v1547_v1 = vld [vmem:[%s2028_s1 + $0xe0] sm:$0xff]  }
  0x20   : > { %v480_v27 = vor.u32 %v479_v4, %v476_v3  ;;  %v531_v28 = vrot.slane %v529_v7, 1  ;;  %v440_v29 = vshrl.u32 %v1664_v15, 16  ;;  %v486_v30 = vrot.slane %v436_v23, 2  ;;  %1435 = vmatprep.subr.bf16.mxu1 %v1543_v47  ;;  %v1549_v7 = vld [vmem:[%s2028_s1 + $0x70] sm:$0xff]   ;;  %v316_v47 = vld [vmem:[%s2029_s2 + $0x8] sm:$0xff] }
  0x21   : > { %392 = vrot.lane.b32.xlu0 %v372_v18, %s1574_s17  ;;  %v534_v34 = vrot.slane %v532_v20, 2  ;;  %v444_v35 = vshll.u32 %v1737_v22, 16  ;;  %v1751_v36 = vcombine.low %v1646_v9, %v330_v61  ;;  %v380_v38 = vsel %vm360_vm0, %v375_v19, %v379_v2  ;;  %v1551_v18 = vld [vmem:[%s2028_s1 + $0xe8] sm:$0xff]  }
  0x22   : > { %v484_v37 = vsel %vm472_vm1, %v480_v27, %v483_v5  ;;  %v442_v23 = vor.u32 %v440_v29, %v1692_v33  ;;  %v485_v39 = vrot.slane %v440_v29, 1  ;;  %v1761_v43 = vcombine.low %v335_v8, %v337_v16  ;;  %v1542_v33 = vld [vmem:[%s2028_s1 + $0x20] sm:$0xff]   ;;  %v1550_v16 = vld [vmem:[%s2028_s1 + $0x30] sm:$0xff]   ;;  %v1552_v20 = vld [vmem:[%s2028_s1 + $0xa8] sm:$0xff]  }
  0x23   : > { %498 = vrot.lane.b32.xlu1 %v484_v37, %s1574_s17  ;;  %v535_v41 = vor.u32 %v534_v34, %v531_v28  ;;  %v446_v42 = vrot.slane %v444_v35, 1  ;;  %v385_v9 = vshll.u32 %v1751_v36, 16  ;;  %v448_v45 = vshrl.u32 %v1737_v22, 16  ;;  %1398 = vmatpush3.bf16.msra.mxu0 %v1542_v33  ;;  %v1554_v29 = vld [vmem:[%s2028_s1 + $0x38] sm:$0xff]   ;;  %v1556_v35 = vld [vmem:[%s2028_s1 + $0xf0] sm:$0xff]  }
  0x24   : > { %v487_v44 = vor.u32 %v486_v30, %v485_v39  ;;  %v1765_v46 = vcombine.low %v1649_v10, %v335_v8  ;;  %v538_v52 = vshrl.u32 %v1761_v43, 16  ;;  %v383_v53 = vor.u32 %v381_v25, %v379_v2  ;;  %1399 = vmatprep.subr.bf16.mxu0 %v1545_v58  ;;  %v1548_v2 = vld [vmem:[%s2028_s1 + $0xa0] sm:$0xff]   ;;  %v322_v58 = vld [vmem:[%s2029_s2 + $0x38] sm:$0x1f] }
  0x25   : > { %394 = vrot.lane.b32.xlu0 %v380_v38, %s1574_s17  ;;  %v536_v48 = vsel %vm472_vm1, %v1707_v49, %v535_v41  ;;  %v387_v51 = vrot.slane %v385_v9, 1  ;;  %v447_v10 = vsel %vm360_vm0, %v442_v23, %v446_v42  ;;  %v541_v54 = vshll.u32 %v1761_v43, 16  ;;  %v1544_v49 = vld [vmem:[%s2028_s1 + $0x98] sm:$0xff]   ;;  %v331_v30 = vld [vmem:[%s1635_s8] sm:$0xe]  ;;  %v1557_v38 = vld [vmem:[%s2028_s1 + $0xb0] sm:$0xff]  }
  0x26   : > { %v490_v55 = vshrl.u32 %v1765_v46, 16  ;;  %v540_v56 = vrot.slane %v538_v52, 1  ;;  %v493_v57 = vshll.u32 %v1765_v46, 16  ;;  %v488_v25 = vsel %vm472_vm1, %v483_v5, %v487_v44  ;;  %1436 = vmatpush3.bf16.msra.mxu1 %v1544_v49  ;;  %v1859_v23 = vld [vmem:[%s2028_s1 + $0x100] sm:$0xff]   ;;  %v321_v49 = vld [vmem:[%s2029_s2 + $0x30] sm:$0xff] }
  0x27   : > { %548 = vrot.lane.b32.xlu1 %v536_v48, %s1574_s17  ;;  %v543_v59 = vrot.slane %v541_v54, 2  ;;  %v388_v63 = vsel %vm360_vm0, %v383_v53, %v387_v51  ;;  %1400 = vmatpush3.bf16.msra.mxu0 %v1546_v62  ;;  %v389_v5 = vshrl.u32 %v1751_v36, 16  ;;  %v450_v8 = vor.u32 %v448_v45, %v446_v42  ;;  %v1885_v45 = vld [vmem:[%s1635_s8 + $0x8] sm:$0xc]  ;;  %v315_v52 = vld [vmem:[%s2029_s2] sm:$0xff]  ;;  %v318_v54 = vld [vmem:[%s2029_s2 + $0x18] sm:$0xff] }
  0x28   : > { %v492_v60 = vrot.slane %v490_v55, 1  ;;  %v495_v61 = vrot.slane %v493_v57, 2  ;;  %1437 = vmatprep.subr.bf16.mxu1 %v1547_v1  ;;  %v465_v17 = vrot.slane %v1709_v50, 1  ;;  %1401 = vmatprep.subr.bf16.mxu0 %v1549_v7  ;;  %v466_v19 = vrot.slane %v1654_v12, 1  ;;  %v320_v57 = vld [vmem:[%s2029_s2 + $0x28] sm:$0xff] }
  0x29   : > { %455 = vrot.lane.b32.xlu0 %v447_v10, %s1574_s17  ;;  %v544_v0 = vor.u32 %v543_v59, %v540_v56  ;;  %v1822_v22 = vrot.slane %v1661_v14, 1  ;;  %v468_v12 = vrot.slane %v1664_v15, 1  ;;  %v391_v28 = vor.u32 %v389_v5, %v387_v51  ;;  %v1565_v51 = vld [vmem:[%s1635_s8 + $0x28] ss:$0 sps:$4 sm:$0x11]   ;;  %v317_v10 = vld [vmem:[%s2029_s2 + $0x10] sm:$0xff]  ;;  %s241_s8 = scalar_lea.vmem %s2032_s5, %s2034_s19 }
  0x2a   : > { %v496_v4 = vor.u32 %v495_v61, %v492_v60  ;;  %1438 = vmatpush3.bf16.msra.mxu1 %v1548_v2  ;;  %v1829_v27 = vsel %vm406_vm2, %v465_v17, %v466_v19  ;;  %v514_v32 = vrot.slane %v1761_v43, 1  ;;  %v1318_v34 = vcombine.low %v331_v30, %v1657_v13  ;;  %v319_v56 = vld [vmem:[%s2029_s2 + $0x20] sm:$0xff] }
  0x2b   : > { %500 = vrot.lane.b32.xlu1 %v488_v25, %s1574_s17  ;;  %v545_v3 = vsel %vm472_vm1, %v535_v41, %v544_v0  ;;  %1402 = vmatpush3.bf16.msra.mxu0 %v1550_v16  ;;  %v1843_v15 = vsel %vm406_vm2, %v466_v19, %v468_v12  ;;  %v470_v37 = vrot.slane %v1765_v46, 1  ;;  %v1560_v41 = vld [vmem:[%s2028_s1 + $0xb8] sm:$0xff]   ;;  %v564_v42 = vrot.slane %v1661_v14, 2 }
  0x2c   : > { %v497_v50 = vsel %vm472_vm1, %v487_v44, %v496_v4  ;;  %1439 = vmatprep.subr.bf16.mxu1 %v1551_v18  ;;  %1403 = vmatprep.subr.bf16.mxu0 %v1553_v24  ;;  %v1854_v13 = vsel %vm406_vm2, %v1822_v22, %v514_v32  ;;  %v566_v9 = vrot.slane %v1761_v43, 2  ;;  %v1575_v33 = vmov 0  }
  0x2d   : > { %396 = vrot.lane.b32.xlu0 %v388_v63, %s1574_s17  ;;  %v1864_v39 = vsel %vm406_vm2, %v468_v12, %v470_v37  ;;  %1513 = vset.pattern.permute.xlu1 %v1575_v33  ;;  %v1328_v48 = vcombine.low %v1885_v45, %v1641_v6  ;;  %v568_v53 = vrot.slane %v1565_v51, 2  ;;  %v407_v25 = vrot.slane %v1318_v34, 1 }
  0x2e   : > { %1440 = vmatpush3.bf16.msra.mxu1 %v1552_v20  ;;  %v1881_v44 = vsel %vm560_vm3, %v564_v42, %v566_v9  ;;  %1512 = vset.pattern.permute.xlu0 %v1575_v33  ;;  %v408_v59 = vrot.slane %v1672_v21, 1  ;;  %v512_v60 = vrot.slane %v1679_v26, 1  ;;  %v410_v61 = vrot.slane %v1651_v11, 1 }
  0x2f   : > { %550 = vrot.lane.b32.xlu1 %v545_v3, %s1574_s17  ;;  %1404 = vmatpush3.bf16.msra.mxu0 %v1554_v29  ;;  %v1903_v55 = vsel %vm560_vm3, %v566_v9, %v568_v53 }
  0x30   : > { %1441 = vmatprep.subr.bf16.mxu1 %v1556_v35  ;;  %1477 = vmatprep.subr.bf16.mxu0 %v1859_v23  ;;  %v409_v63 = vsel %vm406_vm2, %v407_v25, %v408_v59  ;;  %v513_v1 = vsel %vm406_vm2, %v512_v60, %v410_v61  ;;  %v411_v3 = vsel %vm406_vm2, %v408_v59, %v410_v61 }
  0x31   : > { %457 = vrot.lane.b32.xlu0 %v450_v8, %s1574_s17  ;;  %v1561_v8 = vld [vmem:[%s2028_s1 + $0x108] sm:$0xff]   ;;  %v413_v20 = vsel %vm406_vm2, %v410_v61, %v1822_v22 }
  0x32   : > { %1442 = vmatpush3.bf16.msra.mxu1 %v1557_v38 }
  0x33   : > { %502 = vrot.lane.b32.xlu1 %v497_v50, %s1574_s17  ;;  %1443 = vmatprep.subr.bf16.mxu1 %v1559_v40  ;;  %v1562_v50 = vld [vmem:[%s2028_s1 + $0x110] sm:$0xff]  }
  0x35   : > { %398 = vrot.lane.b32.xlu0 %v391_v28, %s1574_s17  ;;  %v1563_v28 = vld [vmem:[%s2028_s1 + $0x118] sm:$0xff]  }
  0x36   : > { %1444 = vmatpush3.bf16.msra.mxu1 %v1560_v41 }
  0x37   : > { %504 = vrot.lane.b32.xlu1 %v496_v4, %s1574_s17  ;;  %1493 = vmatprep.subr.bf16.mxu1 %v1859_v23 }
  0x39   : > { %552 = vrot.lane.b32.xlu0 %v544_v0, %s1574_s17  ;;  %s1983_s17 = scalar_lea.vmem %s2030_s3, %s1380_s25 }
  0x3b   : > { %1060 = vperm.xlu1 %1513, %v316_v47   ;;  %v561_v47 = vrot.slane %v1328_v48, 2 }
  0x3d   : > { %1055 = vperm.xlu0 %1512, %v315_v52  }
  0x3f   : > { %1065 = vperm.xlu1 %1513, %v317_v10  }
  0x41   : > { %1070 = vperm.xlu0 %1512, %v318_v54  }
  0x43   : > { %1075 = vperm.xlu1 %1513, %v319_v56  }
  0x45   : > { %1080 = vperm.xlu0 %1512, %v320_v57  }
  0x47   : > { %1085 = vperm.xlu1 %1513, %v321_v49  }
  0x49   : > { %1090 = vperm.xlu0 %1512, %v322_v58  }
  0x8d   : > { %v454_v62 = vpop.permute.xlu1 %453 }
  0x8e   : > { %v589_v26 = vsel %vm570_vm4, %v411_v3, %v454_v62 }
  0x8f   : > { %v452_v0 = vpop.permute.xlu0 %451 }
  0x90   : > { %v585_v2 = vsel %vm570_vm4, %v409_v63, %v452_v0 }
  0x91   : > { %890 = vmatprep.mubr.bf16.mxu0 %v585_v2  ;;  %v547_v4 = vpop.permute.xlu1 %546 }
  0x92   : > { %v617_v5 = vsel %vm570_vm4, %v513_v1, %v547_v4 }
  0x93   : > { %v393_v7 = vpop.permute.xlu0 %392  ;;  %955 = vmatprep.mubr.bf16.mxu1 %v617_v5 }
  0x94   : > { %v572_v16 = vsel %vm570_vm4, %v1685_v31, %v393_v7 }
  0x95   : > { %891 = vmatmul.mubr.bf16.vlgmr.msra.gmra.mrb[0].mxu0 %v572_v16  ;;  %v499_v17 = vpop.permute.xlu1 %498 }
  0x96   : > { %1478 = vmatpush3.bf16.msra.mxu0 %v1859_v23  ;;  %898 = vmatprep.mubr.bf16.mxu0 %v589_v26  ;;  %v601_v18 = vsel %vm570_vm4, %v1829_v27, %v499_v17 }
  0x97   : > { %956 = vmatmul.mubr.bf16.vlgmr.msra.gmra.mrb[0].mxu1 %v601_v18  ;;  %v395_v19 = vpop.permute.xlu0 %394  ;;  %1479 = vmatprep.subr.bf16.mxu0 %v1561_v8 }
  0x98   : > { %1497 = vmatpush3.bf16.msra.mxu1 %v1859_v23  ;;  %v575_v24 = vsel %vm570_vm4, %v1672_v21, %v395_v19 }
  0x99   : > { %v549_v31 = vpop.permute.xlu1 %548  ;;  %1494 = vmatprep.subr.bf16.mxu1 %v1561_v8 }
  0x9a   : > { %1480 = vmatpush3.bf16.msra.mxu0 %v1561_v8  ;;  %v620_v27 = vsel %vm570_vm4, %v413_v20, %v549_v31 }
  0x9b   : > { %v456_v12 = vpop.permute.xlu0 %455  ;;  %963 = vmatprep.mubr.bf16.mxu1 %v620_v27  ;;  %1481 = vmatprep.subr.bf16.mxu0 %v1562_v50 }
  0x9c   : > { %v593_v29 = vsel %vm570_vm4, %v413_v20, %v456_v12  ;;  %1498 = vmatpush3.bf16.msra.mxu1 %v1561_v8 }
  0x9d   : > { %899 = vmatmul.mubr.bf16.gmra.mrb[4].mxu0 %v575_v24  ;;  %v501_v30 = vpop.permute.xlu1 %500  ;;  %1495 = vmatprep.subr.bf16.mxu1 %v1562_v50 }
  0x9e   : > { %906 = vmatprep.mubr.bf16.mxu0 %v593_v29  ;;  %v605_v21 = vsel %vm570_vm4, %v1843_v15, %v501_v30  ;;  %1482 = vmatpush3.bf16.msra.mxu0 %v1562_v50 }
  0x9f   : > { %964 = vmatmul.mubr.bf16.gmra.mrb[4].mxu1 %v605_v21  ;;  %v397_v34 = vpop.permute.xlu0 %396  ;;  %1483 = vmatprep.subr.bf16.mxu0 %v1563_v28 }
  0xa0   : > { %1499 = vmatpush3.bf16.msra.mxu1 %v1562_v50  ;;  %v578_v38 = vsel %vm570_vm4, %v1651_v11, %v397_v34 }
  0xa1   : > { %v551_v35 = vpop.permute.xlu1 %550  ;;  %1496 = vmatprep.subr.bf16.mxu1 %v1563_v28 }
  0xa2   : > { %v624_v23 = vsel %vm570_vm4, %v1854_v13, %v551_v35  ;;  %1484 = vmatpush3.bf16.msra.mxu0 %v1563_v28  ;;  %v562_v13 = vrot.slane %v1651_v11, 2 }
  0xa3   : > { %v458_v40 = vpop.permute.xlu0 %457  ;;  %971 = vmatprep.mubr.bf16.mxu1 %v624_v23 }
  0xa4   : > { %v597_v41 = vsel %vm570_vm4, %v1822_v22, %v458_v40  ;;  %1500 = vmatpush3.bf16.msra.mxu1 %v1563_v28  ;;  %v563_v10 = vsel %vm560_vm3, %v561_v47, %v562_v13  ;;  %v565_v6 = vsel %vm560_vm3, %v562_v13, %v564_v42 }
  0xa5   : > { %907 = vmatmul.mubr.bf16.gmra.mrb[8].mxu0 %v578_v38  ;;  %v503_v15 = vpop.permute.xlu1 %502 }
  0xa6   : > { %914 = vmatprep.mubr.bf16.mxu0 %v597_v41  ;;  %v609_v9 = vsel %vm570_vm4, %v1864_v39, %v503_v15 }
  0xa7   : > { %972 = vmatmul.mubr.bf16.gmra.mrb[8].mxu1 %v609_v9  ;;  %v399_v33 = vpop.permute.xlu0 %398 }
  0xa8   : > { %v581_v52 = vsel %vm570_vm4, %v1751_v36, %v399_v33 }
  0xa9   : > { %v505_v51 = vpop.permute.xlu1 %504 }
  0xaa   : > { %v613_v39 = vsel %vm570_vm4, %v470_v37, %v505_v51 }
  0xab   : > { %v553_v22 = vpop.permute.xlu0 %552 }
  0xac   : > { %v628_v53 = vsel %vm570_vm4, %v514_v32, %v553_v22 }
  0xad   : > { %915 = vmatmul.mubr.bf16.gmra.mrb[12].mxu0 %v581_v52  ;;  %979 = vmatprep.mubr.bf16.mxu1 %v628_v53 }
  0xae   : > { %1485 = vmatprep.mubr.msk.bf16.mxu0 %vm570_vm4, %v563_v10 }
  0xaf   : > { %980 = vmatmul.mubr.bf16.gmra.mrb[12].mxu1 %v613_v39 }
  0xb0   : > { %1489 = vmatprep.mubr.msk.bf16.mxu1 %vm570_vm4, %v1881_v44 }
  0xb5   : > { %1486 = vmatmul.mubr.msk.bf16.vlgmr.msra.gmra.mrb[16].mxu0 %vm570_vm4, %v565_v6 }
  0xb7   : > { %1490 = vmatmul.mubr.msk.bf16.vlgmr.msra.gmra.mrb[16].mxu1 %vm570_vm4, %v1903_v55 }
  0xba   : > { %v1061_v26 = vpop.permute.xlu1 %1060 }
  0xbc   : > { %v1056_v29 = vpop.permute.xlu0 %1055 }
  0xbe   : > { %v1066_v34 = vpop.permute.xlu1 %1065 }
  0xc0   : > { %v1071_v52 = vpop.permute.xlu0 %1070 }
  0xc2   : > { %v1076_v53 = vpop.permute.xlu1 %1075 }
 0x168   : > { %v1405_v11 = vpop.f32.mrb[0].mxu0 }
 0x169   : > { %v1406_v36 = vpop.f32.mrb[1].mxu0 }
 0x16a   : > { %v1407_v43 = vadd.f32 %v1406_v36, %v1405_v11  ;;  %v1408_v46 = vpop.f32.mrb[2].mxu0  ;;  %v1445_v32 = vpop.f32.mrb[0].mxu1 }
 0x16b   : > { %v1409_v37 = vpop.f32.mrb[3].mxu0  ;;  %v1446_v45 = vpop.f32.mrb[1].mxu1 }
 0x16c   : > { %v1410_v48 = vadd.f32 %v1409_v37, %v1408_v46  ;;  %v1447_v54 = vadd.f32 %v1446_v45, %v1445_v32  ;;  %v1448_v56 = vpop.f32.mrb[2].mxu1 }
 0x16d   : > { %v1449_v44 = vpop.f32.mrb[3].mxu1 }
 0x16e   : > { %v1450_v57 = vadd.f32 %v1449_v44, %v1448_v56  ;;  %v958_v14 = vadd.f32 %v1447_v54, %v1407_v43 }
 0x170   : > { %v1411_v49 = vpop.f32.mrb[4].mxu0  ;;  %v961_v42 = vadd.f32 %v1450_v57, %v1410_v48 }
 0x171   : > { %v1412_v58 = vpop.f32.mrb[5].mxu0 }
 0x172   : > { %v1413_v25 = vadd.f32 %v1412_v58, %v1411_v49  ;;  %v1414_v59 = vpop.f32.mrb[6].mxu0  ;;  %v1451_v60 = vpop.f32.mrb[4].mxu1 }
 0x173   : > { %v1415_v55 = vpop.f32.mrb[7].mxu0  ;;  %v1452_v61 = vpop.f32.mrb[5].mxu1 }
 0x174   : > { %v1416_v62 = vadd.f32 %v1415_v55, %v1414_v59  ;;  %v1453_v63 = vadd.f32 %v1452_v61, %v1451_v60  ;;  %v1454_v0 = vpop.f32.mrb[6].mxu1  ;;  %v1081_v60 = vpop.permute.xlu0 %1080 }
 0x175   : > { %v1455_v1 = vpop.f32.mrb[7].mxu1 }
 0x176   : > { %v1456_v2 = vadd.f32 %v1455_v1, %v1454_v0  ;;  %v966_v3 = vadd.f32 %v1453_v63, %v1413_v25  ;;  %v1086_v0 = vpop.permute.xlu1 %1085 }
 0x178   : > { %v1417_v4 = vpop.f32.mrb[8].mxu0  ;;  %v969_v5 = vadd.f32 %v1456_v2, %v1416_v62 }
 0x179   : > { %v1418_v7 = vpop.f32.mrb[9].mxu0 }
 0x17a   : > { %v1419_v8 = vadd.f32 %v1418_v7, %v1417_v4  ;;  %v1420_v16 = vpop.f32.mrb[10].mxu0  ;;  %v1457_v17 = vpop.f32.mrb[8].mxu1 }
 0x17b   : > { %v1421_v18 = vpop.f32.mrb[11].mxu0  ;;  %v1458_v19 = vpop.f32.mrb[9].mxu1 }
 0x17c   : > { %v1422_v20 = vadd.f32 %v1421_v18, %v1420_v16  ;;  %v1459_v50 = vadd.f32 %v1458_v19, %v1457_v17  ;;  %v1460_v31 = vpop.f32.mrb[10].mxu1 }
 0x17d   : > { %v1461_v24 = vpop.f32.mrb[11].mxu1 }
 0x17e   : > { %v1462_v27 = vadd.f32 %v1461_v24, %v1460_v31  ;;  %v974_v12 = vadd.f32 %v1459_v50, %v1419_v8 }
 0x180   : > { %v1423_v28 = vpop.f32.mrb[12].mxu0  ;;  %v977_v30 = vadd.f32 %v1462_v27, %v1422_v20 }
 0x181   : > { %v1424_v21 = vpop.f32.mrb[13].mxu0 }
 0x182   : > { %v1425_v35 = vadd.f32 %v1424_v21, %v1423_v28  ;;  %v1426_v38 = vpop.f32.mrb[14].mxu0  ;;  %v1463_v23 = vpop.f32.mrb[12].mxu1 }
 0x183   : > { %v1427_v40 = vpop.f32.mrb[15].mxu0  ;;  %v1464_v41 = vpop.f32.mrb[13].mxu1 }
 0x184   : > { %v1428_v15 = vadd.f32 %v1427_v40, %v1426_v38  ;;  %v1465_v9 = vadd.f32 %v1464_v41, %v1463_v23  ;;  %v1466_v33 = vpop.f32.mrb[14].mxu1  ;;  %v1091_v28 = vpop.permute.xlu0 %1090  ;;  %v1144_v23 = vld [vmem:[%s1983_s17 + $0x1c] sm:$0x7] }
 0x185   : > { %v1467_v47 = vpop.f32.mrb[15].mxu1 }
 0x186   : > { %v1468_v13 = vadd.f32 %v1467_v47, %v1466_v33  ;;  %v982_v51 = vadd.f32 %v1465_v9, %v1425_v35 }
 0x188   : > { %v1487_v22 = vpop.f32.mrb[16].mxu0  ;;  %v985_v10 = vadd.f32 %v1468_v13, %v1428_v15 }
 0x189   : > { %v1031_v39 = vadd.f32 %v1487_v22, %v966_v3  ;;  %v1022_v6 = vpop.f32.mrb[17].mxu0 }
 0x18a   : > { %v1023_v11 = vadd.f32 %v1022_v6, %v958_v14  ;;  %v1488_v36 = vpop.f32.mrb[18].mxu0  ;;  %v1491_v43 = vpop.f32.mrb[16].mxu1 }
 0x18b   : > { %v1095_v46 = vmul.f32 %v1066_v34, %v1031_v39  ;;  %v1034_v32 = vadd.f32 %v1488_v36, %v969_v5  ;;  %v1025_v37 = vpop.f32.mrb[19].mxu0  ;;  %v1047_v45 = vadd.f32 %v1491_v43, %v982_v51  ;;  %v1038_v48 = vpop.f32.mrb[17].mxu1 }
 0x18c   : > { %v1093_v54 = vmul.f32 %v1056_v29, %v1023_v11  ;;  %v1026_v56 = vadd.f32 %v1025_v37, %v961_v42  ;;  %v1039_v44 = vadd.f32 %v1038_v48, %v974_v12  ;;  %v1492_v57 = vpop.f32.mrb[18].mxu1 }
 0x18d   : > { %v1383_v14 = vpack.c.bf16 %v1095_v46, %v1095_v46  ;;  %v1096_v49 = vmul.f32 %v1071_v52, %v1034_v32  ;;  %v1041_v58 = vpop.f32.mrb[19].mxu1  ;;  %v1150_v61 = vsel %vm570_vm4, %v1095_v46, 0.0  ;;  %v1171_v62 = vmul.f32 %v1095_v46, %v1031_v39 }
 0x18e   : > { %v1381_v25 = vpack.c.bf16 %v1093_v54, %v1093_v54  ;;  %v1169_v59 = vmul.f32 %v1093_v54, %v1023_v11  ;;  %v1094_v55 = vmul.f32 %v1061_v26, %v1026_v56  ;;  %v1147_v42 = vsel %vm570_vm4, %v1093_v54, 0.0 }
 0x18f   : > { %1136 = vst.msk [vmem:[%s1983_s17 + $0x8] sm:$0xf] %vm1133_vm5, %v1383_v14  ;;  %v1384_v63 = vpack.c.bf16 %v1096_v49, %v1096_v49  ;;  %v1172_v4 = vmul.f32 %v1096_v49, %v1034_v32  ;;  %v1099_v7 = vmul.f32 %v1086_v0, %v1047_v45  ;;  %v1097_v26 = vmul.f32 %v1076_v53, %v1039_v44 }
 0x190   : > { %1134 = vst.msk [vmem:[%s1983_s17] sm:$0xf] %vm1133_vm5, %v1381_v25  ;;  %v1382_v1 = vpack.c.bf16 %v1094_v55, %v1094_v55  ;;  %v1148_v2 = vsel %vm570_vm4, %v1094_v55, 0.0  ;;  %v1170_v3 = vmul.f32 %v1094_v55, %v1026_v56  ;;  %v1177_v8 = vsel %vm570_vm4, %v1169_v59, 0.0 }
 0x191   : > { %1137 = vst.msk [vmem:[%s1983_s17 + $0xc] sm:$0xf] %vm1133_vm5, %v1384_v63  ;;  %v1149_v5 = vadd.f32 %v1148_v2, %v1147_v42  ;;  %v1050_v17 = vadd.f32 %v1492_v57, %v985_v10  ;;  %v1042_v18 = vadd.f32 %v1041_v58, %v977_v30  ;;  %v1387_v50 = vpack.c.bf16 %v1099_v7, %v1099_v7 }
 0x192   : > { %1135 = vst.msk [vmem:[%s1983_s17 + $0x4] sm:$0xf] %vm1133_vm5, %v1382_v1  ;;  %v1178_v16 = vsel %vm570_vm4, %v1170_v3, 0.0  ;;  %v1180_v31 = vsel %vm570_vm4, %v1171_v62, 0.0  ;;  %v1152_v24 = vsel %vm570_vm4, %v1096_v49, 0.0  ;;  %v1385_v27 = vpack.c.bf16 %v1097_v26, %v1097_v26 }
 0x193   : > { %v1151_v19 = vadd.f32 %v1150_v61, %v1149_v5  ;;  %v1179_v20 = vadd.f32 %v1178_v16, %v1177_v8  ;;  %v1173_v12 = vmul.f32 %v1097_v26, %v1039_v44  ;;  %1140 = vst.msk [vmem:[%s1983_s17 + $0x18] sm:$0xf] %vm1133_vm5, %v1387_v50  ;;  %v1100_v34 = vmul.f32 %v1091_v28, %v1050_v17 }
 0x194   : > { %v1098_v35 = vmul.f32 %v1081_v60, %v1042_v18  ;;  %v1182_v30 = vsel %vm570_vm4, %v1172_v4, 0.0  ;;  %1138 = vst.msk [vmem:[%s1983_s17 + $0x10] sm:$0xf] %vm1133_vm5, %v1385_v27  ;;  %v1154_v38 = vsel %vm570_vm4, %v1097_v26, 0.0  ;;  %v1175_v40 = vmul.f32 %v1099_v7, %v1047_v45 }
 0x195   : > { %v1181_v29 = vadd.f32 %v1180_v31, %v1179_v20  ;;  %v1153_v21 = vadd.f32 %v1152_v24, %v1151_v19  ;;  %v1388_v9 = vpack.c.bf16 %v1100_v34, %v1100_v34  ;;  %v1184_v33 = vsel %vm570_vm4, %v1173_v12, 0.0 }
 0x196   : > { %v1386_v47 = vpack.c.bf16 %v1098_v35, %v1098_v35  ;;  %v1156_v13 = vsel %vm570_vm4, %v1098_v35, 0.0  ;;  %v1174_v51 = vmul.f32 %v1098_v35, %v1042_v18  ;;  %v1158_v53 = vsel %vm570_vm4, %v1099_v7, 0.0 }
 0x197   : > { %v1155_v41 = vadd.f32 %v1154_v38, %v1153_v21  ;;  %v1183_v15 = vadd.f32 %v1182_v30, %v1181_v29  ;;  %v1145_v22 = vsel %vm1143_vm8, %v1388_v9, %v1144_v23  ;;  %v1176_v39 = vmul.f32 %v1100_v34, %v1050_v17 }
 0x198   : > { %1146 = vst [vmem:[%s1983_s17 + $0x1c] sm:$0x7] %v1145_v22  ;;  %1139 = vst.msk [vmem:[%s1983_s17 + $0x14] sm:$0xf] %vm1133_vm5, %v1386_v47  ;;  %v1186_v6 = vsel %vm570_vm4, %v1174_v51, 0.0  ;;  %v1188_v43 = vsel %vm570_vm4, %v1175_v40, 0.0 }
 0x199   : > { %v1185_v52 = vadd.f32 %v1184_v33, %v1183_v15  ;;  %v1157_v10 = vadd.f32 %v1156_v13, %v1155_v41  ;;  %v1161_v46 = vsel %vm1160_vm9, %v1100_v34, 0.0  ;;  %v1190_v45 = vsel %vm1160_vm9, %v1176_v39, 0.0 }
 0x19b   : > { %v1159_v11 = vadd.f32 %v1158_v53, %v1157_v10  ;;  %v1187_v36 = vadd.f32 %v1186_v6, %v1185_v52 }
 0x19d   : > { %v1162_v32 = vadd.f32 %v1161_v46, %v1159_v11  ;;  %v1189_v37 = vadd.f32 %v1188_v43, %v1187_v36 }
 0x19f   : > { %v1163_v48 = vrot.slane %v1162_v32, 4  ;;  %v1191_v54 = vadd.f32 %v1190_v45, %v1189_v37 }
 0x1a1   : > { %v1164_v56 = vadd.f32 %v1163_v48, %v1162_v32  ;;  %v1192_v44 = vrot.slane %v1191_v54, 4 }
 0x1a3   : > { %v1165_v57 = vrot.slane %v1164_v56, 2  ;;  %v1193_v14 = vadd.f32 %v1192_v44, %v1191_v54 }
 0x1a5   : > { %v1166_v49 = vadd.f32 %v1165_v57, %v1164_v56  ;;  %v1194_v58 = vrot.slane %v1193_v14, 2 }
 0x1a7   : > { %v1167_v25 = vrot.slane %v1166_v49, 1  ;;  %v1195_v59 = vadd.f32 %v1194_v58, %v1193_v14 }
 0x1a9   : > { %v1168_v60 = vadd.f32 %v1167_v25, %v1166_v49  ;;  %v1196_v55 = vrot.slane %v1195_v59, 1 }
 0x1ab   : > { %v1197_v61 = vadd.f32 %v1196_v55, %v1195_v59  ;;  %1199 = vst.msk [vmem:[%s238_s30] sm:$0x1] %vm1198_vm10, %v1168_v60 }
 0x1ad   : > { %1200 = vst.msk [vmem:[%s241_s8] sm:$0x1] %vm1198_vm10, %v1197_v61 }
 0x1ae PF: > { %s16_s18 = sadd.s32 1, %s1572_s18  }
 0x1af   : > { %p13_p4 = scmp.ge.s32.totalorder %s16_s18, 4  }
 0x1b1   :  { %15 = sbr.rel (!%p13_p4) target bundleno = 1 (0x1), region = 86 }

// kernel: _lambda_.13
= control target key start
LH: loop header
LB: loop body
LE: loop exit
PB: predicated region body
PF: predicated region fallthrough
CT: control target
= control target key end

     0   :  { %s588_s15 = smov 0   ;;  %s635_s0 = inlined_call_operand.vmem [shape: bf16[2,61,64], index: 0, kind: input, shape index: {}]   ;;  %s636_s1 = inlined_call_operand.vmem [shape: f32[1,64], index: 1, kind: input, shape index: {}]   ;;  %s637_s2 = inlined_call_operand.vmem [shape: f32[1,64], index: 2, kind: input, shape index: {}]   ;;  %s638_s3 = inlined_call_operand.vmem [shape: bf16[25,51], index: 3, kind: input, shape index: {}]   ;;  %s639_s4 = inlined_call_operand.vmem [shape: bf16[2,25,64], index: 4, kind: output, shape index: {}]  }
   0x1 LB: > { %s484_s16 = sadd.s32 4294967295, %s560_s15   ;;  %p488_p0 = scmp.ge.s32.totalorder %s560_s15, 1  ;;  %s560_s15 = sphi %s588_s15, %s14_s15  }
   0x2   : > { %p162_p1 = scmp.lt.s32.totalorder %s560_s15, 3 }
   0x4   : > { %p163_p2 = pnand %p488_p0, %p162_p1 }
   0x5   : > { %p188_p3 = scmp.lt.s32.totalorder (!%p163_p2), %s484_s16, 1  ;;  %v552_v0 = vld [vmem:[%s638_s3] sm:$0xff] (!%p163_p2)   ;;  %vm340_vm0 = vcmask (!%p163_p2), 416768   ;;  %vm264_vm1 = vcmask (!%p163_p2), 1046528   ;;  %vm347_vm2 = vcmask (!%p163_p2), 1040384   ;;  %vm348_vm3 = vcmask (!%p163_p2), 1041408  }
   0x6   : > { %166 = sbr.rel (%p163_p2) target bundleno = 272 (0x110), region = 36  ;;  %539 = vmatprep.mubr.msk.bf16.mxu0 (!%p163_p2), %vm340_vm0, %v552_v0  ;;  %v493_v1 = vld [vmem:[%s636_s1] ss:$0 sm:$0xff] (!%p163_p2)  ;;  %vm423_vm4 = vcmask (!%p163_p2), 516096   ;;  %vm424_vm5 = vsmask.f32 (!%p163_p2), 256 }
   0x7   : > { %v494_v11 = vld [vmem:[%s637_s2] ss:$0 sm:$0xff] (!%p163_p2)  ;;  %vm419_vm6 = vcmask (!%p163_p2), 519168   ;;  %vm425_vm7 = vmand (!%p163_p2), %vm423_vm4, %vm424_vm5 }
   0xd   : > { %s641_s16 = smov (!%p188_p3, %s484_s16), 1 }
   0xe   : > { %s505_s19 = sshll.u32 %s641_s16, 5  ;;  %s506_s29 = sshll.u32 %s641_s16, 4 }
   0xf   : > { %s192_s22 = scalar_lea.vmem %s635_s0, %s505_s19  ;;  %s197_s6 = scalar_lea.vmem %s639_s4, %s506_s29 }
  0x10   : > { %v512_v2 = vld [vmem:[%s192_s22] sm:$0xff]   ;;  %v523_v3 = vld [vmem:[%s192_s22 + $0x8] sm:$0xff]   ;;  %v524_v4 = vld [vmem:[%s192_s22 + $0x10] sm:$0xff]  }
  0x11   : > { %v513_v5 = vunpack.c.l.bf16 %v512_v2  ;;  %v514_v6 = vunpack.c.h.bf16 %v512_v2  ;;  %v517_v7 = vunpack.c.l.bf16 %v523_v3  ;;  %v518_v8 = vunpack.c.h.bf16 %v523_v3  ;;  %v211_v9 = vld [vmem:[%s192_s22 + $0x18] sm:$0xf]  ;;  %v212_v10 = vld [vmem:[%s192_s22 + $0x1c] sm:$0x7] }
  0x12   : > { %v521_v12 = vunpack.c.l.bf16 %v524_v4  ;;  %v522_v13 = vunpack.c.h.bf16 %v524_v4  ;;  %v219_v14 = vunpack.c.l.bf16 %v211_v9  ;;  %v220_v15 = vunpack.c.l.bf16 %v212_v10 }
  0x13   : > { %v227_v16 = vmul.f32 %v513_v5, %v493_v1  ;;  %v228_v17 = vmul.f32 %v514_v6, %v493_v1  ;;  %v229_v18 = vmul.f32 %v517_v7, %v493_v1  ;;  %v230_v19 = vmul.f32 %v518_v8, %v493_v1 }
  0x14   : > { %v231_v20 = vmul.f32 %v521_v12, %v493_v1  ;;  %v232_v21 = vmul.f32 %v522_v13, %v493_v1  ;;  %v233_v22 = vmul.f32 %v493_v1, %v219_v14  ;;  %v234_v23 = vmul.f32 %v493_v1, %v220_v15 }
  0x15   : > { %v241_v24 = vadd.f32 %v494_v11, %v227_v16  ;;  %v242_v25 = vadd.f32 %v494_v11, %v228_v17  ;;  %v243_v26 = vadd.f32 %v494_v11, %v229_v18  ;;  %v244_v27 = vadd.f32 %v494_v11, %v230_v19 }
  0x16   : > { %v245_v28 = vadd.f32 %v494_v11, %v231_v20  ;;  %v246_v29 = vadd.f32 %v494_v11, %v232_v21  ;;  %v247_v30 = vadd.f32 %v494_v11, %v233_v22  ;;  %v248_v31 = vadd.f32 %v494_v11, %v234_v23 }
  0x17   : > { %v249_v32 = vmax.f32 %v241_v24, 0.0  ;;  %v250_v33 = vmax.f32 %v242_v25, 0.0  ;;  %v251_v34 = vmax.f32 %v243_v26, 0.0  ;;  %v252_v35 = vmax.f32 %v244_v27, 0.0  ;;  %v553_v24 = vld [vmem:[%s638_s3 + $0x8] sm:$0x1f]  }
  0x18   : > { %v253_v36 = vmax.f32 %v245_v28, 0.0  ;;  %v254_v37 = vmax.f32 %v246_v29, 0.0  ;;  %v255_v38 = vmax.f32 %v247_v30, 0.0  ;;  %v256_v39 = vmax.f32 %v248_v31, 0.0  ;;  %v426_v30 = vld [vmem:[%s197_s6 + $0xc] sm:$0x1] }
  0x19   : > { %v265_v40 = vrot.slane %v250_v33, 1  ;;  %v266_v41 = vrot.slane %v251_v34, 1  ;;  %v268_v42 = vrot.slane %v252_v35, 1  ;;  %v562_v18 = vmov 65535  }
  0x1a   : > { %v270_v43 = vrot.slane %v253_v36, 1  ;;  %v272_v44 = vrot.slane %v254_v37, 1  ;;  %v274_v45 = vrot.slane %v255_v38, 1  ;;  %v276_v46 = vrot.slane %v256_v39, 1 }
  0x1b   : > { %v267_v47 = vsel %vm264_vm1, %v265_v40, %v266_v41  ;;  %v269_v48 = vsel %vm264_vm1, %v266_v41, %v268_v42  ;;  %v349_v19 = vsel %vm347_vm2, 4294967295, %v562_v18 }
  0x1c   : > { %v271_v49 = vsel %vm264_vm1, %v268_v42, %v270_v43  ;;  %v285_v50 = vmax.f32 %v249_v32, %v267_v47  ;;  %v286_v51 = vmax.f32 %v250_v33, %v269_v48  ;;  %v273_v52 = vsel %vm264_vm1, %v270_v43, %v272_v44 }
  0x1d   : > { %v287_v53 = vmax.f32 %v251_v34, %v271_v49  ;;  %v275_v54 = vsel %vm264_vm1, %v272_v44, %v274_v45  ;;  %v288_v55 = vmax.f32 %v252_v35, %v273_v52  ;;  %v277_v56 = vsel %vm264_vm1, %v274_v45, %v276_v46 }
  0x1e   : > { %v299_v57 = vrot.slane %v285_v50, 1  ;;  %v300_v58 = vrot.slane %v286_v51, 1  ;;  %v289_v59 = vmax.f32 %v253_v36, %v275_v54  ;;  %v290_v60 = vmax.f32 %v254_v37, %v277_v56 }
  0x1f   : > { %v302_v61 = vrot.slane %v287_v53, 1  ;;  %v304_v62 = vrot.slane %v288_v55, 1  ;;  %v291_v63 = vmax.f32 %v255_v38, %v276_v46  ;;  %v350_v22 = vsel %vm348_vm3, %v349_v19, 0 }
  0x20   : > { %v301_v0 = vsel %vm264_vm1, %v299_v57, %v300_v58  ;;  %v306_v1 = vrot.slane %v289_v59, 1  ;;  %v308_v2 = vrot.slane %v290_v60, 1 }
  0x21   : > { %v303_v3 = vsel %vm264_vm1, %v300_v58, %v302_v61  ;;  %v319_v4 = vmax.f32 %v285_v50, %v301_v0  ;;  %v305_v5 = vsel %vm264_vm1, %v302_v61, %v304_v62  ;;  %v310_v6 = vrot.slane %v291_v63, 1 }
  0x22   : > { %v320_v7 = vmax.f32 %v286_v51, %v303_v3  ;;  %v307_v8 = vsel %vm264_vm1, %v304_v62, %v306_v1  ;;  %v321_v9 = vmax.f32 %v287_v53, %v305_v5  ;;  %v309_v10 = vsel %vm264_vm1, %v306_v1, %v308_v2 }
  0x23   : > { %v322_v11 = vmax.f32 %v288_v55, %v307_v8  ;;  %v311_v12 = vsel %vm264_vm1, %v308_v2, %v310_v6  ;;  %v323_v14 = vmax.f32 %v289_v59, %v309_v10  ;;  %v325_v16 = vmax.f32 %v291_v63, %v310_v6 }
  0x24   : > { %v326_v13 = vpack.c.bf16 %v320_v7, %v319_v4  ;;  %v324_v15 = vmax.f32 %v290_v60, %v311_v12 }
  0x25   : > { %v327_v17 = vpack.c.bf16 %v322_v11, %v321_v9  ;;  %v329_v21 = vpack.c.bf16 %v325_v16, %v325_v16 }
  0x26   : > { %531 = vmatprep.subr.bf16.mxu0 %v326_v13  ;;  %v328_v20 = vpack.c.bf16 %v324_v15, %v323_v14 }
  0x27   : > { %532 = vmatpush3.bf16.msra.mxu0 %v326_v13  ;;  %v352_v23 = vand.u32 %v350_v22, %v329_v21 }
  0x28   : > { %533 = vmatprep.subr.bf16.mxu0 %v327_v17 }
  0x2b   : > { %534 = vmatpush3.bf16.msra.mxu0 %v327_v17 }
  0x2c   : > { %535 = vmatprep.subr.bf16.mxu0 %v328_v20 }
  0x2f   : > { %536 = vmatpush3.bf16.msra.mxu0 %v328_v20 }
  0x30   : > { %537 = vmatprep.subr.bf16.mxu0 %v352_v23 }
  0x33   : > { %538 = vmatpush3.bf16.msra.mxu0 %v352_v23 }
  0x36   : > { %540 = vmatmul.mubr.msk.bf16.vlgmr.msra.gmra.mrb[0].mxu0 %vm340_vm0, %v553_v24 }
 0x109   : > { %v541_v25 = vpop.f32.mrb[0].mxu0 }
 0x10a   : > { %v509_v26 = vpack.c.bf16 %v541_v25, %v541_v25  ;;  %v388_v27 = vpop.f32.mrb[1].mxu0 }
 0x10b   : > { %v507_v28 = vpack.c.bf16 %v388_v27, %v388_v27  ;;  %v542_v29 = vpop.f32.mrb[2].mxu0 }
 0x10c   : > { %422 = vst.msk [vmem:[%s197_s6 + $0x8] sm:$0xf] %vm419_vm6, %v509_v26  ;;  %v510_v31 = vpack.c.bf16 %v542_v29, %v542_v29  ;;  %v391_v32 = vpop.f32.mrb[3].mxu0 }
 0x10d   : > { %420 = vst.msk [vmem:[%s197_s6] sm:$0xf] %vm419_vm6, %v507_v28  ;;  %v508_v33 = vpack.c.bf16 %v391_v32, %v391_v32 }
 0x10e   : > { %v427_v34 = vsel %vm425_vm7, %v510_v31, %v426_v30 }
 0x10f   : > { %428 = vst [vmem:[%s197_s6 + $0xc] sm:$0x1] %v427_v34  ;;  %421 = vst.msk [vmem:[%s197_s6 + $0x4] sm:$0xf] %vm419_vm6, %v508_v33 }
 0x110 PF: > { %s14_s15 = sadd.s32 1, %s560_s15  }
 0x111   : > { %p11_p4 = scmp.ge.s32.totalorder %s14_s15, 4  }
 0x113   :  { %13 = sbr.rel (!%p11_p4) target bundleno = 1 (0x1), region = 66 }

// kernel: _lambda_.14
= control target key start
LH: loop header
LB: loop body
LE: loop exit
PB: predicated region body
PF: predicated region fallthrough
CT: control target
= control target key end

     0   :  { %s1171_s18 = smov 0   ;;  %s1364_s0 = inlined_call_operand.vmem [shape: bf16[2,25,64], index: 0, kind: input, shape index: {}]   ;;  %s1365_s1 = inlined_call_operand.vmem [shape: bf16[576,64], index: 1, kind: input, shape index: {}]   ;;  %s1366_s2 = inlined_call_operand.vmem [shape: f32[13,1], index: 2, kind: input, shape index: {}]   ;;  %s1367_s3 = inlined_call_operand.vmem [shape: bf16[2,13,64], index: 3, kind: output, shape index: {0}]   ;;  %s1368_s4 = inlined_call_operand.vmem [shape: f32[2,1,64], index: 4, kind: output, shape index: {1}]   ;;  %s1369_s5 = inlined_call_operand.vmem [shape: f32[2,1,64], index: 5, kind: output, shape index: {2}]  }
   0x1 LB: > { %s946_s19 = sadd.s32 4294967295, %s1135_s18   ;;  %p950_p0 = scmp.ge.s32.totalorder %s1135_s18, 1  ;;  %s1135_s18 = sphi %s1171_s18, %s16_s18  }
   0x2   : > { %p192_p1 = scmp.lt.s32.totalorder %s1135_s18, 3 }
   0x4   : > { %p193_p2 = pnand %p950_p0, %p192_p1 }
   0x5   : > { %p226_p3 = scmp.lt.s32.totalorder (!%p193_p2), %s946_s19, 1  ;;  %v1091_v0 = vld [vmem:[%s1365_s1 + $0x40] sm:$0xff] (!%p193_p2)   ;;  %vm355_vm0 = vsmask.f32 (!%p193_p2), 5376  ;;  %v1095_v4 = vld [vmem:[%s1365_s1 + $0x48] sm:$0xff] (!%p193_p2)   ;;  %s1137_s13 = smov (!%p193_p2), 64  }
   0x6   : > { %196 = sbr.rel (%p193_p2) target bundleno = 400 (0x190), region = 32  ;;  %v1092_v1 = vld [vmem:[%s1365_s1] sm:$0xff] (!%p193_p2)   ;;  %1009 = vmatprep.subr.bf16.mxu0 (!%p193_p2), %v1091_v0  ;;  %v1096_v15 = vld [vmem:[%s1365_s1 + $0x8] sm:$0xff] (!%p193_p2)   ;;  %vm385_vm1 = vsmask.f32 (!%p193_p2), 4352  ;;  %v1099_v47 = vld [vmem:[%s1365_s1 + $0x50] sm:$0xff] (!%p193_p2)  }
   0x7   : > { %v1093_v2 = vld [vmem:[%s1365_s1 + $0xc0] sm:$0xff] (!%p193_p2)   ;;  %1010 = vmatpush3.bf16.msra.mxu0 (!%p193_p2), %v1092_v1  ;;  %v1097_v36 = vld [vmem:[%s1365_s1 + $0xc8] sm:$0xff] (!%p193_p2)   ;;  %v1100_v50 = vld [vmem:[%s1365_s1 + $0x10] sm:$0xff] (!%p193_p2)   ;;  %vm381_vm2 = vcmask (!%p193_p2), 1044480   ;;  %v1138_v1 = vmov (!%p193_p2), 0   ;;  %vm427_vm3 = vcmask (!%p193_p2), 1045504  }
   0x8   : > { %v1094_v3 = vld [vmem:[%s1365_s1 + $0x80] sm:$0xff] (!%p193_p2)   ;;  %1031 = vmatprep.subr.bf16.mxu1 (!%p193_p2), %v1093_v2  ;;  %1011 = vmatprep.subr.bf16.mxu0 (!%p193_p2), %v1095_v4  ;;  %v1098_v44 = vld [vmem:[%s1365_s1 + $0x88] sm:$0xff] (!%p193_p2)   ;;  %v1101_v53 = vld [vmem:[%s1365_s1 + $0xd0] sm:$0xff] (!%p193_p2)   ;;  %vm431_vm4 = vcmask (!%p193_p2), 523264   ;;  %vm1140_vm5 = vmmov (!%p193_p2), 0   ;;  %vm811_vm6 = vcmask (!%p193_p2), 518144  }
   0x9   : > { %1032 = vmatpush3.bf16.msra.mxu1 (!%p193_p2), %v1094_v3  ;;  %v1102_v55 = vld [vmem:[%s1365_s1 + $0x90] sm:$0xff] (!%p193_p2)   ;;  %v1103_v56 = vld [vmem:[%s1365_s1 + $0x58] sm:$0xff] (!%p193_p2)   ;;  %v1107_v63 = vld [vmem:[%s1365_s1 + $0x60] sm:$0xff] (!%p193_p2)   ;;  %1082 = vset.pattern.permute.xlu0 (!%p193_p2), %v1138_v1  ;;  %vm812_vm7 = vsmask.f32 (!%p193_p2), 2304  ;;  %vm809_vm8 = vcmask (!%p193_p2), 519168  }
   0xa   : > { %1033 = vmatprep.subr.bf16.mxu1 (!%p193_p2), %v1097_v36  ;;  %v1104_v59 = vld [vmem:[%s1365_s1 + $0x18] sm:$0xff] (!%p193_p2)   ;;  %v1108_v0 = vld [vmem:[%s1365_s1 + $0x20] sm:$0xff] (!%p193_p2)   ;;  %1083 = vset.pattern.permute.xlu1 (!%p193_p2), %v1138_v1  ;;  %v1111_v4 = vld [vmem:[%s1365_s1 + $0x68] sm:$0xff] (!%p193_p2)   ;;  %vm818_vm9 = vcmask (!%p193_p2), 520192   ;;  %vm838_vm11 = vcmask (!%p193_p2), 516096  }
   0xb   : > { %1012 = vmatpush3.bf16.msra.mxu0 (!%p193_p2), %v1096_v15  ;;  %v1105_v60 = vld [vmem:[%s1365_s1 + $0xd8] sm:$0xff] (!%p193_p2)   ;;  %v1109_v2 = vld [vmem:[%s1365_s1 + $0xe0] sm:$0xff] (!%p193_p2)   ;;  %v1117_v15 = vld [vmem:[%s1365_s1 + $0xf0] sm:$0xff] (!%p193_p2)  }
   0xc   : > { %1013 = vmatprep.subr.bf16.mxu0 (!%p193_p2), %v1099_v47  ;;  %v1106_v62 = vld [vmem:[%s1365_s1 + $0x98] sm:$0xff] (!%p193_p2)   ;;  %v1110_v3 = vld [vmem:[%s1365_s1 + $0xa0] sm:$0xff] (!%p193_p2)   ;;  %vm813_vm10 = vmand (!%p193_p2), %vm811_vm6, %vm812_vm7 }
   0xd   : > { %s1371_s19 = smov (!%p226_p3, %s946_s19), 1  ;;  %1034 = vmatpush3.bf16.msra.mxu1 %v1098_v44 }
   0xe   : > { %s1005_s26 = sshll.u32 %s1371_s19, 4  ;;  %1035 = vmatprep.subr.bf16.mxu1 %v1101_v53  ;;  %s1006_s9 = sshll.u32 %s1371_s19, 3 }
   0xf   : > { %s1197_s6 = scalar_lea.vmem %s1364_s0, %s1005_s26  ;;  %1014 = vmatpush3.bf16.msra.mxu0 %v1100_v50  ;;  %s235_s12 = scalar_lea.vmem %s1367_s3, %s1006_s9 }
  0x10   : > { %v325_v5 = vld [vmem:[%s1197_s6 + $0x4] sm:$0xe]  ;;  %v1204_v6 = vld [vmem:[%s1197_s6 + $0x8] sm:$0xf]  ;;  %v321_v11 = vld [vmem:[%s1197_s6] sm:$0xc]  ;;  %1015 = vmatprep.subr.bf16.mxu0 %v1103_v56  ;;  %s238_s15 = scalar_lea.vmem %s1368_s4, %s1371_s19  ;;  %s241_s20 = scalar_lea.vmem %s1369_s5, %s1371_s19 }
  0x11   : > { %v1207_v7 = vld [vmem:[%s1197_s6 + $0x4] sm:$0xc]  ;;  %v1210_v8 = vcombine.low %v325_v5, %v1204_v6  ;;  %v1087_v13 = vld [vmem:[%s1197_s6 + $0x8] ss:$0 sps:$4 sm:$0x11]   ;;  %1036 = vmatpush3.bf16.msra.mxu1 %v1102_v55 }
  0x12   : > { %v962_v9 = vcombine.low %v1207_v7, %v1204_v6  ;;  %v1215_v10 = vld [vmem:[%s1197_s6 + $0x4] sm:$0xf]  ;;  %v323_v14 = vld [vmem:[%s1197_s6] sm:$0x8]  ;;  %v365_v21 = vshrl.u32 %v1087_v13, 16  ;;  %v368_v22 = vshll.u32 %v1087_v13, 16  ;;  %1037 = vmatprep.subr.bf16.mxu1 %v1105_v60 }
  0x13   : > { %v957_v12 = vcombine.low %v321_v11, %v1215_v10  ;;  %v412_v16 = vshrl.u32 %v1210_v8, 16  ;;  %v415_v17 = vshll.u32 %v1210_v8, 16  ;;  %v959_v18 = vcombine.low %v323_v14, %v1215_v10  ;;  %v1089_v25 = vld [vmem:[%s1197_s6 + $0x8] ss:$0 sps:$4 sm:$0x33]   ;;  %1016 = vmatpush3.bf16.msra.mxu0 %v1104_v59  ;;  %v1115_v13 = vld [vmem:[%s1365_s1 + $0x70] sm:$0xff]  }
  0x14   : > { %v367_v29 = vrot.slane %v365_v21, 2  ;;  %v370_v30 = vrot.slane %v368_v22, 3  ;;  %v1229_v31 = vld [vmem:[%s1197_s6] sm:$0x7f]   ;;  %v395_v35 = vshrl.u32 %v1089_v25, 16  ;;  %v398_v39 = vshll.u32 %v1089_v25, 16  ;;  %1017 = vmatprep.subr.bf16.mxu0 %v1107_v63 }
  0x15   : > { %v357_v19 = vshrl.u32 %v957_v12, 16  ;;  %v360_v20 = vshll.u32 %v957_v12, 16  ;;  %v414_v23 = vrot.slane %v412_v16, 1  ;;  %v417_v24 = vrot.slane %v415_v17, 2  ;;  %1038 = vmatpush3.bf16.msra.mxu1 %v1106_v62  ;;  %v1112_v5 = vld [vmem:[%s1365_s1 + $0x28] sm:$0xff]   ;;  %v1116_v14 = vld [vmem:[%s1365_s1 + $0x30] sm:$0xff]  }
  0x16   : > { %v387_v26 = vshrl.u32 %v959_v18, 16  ;;  %v390_v34 = vshll.u32 %v959_v18, 16  ;;  %v371_v38 = vor.u32 %v370_v30, %v367_v29  ;;  %v335_v40 = vshrl.u32 %v1229_v31, 16  ;;  %1039 = vmatprep.subr.bf16.mxu1 %v1109_v2  ;;  %v1113_v11 = vld [vmem:[%s1365_s1 + $0xe8] sm:$0xff]   ;;  %v1118_v16 = vld [vmem:[%s1365_s1 + $0xb0] sm:$0xff]   ;;  %v1119_v17 = vld [vmem:[%s1365_s1 + $0x78] sm:$0xff]  }
  0x17   : > { %v359_v27 = vrot.slane %v357_v19, 2  ;;  %v362_v28 = vrot.slane %v360_v20, 3  ;;  %v418_v32 = vor.u32 %v417_v24, %v414_v23  ;;  %v397_v42 = vrot.slane %v395_v35, 3  ;;  %1018 = vmatpush3.bf16.msra.mxu0 %v1108_v0  ;;  %v1114_v12 = vld [vmem:[%s1365_s1 + $0xa8] sm:$0xff]   ;;  %v319_v19 = vld [vmem:[%s1197_s6] sm:$0xe] }
  0x18   : > { %v389_v33 = vrot.slane %v387_v26, 3  ;;  %v392_v41 = vrot.slane %v390_v34, 4  ;;  %v337_v43 = vshll.u32 %v1229_v31, 16  ;;  %v400_v46 = vrot.slane %v398_v39, 4  ;;  %1019 = vmatprep.subr.bf16.mxu0 %v1111_v4  ;;  %v1122_v21 = vld [vmem:[%s1365_s1 + $0xf8] sm:$0xff]  }
  0x19   : > { %v363_v37 = vor.u32 %v362_v28, %v359_v27  ;;  %419 = vrot.lane.b32.xlu1 %v418_v32, %s1137_s13  ;;  %v382_v57 = vrot.slane %v959_v18, 3  ;;  %v383_v58 = vrot.slane %v1089_v25, 3  ;;  %1040 = vmatpush3.bf16.msra.mxu1 %v1110_v3  ;;  %v1120_v18 = vld [vmem:[%s1365_s1 + $0x38] sm:$0xff]   ;;  %v956_v20 = vcombine.low %v319_v19, %v1215_v10  ;;  %v1128_v24 = vld [vmem:[%s1197_s6 + $0xc] ss:$0 sps:$4 sm:$0x11]  }
  0x1a   : > { %v393_v48 = vor.u32 %v392_v41, %v389_v33  ;;  %v339_v49 = vrot.slane %v337_v43, 1  ;;  %v401_v51 = vor.u32 %v400_v46, %v397_v42  ;;  %1041 = vmatprep.subr.bf16.mxu1 %v1113_v11  ;;  %v1123_v22 = vld [vmem:[%s1365_s1 + $0xb8] sm:$0xff]   ;;  %v1139_v23 = vmov 0.0   ;;  %v315_v10 = vld [vmem:[%s1366_s2] sm:$0xff]  ;;  %v316_v26 = vld [vmem:[%s1366_s2 + $0x8] sm:$0x1f] }
  0x1b   : > { %v372_v45 = vsel %vm355_vm0, %v363_v37, %v371_v38  ;;  %v1262_v61 = vsel %vm381_vm2, %v382_v57, %v383_v58  ;;  %1020 = vmatpush3.bf16.msra.mxu0 %v1112_v5  ;;  %v428_v25 = vrot.slane %v962_v9, 2  ;;  %v429_v27 = vrot.slane %v1128_v24, 2  ;;  %v1124_v33 = vld [vmem:[%s1365_s1 + $0x100] sm:$0xff]   ;;  %v1125_v37 = vld [vmem:[%s1365_s1 + $0x108] sm:$0xff]   ;;  %v1126_v38 = vld [vmem:[%s1365_s1 + $0x110] sm:$0xff]  }
  0x1c   : > { %373 = vrot.lane.b32.xlu0 %v372_v45, %s1137_s13  ;;  %v340_v52 = vor.u32 %v339_v49, %v335_v40  ;;  %v402_v54 = vsel %vm385_vm1, %v393_v48, %v401_v51  ;;  %1021 = vmatprep.subr.bf16.mxu0 %v1115_v13  ;;  %v410_v29 = vrot.slane %v1210_v8, 1  ;;  %v348_v30 = vrot.slane %v956_v20, 1  ;;  %v814_v1 = vld [vmem:[%s235_s12 + $0x4] sm:$0x7] }
  0x1d   : > { %403 = vrot.lane.b32.xlu1 %v402_v54, %s1137_s13  ;;  %1042 = vmatpush3.bf16.msra.mxu1 %v1114_v12  ;;  %v430_v28 = vsel %vm427_vm3, %v428_v25, %v429_v27 }
  0x1e   : > { %1043 = vmatprep.subr.bf16.mxu1 %v1117_v15 }
  0x1f   : > { %1022 = vmatpush3.bf16.msra.mxu0 %v1116_v14 }
  0x20   : > { %341 = vrot.lane.b32.xlu0 %v340_v52, %s1137_s13  ;;  %1023 = vmatprep.subr.bf16.mxu0 %v1119_v17 }
  0x21   : > { %1044 = vmatpush3.bf16.msra.mxu1 %v1118_v16  ;;  %796 = vperm.xlu1 %1083, %v316_v26  }
  0x22   : > { %1045 = vmatprep.subr.bf16.mxu1 %v1122_v21 }
  0x23   : > { %1024 = vmatpush3.bf16.msra.mxu0 %v1120_v18 }
  0x24   : > { %1058 = vmatprep.subr.bf16.mxu0 %v1139_v23  ;;  %791 = vperm.xlu0 %1082, %v315_v10  }
  0x25   : > { %1046 = vmatpush3.bf16.msra.mxu1 %v1123_v22 }
  0x8b   : > { %v420_v32 = vpop.permute.xlu1 %419 }
  0x8c   : > { %v445_v6 = vsel %vm431_vm4, %v410_v29, %v420_v32 }
  0x8d   : > { %739 = vmatprep.mubr.bf16.mxu1 %v445_v6 }
  0x8e   : > { %v374_v7 = vpop.permute.xlu0 %373 }
  0x8f   : > { %v437_v9 = vsel %vm431_vm4, %v348_v30, %v374_v7  ;;  %v404_v34 = vpop.permute.xlu1 %403 }
  0x90   : > { %698 = vmatprep.mubr.bf16.mxu0 %v437_v9  ;;  %v441_v8 = vsel %vm431_vm4, %v1262_v61, %v404_v34 }
  0x91   : > { %740 = vmatmul.mubr.bf16.vlgmr.msra.gmra.mrb[0].mxu1 %v441_v8 }
  0x92   : > { %v342_v35 = vpop.permute.xlu0 %341 }
  0x93   : > { %v433_v36 = vsel %vm431_vm4, %v1229_v31, %v342_v35  ;;  %v1127_v31 = vld [vmem:[%s1365_s1 + $0x118] sm:$0xff]  }
  0x94   : > { %699 = vmatmul.mubr.bf16.vlgmr.msra.gmra.mrb[0].mxu0 %v433_v36 }
  0x95   : > { %1059 = vmatpush3.bf16.msra.mxu0 %v1124_v33  ;;  %1066 = vmatprep.mubr.msk.bf16.mxu0 %vm1140_vm5, %v1139_v23 }
  0x96   : > { %1060 = vmatprep.subr.bf16.mxu0 %v1139_v23 }
  0x99   : > { %1061 = vmatpush3.bf16.msra.mxu0 %v1125_v37 }
  0x9a   : > { %1062 = vmatprep.subr.bf16.mxu0 %v1139_v23 }
  0x9d   : > { %1063 = vmatpush3.bf16.msra.mxu0 %v1126_v38 }
  0x9e   : > { %1064 = vmatprep.subr.bf16.mxu0 %v1139_v23 }
  0xa0   : > { %v797_v58 = vpop.permute.xlu1 %796 }
  0xa1   : > { %1065 = vmatpush3.bf16.msra.mxu0 %v1127_v31 }
  0xa3   : > { %v792_v54 = vpop.permute.xlu0 %791 }
  0xa4   : > { %1067 = vmatmul.mubr.msk.bf16.vlgmr.msra.gmra.mrb[4].mxu0 %vm431_vm4, %v430_v28 }
 0x164   : > { %v1047_v40 = vpop.f32.mrb[0].mxu1 }
 0x165   : > { %v1048_v42 = vpop.f32.mrb[1].mxu1 }
 0x166   : > { %v1049_v44 = vadd.f32 %v1048_v42, %v1047_v40  ;;  %v1050_v46 = vpop.f32.mrb[2].mxu1 }
 0x167   : > { %v1025_v39 = vpop.f32.mrb[0].mxu0  ;;  %v1051_v48 = vpop.f32.mrb[3].mxu1 }
 0x168   : > { %v1026_v41 = vpop.f32.mrb[1].mxu0  ;;  %v1052_v50 = vadd.f32 %v1051_v48, %v1050_v46 }
 0x169   : > { %v1027_v43 = vadd.f32 %v1026_v41, %v1025_v39  ;;  %v1028_v45 = vpop.f32.mrb[2].mxu0 }
 0x16a   : > { %v1029_v47 = vpop.f32.mrb[3].mxu0 }
 0x16b   : > { %v1030_v49 = vadd.f32 %v1029_v47, %v1028_v45  ;;  %v742_v51 = vadd.f32 %v1049_v44, %v1027_v43 }
 0x16d   : > { %v745_v52 = vadd.f32 %v1052_v50, %v1030_v49 }
 0x177   : > { %v782_v53 = vpop.f32.mrb[4].mxu0 }
 0x178   : > { %v783_v55 = vadd.f32 %v782_v53, %v742_v51  ;;  %v1068_v56 = vpop.f32.mrb[5].mxu0 }
 0x179   : > { %v785_v57 = vpop.f32.mrb[6].mxu0 }
 0x17a   : > { %v786_v59 = vadd.f32 %v785_v57, %v745_v52  ;;  %v799_v60 = vmul.f32 %v792_v54, %v783_v55  ;;  %v1069_v61 = vpop.f32.mrb[7].mxu0 }
 0x17c   : > { %v1007_v62 = vpack.c.bf16 %v799_v60, %v799_v60  ;;  %v827_v63 = vmul.f32 %v799_v60, %v783_v55  ;;  %v800_v0 = vmul.f32 %v797_v58, %v786_v59  ;;  %v817_v2 = vsel %vm431_vm4, %v799_v60, 0.0 }
 0x17e   : > { %810 = vst.msk [vmem:[%s235_s12] sm:$0xf] %vm809_vm8, %v1007_v62  ;;  %v1008_v3 = vpack.c.bf16 %v800_v0, %v800_v0  ;;  %v819_v4 = vsel %vm818_vm9, %v800_v0, 0.0  ;;  %v828_v5 = vmul.f32 %v800_v0, %v786_v59  ;;  %v829_v12 = vsel %vm431_vm4, %v827_v63, 0.0 }
 0x17f   : > { %v820_v11 = vadd.f32 %v819_v4, %v817_v2 }
 0x180   : > { %v815_v13 = vsel %vm813_vm10, %v1008_v3, %v814_v1  ;;  %v830_v14 = vsel %vm818_vm9, %v828_v5, 0.0 }
 0x181   : > { %816 = vst [vmem:[%s235_s12 + $0x4] sm:$0x7] %v815_v13  ;;  %v821_v15 = vrot.slane %v820_v11, 4  ;;  %v831_v16 = vadd.f32 %v830_v14, %v829_v12 }
 0x183   : > { %v822_v17 = vadd.f32 %v821_v15, %v820_v11  ;;  %v832_v18 = vrot.slane %v831_v16, 4 }
 0x185   : > { %v823_v19 = vrot.slane %v822_v17, 2  ;;  %v833_v20 = vadd.f32 %v832_v18, %v831_v16 }
 0x187   : > { %v824_v21 = vadd.f32 %v823_v19, %v822_v17  ;;  %v834_v22 = vrot.slane %v833_v20, 2 }
 0x189   : > { %v825_v23 = vrot.slane %v824_v21, 1  ;;  %v835_v24 = vadd.f32 %v834_v22, %v833_v20 }
 0x18b   : > { %v826_v25 = vadd.f32 %v825_v23, %v824_v21  ;;  %v836_v10 = vrot.slane %v835_v24, 1 }
 0x18d   : > { %v837_v26 = vadd.f32 %v836_v10, %v835_v24  ;;  %839 = vst.msk [vmem:[%s238_s15] sm:$0x1] %vm838_vm11, %v826_v25 }
 0x18f   : > { %840 = vst.msk [vmem:[%s241_s20] sm:$0x1] %vm838_vm11, %v837_v26 }
 0x190 PF: > { %s16_s18 = sadd.s32 1, %s1135_s18  }
 0x191   : > { %p13_p4 = scmp.ge.s32.totalorder %s16_s18, 4  }
 0x193   :  { %15 = sbr.rel (!%p13_p4) target bundleno = 1 (0x1), region = 86 }

// kernel: _lambda_.15
= control target key start
LH: loop header
LB: loop body
LE: loop exit
PB: predicated region body
PF: predicated region fallthrough
CT: control target
= control target key end

     0   :  { %10 = vsyncpa [#allocation3], 0  ;;  %s737_s0 = inlined_call_operand.vmem [shape: bf16[2,13,64], index: 0, kind: input, shape index: {}]   ;;  %s738_s1 = inlined_call_operand.vmem [shape: f32[1,64], index: 1, kind: input, shape index: {}]   ;;  %s739_s2 = inlined_call_operand.vmem [shape: f32[1,64], index: 2, kind: input, shape index: {}]   ;;  %s740_s3 = inlined_call_operand.vmem [shape: f32[64,5], index: 3, kind: input, shape index: {}]   ;;  %s741_s4 = inlined_call_operand.vmem [shape: f32[1,5], index: 4, kind: input, shape index: {}]   ;;  %s742_s5 = inlined_call_operand.hbm [shape: f32[2,1,5], index: 5, kind: output, shape index: {}]  }
   0x1   :  { %12 = vsyncpa [#allocation3 + $0x1], 0  ;;  %s604_s18 = smov 0   ;;  %s606_s19 = smov 0  }
   0x2   :  { %s608_s20 = smov 0   ;;  %s610_s21 = smov 0  }
   0x3 LB: > { %s625_s22 = sadd.s32 4294967295, %s568_s21   ;;  %s411_s23 = sadd.s32 4294967294, %s568_s21   ;;  %s568_s21 = sphi %s610_s21, %s748_s21   ;;  %s564_s20 = sphi %s608_s20, %s747_s20   ;;  %s560_s19 = sphi %s606_s19, %s746_s19   ;;  %s556_s18 = sphi %s604_s18, %s745_s18  }
   0x4   : > { %s629_s24 = sadd.s32 1, %s568_s21   ;;  %s135_s25 = sadd.s32 1, %s564_s20 }
   0x5   : > { %s132_s26 = ssub.s32 %s568_s21, %s629_s24  ;;  %p145_p0 = scmp.ne.s32.totalorder %s564_s20, %s560_s19 }
   0x6   : > { %p133_p1 = scmp.eq.s32.totalorder %s132_s26, 0  ;;  %p146_p2 = scmp.eq.s32.totalorder %s625_s22, 1 }
   0x7   : > { %p151_p3 = scmp.ne.s32.totalorder %s560_s19, %s556_s18  ;;  %p152_p4 = scmp.eq.s32.totalorder %s411_s23, 1 }
   0x8   : > { %s640_s27 = scalar_select %p133_p1, %s564_s20, %s135_s25  }
   0x9   : > { %p642_p5 = por %p146_p2, %p145_p0  ;;  %p646_p6 = por %p152_p4, %p151_p3 }
   0xa   : > { %p414_p7 = scmp.ge.s32.totalorder %s568_s21, 1  ;;  %p190_p8 = scmp.lt.s32.totalorder %s568_s21, 3 }
   0xc   : > { %p191_p9 = pnand %p414_p7, %p190_p8 }
   0xd   : > { %v258_v0 = vld [vmem:[%s740_s3] sm:$0xff] (!%p191_p9)  ;;  %v259_v1 = vld [vmem:[%s740_s3 + $0x8] sm:$0xff] (!%p191_p9)  ;;  %v260_v2 = vld [vmem:[%s740_s3 + $0x10] sm:$0xff] (!%p191_p9)  ;;  %v570_v3 = vmov (!%p191_p9), 0.0|0.0   ;;  %vm571_vm0 = vmmov (!%p191_p9), 0   ;;  %v572_v6 = vmov (!%p191_p9), 0.0  }
   0xe   : > { %194 = sbr.rel (%p191_p9) target bundleno = 271 (0x10f), region = 40  ;;  %452 = vmatprep.subr.bf16.mxu0 (!%p191_p9), %v570_v3  ;;  %v453_v4 = vpack.c.bf16 (!%p191_p9), %v259_v1, %v258_v0  ;;  %v261_v5 = vld [vmem:[%s740_s3 + $0x18] sm:$0xff] (!%p191_p9)  ;;  %449 = vmatprep.mubr.msk.f32.mxu0 (!%p191_p9), %vm571_vm0, %v572_v6  ;;  %p217_p10 = scmp.lt.s32.totalorder (!%p191_p9), %s625_s22, 1  ;;  %v262_v8 = vld [vmem:[%s740_s3 + $0x20] sm:$0xff] (!%p191_p9)  ;;  %v263_v9 = vld [vmem:[%s740_s3 + $0x28] sm:$0xff] (!%p191_p9)  ;;  %vm248_vm1 = vcmask (!%p191_p9), 1042432  }
   0xf   : > { %v456_v7 = vpack.c.bf16 (!%p191_p9), %v261_v5, %v260_v2  ;;  %v459_v10 = vpack.c.bf16 (!%p191_p9), %v263_v9, %v262_v8  ;;  %v417_v11 = vld [vmem:[%s738_s1] ss:$0 sm:$0xff] (!%p191_p9)  ;;  %v264_v14 = vld [vmem:[%s740_s3 + $0x30] sm:$0xff] (!%p191_p9)  ;;  %v265_v15 = vld [vmem:[%s740_s3 + $0x38] sm:$0xff] (!%p191_p9)  ;;  %vm267_vm2 = vcmask (!%p191_p9), 523264   ;;  %s215_s14 = sand.u32 (!%p191_p9), 1, %s560_s19  }
  0x10   : > { %454 = vmatpush3.bf16.msra.mxu0 (!%p191_p9), %v453_v4  ;;  %v418_v18 = vld [vmem:[%s739_s2] ss:$0 sm:$0xff] (!%p191_p9)  ;;  %v462_v21 = vpack.c.bf16 (!%p191_p9), %v265_v15, %v264_v14  ;;  %s420_s17 = sshll.u32 (!%p191_p9), %s625_s22, 4  ;;  %vm341_vm3 = vcmask (!%p191_p9), 32768   ;;  %s344_s7 = scalar_lea.sflag (!%p191_p9), [#allocation3], %s215_s14 }
  0x11   : > { %455 = vmatprep.subr.bf16.mxu0 (!%p191_p9), %v570_v3  ;;  %v266_v32 = vld [vmem:[%s741_s4] sm:$0x1] (!%p191_p9)  ;;  %s695_s6 = scalar_lea.hbm (!%p191_p9), %s742_s5, %s420_s17 }
  0x14   : > { %457 = vmatpush3.bf16.msra.mxu0 (!%p191_p9), %v456_v7 }
  0x15   : > { %s218_s13 = scalar_select %p217_p10, %s625_s22, 1  ;;  %458 = vmatprep.subr.bf16.mxu0 %v570_v3 }
  0x16   : > { %s573_s22 = smov [#allocation2]  }
  0x17   : > { %s423_s23 = sshll.u32 %s218_s13, 3  ;;  %s510_s9 = sshll.u32 %s573_s22, 4  ;;  %s511_s9 = int_to_ptr.vmem [resolvable:$false] %s510_s9 }
  0x18   : > { %s221_s30 = scalar_lea.vmem %s737_s0, %s423_s23  ;;  %460 = vmatpush3.bf16.msra.mxu0 %v459_v10  ;;  %s216_s23 = scalar_lea.vmem [#allocation2], %s215_s14 }
  0x19   : > { %v224_v12 = vld [vmem:[%s221_s30] sm:$0xf]  ;;  %v225_v13 = vld [vmem:[%s221_s30 + $0x4] sm:$0x7]  ;;  %461 = vmatprep.subr.bf16.mxu0 %v570_v3  ;;  %s356_s25 = sshll.u32 %s216_s23, 4  ;;  %s512_s10 = scalar_lea.vmem %s511_s9, 32  ;;  %s697_s25 = int_to_ptr.vmem [resolvable:$true] %s356_s25 }
  0x1a   : > { %v226_v16 = vunpack.c.l.bf16 %v224_v12  ;;  %v227_v17 = vunpack.c.l.bf16 %v225_v13  ;;  %s506_s8 = scalar_lea.vmem %s697_s25, 16  ;;  %p513_p0 = scmp.lt.s32.totalorder %s697_s25, %s511_s9 }
  0x1b   : > { %p507_p11 = scmp.ne.s32.totalorder %s697_s25, %s506_s8  ;;  %p514_p1 = scmp.lt.s32.totalorder %s512_s10, %s506_s8 }
  0x1c   : > { %v234_v19 = vmul.f32 %v417_v11, %v226_v16  ;;  %v235_v20 = vmul.f32 %v417_v11, %v227_v17  ;;  %463 = vmatpush3.bf16.msra.mxu0 %v462_v21 }
  0x1d   : > { %p508_p12 = pnand %p507_p11, %p642_p5  ;;  %p515_p2 = por %p514_p1, %p513_p0 }
  0x1e   : > { %v242_v22 = vadd.f32 %v418_v18, %v234_v19  ;;  %v243_v23 = vadd.f32 %v418_v18, %v235_v20 }
  0x1f   : > { %p509_p13 = pneg %p508_p12 }
  0x20   : > { %v244_v24 = vmax.f32 %v242_v22, 0.0  ;;  %v245_v25 = vmax.f32 %v243_v23, 0.0 }
  0x21   : > { %p516_p3 = pnand %p515_p2, %p509_p13 }
  0x22   : > { %v249_v26 = vrot.slane %v244_v24, 5  ;;  %v250_v27 = vrot.slane %v245_v25, 5 }
  0x24   : > { %v251_v28 = vsel %vm248_vm1, %v249_v26, %v250_v27 }
  0x25   : > { %v253_v29 = vmax.f32 %v244_v24, %v251_v28 }
  0x27   : > { %v255_v30 = vrot.slane %v253_v29, 1 }
  0x29   : > { %v257_v31 = vmax.f32 %v253_v29, %v255_v30 }
  0x2b   : > { %450 = vmatmul.mubr.msk.f32.vlgmr.msra.gmra.mrb[0].mxu0 %vm267_vm2, %v257_v31 }
  0xfe   : > { %v337_v33 = vpop.f32.mrb[0].mxu0 }
  0xff   : > { %v338_v34 = vadd.f32 %v337_v33, %v266_v32  ;;  %v451_v35 = vpop.f32.mrb[1].mxu0 }
 0x101   : > { %342 = vst.msk [vmem:[%s216_s23] sm:$0x1] %vm341_vm3, %v338_v34 }
 0x102   : > { %519 = shalt.err (!%p516_p3)
}
 0x103   : > { %s520_s11 = scalar_lea.hbm %s695_s6, 16  ;;  %s524_s14 = scalar_lea.hbm %s742_s5, 32 }
 0x104   : > { %p521_p4 = scmp.ne.s32.totalorder %s695_s6, %s520_s11  ;;  %p525_p9 = scmp.lt.u32.totalorder %s695_s6, %s742_s5 }
 0x105   : > { %p526_p10 = scmp.lt.u32.totalorder %s524_s14, %s520_s11  ;;  %p528_p12 = scmp.lt.u32.totalorder %s520_s11, %s695_s6 }
 0x106   : > { %p522_p7 = pnand %p521_p4, %p642_p5 }
 0x107   : > { %p527_p11 = por %p526_p10, %p525_p9 }
 0x108   : > { %p523_p8 = pneg %p522_p7 }
 0x109   : > { %p529_p13 = por %p528_p12, %p527_p11 }
 0x10b   : > { %p530_p0 = pnand %p529_p13, %p523_p8 }
 0x10d   : > { %533 = shalt.err (!%p530_p0)
}
 0x10e   : > { %464 = dma.vmem_to_hbm [thread:$0]  (%p642_p5), %s697_s25, 16, %s695_s6, %s344_s7  }
 0x10f PF: > { %p470_p1 = scmp.ge.s32.totalorder %s568_s21, 2  ;;  %s368_s17 = sand.u32 1, %s556_s18  }
 0x110   : > { %s369_s23 = scalar_lea.sflag [#allocation3], %s368_s17 }
 0x111   : > { %p467_p2 = pnand %p470_p1, %p646_p6 }
 0x113   : > { %551 = dma.done.wait (!%p467_p2), %s369_s23, 16  }
 0x114   : > { %553 = vsyncadd (!%p467_p2), %s369_s23, 4294967280  ;;  %p15_p3 = scmp.ge.s32.totalorder %s629_s24, 4   ;;  %s745_s18 = smov %s560_s19 }
 0x115   : > { %s746_s19 = smov %s564_s20  ;;  %s747_s20 = smov %s640_s27 }
 0x116   : > { %s748_s21 = smov %s629_s24  ;;  %17 = sbr.rel (!%p15_p3) target bundleno = 3 (0x3), region = 75 }
 0x11d   :  { %373 = vsyncpa [#allocation3], 1 }
 0x11e   :  { %375 = vsyncpa [#allocation3 + $0x1], 1 }

</bundles_post_ra>
